<compile_context>
chip_gen: v6e
topology: v6e:2x2x1
jax: 0.10.0
libtpu: 0.0.40
codegen_flags: <defaults>
</compile_context>

<pallas_src>
import functools
import math

import jax
import jax.numpy as jnp
from jax.experimental import pallas as pl
from jax.experimental.pallas import tpu as pltpu

_BN_EPS = 1e-5


def _round_up(x, m):
    return (x + m - 1) // m * m


# ----------------------------------------------------------------------------
# In-kernel helpers
#
# The input arrives spatially zero-padded (1 top, 2 bottom, 1 left, 1 right) and
# flattened to rows with stride Wp = W + 2, so tap (dy, dx) of a 3x3 conv is a
# plain window of M = H*Wp consecutive rows at offset dy*Wp + dx.  Output rows use
# the same h*Wp + w indexing; the 2 "wrap" columns per row are garbage and are
# sliced away (with the channel padding) once in the wrapper.
# ----------------------------------------------------------------------------
def _tap_dots(load, w_ref, Wp):
    """Nine shifted bf16 MXU dots, f32 accumulation."""
    acc = None
    for dy in range(3):
        for dx in range(3):
            patch = load(dy * Wp + dx).astype(jnp.bfloat16)
            d = jnp.dot(patch, w_ref[dy * 3 + dx],
                        preferred_element_type=jnp.float32)
            acc = d if acc is None else acc + d
    return acc


def _conv_tower(x_ref, w1_ref, s1_ref, t1_ref, w2_ref, s2_ref, t2_ref,
                h_scr, H, W):
    """conv1+bn1+relu1 into the padded-flat VMEM scratch, then conv2+bn2+relu2.

    Returns the post-relu2 activation, shape (H*(W+2), CoutP), f32."""
    Wp = W + 2
    M = H * Wp
    n_pad = h_scr.shape[0]
    coutp = h_scr.shape[1]

    # conv1: nine shifted dots off the padded-flat input, BN+ReLU in f32.
    acc1 = _tap_dots(lambda off: x_ref[0, off:off + M, :], w1_ref, Wp)
    y1 = jnp.maximum(acc1 * s1_ref[...] + t1_ref[...], 0.0)

    # Scratch = padded-flat conv1 activation.  Border rows and the two wrap
    # columns per row MUST be zero: they are conv2's zero padding.
    h_scr[0:Wp + 1, :] = jnp.zeros((Wp + 1, coutp), h_scr.dtype)
    h_scr[Wp + 1 + M:, :] = jnp.zeros((n_pad - (Wp + 1 + M), coutp), h_scr.dtype)
    col = jax.lax.broadcasted_iota(jnp.int32, (M, 1), 0) % Wp
    h_scr[Wp + 1:Wp + 1 + M, :] = jnp.where(col < W, y1, 0.0).astype(h_scr.dtype)

    # conv2: nine shifted dots off the VMEM scratch (no HBM round trip).
    acc2 = _tap_dots(lambda off: h_scr[off:off + M, :], w2_ref, Wp)
    return jnp.maximum(acc2 * s2_ref[...] + t2_ref[...], 0.0)


def _resblock_proj_kernel(x_ref, w1_ref, s1_ref, t1_ref, w2_ref, s2_ref, t2_ref,
                          wsc_ref, ssc_ref, tsc_ref, o_ref, h_scr, *, H, W):
    Wp = W + 2
    M = H * Wp
    y2 = _conv_tower(x_ref, w1_ref, s1_ref, t1_ref, w2_ref, s2_ref, t2_ref,
                     h_scr, H, W)
    # Fused projection shortcut: 1x1 conv + BN + ReLU on the block's input
    # (residue row m lives at padded-flat row m + Wp + 1).
    res = x_ref[0, Wp + 1:Wp + 1 + M, :].astype(jnp.bfloat16)
    sc = jnp.dot(res, wsc_ref[...], preferred_element_type=jnp.float32)
    sc = jnp.maximum(sc * ssc_ref[...] + tsc_ref[...], 0.0)
    o_ref[0] = (y2 + sc).astype(o_ref.dtype)


def _resblock_id_kernel(x_ref, w1_ref, s1_ref, t1_ref, w2_ref, s2_ref, t2_ref,
                        eye_ref, o_ref, h_scr, *, H, W):
    Wp = W + 2
    M = H * Wp
    y2 = _conv_tower(x_ref, w1_ref, s1_ref, t1_ref, w2_ref, s2_ref, t2_ref,
                     h_scr, H, W)
    # Identity shortcut: embed the cin-channel residual into CoutP lanes with a
    # (cin, CoutP) identity-matrix dot.  hi/lo bf16 split keeps ~f32 accuracy.
    res = x_ref[0, Wp + 1:Wp + 1 + M, :]
    r_hi = res.astype(jnp.bfloat16)
    r_lo = (res - r_hi.astype(jnp.float32)).astype(jnp.bfloat16)
    sc = (jnp.dot(r_hi, eye_ref[...], preferred_element_type=jnp.float32)
          + jnp.dot(r_lo, eye_ref[...], preferred_element_type=jnp.float32))
    o_ref[0] = (y2 + sc).astype(o_ref.dtype)


# ----------------------------------------------------------------------------
# pallas_call wrapper helpers
# ----------------------------------------------------------------------------
def _batched_spec(a):
    zeros = (0,) * (a.ndim - 1)
    return pl.BlockSpec((1,) + tuple(a.shape[1:]), lambda b: (b,) + zeros)


def _shared_spec(a):
    zeros = (0,) * a.ndim
    return pl.BlockSpec(tuple(a.shape), lambda b: zeros)


def _compiler_params(xpf, shared, M, coutp, n_pad):
    # Derive the VMEM budget from real buffer sizes (double-buffered per-image
    # blocks + resident weights + scratch) plus headroom; clamp so it is safe on
    # v5e/v6e (128 MiB physical) and v7x (64 MiB physical).
    per_step = 2 * (xpf.shape[1] * xpf.shape[2] * 4 + M * coutp * 4)
    weights = sum(int(a.size) * a.dtype.itemsize for a in shared)
    scratch = n_pad * coutp * 4
    need = per_step + 2 * weights + scratch + (4 << 20)
    limit = int(min(max(need, 32 << 20), 48 << 20))
    return pltpu.CompilerParams(
        dimension_semantics=("parallel",),
        vmem_limit_bytes=limit,
    )


# ----------------------------------------------------------------------------
# Host-side parameter preparation (cheap, one-off)
# ----------------------------------------------------------------------------
def _pad_flat(x_nhwc):
    """Zero-pad H by (1,2), W by (1,1); flatten (H,W) -> rows of stride W+2."""
    B, H, W, C = x_nhwc.shape
    xp = jnp.pad(x_nhwc, ((0, 0), (1, 2), (1, 1), (0, 0)))
    return xp.reshape(B, (H + 3) * (W + 2), C)


def _prep_w3x3(w, kin_pad, cout_pad):
    """torch (Cout,Cin,3,3) -> (9, KinP, CoutP) bf16, taps ordered (dy, dx)."""
    cout, cin = w.shape[0], w.shape[1]
    w9 = jnp.transpose(w, (2, 3, 1, 0)).reshape(9, cin, cout)
    w9 = jnp.pad(w9, ((0, 0), (0, kin_pad - cin), (0, cout_pad - cout)))
    return w9.astype(jnp.bfloat16)


def _prep_w1x1(w, cout_pad):
    cout, cin = w.shape[0], w.shape[1]
    wm = w.reshape(cout, cin).T
    return jnp.pad(wm, ((0, 0), (0, cout_pad - cout))).astype(jnp.bfloat16)


def _fold_bn_bias(bias, bn, cout_pad):
    """Fold conv bias + eval-mode BN into (scale, shift):  y = acc*s + t."""
    cout = bias.shape[0]
    s = bn["gamma"] / jnp.sqrt(bn["var"] + _BN_EPS)
    t = bn["beta"] + (bias - bn["mean"]) * s
    s = jnp.pad(s, (0, cout_pad - cout)).reshape(1, cout_pad).astype(jnp.float32)
    t = jnp.pad(t, (0, cout_pad - cout)).reshape(1, cout_pad).astype(jnp.float32)
    return s, t


# ----------------------------------------------------------------------------
# ResidualBasicBlock forward (NCHW in / NCHW out, like the PyTorch module)
# ----------------------------------------------------------------------------
def residual_basic_block(params, x_nchw):
    x = jnp.transpose(x_nchw, (0, 2, 3, 1)).astype(jnp.float32)     # -> NHWC
    B, H, W, cin = x.shape
    cout = params["conv1"]["w"].shape[0]
    coutp = _round_up(cout, 128)                                     # lane-dense
    Wp = W + 2
    M = H * Wp
    n_pad = (H + 3) * Wp

    xpf = _pad_flat(x)                                               # (B, n_pad, Cin)

    w1 = _prep_w3x3(params["conv1"]["w"], cin, coutp)
    s1, t1 = _fold_bn_bias(params["conv1"]["b"], params["bn1"], coutp)
    w2 = _prep_w3x3(params["conv2"]["w"], coutp, coutp)
    s2, t2 = _fold_bn_bias(params["conv2"]["b"], params["bn2"], coutp)

    if "short_conv" in params:                                       # projection
        wsc = _prep_w1x1(params["short_conv"]["w"], coutp)
        ssc, tsc = _fold_bn_bias(params["short_conv"]["b"], params["short_bn"],
                                 coutp)
        kernel = functools.partial(_resblock_proj_kernel, H=H, W=W)
        operands = (xpf, w1, s1, t1, w2, s2, t2, wsc, ssc, tsc)
        sc_flops = 2 * M * cin * coutp
    else:                                                            # identity
        eye = jnp.eye(cin, coutp, dtype=jnp.bfloat16)
        kernel = functools.partial(_resblock_id_kernel, H=H, W=W)
        operands = (xpf, w1, s1, t1, w2, s2, t2, eye)
        sc_flops = 2 * 2 * M * cin * coutp

    in_specs = [_batched_spec(xpf)] + [_shared_spec(a) for a in operands[1:]]
    flops = B * (2 * M * 9 * (cin * coutp + coutp * coutp) + sc_flops)
    bytes_accessed = (sum(int(a.size) * a.dtype.itemsize for a in operands)
                      + B * M * coutp * 4)

    out = pl.pallas_call(
        kernel,
        out_shape=jax.ShapeDtypeStruct((B, M, coutp), jnp.float32),
        grid=(B,),
        in_specs=in_specs,
        out_specs=pl.BlockSpec((1, M, coutp), lambda b: (b, 0, 0)),
        scratch_shapes=[pltpu.VMEM((n_pad, coutp), jnp.float32)],
        compiler_params=_compiler_params(xpf, operands[1:], M, coutp, n_pad),
        cost_estimate=pl.CostEstimate(flops=int(flops), transcendentals=0,
                                      bytes_accessed=int(bytes_accessed)),
    )(*operands)

    out = out.reshape(B, H, Wp, coutp)[:, :, :W, :cout]              # drop padding
    return jnp.transpose(out, (0, 3, 1, 2))                          # -> NCHW


# ----------------------------------------------------------------------------
# Deterministic parameters + plain-JAX reference for verification
# ----------------------------------------------------------------------------
class _ParamGen:
    def __init__(self, key):
        self._key, self._i = key, 0

    def draw(self, shape, scale=1.0, offset=0.0):
        self._i += 1
        k = jax.random.fold_in(self._key, self._i)
        return offset + scale * jax.random.normal(k, shape, dtype=jnp.float32)


def make_conv(pg, cin, cout, k):
    fan = cin * k * k
    return {"w": pg.draw((cout, cin, k, k), scale=1.0 / math.sqrt(fan)),
            "b": pg.draw((cout,), scale=0.05)}


def make_bn(pg, c):
    return {"gamma": pg.draw((c,), 0.1, 1.0),
            "beta": pg.draw((c,), 0.1),
            "mean": pg.draw((c,), 0.1),
            "var": jnp.abs(pg.draw((c,), 0.2, 1.0)) + 0.1}


def make_resblock_params(key, in_planes, out_planes, stride=1):
    pg = _ParamGen(key)
    p = {"conv1": make_conv(pg, in_planes, out_planes, 3),
         "bn1": make_bn(pg, out_planes),
         "conv2": make_conv(pg, out_planes, out_planes, 3),
         "bn2": make_bn(pg, out_planes)}
    if stride != 1 or in_planes != out_planes:
        p["short_conv"] = make_conv(pg, in_planes, out_planes, 1)
        p["short_bn"] = make_bn(pg, out_planes)
    return p


def reference_resblock(params, x_nchw):
    def conv(x, cp, k):
        y = jax.lax.conv_general_dilated(
            x, cp["w"], window_strides=(1, 1), padding=[(k // 2, k // 2)] * 2,
            dimension_numbers=("NCHW", "OIHW", "NCHW"))
        return y + cp["b"][None, :, None, None]

    def bn(x, q):
        c = lambda v: v[None, :, None, None]
        return (x - c(q["mean"])) * c(q["gamma"]) / jnp.sqrt(c(q["var"]) + _BN_EPS) \
            + c(q["beta"])

    out = jax.nn.relu(bn(conv(x_nchw, params["conv1"], 3), params["bn1"]))
    out = jax.nn.relu(bn(conv(out, params["conv2"], 3), params["bn2"]))
    if "short_conv" in params:
        sc = jax.nn.relu(bn(conv(x_nchw, params["short_conv"], 1), params["short_bn"]))
    else:
        sc = x_nchw
    return out + sc


# ----------------------------------------------------------------------------
if __name__ == "__main__":
    key = jax.random.PRNGKey(0)

    # (a) projection shortcut: in_planes != out_planes
    p_proj = make_resblock_params(jax.random.fold_in(key, 1), 4, 16)
    x_proj = jax.random.normal(jax.random.fold_in(key, 2), (2, 4, 16, 16), jnp.float32)
    # (b) identity shortcut: in_planes == out_planes
    p_id = make_resblock_params(jax.random.fold_in(key, 3), 16, 16)
    x_id = jax.random.normal(jax.random.fold_in(key, 4), (2, 16, 16, 16), jnp.float32)

    fwd = jax.jit(residual_basic_block)
    out_proj = fwd(p_proj, x_proj)
    out_id = fwd(p_id, x_id)
    jax.block_until_ready((out_proj, out_id))

    assert out_proj.shape == (2, 16, 16, 16)
    assert out_id.shape == (2, 16, 16, 16)
    for o, p, xx in ((out_proj, p_proj, x_proj), (out_id, p_id, x_id)):
        assert bool(jnp.all(jnp.isfinite(o)))
        ref = reference_resblock(p, xx)
        # tolerance covers bf16 matmul inputs (f32 accumulate) vs. XLA f32 conv
        assert bool(jnp.allclose(o, ref, atol=3e-2, rtol=3e-2)), \
            float(jnp.max(jnp.abs(o - ref)))
    print("KERNEL_OK")
</pallas_src>

<mosaic_0001>
module attributes {stable_mosaic.version = 11 : i64} {
  func.func @_resblock_proj_kernel(%arg0: i32, %arg1: memref<1x342x4xf32, #tpu.memory_space<vmem>>, %arg2: memref<9x4x128xbf16, #tpu.memory_space<vmem>>, %arg3: memref<1x128xf32, #tpu.memory_space<vmem>>, %arg4: memref<1x128xf32, #tpu.memory_space<vmem>>, %arg5: memref<9x128x128xbf16, #tpu.memory_space<vmem>>, %arg6: memref<1x128xf32, #tpu.memory_space<vmem>>, %arg7: memref<1x128xf32, #tpu.memory_space<vmem>>, %arg8: memref<4x128xbf16, #tpu.memory_space<vmem>>, %arg9: memref<1x128xf32, #tpu.memory_space<vmem>>, %arg10: memref<1x128xf32, #tpu.memory_space<vmem>>, %arg11: memref<1x288x128xf32, #tpu.memory_space<vmem>>, %arg12: memref<342x128xf32, #tpu.memory_space<vmem>>) attributes {dimension_semantics = [#tpu.dimension_semantics<parallel>], iteration_bounds = array<i64: 2>, scalar_prefetch = 0 : i64, scratch_operands = 1 : i64, tpu.core_type = #tpu.core_type<tc>, window_params = [{transform_indices = @transform_0, window_bounds = array<i64: 1, 342, 4>}, {pipeline_mode = #tpu.pipeline_mode<synchronous>, transform_indices = @transform_1, window_bounds = array<i64: 9, 4, 128>}, {pipeline_mode = #tpu.pipeline_mode<synchronous>, transform_indices = @transform_2, window_bounds = array<i64: 1, 128>}, {pipeline_mode = #tpu.pipeline_mode<synchronous>, transform_indices = @transform_3, window_bounds = array<i64: 1, 128>}, {pipeline_mode = #tpu.pipeline_mode<synchronous>, transform_indices = @transform_4, window_bounds = array<i64: 9, 128, 128>}, {pipeline_mode = #tpu.pipeline_mode<synchronous>, transform_indices = @transform_5, window_bounds = array<i64: 1, 128>}, {pipeline_mode = #tpu.pipeline_mode<synchronous>, transform_indices = @transform_6, window_bounds = array<i64: 1, 128>}, {pipeline_mode = #tpu.pipeline_mode<synchronous>, transform_indices = @transform_7, window_bounds = array<i64: 4, 128>}, {pipeline_mode = #tpu.pipeline_mode<synchronous>, transform_indices = @transform_8, window_bounds = array<i64: 1, 128>}, {pipeline_mode = #tpu.pipeline_mode<synchronous>, transform_indices = @transform_9, window_bounds = array<i64: 1, 128>}, {transform_indices = @transform_10, window_bounds = array<i64: 1, 288, 128>}]} {
    %c0 = arith.constant 0 : index
    %c0_0 = arith.constant 0 : index
    %c0_1 = arith.constant 0 : index
    %0 = vector.load %arg1[%c0, %c0_0, %c0_1] : memref<1x342x4xf32, #tpu.memory_space<vmem>>, vector<1x288x4xf32>
    %1 = vector.shape_cast %0 : vector<1x288x4xf32> to vector<288x4xf32>
    %2 = arith.truncf %1 : vector<288x4xf32> to vector<288x4xbf16>
    %c0_2 = arith.constant 0 : index
    %c0_3 = arith.constant 0 : index
    %c0_4 = arith.constant 0 : index
    %3 = vector.load %arg2[%c0_2, %c0_3, %c0_4] : memref<9x4x128xbf16, #tpu.memory_space<vmem>>, vector<1x4x128xbf16>
    %4 = vector.shape_cast %3 : vector<1x4x128xbf16> to vector<4x128xbf16>
    %cst = arith.constant dense<0.000000e+00> : vector<288x128xf32>
    %5 = tpu.matmul %2, %4, %cst {dimension_numbers = #tpu.dot_dimension_numbers<[1], [0], [0], [1], [0, 0, 1, 1], [], []>} : vector<288x4xbf16>, vector<4x128xbf16>, vector<288x128xf32> -> vector<288x128xf32>
    %c0_5 = arith.constant 0 : index
    %c1 = arith.constant 1 : index
    %c0_6 = arith.constant 0 : index
    %6 = vector.load %arg1[%c0_5, %c1, %c0_6] : memref<1x342x4xf32, #tpu.memory_space<vmem>>, vector<1x288x4xf32>
    %7 = vector.shape_cast %6 : vector<1x288x4xf32> to vector<288x4xf32>
    %8 = arith.truncf %7 : vector<288x4xf32> to vector<288x4xbf16>
    %c1_7 = arith.constant 1 : index
    %c0_8 = arith.constant 0 : index
    %c0_9 = arith.constant 0 : index
    %9 = vector.load %arg2[%c1_7, %c0_8, %c0_9] : memref<9x4x128xbf16, #tpu.memory_space<vmem>>, vector<1x4x128xbf16>
    %10 = vector.shape_cast %9 : vector<1x4x128xbf16> to vector<4x128xbf16>
    %cst_10 = arith.constant dense<0.000000e+00> : vector<288x128xf32>
    %11 = tpu.matmul %8, %10, %cst_10 {dimension_numbers = #tpu.dot_dimension_numbers<[1], [0], [0], [1], [0, 0, 1, 1], [], []>} : vector<288x4xbf16>, vector<4x128xbf16>, vector<288x128xf32> -> vector<288x128xf32>
    %12 = arith.addf %5, %11 : vector<288x128xf32>
    %c0_11 = arith.constant 0 : index
    %c2 = arith.constant 2 : index
    %c0_12 = arith.constant 0 : index
    %13 = vector.load %arg1[%c0_11, %c2, %c0_12] : memref<1x342x4xf32, #tpu.memory_space<vmem>>, vector<1x288x4xf32>
    %14 = vector.shape_cast %13 : vector<1x288x4xf32> to vector<288x4xf32>
    %15 = arith.truncf %14 : vector<288x4xf32> to vector<288x4xbf16>
    %c2_13 = arith.constant 2 : index
    %c0_14 = arith.constant 0 : index
    %c0_15 = arith.constant 0 : index
    %16 = vector.load %arg2[%c2_13, %c0_14, %c0_15] : memref<9x4x128xbf16, #tpu.memory_space<vmem>>, vector<1x4x128xbf16>
    %17 = vector.shape_cast %16 : vector<1x4x128xbf16> to vector<4x128xbf16>
    %cst_16 = arith.constant dense<0.000000e+00> : vector<288x128xf32>
    %18 = tpu.matmul %15, %17, %cst_16 {dimension_numbers = #tpu.dot_dimension_numbers<[1], [0], [0], [1], [0, 0, 1, 1], [], []>} : vector<288x4xbf16>, vector<4x128xbf16>, vector<288x128xf32> -> vector<288x128xf32>
    %19 = arith.addf %12, %18 : vector<288x128xf32>
    %c0_17 = arith.constant 0 : index
    %c18 = arith.constant 18 : index
    %c0_18 = arith.constant 0 : index
    %20 = vector.load %arg1[%c0_17, %c18, %c0_18] : memref<1x342x4xf32, #tpu.memory_space<vmem>>, vector<1x288x4xf32>
    %21 = vector.shape_cast %20 : vector<1x288x4xf32> to vector<288x4xf32>
    %22 = arith.truncf %21 : vector<288x4xf32> to vector<288x4xbf16>
    %c3 = arith.constant 3 : index
    %c0_19 = arith.constant 0 : index
    %c0_20 = arith.constant 0 : index
    %23 = vector.load %arg2[%c3, %c0_19, %c0_20] : memref<9x4x128xbf16, #tpu.memory_space<vmem>>, vector<1x4x128xbf16>
    %24 = vector.shape_cast %23 : vector<1x4x128xbf16> to vector<4x128xbf16>
    %cst_21 = arith.constant dense<0.000000e+00> : vector<288x128xf32>
    %25 = tpu.matmul %22, %24, %cst_21 {dimension_numbers = #tpu.dot_dimension_numbers<[1], [0], [0], [1], [0, 0, 1, 1], [], []>} : vector<288x4xbf16>, vector<4x128xbf16>, vector<288x128xf32> -> vector<288x128xf32>
    %26 = arith.addf %19, %25 : vector<288x128xf32>
    %c0_22 = arith.constant 0 : index
    %c19 = arith.constant 19 : index
    %c0_23 = arith.constant 0 : index
    %27 = vector.load %arg1[%c0_22, %c19, %c0_23] : memref<1x342x4xf32, #tpu.memory_space<vmem>>, vector<1x288x4xf32>
    %28 = vector.shape_cast %27 : vector<1x288x4xf32> to vector<288x4xf32>
    %29 = arith.truncf %28 : vector<288x4xf32> to vector<288x4xbf16>
    %c4 = arith.constant 4 : index
    %c0_24 = arith.constant 0 : index
    %c0_25 = arith.constant 0 : index
    %30 = vector.load %arg2[%c4, %c0_24, %c0_25] : memref<9x4x128xbf16, #tpu.memory_space<vmem>>, vector<1x4x128xbf16>
    %31 = vector.shape_cast %30 : vector<1x4x128xbf16> to vector<4x128xbf16>
    %cst_26 = arith.constant dense<0.000000e+00> : vector<288x128xf32>
    %32 = tpu.matmul %29, %31, %cst_26 {dimension_numbers = #tpu.dot_dimension_numbers<[1], [0], [0], [1], [0, 0, 1, 1], [], []>} : vector<288x4xbf16>, vector<4x128xbf16>, vector<288x128xf32> -> vector<288x128xf32>
    %33 = arith.addf %26, %32 : vector<288x128xf32>
    %c0_27 = arith.constant 0 : index
    %c20 = arith.constant 20 : index
    %c0_28 = arith.constant 0 : index
    %34 = vector.load %arg1[%c0_27, %c20, %c0_28] : memref<1x342x4xf32, #tpu.memory_space<vmem>>, vector<1x288x4xf32>
    %35 = vector.shape_cast %34 : vector<1x288x4xf32> to vector<288x4xf32>
    %36 = arith.truncf %35 : vector<288x4xf32> to vector<288x4xbf16>
    %c5 = arith.constant 5 : index
    %c0_29 = arith.constant 0 : index
    %c0_30 = arith.constant 0 : index
    %37 = vector.load %arg2[%c5, %c0_29, %c0_30] : memref<9x4x128xbf16, #tpu.memory_space<vmem>>, vector<1x4x128xbf16>
    %38 = vector.shape_cast %37 : vector<1x4x128xbf16> to vector<4x128xbf16>
    %cst_31 = arith.constant dense<0.000000e+00> : vector<288x128xf32>
    %39 = tpu.matmul %36, %38, %cst_31 {dimension_numbers = #tpu.dot_dimension_numbers<[1], [0], [0], [1], [0, 0, 1, 1], [], []>} : vector<288x4xbf16>, vector<4x128xbf16>, vector<288x128xf32> -> vector<288x128xf32>
    %40 = arith.addf %33, %39 : vector<288x128xf32>
    %c0_32 = arith.constant 0 : index
    %c36 = arith.constant 36 : index
    %c0_33 = arith.constant 0 : index
    %41 = vector.load %arg1[%c0_32, %c36, %c0_33] : memref<1x342x4xf32, #tpu.memory_space<vmem>>, vector<1x288x4xf32>
    %42 = vector.shape_cast %41 : vector<1x288x4xf32> to vector<288x4xf32>
    %43 = arith.truncf %42 : vector<288x4xf32> to vector<288x4xbf16>
    %c6 = arith.constant 6 : index
    %c0_34 = arith.constant 0 : index
    %c0_35 = arith.constant 0 : index
    %44 = vector.load %arg2[%c6, %c0_34, %c0_35] : memref<9x4x128xbf16, #tpu.memory_space<vmem>>, vector<1x4x128xbf16>
    %45 = vector.shape_cast %44 : vector<1x4x128xbf16> to vector<4x128xbf16>
    %cst_36 = arith.constant dense<0.000000e+00> : vector<288x128xf32>
    %46 = tpu.matmul %43, %45, %cst_36 {dimension_numbers = #tpu.dot_dimension_numbers<[1], [0], [0], [1], [0, 0, 1, 1], [], []>} : vector<288x4xbf16>, vector<4x128xbf16>, vector<288x128xf32> -> vector<288x128xf32>
    %47 = arith.addf %40, %46 : vector<288x128xf32>
    %c0_37 = arith.constant 0 : index
    %c37 = arith.constant 37 : index
    %c0_38 = arith.constant 0 : index
    %48 = vector.load %arg1[%c0_37, %c37, %c0_38] : memref<1x342x4xf32, #tpu.memory_space<vmem>>, vector<1x288x4xf32>
    %49 = vector.shape_cast %48 : vector<1x288x4xf32> to vector<288x4xf32>
    %50 = arith.truncf %49 : vector<288x4xf32> to vector<288x4xbf16>
    %c7 = arith.constant 7 : index
    %c0_39 = arith.constant 0 : index
    %c0_40 = arith.constant 0 : index
    %51 = vector.load %arg2[%c7, %c0_39, %c0_40] : memref<9x4x128xbf16, #tpu.memory_space<vmem>>, vector<1x4x128xbf16>
    %52 = vector.shape_cast %51 : vector<1x4x128xbf16> to vector<4x128xbf16>
    %cst_41 = arith.constant dense<0.000000e+00> : vector<288x128xf32>
    %53 = tpu.matmul %50, %52, %cst_41 {dimension_numbers = #tpu.dot_dimension_numbers<[1], [0], [0], [1], [0, 0, 1, 1], [], []>} : vector<288x4xbf16>, vector<4x128xbf16>, vector<288x128xf32> -> vector<288x128xf32>
    %54 = arith.addf %47, %53 : vector<288x128xf32>
    %c0_42 = arith.constant 0 : index
    %c38 = arith.constant 38 : index
    %c0_43 = arith.constant 0 : index
    %55 = vector.load %arg1[%c0_42, %c38, %c0_43] : memref<1x342x4xf32, #tpu.memory_space<vmem>>, vector<1x288x4xf32>
    %56 = vector.shape_cast %55 : vector<1x288x4xf32> to vector<288x4xf32>
    %57 = arith.truncf %56 : vector<288x4xf32> to vector<288x4xbf16>
    %c8 = arith.constant 8 : index
    %c0_44 = arith.constant 0 : index
    %c0_45 = arith.constant 0 : index
    %58 = vector.load %arg2[%c8, %c0_44, %c0_45] : memref<9x4x128xbf16, #tpu.memory_space<vmem>>, vector<1x4x128xbf16>
    %59 = vector.shape_cast %58 : vector<1x4x128xbf16> to vector<4x128xbf16>
    %cst_46 = arith.constant dense<0.000000e+00> : vector<288x128xf32>
    %60 = tpu.matmul %57, %59, %cst_46 {dimension_numbers = #tpu.dot_dimension_numbers<[1], [0], [0], [1], [0, 0, 1, 1], [], []>} : vector<288x4xbf16>, vector<4x128xbf16>, vector<288x128xf32> -> vector<288x128xf32>
    %61 = arith.addf %54, %60 : vector<288x128xf32>
    %c0_47 = arith.constant 0 : index
    %c0_48 = arith.constant 0 : index
    %62 = vector.load %arg3[%c0_47, %c0_48] : memref<1x128xf32, #tpu.memory_space<vmem>>, vector<1x128xf32>
    %63 = vector.broadcast %62 : vector<1x128xf32> to vector<288x128xf32>
    %64 = arith.mulf %61, %63 : vector<288x128xf32>
    %c0_49 = arith.constant 0 : index
    %c0_50 = arith.constant 0 : index
    %65 = vector.load %arg4[%c0_49, %c0_50] : memref<1x128xf32, #tpu.memory_space<vmem>>, vector<1x128xf32>
    %66 = vector.broadcast %65 : vector<1x128xf32> to vector<288x128xf32>
    %67 = arith.addf %64, %66 : vector<288x128xf32>
    %cst_51 = arith.constant 0.000000e+00 : f32
    %68 = vector.broadcast %cst_51 : f32 to vector<288x128xf32>
    %69 = arith.maximumf %67, %68 : vector<288x128xf32>
    %cst_52 = arith.constant 0.000000e+00 : f32
    %70 = vector.broadcast %cst_52 : f32 to vector<19x128xf32>
    %c0_53 = arith.constant 0 : index
    %c0_54 = arith.constant 0 : index
    %71 = vector.load %arg12[%c0_53, %c0_54] : memref<342x128xf32, #tpu.memory_space<vmem>>, vector<19x128xf32>
    tpu.vector_store %arg12[%c0_53, %c0_54], %70 {strides = array<i32>} : memref<342x128xf32, #tpu.memory_space<vmem>>, vector<19x128xf32>,
    %cst_55 = arith.constant 0.000000e+00 : f32
    %72 = vector.broadcast %cst_55 : f32 to vector<35x128xf32>
    %c307 = arith.constant 307 : index
    %c0_56 = arith.constant 0 : index
    %73 = vector.load %arg12[%c307, %c0_56] : memref<342x128xf32, #tpu.memory_space<vmem>>, vector<35x128xf32>
    tpu.vector_store %arg12[%c307, %c0_56], %72 {strides = array<i32>} : memref<342x128xf32, #tpu.memory_space<vmem>>, vector<35x128xf32>,
    %74 = tpu.iota {dimensions = array<i32: 0>} : vector<288x1xi32>
    %c18_i32 = arith.constant 18 : i32
    %c0_i32 = arith.constant 0 : i32
    %75 = arith.cmpi eq, %c18_i32, %c0_i32 : i32
    %c1_i32 = arith.constant 1 : i32
    %76 = arith.select %75, %c1_i32, %c18_i32 : i32
    %77 = vector.broadcast %76 : i32 to vector<288x1xi32>
    %78 = arith.remsi %74, %77 : vector<288x1xi32>
    %c0_i32_57 = arith.constant 0 : i32
    %79 = vector.broadcast %c0_i32_57 : i32 to vector<288x1xi32>
    %80 = arith.cmpi ne, %78, %79 : vector<288x1xi32>
    %c0_i32_58 = arith.constant 0 : i32
    %81 = vector.broadcast %c0_i32_58 : i32 to vector<288x1xi32>
    %82 = arith.cmpi slt, %78, %81 : vector<288x1xi32>
    %c0_i32_59 = arith.constant 0 : i32
    %83 = arith.cmpi slt, %76, %c0_i32_59 : i32
    %84 = vector.broadcast %83 : i1 to vector<288x1xi1>
    %85 = vector.broadcast %84 : vector<288x1xi1> to vector<288x1xi1>
    %86 = arith.xori %82, %85 : vector<288x1xi1>
    %87 = arith.andi %86, %80 : vector<288x1xi1>
    %88 = vector.broadcast %76 : i32 to vector<288x1xi32>
    %89 = arith.addi %78, %88 : vector<288x1xi32>
    %90 = arith.select %87, %89, %78 : vector<288x1xi1>, vector<288x1xi32>
    %c16_i32 = arith.constant 16 : i32
    %91 = vector.broadcast %c16_i32 : i32 to vector<288x1xi32>
    %92 = arith.cmpi slt, %90, %91 : vector<288x1xi32>
    %cst_60 = arith.constant 0.000000e+00 : f32
    %93 = vector.shape_cast %92 : vector<288x1xi1> to vector<288x1xi1>
    %94 = vector.broadcast %93 : vector<288x1xi1> to vector<288x128xi1>
    %95 = vector.broadcast %cst_60 : f32 to vector<288x128xf32>
    %96 = arith.select %94, %69, %95 : vector<288x128xi1>, vector<288x128xf32>
    %c19_61 = arith.constant 19 : index
    %c0_62 = arith.constant 0 : index
    %97 = vector.load %arg12[%c19_61, %c0_62] : memref<342x128xf32, #tpu.memory_space<vmem>>, vector<288x128xf32>
    tpu.vector_store %arg12[%c19_61, %c0_62], %96 {strides = array<i32>} : memref<342x128xf32, #tpu.memory_space<vmem>>, vector<288x128xf32>,
    %c0_63 = arith.constant 0 : index
    %c0_64 = arith.constant 0 : index
    %98 = vector.load %arg12[%c0_63, %c0_64] : memref<342x128xf32, #tpu.memory_space<vmem>>, vector<288x128xf32>
    %99 = arith.truncf %98 : vector<288x128xf32> to vector<288x128xbf16>
    %c0_65 = arith.constant 0 : index
    %c0_66 = arith.constant 0 : index
    %c0_67 = arith.constant 0 : index
    %100 = vector.load %arg5[%c0_65, %c0_66, %c0_67] : memref<9x128x128xbf16, #tpu.memory_space<vmem>>, vector<1x128x128xbf16>
    %101 = vector.shape_cast %100 : vector<1x128x128xbf16> to vector<128x128xbf16>
    %cst_68 = arith.constant dense<0.000000e+00> : vector<288x128xf32>
    %102 = tpu.matmul %99, %101, %cst_68 {dimension_numbers = #tpu.dot_dimension_numbers<[1], [0], [0], [1], [0, 0, 1, 1], [], []>} : vector<288x128xbf16>, vector<128x128xbf16>, vector<288x128xf32> -> vector<288x128xf32>
    %c1_69 = arith.constant 1 : index
    %c0_70 = arith.constant 0 : index
    %103 = vector.load %arg12[%c1_69, %c0_70] : memref<342x128xf32, #tpu.memory_space<vmem>>, vector<288x128xf32>
    %104 = arith.truncf %103 : vector<288x128xf32> to vector<288x128xbf16>
    %c1_71 = arith.constant 1 : index
    %c0_72 = arith.constant 0 : index
    %c0_73 = arith.constant 0 : index
    %105 = vector.load %arg5[%c1_71, %c0_72, %c0_73] : memref<9x128x128xbf16, #tpu.memory_space<vmem>>, vector<1x128x128xbf16>
    %106 = vector.shape_cast %105 : vector<1x128x128xbf16> to vector<128x128xbf16>
    %cst_74 = arith.constant dense<0.000000e+00> : vector<288x128xf32>
    %107 = tpu.matmul %104, %106, %cst_74 {dimension_numbers = #tpu.dot_dimension_numbers<[1], [0], [0], [1], [0, 0, 1, 1], [], []>} : vector<288x128xbf16>, vector<128x128xbf16>, vector<288x128xf32> -> vector<288x128xf32>
    %108 = arith.addf %102, %107 : vector<288x128xf32>
    %c2_75 = arith.constant 2 : index
    %c0_76 = arith.constant 0 : index
    %109 = vector.load %arg12[%c2_75, %c0_76] : memref<342x128xf32, #tpu.memory_space<vmem>>, vector<288x128xf32>
    %110 = arith.truncf %109 : vector<288x128xf32> to vector<288x128xbf16>
    %c2_77 = arith.constant 2 : index
    %c0_78 = arith.constant 0 : index
    %c0_79 = arith.constant 0 : index
    %111 = vector.load %arg5[%c2_77, %c0_78, %c0_79] : memref<9x128x128xbf16, #tpu.memory_space<vmem>>, vector<1x128x128xbf16>
    %112 = vector.shape_cast %111 : vector<1x128x128xbf16> to vector<128x128xbf16>
    %cst_80 = arith.constant dense<0.000000e+00> : vector<288x128xf32>
    %113 = tpu.matmul %110, %112, %cst_80 {dimension_numbers = #tpu.dot_dimension_numbers<[1], [0], [0], [1], [0, 0, 1, 1], [], []>} : vector<288x128xbf16>, vector<128x128xbf16>, vector<288x128xf32> -> vector<288x128xf32>
    %114 = arith.addf %108, %113 : vector<288x128xf32>
    %c18_81 = arith.constant 18 : index
    %c0_82 = arith.constant 0 : index
    %115 = vector.load %arg12[%c18_81, %c0_82] : memref<342x128xf32, #tpu.memory_space<vmem>>, vector<288x128xf32>
    %116 = arith.truncf %115 : vector<288x128xf32> to vector<288x128xbf16>
    %c3_83 = arith.constant 3 : index
    %c0_84 = arith.constant 0 : index
    %c0_85 = arith.constant 0 : index
    %117 = vector.load %arg5[%c3_83, %c0_84, %c0_85] : memref<9x128x128xbf16, #tpu.memory_space<vmem>>, vector<1x128x128xbf16>
    %118 = vector.shape_cast %117 : vector<1x128x128xbf16> to vector<128x128xbf16>
    %cst_86 = arith.constant dense<0.000000e+00> : vector<288x128xf32>
    %119 = tpu.matmul %116, %118, %cst_86 {dimension_numbers = #tpu.dot_dimension_numbers<[1], [0], [0], [1], [0, 0, 1, 1], [], []>} : vector<288x128xbf16>, vector<128x128xbf16>, vector<288x128xf32> -> vector<288x128xf32>
    %120 = arith.addf %114, %119 : vector<288x128xf32>
    %c19_87 = arith.constant 19 : index
    %c0_88 = arith.constant 0 : index
    %121 = vector.load %arg12[%c19_87, %c0_88] : memref<342x128xf32, #tpu.memory_space<vmem>>, vector<288x128xf32>
    %122 = arith.truncf %121 : vector<288x128xf32> to vector<288x128xbf16>
    %c4_89 = arith.constant 4 : index
    %c0_90 = arith.constant 0 : index
    %c0_91 = arith.constant 0 : index
    %123 = vector.load %arg5[%c4_89, %c0_90, %c0_91] : memref<9x128x128xbf16, #tpu.memory_space<vmem>>, vector<1x128x128xbf16>
    %124 = vector.shape_cast %123 : vector<1x128x128xbf16> to vector<128x128xbf16>
    %cst_92 = arith.constant dense<0.000000e+00> : vector<288x128xf32>
    %125 = tpu.matmul %122, %124, %cst_92 {dimension_numbers = #tpu.dot_dimension_numbers<[1], [0], [0], [1], [0, 0, 1, 1], [], []>} : vector<288x128xbf16>, vector<128x128xbf16>, vector<288x128xf32> -> vector<288x128xf32>
    %126 = arith.addf %120, %125 : vector<288x128xf32>
    %c20_93 = arith.constant 20 : index
    %c0_94 = arith.constant 0 : index
    %127 = vector.load %arg12[%c20_93, %c0_94] : memref<342x128xf32, #tpu.memory_space<vmem>>, vector<288x128xf32>
    %128 = arith.truncf %127 : vector<288x128xf32> to vector<288x128xbf16>
    %c5_95 = arith.constant 5 : index
    %c0_96 = arith.constant 0 : index
    %c0_97 = arith.constant 0 : index
    %129 = vector.load %arg5[%c5_95, %c0_96, %c0_97] : memref<9x128x128xbf16, #tpu.memory_space<vmem>>, vector<1x128x128xbf16>
    %130 = vector.shape_cast %129 : vector<1x128x128xbf16> to vector<128x128xbf16>
    %cst_98 = arith.constant dense<0.000000e+00> : vector<288x128xf32>
    %131 = tpu.matmul %128, %130, %cst_98 {dimension_numbers = #tpu.dot_dimension_numbers<[1], [0], [0], [1], [0, 0, 1, 1], [], []>} : vector<288x128xbf16>, vector<128x128xbf16>, vector<288x128xf32> -> vector<288x128xf32>
    %132 = arith.addf %126, %131 : vector<288x128xf32>
    %c36_99 = arith.constant 36 : index
    %c0_100 = arith.constant 0 : index
    %133 = vector.load %arg12[%c36_99, %c0_100] : memref<342x128xf32, #tpu.memory_space<vmem>>, vector<288x128xf32>
    %134 = arith.truncf %133 : vector<288x128xf32> to vector<288x128xbf16>
    %c6_101 = arith.constant 6 : index
    %c0_102 = arith.constant 0 : index
    %c0_103 = arith.constant 0 : index
    %135 = vector.load %arg5[%c6_101, %c0_102, %c0_103] : memref<9x128x128xbf16, #tpu.memory_space<vmem>>, vector<1x128x128xbf16>
    %136 = vector.shape_cast %135 : vector<1x128x128xbf16> to vector<128x128xbf16>
    %cst_104 = arith.constant dense<0.000000e+00> : vector<288x128xf32>
    %137 = tpu.matmul %134, %136, %cst_104 {dimension_numbers = #tpu.dot_dimension_numbers<[1], [0], [0], [1], [0, 0, 1, 1], [], []>} : vector<288x128xbf16>, vector<128x128xbf16>, vector<288x128xf32> -> vector<288x128xf32>
    %138 = arith.addf %132, %137 : vector<288x128xf32>
    %c37_105 = arith.constant 37 : index
    %c0_106 = arith.constant 0 : index
    %139 = vector.load %arg12[%c37_105, %c0_106] : memref<342x128xf32, #tpu.memory_space<vmem>>, vector<288x128xf32>
    %140 = arith.truncf %139 : vector<288x128xf32> to vector<288x128xbf16>
    %c7_107 = arith.constant 7 : index
    %c0_108 = arith.constant 0 : index
    %c0_109 = arith.constant 0 : index
    %141 = vector.load %arg5[%c7_107, %c0_108, %c0_109] : memref<9x128x128xbf16, #tpu.memory_space<vmem>>, vector<1x128x128xbf16>
    %142 = vector.shape_cast %141 : vector<1x128x128xbf16> to vector<128x128xbf16>
    %cst_110 = arith.constant dense<0.000000e+00> : vector<288x128xf32>
    %143 = tpu.matmul %140, %142, %cst_110 {dimension_numbers = #tpu.dot_dimension_numbers<[1], [0], [0], [1], [0, 0, 1, 1], [], []>} : vector<288x128xbf16>, vector<128x128xbf16>, vector<288x128xf32> -> vector<288x128xf32>
    %144 = arith.addf %138, %143 : vector<288x128xf32>
    %c38_111 = arith.constant 38 : index
    %c0_112 = arith.constant 0 : index
    %145 = vector.load %arg12[%c38_111, %c0_112] : memref<342x128xf32, #tpu.memory_space<vmem>>, vector<288x128xf32>
    %146 = arith.truncf %145 : vector<288x128xf32> to vector<288x128xbf16>
    %c8_113 = arith.constant 8 : index
    %c0_114 = arith.constant 0 : index
    %c0_115 = arith.constant 0 : index
    %147 = vector.load %arg5[%c8_113, %c0_114, %c0_115] : memref<9x128x128xbf16, #tpu.memory_space<vmem>>, vector<1x128x128xbf16>
    %148 = vector.shape_cast %147 : vector<1x128x128xbf16> to vector<128x128xbf16>
    %cst_116 = arith.constant dense<0.000000e+00> : vector<288x128xf32>
    %149 = tpu.matmul %146, %148, %cst_116 {dimension_numbers = #tpu.dot_dimension_numbers<[1], [0], [0], [1], [0, 0, 1, 1], [], []>} : vector<288x128xbf16>, vector<128x128xbf16>, vector<288x128xf32> -> vector<288x128xf32>
    %150 = arith.addf %144, %149 : vector<288x128xf32>
    %c0_117 = arith.constant 0 : index
    %c0_118 = arith.constant 0 : index
    %151 = vector.load %arg6[%c0_117, %c0_118] : memref<1x128xf32, #tpu.memory_space<vmem>>, vector<1x128xf32>
    %152 = vector.broadcast %151 : vector<1x128xf32> to vector<288x128xf32>
    %153 = arith.mulf %150, %152 : vector<288x128xf32>
    %c0_119 = arith.constant 0 : index
    %c0_120 = arith.constant 0 : index
    %154 = vector.load %arg7[%c0_119, %c0_120] : memref<1x128xf32, #tpu.memory_space<vmem>>, vector<1x128xf32>
    %155 = vector.broadcast %154 : vector<1x128xf32> to vector<288x128xf32>
    %156 = arith.addf %153, %155 : vector<288x128xf32>
    %cst_121 = arith.constant 0.000000e+00 : f32
    %157 = vector.broadcast %cst_121 : f32 to vector<288x128xf32>
    %158 = arith.maximumf %156, %157 : vector<288x128xf32>
    %c0_122 = arith.constant 0 : index
    %c19_123 = arith.constant 19 : index
    %c0_124 = arith.constant 0 : index
    %159 = vector.load %arg1[%c0_122, %c19_123, %c0_124] : memref<1x342x4xf32, #tpu.memory_space<vmem>>, vector<1x288x4xf32>
    %160 = vector.shape_cast %159 : vector<1x288x4xf32> to vector<288x4xf32>
    %161 = arith.truncf %160 : vector<288x4xf32> to vector<288x4xbf16>
    %c0_125 = arith.constant 0 : index
    %c0_126 = arith.constant 0 : index
    %162 = vector.load %arg8[%c0_125, %c0_126] : memref<4x128xbf16, #tpu.memory_space<vmem>>, vector<4x128xbf16>
    %cst_127 = arith.constant dense<0.000000e+00> : vector<288x128xf32>
    %163 = tpu.matmul %161, %162, %cst_127 {dimension_numbers = #tpu.dot_dimension_numbers<[1], [0], [0], [1], [0, 0, 1, 1], [], []>} : vector<288x4xbf16>, vector<4x128xbf16>, vector<288x128xf32> -> vector<288x128xf32>
    %c0_128 = arith.constant 0 : index
    %c0_129 = arith.constant 0 : index
    %164 = vector.load %arg9[%c0_128, %c0_129] : memref<1x128xf32, #tpu.memory_space<vmem>>, vector<1x128xf32>
    %165 = vector.broadcast %164 : vector<1x128xf32> to vector<288x128xf32>
    %166 = arith.mulf %163, %165 : vector<288x128xf32>
    %c0_130 = arith.constant 0 : index
    %c0_131 = arith.constant 0 : index
    %167 = vector.load %arg10[%c0_130, %c0_131] : memref<1x128xf32, #tpu.memory_space<vmem>>, vector<1x128xf32>
    %168 = vector.broadcast %167 : vector<1x128xf32> to vector<288x128xf32>
    %169 = arith.addf %166, %168 : vector<288x128xf32>
    %cst_132 = arith.constant 0.000000e+00 : f32
    %170 = vector.broadcast %cst_132 : f32 to vector<288x128xf32>
    %171 = arith.maximumf %169, %170 : vector<288x128xf32>
    %172 = arith.addf %158, %171 : vector<288x128xf32>
    %c0_133 = arith.constant 0 : index
    %c0_134 = arith.constant 0 : index
    %c0_135 = arith.constant 0 : index
    %173 = vector.load %arg11[%c0_133, %c0_134, %c0_135] : memref<1x288x128xf32, #tpu.memory_space<vmem>>, vector<1x288x128xf32>
    %174 = vector.shape_cast %173 : vector<1x288x128xf32> to vector<288x128xf32>
    %175 = vector.shape_cast %172 : vector<288x128xf32> to vector<1x288x128xf32>
    tpu.vector_store %arg11[%c0_133, %c0_134, %c0_135], %175 {strides = array<i32>} : memref<1x288x128xf32, #tpu.memory_space<vmem>>, vector<1x288x128xf32>,
    return
  }
  func.func @transform_0(%arg0: i32) -> (i32, i32, i32) {
    %c0_i32 = arith.constant 0 : i32
    %c0_i32_0 = arith.constant 0 : i32
    %c0_i32_1 = arith.constant 0 : i32
    return %arg0, %c0_i32, %c0_i32_0 : i32, i32, i32
  }
  func.func @transform_1(%arg0: i32) -> (i32, i32, i32) {
    %c0_i32 = arith.constant 0 : i32
    %c0_i32_0 = arith.constant 0 : i32
    %c0_i32_1 = arith.constant 0 : i32
    %c0_i32_2 = arith.constant 0 : i32
    return %c0_i32, %c0_i32_0, %c0_i32_1 : i32, i32, i32
  }
  func.func @transform_2(%arg0: i32) -> (i32, i32) {
    %c0_i32 = arith.constant 0 : i32
    %c0_i32_0 = arith.constant 0 : i32
    %c0_i32_1 = arith.constant 0 : i32
    return %c0_i32, %c0_i32_0 : i32, i32
  }
  func.func @transform_3(%arg0: i32) -> (i32, i32) {
    %c0_i32 = arith.constant 0 : i32
    %c0_i32_0 = arith.constant 0 : i32
    %c0_i32_1 = arith.constant 0 : i32
    return %c0_i32, %c0_i32_0 : i32, i32
  }
  func.func @transform_4(%arg0: i32) -> (i32, i32, i32) {
    %c0_i32 = arith.constant 0 : i32
    %c0_i32_0 = arith.constant 0 : i32
    %c0_i32_1 = arith.constant 0 : i32
    %c0_i32_2 = arith.constant 0 : i32
    return %c0_i32, %c0_i32_0, %c0_i32_1 : i32, i32, i32
  }
  func.func @transform_5(%arg0: i32) -> (i32, i32) {
    %c0_i32 = arith.constant 0 : i32
    %c0_i32_0 = arith.constant 0 : i32
    %c0_i32_1 = arith.constant 0 : i32
    return %c0_i32, %c0_i32_0 : i32, i32
  }
  func.func @transform_6(%arg0: i32) -> (i32, i32) {
    %c0_i32 = arith.constant 0 : i32
    %c0_i32_0 = arith.constant 0 : i32
    %c0_i32_1 = arith.constant 0 : i32
    return %c0_i32, %c0_i32_0 : i32, i32
  }
  func.func @transform_7(%arg0: i32) -> (i32, i32) {
    %c0_i32 = arith.constant 0 : i32
    %c0_i32_0 = arith.constant 0 : i32
    %c0_i32_1 = arith.constant 0 : i32
    return %c0_i32, %c0_i32_0 : i32, i32
  }
  func.func @transform_8(%arg0: i32) -> (i32, i32) {
    %c0_i32 = arith.constant 0 : i32
    %c0_i32_0 = arith.constant 0 : i32
    %c0_i32_1 = arith.constant 0 : i32
    return %c0_i32, %c0_i32_0 : i32, i32
  }
  func.func @transform_9(%arg0: i32) -> (i32, i32) {
    %c0_i32 = arith.constant 0 : i32
    %c0_i32_0 = arith.constant 0 : i32
    %c0_i32_1 = arith.constant 0 : i32
    return %c0_i32, %c0_i32_0 : i32, i32
  }
  func.func @transform_10(%arg0: i32) -> (i32, i32, i32) {
    %c0_i32 = arith.constant 0 : i32
    %c0_i32_0 = arith.constant 0 : i32
    %c0_i32_1 = arith.constant 0 : i32
    return %arg0, %c0_i32, %c0_i32_0 : i32, i32, i32
  }
}

</mosaic_0001>

<bundles_post_ra>
// kernel: residual_basic_block.1
= control target key start
LH: loop header
LB: loop body
LE: loop exit
PB: predicated region body
PF: predicated region fallthrough
CT: control target
= control target key end

     0   :  { %s9638_s13 = smov 0   ;;  %s13267_s0 = inlined_call_operand.vmem [shape: f32[2,342,4], index: 0, kind: input, shape index: {}]   ;;  %s13268_s1 = inlined_call_operand.vmem [shape: bf16[9,4,128], index: 1, kind: input, shape index: {}]   ;;  %s13269_s2 = inlined_call_operand.vmem [shape: f32[1,128], index: 2, kind: input, shape index: {}]   ;;  %s13270_s3 = inlined_call_operand.vmem [shape: f32[1,128], index: 3, kind: input, shape index: {}]   ;;  %s13271_s4 = inlined_call_operand.vmem [shape: bf16[9,128,128], index: 4, kind: input, shape index: {}]   ;;  %s13272_s5 = inlined_call_operand.vmem [shape: f32[1,128], index: 5, kind: input, shape index: {}]   ;;  %s13273_s6 = inlined_call_operand.vmem [shape: f32[1,128], index: 6, kind: input, shape index: {}]   ;;  %s13274_s7 = inlined_call_operand.vmem [shape: bf16[4,128], index: 7, kind: input, shape index: {}]   ;;  %s13275_s8 = inlined_call_operand.vmem [shape: f32[1,128], index: 8, kind: input, shape index: {}]   ;;  %s13276_s9 = inlined_call_operand.vmem [shape: f32[1,128], index: 9, kind: input, shape index: {}]   ;;  %s13277_s10 = inlined_call_operand.vmem [shape: f32[2,288,128], index: 10, kind: output, shape index: {}]  }
   0x1 LB: > { %s7722_s14 = sadd.s32 4294967295, %s9578_s13   ;;  %p7726_p0 = scmp.ge.s32.totalorder %s9578_s13, 1  ;;  %s9578_s13 = sphi %s9638_s13, %s20_s13  }
   0x2   : > { %p312_p1 = scmp.lt.s32.totalorder %s9578_s13, 3 }
   0x4   : > { %p313_p2 = pnand %p7726_p0, %p312_p1 }
   0x6   : > { %316 = sbr.rel (%p313_p2) target bundleno = 1083 (0x43b), region = 60 }
   0xb   : > { %v7729_v0 = vld [vmem:[%s13268_s1 + $0x2] sm:$0x3]  ;;  %vm13301_vm0 = vcmask 1041408   ;;  %p350_p3 = scmp.lt.s32.totalorder %s7722_s14, 1  ;;  %v7766_v2 = vld [vmem:[%s13268_s1 + $0x4] sm:$0x3] }
   0xc   : > { %9399 = vmatprep.subr.msk.bf16.mxu0 %vm13301_vm0, %v7729_v0  ;;  %9400 = vmatprep.subr.msk.bf16.mxu1 %vm13301_vm0, %v7729_v0  ;;  %v529_v1 = vsel %vm13301_vm0, %v7729_v0, 0  ;;  %v415_v3 = vld [vmem:[%s13268_s1] sm:$0x3]  ;;  %vm13289_vm1 = vcmask 31744   ;;  %v1053_v15 = vsel %vm13301_vm0, %v7766_v2, 0 }
   0xd   : > { %8550 = vmatpush3.bf16.msra.mxu0 %v529_v1  ;;  %9398 = vmatpush3.bf16.msra.mxu1 %v529_v1  ;;  %s13855_s14 = smov (!%p350_p3, %s7722_s14), 1  ;;  %v763_v18 = vsel %vm13301_vm0, %v415_v3, 0  ;;  %v9688_v24 = vld [vmem:[%s13268_s1 + $0x6] sm:$0x3]  ;;  %v9693_v25 = vld [vmem:[%s13268_s1 + $0x8] sm:$0x3] }
   0xe   : > { %9402 = vmatprep.subr.msk.bf16.mxu0 %vm13301_vm0, %v7766_v2  ;;  %9401 = vmatprep.subr.msk.bf16.mxu1 %vm13301_vm0, %v415_v3  ;;  %s9410_s21 = smul.u32 344, %s13855_s14 }
   0xf   : > { %s9411_s12 = smul.u32 288, %s13855_s14 }
  0x10   : > { %s9666_s24 = scalar_lea.vmem %s13267_s0, %s9410_s21 }
  0x11   : > { %v416_v4 = vld [vmem:[%s9666_s24 + $0x1] sm:$0xff]  ;;  %v417_v5 = vld [vmem:[%s9666_s24 + $0x9] sm:$0xff]  ;;  %v418_v9 = vld [vmem:[%s9666_s24 + $0x11] sm:$0xff]  ;;  %s13059_s16 = scalar_lea.vmem %s13277_s10, %s9411_s12 }
  0x12   : > { %v436_v6 = vld [vmem:[%s9666_s24 + $0xa1] sm:$0xff]  ;;  %v452_v7 = vpack.c.bf16 %v417_v5, %v416_v4  ;;  %v437_v8 = vld [vmem:[%s9666_s24 + $0xa9] sm:$0xff]  ;;  %v419_v10 = vld [vmem:[%s9666_s24 + $0x19] sm:$0xff] }
  0x13   : > { %v462_v11 = vpack.c.bf16 %v437_v8, %v436_v6  ;;  %v453_v12 = vpack.c.bf16 %v419_v10, %v418_v9  ;;  %v438_v13 = vld [vmem:[%s9666_s24 + $0xb1] sm:$0xff]  ;;  %v439_v14 = vld [vmem:[%s9666_s24 + $0xb9] sm:$0xff]  ;;  %v420_v16 = vld [vmem:[%s9666_s24 + $0x21] sm:$0xff]  ;;  %v1379_v10 = vsel %vm13301_vm0, %v9688_v24, 0 }
  0x14   : > { %8551 = vmatprep.mubr.msk.bf16.mxu0 %vm13289_vm1, %v452_v7  ;;  %v463_v17 = vpack.c.bf16 %v439_v14, %v438_v13  ;;  %v421_v19 = vld [vmem:[%s9666_s24 + $0x29] sm:$0xff]  ;;  %v440_v20 = vld [vmem:[%s9666_s24 + $0xc1] sm:$0xff]  ;;  %v422_v26 = vld [vmem:[%s9666_s24 + $0x31] sm:$0xff] }
  0x15   : > { %v441_v21 = vld [vmem:[%s9666_s24 + $0xc9] sm:$0xff]  ;;  %8571 = vmatprep.mubr.msk.bf16.mxu1 %vm13289_vm1, %v462_v11  ;;  %8552 = vmatmul.mubr.msk.bf16.vlgmr.msra.gmra.mxu0 %vm13289_vm1, %v453_v12  ;;  %v454_v22 = vpack.c.bf16 %v421_v19, %v420_v16  ;;  %v423_v27 = vld [vmem:[%s9666_s24 + $0x39] sm:$0xff]  ;;  %v442_v28 = vld [vmem:[%s9666_s24 + $0xd1] sm:$0xff] }
  0x16   : > { %v464_v23 = vpack.c.bf16 %v441_v21, %v440_v20  ;;  %8572 = vmatmul.mubr.msk.bf16.vlgmr.msra.gmra.mxu1 %vm13289_vm1, %v463_v17  ;;  %8626 = vmatpush3.bf16.msra.mxu0 %v1053_v15  ;;  %v443_v29 = vld [vmem:[%s9666_s24 + $0xd9] sm:$0xff]  ;;  %v424_v30 = vld [vmem:[%s9666_s24 + $0x41] sm:$0xff]  ;;  %v425_v31 = vld [vmem:[%s9666_s24 + $0x49] sm:$0xff]  ;;  %v455_v34 = vpack.c.bf16 %v423_v27, %v422_v26 }
  0x17   : > { %8588 = vmatpush3.bf16.msra.mxu1 %v763_v18  ;;  %8555 = vmatprep.mubr.msk.bf16.mxu0 %vm13289_vm1, %v454_v22  ;;  %v444_v32 = vld [vmem:[%s9666_s24 + $0xe1] sm:$0xff]  ;;  %v445_v33 = vld [vmem:[%s9666_s24 + $0xe9] sm:$0xff]  ;;  %v465_v35 = vpack.c.bf16 %v443_v29, %v442_v28  ;;  %v456_v36 = vpack.c.bf16 %v425_v31, %v424_v30  ;;  %v426_v38 = vld [vmem:[%s9666_s24 + $0x51] sm:$0xff]  ;;  %v1705_v22 = vsel %vm13301_vm0, %v9693_v25, 0 }
  0x18   : > { %8575 = vmatprep.mubr.msk.bf16.mxu1 %vm13289_vm1, %v464_v23  ;;  %9403 = vmatprep.subr.msk.bf16.mxu1 %vm13301_vm0, %v9688_v24  ;;  %v466_v37 = vpack.c.bf16 %v445_v33, %v444_v32  ;;  %v427_v39 = vld [vmem:[%s9666_s24 + $0x59] sm:$0xff]  ;;  %v446_v40 = vld [vmem:[%s9666_s24 + $0xf1] sm:$0xff]  ;;  %v428_v42 = vld [vmem:[%s9666_s24 + $0x61] sm:$0xff] }
  0x19   : > { %9404 = vmatprep.subr.msk.bf16.mxu0 %vm13301_vm0, %v9693_v25  ;;  %v447_v41 = vld [vmem:[%s9666_s24 + $0xf9] sm:$0xff]  ;;  %v429_v43 = vld [vmem:[%s9666_s24 + $0x69] sm:$0xff]  ;;  %v448_v44 = vld [vmem:[%s9666_s24 + $0x101] sm:$0xff]  ;;  %v457_v46 = vpack.c.bf16 %v427_v39, %v426_v38 }
  0x1a   : > { %v449_v45 = vld [vmem:[%s9666_s24 + $0x109] sm:$0xff]  ;;  %v467_v47 = vpack.c.bf16 %v447_v41, %v446_v40  ;;  %v458_v48 = vpack.c.bf16 %v429_v43, %v428_v42  ;;  %v430_v50 = vld [vmem:[%s9666_s24 + $0x71] sm:$0xff]  ;;  %v431_v51 = vld [vmem:[%s9666_s24 + $0x79] sm:$0xff] }
  0x1b   : > { %v468_v49 = vpack.c.bf16 %v449_v45, %v448_v44  ;;  %v450_v52 = vld [vmem:[%s9666_s24 + $0x111] sm:$0xff]  ;;  %v451_v53 = vld [vmem:[%s9666_s24 + $0x119] sm:$0xff]  ;;  %v432_v54 = vld [vmem:[%s9666_s24 + $0x81] sm:$0xff]  ;;  %v459_v58 = vpack.c.bf16 %v431_v51, %v430_v50 }
  0x1c   : > { %v433_v55 = vld [vmem:[%s9666_s24 + $0x89] sm:$0xff]  ;;  %v361_v56 = vld [vmem:[%s9666_s24] sm:$0xff]  ;;  %v469_v59 = vpack.c.bf16 %v451_v53, %v450_v52  ;;  %v434_v62 = vld [vmem:[%s9666_s24 + $0x91] sm:$0xff] }
  0x1d   : > { %8556 = vmatmul.mubr.msk.bf16.gmra.mxu0 %vm13289_vm1, %v455_v34  ;;  %v362_v57 = vld [vmem:[%s9666_s24 + $0x8] sm:$0xff]  ;;  %v460_v60 = vpack.c.bf16 %v433_v55, %v432_v54  ;;  %v435_v63 = vld [vmem:[%s9666_s24 + $0x99] sm:$0xff]  ;;  %v363_v0 = vld [vmem:[%s9666_s24 + $0x10] sm:$0xff] }
  0x1e   : > { %8576 = vmatmul.mubr.msk.bf16.gmra.mxu1 %vm13289_vm1, %v465_v35  ;;  %8559 = vmatprep.mubr.msk.bf16.mxu0 %vm13289_vm1, %v456_v36  ;;  %v397_v61 = vpack.c.bf16 %v362_v57, %v361_v56  ;;  %v364_v1 = vld [vmem:[%s9666_s24 + $0x18] sm:$0xff]  ;;  %v942_v2 = vld [vmem:[%s9666_s24 + $0x2] sm:$0xff]  ;;  %v943_v3 = vld [vmem:[%s9666_s24 + $0xa] sm:$0xff]  ;;  %v461_v6 = vpack.c.bf16 %v435_v63, %v434_v62 }
  0x1f   : > { %8579 = vmatprep.mubr.msk.bf16.mxu1 %vm13289_vm1, %v466_v37  ;;  %v365_v4 = vld [vmem:[%s9666_s24 + $0x20] sm:$0xff]  ;;  %v366_v5 = vld [vmem:[%s9666_s24 + $0x28] sm:$0xff]  ;;  %v398_v7 = vpack.c.bf16 %v364_v1, %v363_v0  ;;  %v978_v8 = vpack.c.bf16 %v943_v3, %v942_v2  ;;  %v944_v12 = vld [vmem:[%s9666_s24 + $0x12] sm:$0xff] }
  0x20   : > { %v399_v9 = vpack.c.bf16 %v366_v5, %v365_v4  ;;  %v9752_v11 = vld [vmem:[%s13268_s1 + $0xa] sm:$0x3]  ;;  %v945_v13 = vld [vmem:[%s9666_s24 + $0x1a] sm:$0xff]  ;;  %v367_v14 = vld [vmem:[%s9666_s24 + $0x30] sm:$0xff] }
  0x21   : > { %v368_v15 = vld [vmem:[%s9666_s24 + $0x38] sm:$0xff]  ;;  %v369_v16 = vld [vmem:[%s9666_s24 + $0x40] sm:$0xff]  ;;  %v370_v17 = vld [vmem:[%s9666_s24 + $0x48] sm:$0xff]  ;;  %v9767_v20 = vpack.c.bf16 %v945_v13, %v944_v12 }
  0x22   : > { %v946_v18 = vld [vmem:[%s9666_s24 + $0x22] sm:$0xff]  ;;  %v947_v19 = vld [vmem:[%s9666_s24 + $0x2a] sm:$0xff]  ;;  %v400_v21 = vpack.c.bf16 %v368_v15, %v367_v14  ;;  %v401_v23 = vpack.c.bf16 %v370_v17, %v369_v16  ;;  %v948_v28 = vld [vmem:[%s9666_s24 + $0x32] sm:$0xff] }
  0x23   : > { %v9771_v24 = vpack.c.bf16 %v947_v19, %v946_v18  ;;  %v9778_v26 = vld [vmem:[%s13268_s1 + $0xc] sm:$0x3]  ;;  %v371_v27 = vld [vmem:[%s9666_s24 + $0x50] sm:$0xff]  ;;  %v949_v25 = vld [vmem:[%s9666_s24 + $0x3a] sm:$0xff] }
  0x24   : > { %v372_v29 = vld [vmem:[%s9666_s24 + $0x58] sm:$0xff]  ;;  %v950_v30 = vld [vmem:[%s9666_s24 + $0x42] sm:$0xff]  ;;  %v951_v31 = vld [vmem:[%s9666_s24 + $0x4a] sm:$0xff]  ;;  %v9794_v34 = vpack.c.bf16 %v949_v25, %v948_v28 }
  0x25   : > { %8560 = vmatmul.mubr.msk.bf16.gmra.mxu0 %vm13289_vm1, %v457_v46  ;;  %v373_v32 = vld [vmem:[%s9666_s24 + $0x60] sm:$0xff]  ;;  %v374_v33 = vld [vmem:[%s9666_s24 + $0x68] sm:$0xff]  ;;  %v402_v35 = vpack.c.bf16 %v372_v29, %v371_v27  ;;  %v9796_v36 = vpack.c.bf16 %v951_v31, %v950_v30  ;;  %v952_v38 = vld [vmem:[%s9666_s24 + $0x52] sm:$0xff] }
  0x26   : > { %8580 = vmatmul.mubr.msk.bf16.gmra.mxu1 %vm13289_vm1, %v467_v47  ;;  %8563 = vmatprep.mubr.msk.bf16.mxu0 %vm13289_vm1, %v458_v48  ;;  %v403_v37 = vpack.c.bf16 %v374_v33, %v373_v32  ;;  %v375_v39 = vld [vmem:[%s9666_s24 + $0x70] sm:$0xff]  ;;  %v953_v40 = vld [vmem:[%s9666_s24 + $0x5a] sm:$0xff]  ;;  %v954_v42 = vld [vmem:[%s9666_s24 + $0x62] sm:$0xff] }
  0x27   : > { %8583 = vmatprep.mubr.msk.bf16.mxu1 %vm13289_vm1, %v468_v49  ;;  %v376_v41 = vld [vmem:[%s9666_s24 + $0x78] sm:$0xff]  ;;  %v955_v43 = vld [vmem:[%s9666_s24 + $0x6a] sm:$0xff]  ;;  %v377_v44 = vld [vmem:[%s9666_s24 + $0x80] sm:$0xff]  ;;  %v9812_v46 = vpack.c.bf16 %v953_v40, %v952_v38 }
  0x28   : > { %v378_v45 = vld [vmem:[%s9666_s24 + $0x88] sm:$0xff]  ;;  %v404_v47 = vpack.c.bf16 %v376_v41, %v375_v39  ;;  %v9814_v48 = vpack.c.bf16 %v955_v43, %v954_v42  ;;  %v956_v50 = vld [vmem:[%s9666_s24 + $0x72] sm:$0xff]  ;;  %v957_v51 = vld [vmem:[%s9666_s24 + $0x7a] sm:$0xff] }
  0x29   : > { %v405_v49 = vpack.c.bf16 %v378_v45, %v377_v44  ;;  %v379_v52 = vld [vmem:[%s9666_s24 + $0x90] sm:$0xff]  ;;  %v380_v53 = vld [vmem:[%s9666_s24 + $0x98] sm:$0xff]  ;;  %v381_v54 = vld [vmem:[%s9666_s24 + $0xa0] sm:$0xff] }
  0x2a   : > { %v382_v55 = vld [vmem:[%s9666_s24 + $0xa8] sm:$0xff]  ;;  %v960_v62 = vld [vmem:[%s9666_s24 + $0x92] sm:$0xff]  ;;  %v961_v63 = vld [vmem:[%s9666_s24 + $0x9a] sm:$0xff] }
  0x2b   : > { %v958_v56 = vld [vmem:[%s9666_s24 + $0x82] sm:$0xff]  ;;  %v959_v57 = vld [vmem:[%s9666_s24 + $0x8a] sm:$0xff]  ;;  %v384_v1 = vld [vmem:[%s9666_s24 + $0xb8] sm:$0xff] }
  0x2c   : > { %v383_v0 = vld [vmem:[%s9666_s24 + $0xb0] sm:$0xff]  ;;  %v962_v2 = vld [vmem:[%s9666_s24 + $0xa2] sm:$0xff]  ;;  %v965_v12 = vld [vmem:[%s9666_s24 + $0xba] sm:$0xff] }
  0x2d   : > { %8564 = vmatmul.mubr.msk.bf16.gmra.mxu0 %vm13289_vm1, %v459_v58  ;;  %v9830_v58 = vpack.c.bf16 %v957_v51, %v956_v50  ;;  %v963_v3 = vld [vmem:[%s9666_s24 + $0xaa] sm:$0xff]  ;;  %v385_v4 = vld [vmem:[%s9666_s24 + $0xc0] sm:$0xff]  ;;  %v388_v14 = vld [vmem:[%s9666_s24 + $0xd8] sm:$0xff] }
  0x2e   : > { %8584 = vmatmul.mubr.msk.bf16.gmra.mxu1 %vm13289_vm1, %v469_v59  ;;  %8567 = vmatprep.mubr.msk.bf16.mxu0 %vm13289_vm1, %v460_v60  ;;  %v406_v59 = vpack.c.bf16 %v380_v53, %v379_v52  ;;  %v9832_v60 = vpack.c.bf16 %v959_v57, %v958_v56  ;;  %v386_v5 = vld [vmem:[%s9666_s24 + $0xc8] sm:$0xff]  ;;  %v387_v13 = vld [vmem:[%s9666_s24 + $0xd0] sm:$0xff]  ;;  %v389_v17 = vld [vmem:[%s9666_s24 + $0xe0] sm:$0xff]  ;;  %v2031_v57 = vsel %vm13301_vm0, %v9752_v11, 0 }
  0x2f   : > { %8589 = vmatprep.mubr.msk.bf16.mxu1 %vm13289_vm1, %v397_v61  ;;  %v407_v61 = vpack.c.bf16 %v382_v55, %v381_v54  ;;  %v966_v15 = vld [vmem:[%s9666_s24 + $0xc2] sm:$0xff]  ;;  %v967_v16 = vld [vmem:[%s9666_s24 + $0xca] sm:$0xff]  ;;  %v968_v27 = vld [vmem:[%s9666_s24 + $0xd2] sm:$0xff] }
  0x30   : > { %v390_v18 = vld [vmem:[%s9666_s24 + $0xe8] sm:$0xff]  ;;  %v969_v28 = vld [vmem:[%s9666_s24 + $0xda] sm:$0xff]  ;;  %v391_v25 = vld [vmem:[%s9666_s24 + $0xf0] sm:$0xff] }
  0x31   : > { %v392_v29 = vld [vmem:[%s9666_s24 + $0xf8] sm:$0xff]  ;;  %v970_v30 = vld [vmem:[%s9666_s24 + $0xe2] sm:$0xff]  ;;  %v971_v31 = vld [vmem:[%s9666_s24 + $0xea] sm:$0xff] }
  0x32   : > { %v393_v32 = vld [vmem:[%s9666_s24 + $0x100] sm:$0xff]  ;;  %v394_v33 = vld [vmem:[%s9666_s24 + $0x108] sm:$0xff]  ;;  %v9886_v38 = vpack.c.bf16 %v971_v31, %v970_v30  ;;  %v972_v40 = vld [vmem:[%s9666_s24 + $0xf2] sm:$0xff] }
  0x33   : > { %v413_v39 = vpack.c.bf16 %v394_v33, %v393_v32  ;;  %v973_v41 = vld [vmem:[%s9666_s24 + $0xfa] sm:$0xff]  ;;  %v395_v42 = vld [vmem:[%s9666_s24 + $0x110] sm:$0xff]  ;;  %v974_v44 = vld [vmem:[%s9666_s24 + $0x102] sm:$0xff] }
  0x34   : > { %v396_v43 = vld [vmem:[%s9666_s24 + $0x118] sm:$0xff]  ;;  %v975_v45 = vld [vmem:[%s9666_s24 + $0x10a] sm:$0xff] }
  0x35   : > { %8568 = vmatmul.mubr.msk.bf16.gmra.mxu0 %vm13289_vm1, %v461_v6  ;;  %v9848_v6 = vpack.c.bf16 %v961_v63, %v960_v62  ;;  %v9902_v50 = vpack.c.bf16 %v975_v45, %v974_v44  ;;  %v976_v51 = vld [vmem:[%s9666_s24 + $0x112] sm:$0xff]  ;;  %v977_v52 = vld [vmem:[%s9666_s24 + $0x11a] sm:$0xff] }
  0x36   : > { %8590 = vmatmul.mubr.msk.bf16.vlgmr.msra.gmra.mxu1 %vm13289_vm1, %v398_v7  ;;  %8627 = vmatprep.mubr.msk.bf16.mxu0 %vm13289_vm1, %v978_v8  ;;  %v408_v7 = vpack.c.bf16 %v384_v1, %v383_v0  ;;  %v9850_v8 = vpack.c.bf16 %v963_v3, %v962_v2  ;;  %v1594_v53 = vld [vmem:[%s9666_s24 + $0x13] sm:$0xff]  ;;  %v1595_v54 = vld [vmem:[%s9666_s24 + $0x1b] sm:$0xff]  ;;  %v9915_v55 = vpack.c.bf16 %v977_v52, %v976_v51  ;;  %v9943_v1 = vld [vmem:[%s13268_s1 + $0x10] sm:$0x3] }
  0x37   : > { %8664 = vmatpush3.bf16.msra.mxu1 %v1379_v10  ;;  %8593 = vmatprep.mubr.msk.bf16.mxu1 %vm13289_vm1, %v399_v9  ;;  %v409_v9 = vpack.c.bf16 %v386_v5, %v385_v4  ;;  %v964_v10 = vld [vmem:[%s9666_s24 + $0xb2] sm:$0xff]  ;;  %v1630_v56 = vpack.c.bf16 %v1595_v54, %v1594_v53  ;;  %v1599_v62 = vld [vmem:[%s9666_s24 + $0x3b] sm:$0xff]  ;;  %v1628_v51 = vld [vmem:[%s9666_s24 + $0x123] sm:$0xff] }
  0x38   : > { %9405 = vmatprep.subr.msk.bf16.mxu1 %vm13301_vm0, %v9752_v11  ;;  %v9866_v19 = vpack.c.bf16 %v965_v12, %v964_v10  ;;  %v1598_v11 = vld [vmem:[%s9666_s24 + $0x33] sm:$0xff]  ;;  %v1601_v2 = vld [vmem:[%s9666_s24 + $0x4b] sm:$0xff]  ;;  %v1603_v3 = vld [vmem:[%s9666_s24 + $0x5b] sm:$0xff] }
  0x39   : > { %v1632_v0 = vpack.c.bf16 %v1599_v62, %v1598_v11  ;;  %v1621_v30 = vld [vmem:[%s9666_s24 + $0xeb] sm:$0xff]  ;;  %v1622_v31 = vld [vmem:[%s9666_s24 + $0xf3] sm:$0xff]  ;;  %v1623_v32 = vld [vmem:[%s9666_s24 + $0xfb] sm:$0xff] }
  0x3a   : > { %v1921_v44 = vld [vmem:[%s9666_s24 + $0x1c] sm:$0xff]  ;;  %v1629_v52 = vld [vmem:[%s9666_s24 + $0x12b] sm:$0xff] }
  0x3b   : > { %v1922_v53 = vld [vmem:[%s9666_s24 + $0x24] sm:$0xff]  ;;  %v1923_v54 = vld [vmem:[%s9666_s24 + $0x2c] sm:$0xff] }
  0x3c   : > { %v1926_v62 = vld [vmem:[%s9666_s24 + $0x44] sm:$0xff] }
  0x3d   : > { %8628 = vmatmul.mubr.msk.bf16.vlgmr.msra.gmra.mxu0 %vm13289_vm1, %v9767_v20 }
  0x3e   : > { %8594 = vmatmul.mubr.msk.bf16.gmra.mxu1 %vm13289_vm1, %v400_v21  ;;  %8702 = vmatpush3.bf16.msra.mxu0 %v1705_v22  ;;  %v410_v21 = vpack.c.bf16 %v388_v14, %v387_v13  ;;  %v9868_v22 = vpack.c.bf16 %v967_v16, %v966_v15  ;;  %v1609_v13 = vld [vmem:[%s9666_s24 + $0x8b] sm:$0xff]  ;;  %v1611_v14 = vld [vmem:[%s9666_s24 + $0x9b] sm:$0xff] }
  0x3f   : > { %8597 = vmatprep.mubr.msk.bf16.mxu1 %vm13289_vm1, %v401_v23  ;;  %8631 = vmatprep.mubr.msk.bf16.mxu0 %vm13289_vm1, %v9771_v24  ;;  %v411_v23 = vpack.c.bf16 %v390_v18, %v389_v17  ;;  %v1613_v17 = vld [vmem:[%s9666_s24 + $0xab] sm:$0xff]  ;;  %v1615_v18 = vld [vmem:[%s9666_s24 + $0xbb] sm:$0xff] }
  0x40   : > { %9406 = vmatprep.subr.msk.bf16.mxu0 %vm13301_vm0, %v9778_v26 }
  0x45   : > { %8632 = vmatmul.mubr.msk.bf16.gmra.mxu0 %vm13289_vm1, %v9794_v34 }
  0x46   : > { %8598 = vmatmul.mubr.msk.bf16.gmra.mxu1 %vm13289_vm1, %v402_v35  ;;  %8635 = vmatprep.mubr.msk.bf16.mxu0 %vm13289_vm1, %v9796_v36  ;;  %v9884_v35 = vpack.c.bf16 %v969_v28, %v968_v27  ;;  %v1617_v27 = vld [vmem:[%s9666_s24 + $0xcb] sm:$0xff]  ;;  %v1619_v28 = vld [vmem:[%s9666_s24 + $0xdb] sm:$0xff] }
  0x47   : > { %8601 = vmatprep.mubr.msk.bf16.mxu1 %vm13289_vm1, %v403_v37  ;;  %v412_v37 = vpack.c.bf16 %v392_v29, %v391_v25 }
  0x4d   : > { %8636 = vmatmul.mubr.msk.bf16.gmra.mxu0 %vm13289_vm1, %v9812_v46 }
  0x4e   : > { %8602 = vmatmul.mubr.msk.bf16.gmra.mxu1 %vm13289_vm1, %v404_v47  ;;  %8639 = vmatprep.mubr.msk.bf16.mxu0 %vm13289_vm1, %v9814_v48  ;;  %v9900_v47 = vpack.c.bf16 %v973_v41, %v972_v40  ;;  %v1303_v40 = vld [vmem:[%s9666_s24 + $0x12a] sm:$0xff]  ;;  %v1626_v41 = vld [vmem:[%s9666_s24 + $0x113] sm:$0xff] }
  0x4f   : > { %8605 = vmatprep.mubr.msk.bf16.mxu1 %vm13289_vm1, %v405_v49  ;;  %v414_v49 = vpack.c.bf16 %v396_v43, %v395_v42  ;;  %v1627_v42 = vld [vmem:[%s9666_s24 + $0x11b] sm:$0xff] }
  0x50   : > { %v1920_v43 = vld [vmem:[%s9666_s24 + $0x14] sm:$0xff] }
  0x55   : > { %8640 = vmatmul.mubr.msk.bf16.gmra.mxu0 %vm13289_vm1, %v9830_v58 }
  0x56   : > { %8606 = vmatmul.mubr.msk.bf16.gmra.mxu1 %vm13289_vm1, %v406_v59  ;;  %8643 = vmatprep.mubr.msk.bf16.mxu0 %vm13289_vm1, %v9832_v60  ;;  %v9924_v59 = vld [vmem:[%s13268_s1 + $0xe] sm:$0x3] }
  0x57   : > { %8609 = vmatprep.mubr.msk.bf16.mxu1 %vm13289_vm1, %v407_v61  ;;  %v1597_v61 = vld [vmem:[%s9666_s24 + $0x2b] sm:$0xff]  ;;  %v2683_v11 = vsel %vm13301_vm0, %v9924_v59, 0 }
  0x5d   : > { %8644 = vmatmul.mubr.msk.bf16.gmra.mxu0 %vm13289_vm1, %v9848_v6 }
  0x5e   : > { %8610 = vmatmul.mubr.msk.bf16.gmra.mxu1 %vm13289_vm1, %v408_v7  ;;  %8647 = vmatprep.mubr.msk.bf16.mxu0 %vm13289_vm1, %v9850_v8  ;;  %v1606_v7 = vld [vmem:[%s9666_s24 + $0x73] sm:$0xff] }
  0x5f   : > { %8613 = vmatprep.mubr.msk.bf16.mxu1 %vm13289_vm1, %v409_v9  ;;  %v1607_v9 = vld [vmem:[%s9666_s24 + $0x7b] sm:$0xff] }
  0x60   : > { %v1636_v12 = vpack.c.bf16 %v1607_v9, %v1606_v7 }
  0x65   : > { %8648 = vmatmul.mubr.msk.bf16.gmra.mxu0 %vm13289_vm1, %v9866_v19 }
  0x66   : > { %8614 = vmatmul.mubr.msk.bf16.gmra.mxu1 %vm13289_vm1, %v410_v21  ;;  %8651 = vmatprep.mubr.msk.bf16.mxu0 %vm13289_vm1, %v9868_v22 }
  0x67   : > { %8617 = vmatprep.mubr.msk.bf16.mxu1 %vm13289_vm1, %v411_v23 }
  0x6d   : > { %8652 = vmatmul.mubr.msk.bf16.gmra.mxu0 %vm13289_vm1, %v9884_v35 }
  0x6e   : > { %8618 = vmatmul.mubr.msk.bf16.gmra.mxu1 %vm13289_vm1, %v412_v37  ;;  %8655 = vmatprep.mubr.msk.bf16.mxu0 %vm13289_vm1, %v9886_v38  ;;  %v1302_v37 = vld [vmem:[%s9666_s24 + $0x122] sm:$0xff] }
  0x6f   : > { %8621 = vmatprep.mubr.msk.bf16.mxu1 %vm13289_vm1, %v413_v39  ;;  %v1625_v39 = vld [vmem:[%s9666_s24 + $0x10b] sm:$0xff] }
  0x75   : > { %8656 = vmatmul.mubr.msk.bf16.gmra.mxu0 %vm13289_vm1, %v9900_v47 }
  0x76   : > { %8622 = vmatmul.mubr.msk.bf16.gmra.mxu1 %vm13289_vm1, %v414_v49  ;;  %8659 = vmatprep.mubr.msk.bf16.mxu0 %vm13289_vm1, %v9902_v50  ;;  %v1646_v49 = vpack.c.bf16 %v1627_v42, %v1626_v41  ;;  %v1944_v42 = vld [vmem:[%s9666_s24 + $0xd4] sm:$0xff] }
  0x77   : > { %8665 = vmatprep.mubr.msk.bf16.mxu1 %vm13289_vm1, %v9767_v20  ;;  %v1596_v20 = vld [vmem:[%s9666_s24 + $0x23] sm:$0xff] }
  0x78   : > { %v1631_v63 = vpack.c.bf16 %v1597_v61, %v1596_v20  ;;  %v1957_v20 = vpack.c.bf16 %v1923_v54, %v1922_v53 }
  0x7d   : > { %8660 = vmatmul.mubr.msk.bf16.gmra.mxu0 %vm13289_vm1, %v9915_v55 }
  0x7e   : > { %8666 = vmatmul.mubr.msk.bf16.vlgmr.msra.gmra.mxu1 %vm13289_vm1, %v9771_v24  ;;  %8703 = vmatprep.mubr.msk.bf16.mxu0 %vm13289_vm1, %v1630_v56  ;;  %v2357_v24 = vsel %vm13301_vm0, %v9778_v26, 0  ;;  %v1602_v26 = vld [vmem:[%s9666_s24 + $0x53] sm:$0xff]  ;;  %v1925_v56 = vld [vmem:[%s9666_s24 + $0x3c] sm:$0xff] }
  0x7f   : > { %8740 = vmatpush3.bf16.msra.mxu1 %v2031_v57  ;;  %8669 = vmatprep.mubr.msk.bf16.mxu1 %vm13289_vm1, %v9794_v34  ;;  %v1600_v34 = vld [vmem:[%s9666_s24 + $0x43] sm:$0xff]  ;;  %v1634_v5 = vpack.c.bf16 %v1603_v3, %v1602_v26  ;;  %v1647_v57 = vpack.c.bf16 %v1629_v52, %v1628_v51  ;;  %v1931_v3 = vld [vmem:[%s9666_s24 + $0x6c] sm:$0xff] }
  0x80   : > { %9407 = vmatprep.subr.msk.bf16.mxu1 %vm13301_vm0, %v9924_v59  ;;  %v1633_v4 = vpack.c.bf16 %v1601_v2, %v1600_v34  ;;  %v3009_v59 = vsel %vm13301_vm0, %v9943_v1, 0  ;;  %v1930_v26 = vld [vmem:[%s9666_s24 + $0x64] sm:$0xff] }
  0x85   : > { %8704 = vmatmul.mubr.msk.bf16.vlgmr.msra.gmra.mxu0 %vm13289_vm1, %v1631_v63  ;;  %v1927_v63 = vld [vmem:[%s9666_s24 + $0x4c] sm:$0xff] }
  0x86   : > { %8670 = vmatmul.mubr.msk.bf16.gmra.mxu1 %vm13289_vm1, %v9796_v36  ;;  %8778 = vmatpush3.bf16.msra.mxu0 %v2357_v24  ;;  %v1604_v36 = vld [vmem:[%s9666_s24 + $0x63] sm:$0xff]  ;;  %v1928_v24 = vld [vmem:[%s9666_s24 + $0x54] sm:$0xff]  ;;  %v1959_v34 = vpack.c.bf16 %v1927_v63, %v1926_v62 }
  0x87   : > { %8673 = vmatprep.mubr.msk.bf16.mxu1 %vm13289_vm1, %v9812_v46  ;;  %8707 = vmatprep.mubr.msk.bf16.mxu0 %vm13289_vm1, %v1632_v0  ;;  %v1605_v46 = vld [vmem:[%s9666_s24 + $0x6b] sm:$0xff]  ;;  %v1929_v0 = vld [vmem:[%s9666_s24 + $0x5c] sm:$0xff] }
  0x88   : > { %9408 = vmatprep.subr.msk.bf16.mxu0 %vm13301_vm0, %v9943_v1  ;;  %v1635_v10 = vpack.c.bf16 %v1605_v46, %v1604_v36  ;;  %v1960_v2 = vpack.c.bf16 %v1929_v0, %v1928_v24  ;;  %v1961_v36 = vpack.c.bf16 %v1931_v3, %v1930_v26 }
  0x8d   : > { %8708 = vmatmul.mubr.msk.bf16.gmra.mxu0 %vm13289_vm1, %v1633_v4  ;;  %v1932_v4 = vld [vmem:[%s9666_s24 + $0x74] sm:$0xff] }
  0x8e   : > { %8674 = vmatmul.mubr.msk.bf16.gmra.mxu1 %vm13289_vm1, %v9814_v48  ;;  %8711 = vmatprep.mubr.msk.bf16.mxu0 %vm13289_vm1, %v1634_v5  ;;  %v1608_v48 = vld [vmem:[%s9666_s24 + $0x83] sm:$0xff] }
  0x8f   : > { %8677 = vmatprep.mubr.msk.bf16.mxu1 %vm13289_vm1, %v9830_v58  ;;  %v1610_v58 = vld [vmem:[%s9666_s24 + $0x93] sm:$0xff]  ;;  %v1637_v15 = vpack.c.bf16 %v1609_v13, %v1608_v48  ;;  %v1933_v5 = vld [vmem:[%s9666_s24 + $0x7c] sm:$0xff] }
  0x90   : > { %v1638_v16 = vpack.c.bf16 %v1611_v14, %v1610_v58  ;;  %v1962_v1 = vpack.c.bf16 %v1933_v5, %v1932_v4  ;;  %v1936_v13 = vld [vmem:[%s9666_s24 + $0x94] sm:$0xff]  ;;  %v1937_v58 = vld [vmem:[%s9666_s24 + $0x9c] sm:$0xff]  ;;  %v1950_v4 = vld [vmem:[%s9666_s24 + $0x104] sm:$0xff] }
  0x91   : > { %v1951_v5 = vld [vmem:[%s9666_s24 + $0x10c] sm:$0xff] }
  0x95   : > { %8712 = vmatmul.mubr.msk.bf16.gmra.mxu0 %vm13289_vm1, %v1635_v10  ;;  %v1934_v10 = vld [vmem:[%s9666_s24 + $0x84] sm:$0xff] }
  0x96   : > { %8678 = vmatmul.mubr.msk.bf16.gmra.mxu1 %vm13289_vm1, %v9832_v60  ;;  %8715 = vmatprep.mubr.msk.bf16.mxu0 %vm13289_vm1, %v1636_v12  ;;  %v1612_v60 = vld [vmem:[%s9666_s24 + $0xa3] sm:$0xff]  ;;  %v1935_v12 = vld [vmem:[%s9666_s24 + $0x8c] sm:$0xff] }
  0x97   : > { %8681 = vmatprep.mubr.msk.bf16.mxu1 %vm13289_vm1, %v9848_v6  ;;  %v1614_v6 = vld [vmem:[%s9666_s24 + $0xb3] sm:$0xff]  ;;  %v1639_v21 = vpack.c.bf16 %v1613_v17, %v1612_v60  ;;  %v1964_v17 = vpack.c.bf16 %v1937_v58, %v1936_v13 }
  0x98   : > { %v1640_v23 = vpack.c.bf16 %v1615_v18, %v1614_v6 }
  0x9d   : > { %8716 = vmatmul.mubr.msk.bf16.gmra.mxu0 %vm13289_vm1, %v1637_v15 }
  0x9e   : > { %8682 = vmatmul.mubr.msk.bf16.gmra.mxu1 %vm13289_vm1, %v9850_v8  ;;  %8719 = vmatprep.mubr.msk.bf16.mxu0 %vm13289_vm1, %v1638_v16  ;;  %v1616_v8 = vld [vmem:[%s9666_s24 + $0xc3] sm:$0xff]  ;;  %v1963_v16 = vpack.c.bf16 %v1935_v12, %v1934_v10 }
  0x9f   : > { %8685 = vmatprep.mubr.msk.bf16.mxu1 %vm13289_vm1, %v9866_v19  ;;  %v1618_v19 = vld [vmem:[%s9666_s24 + $0xd3] sm:$0xff]  ;;  %v1641_v25 = vpack.c.bf16 %v1617_v27, %v1616_v8  ;;  %v1938_v8 = vld [vmem:[%s9666_s24 + $0xa4] sm:$0xff]  ;;  %v1953_v10 = vld [vmem:[%s9666_s24 + $0x11c] sm:$0xff] }
  0xa0   : > { %v1642_v29 = vpack.c.bf16 %v1619_v28, %v1618_v19  ;;  %v1939_v27 = vld [vmem:[%s9666_s24 + $0xac] sm:$0xff]  ;;  %v1940_v28 = vld [vmem:[%s9666_s24 + $0xb4] sm:$0xff] }
  0xa5   : > { %8720 = vmatmul.mubr.msk.bf16.gmra.mxu0 %vm13289_vm1, %v1639_v21 }
  0xa6   : > { %8686 = vmatmul.mubr.msk.bf16.gmra.mxu1 %vm13289_vm1, %v9868_v22  ;;  %8723 = vmatprep.mubr.msk.bf16.mxu0 %vm13289_vm1, %v1640_v23  ;;  %v1620_v22 = vld [vmem:[%s9666_s24 + $0xe3] sm:$0xff] }
  0xa7   : > { %8689 = vmatprep.mubr.msk.bf16.mxu1 %vm13289_vm1, %v9884_v35  ;;  %v1643_v33 = vpack.c.bf16 %v1621_v30, %v1620_v22  ;;  %v1644_v35 = vpack.c.bf16 %v1623_v32, %v1622_v31  ;;  %v1965_v30 = vpack.c.bf16 %v1939_v27, %v1938_v8 }
  0xad   : > { %8724 = vmatmul.mubr.msk.bf16.gmra.mxu0 %vm13289_vm1, %v1641_v25  ;;  %v1941_v25 = vld [vmem:[%s9666_s24 + $0xbc] sm:$0xff] }
  0xae   : > { %8690 = vmatmul.mubr.msk.bf16.gmra.mxu1 %vm13289_vm1, %v9886_v38  ;;  %8727 = vmatprep.mubr.msk.bf16.mxu0 %vm13289_vm1, %v1642_v29  ;;  %v1624_v38 = vld [vmem:[%s9666_s24 + $0x103] sm:$0xff]  ;;  %v1966_v32 = vpack.c.bf16 %v1941_v25, %v1940_v28 }
  0xaf   : > { %8693 = vmatprep.mubr.msk.bf16.mxu1 %vm13289_vm1, %v9900_v47  ;;  %v1645_v45 = vpack.c.bf16 %v1625_v39, %v1624_v38  ;;  %v1321_v47 = vpack.c.bf16 %v1303_v40, %v1302_v37  ;;  %v1942_v39 = vld [vmem:[%s9666_s24 + $0xc4] sm:$0xff]  ;;  %v1943_v40 = vld [vmem:[%s9666_s24 + $0xcc] sm:$0xff] }
  0xb5   : > { %8728 = vmatmul.mubr.msk.bf16.gmra.mxu0 %vm13289_vm1, %v1643_v33 }
  0xb6   : > { %8694 = vmatmul.mubr.msk.bf16.gmra.mxu1 %vm13289_vm1, %v9902_v50  ;;  %8731 = vmatprep.mubr.msk.bf16.mxu0 %vm13289_vm1, %v1644_v35  ;;  %v1956_v50 = vpack.c.bf16 %v1921_v44, %v1920_v43  ;;  %v1945_v43 = vld [vmem:[%s9666_s24 + $0xdc] sm:$0xff] }
  0xb7   : > { %8697 = vmatprep.mubr.msk.bf16.mxu1 %vm13289_vm1, %v9915_v55  ;;  %v1924_v55 = vld [vmem:[%s9666_s24 + $0x34] sm:$0xff] }
  0xb8   : > { %v1958_v61 = vpack.c.bf16 %v1925_v56, %v1924_v55  ;;  %v1946_v55 = vld [vmem:[%s9666_s24 + $0xe4] sm:$0xff]  ;;  %v1947_v56 = vld [vmem:[%s9666_s24 + $0xec] sm:$0xff] }
  0xb9   : > { %v1969_v63 = vpack.c.bf16 %v1947_v56, %v1946_v55 }
  0xbd   : > { %8732 = vmatmul.mubr.msk.bf16.gmra.mxu0 %vm13289_vm1, %v1645_v45 }
  0xbe   : > { %8698 = vmatmul.mubr.msk.bf16.gmra.mxu1 %vm13289_vm1, %v1321_v47  ;;  %8735 = vmatprep.mubr.msk.bf16.mxu0 %vm13289_vm1, %v1646_v49  ;;  %v1967_v47 = vpack.c.bf16 %v1943_v40, %v1942_v39  ;;  %v1954_v39 = vld [vmem:[%s9666_s24 + $0x124] sm:$0xff]  ;;  %v1955_v40 = vld [vmem:[%s9666_s24 + $0x12c] sm:$0xff] }
  0xbf   : > { %8741 = vmatprep.mubr.msk.bf16.mxu1 %vm13289_vm1, %v1956_v50  ;;  %v1968_v50 = vpack.c.bf16 %v1945_v43, %v1944_v42 }
  0xc5   : > { %8736 = vmatmul.mubr.msk.bf16.gmra.mxu0 %vm13289_vm1, %v1647_v57 }
  0xc6   : > { %8742 = vmatmul.mubr.msk.bf16.vlgmr.msra.gmra.mxu1 %vm13289_vm1, %v1957_v20  ;;  %8779 = vmatprep.mubr.msk.bf16.mxu0 %vm13289_vm1, %v1957_v20  ;;  %v1948_v20 = vld [vmem:[%s9666_s24 + $0xf4] sm:$0xff] }
  0xc7   : > { %8816 = vmatpush3.bf16.msra.mxu1 %v2683_v11  ;;  %8745 = vmatprep.mubr.msk.bf16.mxu1 %vm13289_vm1, %v1958_v61 }
  0xcd   : > { %8780 = vmatmul.mubr.msk.bf16.vlgmr.msra.gmra.mxu0 %vm13289_vm1, %v1958_v61  ;;  %v1949_v61 = vld [vmem:[%s9666_s24 + $0xfc] sm:$0xff] }
  0xce   : > { %8746 = vmatmul.mubr.msk.bf16.gmra.mxu1 %vm13289_vm1, %v1959_v34  ;;  %8854 = vmatpush3.bf16.msra.mxu0 %v3009_v59  ;;  %v1970_v0 = vpack.c.bf16 %v1949_v61, %v1948_v20 }
  0xcf   : > { %8749 = vmatprep.mubr.msk.bf16.mxu1 %vm13289_vm1, %v1960_v2  ;;  %8783 = vmatprep.mubr.msk.bf16.mxu0 %vm13289_vm1, %v1959_v34 }
  0xd5   : > { %v10050_v46 = vpop.f32.mrf.mxu0  ;;  %8784 = vmatmul.mubr.msk.bf16.gmra.mxu0 %vm13289_vm1, %v1960_v2 }
  0xd6   : > { %v10053_v7 = vpop.f32.mrf.mxu1  ;;  %8750 = vmatmul.mubr.msk.bf16.gmra.mxu1 %vm13289_vm1, %v1961_v36  ;;  %8787 = vmatprep.mubr.msk.bf16.mxu0 %vm13289_vm1, %v1961_v36 }
  0xd7   : > { %v10057_v9 = vpop.f32.mrf.mxu0  ;;  %8753 = vmatprep.mubr.msk.bf16.mxu1 %vm13289_vm1, %v1962_v1 }
  0xd8   : > { %v10062_v48 = vpop.f32.mrf.mxu1 }
  0xd9   : > { %v10066_v14 = vpop.f32.mrf.mxu0 }
  0xda   : > { %v10068_v15 = vpop.f32.mrf.mxu1 }
  0xdb   : > { %v10070_v60 = vpop.f32.mrf.mxu0 }
  0xdc   : > { %v10072_v6 = vpop.f32.mrf.mxu1 }
  0xdd   : > { %v10074_v18 = vpop.f32.mrf.mxu0  ;;  %8788 = vmatmul.mubr.msk.bf16.gmra.mxu0 %vm13289_vm1, %v1962_v1  ;;  %v1952_v1 = vld [vmem:[%s9666_s24 + $0x114] sm:$0xff] }
  0xde   : > { %v10077_v21 = vpop.f32.mrf.mxu1  ;;  %8754 = vmatmul.mubr.msk.bf16.gmra.mxu1 %vm13289_vm1, %v1963_v16  ;;  %8791 = vmatprep.mubr.msk.bf16.mxu0 %vm13289_vm1, %v1963_v16  ;;  %v1971_v16 = vpack.c.bf16 %v1951_v5, %v1950_v4  ;;  %v1972_v8 = vpack.c.bf16 %v1953_v10, %v1952_v1  ;;  %v2281_v1 = vld [vmem:[%s9666_s24 + $0x13c] sm:$0xff] }
  0xdf   : > { %v10081_v23 = vpop.f32.mrf.mxu0  ;;  %8757 = vmatprep.mubr.msk.bf16.mxu1 %vm13289_vm1, %v1964_v17  ;;  %v2574_v10 = vld [vmem:[%s9666_s24 + $0x35] sm:$0xff] }
  0xe0   : > { %v10086_v19 = vpop.f32.mrf.mxu1 }
  0xe1   : > { %v10090_v29 = vpop.f32.mrf.mxu0 }
  0xe2   : > { %v10092_v22 = vpop.f32.mrf.mxu1 }
  0xe3   : > { %v10094_v31 = vpop.f32.mrf.mxu0 }
  0xe4   : > { %v10096_v33 = vpop.f32.mrf.mxu1 }
  0xe5   : > { %v10098_v35 = vpop.f32.mrf.mxu0  ;;  %8792 = vmatmul.mubr.msk.bf16.gmra.mxu0 %vm13289_vm1, %v1964_v17 }
  0xe6   : > { %v10101_v37 = vpop.f32.mrf.mxu1  ;;  %8758 = vmatmul.mubr.msk.bf16.gmra.mxu1 %vm13289_vm1, %v1965_v30  ;;  %8795 = vmatprep.mubr.msk.bf16.mxu0 %vm13289_vm1, %v1965_v30 }
  0xe7   : > { %v10105_v38 = vpop.f32.mrf.mxu0  ;;  %8761 = vmatprep.mubr.msk.bf16.mxu1 %vm13289_vm1, %v1966_v32 }
  0xe8   : > { %v10110_v41 = vpop.f32.mrf.mxu1 }
  0xe9   : > { %v10114_v44 = vpop.f32.mrf.mxu0 }
  0xea   : > { %v10116_v45 = vpop.f32.mrf.mxu1 }
  0xeb   : > { %v10118_v49 = vpop.f32.mrf.mxu0 }
  0xec   : > { %v10120_v51 = vpop.f32.mrf.mxu1 }
  0xed   : > { %v10122_v52 = vpop.f32.mrf.mxu0  ;;  %8796 = vmatmul.mubr.msk.bf16.gmra.mxu0 %vm13289_vm1, %v1966_v32 }
  0xee   : > { %v10125_v53 = vpop.f32.mrf.mxu1  ;;  %8762 = vmatmul.mubr.msk.bf16.gmra.mxu1 %vm13289_vm1, %v1967_v47  ;;  %8799 = vmatprep.mubr.msk.bf16.mxu0 %vm13289_vm1, %v1967_v47  ;;  %v2573_v47 = vld [vmem:[%s9666_s24 + $0x2d] sm:$0xff] }
  0xef   : > { %v10129_v54 = vpop.f32.mrf.mxu0  ;;  %8765 = vmatprep.mubr.msk.bf16.mxu1 %vm13289_vm1, %v1968_v50 }
  0xf0   : > { %v10134_v57 = vpop.f32.mrf.mxu1 }
  0xf1   : > { %v10138_v11 = vpop.f32.mrf.mxu0 }
  0xf2   : > { %v10140_v62 = vpop.f32.mrf.mxu1 }
  0xf3   : > { %v10142_v24 = vpop.f32.mrf.mxu0 }
  0xf4   : > { %v10144_v34 = vpop.f32.mrf.mxu1 }
  0xf5   : > { %v10146_v59 = vpop.f32.mrf.mxu0  ;;  %8800 = vmatmul.mubr.msk.bf16.gmra.mxu0 %vm13289_vm1, %v1968_v50 }
  0xf6   : > { %v8591_v2 = vpop.f32.mrf.mxu1  ;;  %8766 = vmatmul.mubr.msk.bf16.gmra.mxu1 %vm13289_vm1, %v1969_v63  ;;  %8803 = vmatprep.mubr.msk.bf16.mxu0 %vm13289_vm1, %v1969_v63 }
  0xf7   : > { %v808_v26 = vadd.f32 %v8591_v2, %v10050_v46  ;;  %v10152_v3 = vpop.f32.mrf.mxu0  ;;  %8769 = vmatprep.mubr.msk.bf16.mxu1 %vm13289_vm1, %v1970_v0 }
  0xf8   : > { %v799_v36 = vpop.f32.mrf.mxu1 }
  0xf9   : > { %v800_v12 = vadd.f32 %v799_v36, %v10057_v9  ;;  %v10160_v13 = vpop.f32.mrf.mxu0 }
  0xfa   : > { %v8592_v58 = vpop.f32.mrf.mxu1 }
  0xfb   : > { %v811_v17 = vadd.f32 %v8592_v58, %v10066_v14  ;;  %v10163_v46 = vpop.f32.mrf.mxu0 }
  0xfc   : > { %v802_v27 = vpop.f32.mrf.mxu1 }
  0xfd   : > { %v803_v28 = vadd.f32 %v802_v27, %v10070_v60  ;;  %v8629_v25 = vpop.f32.mrf.mxu0  ;;  %8804 = vmatmul.mubr.msk.bf16.gmra.mxu0 %vm13289_vm1, %v1970_v0  ;;  %v2572_v60 = vld [vmem:[%s9666_s24 + $0x25] sm:$0xff] }
  0xfe   : > { %v8595_v9 = vpop.f32.mrf.mxu1  ;;  %v10167_v30 = vadd.f32 %v8629_v25, %v808_v26  ;;  %8770 = vmatmul.mubr.msk.bf16.gmra.mxu1 %vm13289_vm1, %v1971_v16  ;;  %8807 = vmatprep.mubr.msk.bf16.mxu0 %vm13289_vm1, %v1971_v16  ;;  %v2608_v0 = vpack.c.bf16 %v2573_v47, %v2572_v60  ;;  %v2898_v16 = vld [vmem:[%s9666_s24 + $0x26] sm:$0xff] }
  0xff   : > { %v824_v14 = vadd.f32 %v8595_v9, %v10074_v18  ;;  %v1089_v32 = vpop.f32.mrf.mxu0  ;;  %8773 = vmatprep.mubr.msk.bf16.mxu1 %vm13289_vm1, %v1972_v8  ;;  %v1973_v18 = vpack.c.bf16 %v1955_v40, %v1954_v39  ;;  %v2577_v25 = vld [vmem:[%s9666_s24 + $0x4d] sm:$0xff] }
 0x100   : > { %v815_v42 = vpop.f32.mrf.mxu1  ;;  %v10175_v43 = vadd.f32 %v1089_v32, %v800_v12 }
 0x101   : > { %v816_v50 = vadd.f32 %v815_v42, %v10081_v23  ;;  %v8630_v55 = vpop.f32.mrf.mxu0 }
 0x102   : > { %v8596_v56 = vpop.f32.mrf.mxu1  ;;  %v10180_v20 = vadd.f32 %v8630_v55, %v811_v17  ;;  %v2899_v17 = vld [vmem:[%s9666_s24 + $0x2e] sm:$0xff] }
 0x103   : > { %v827_v61 = vadd.f32 %v8596_v56, %v10090_v29  ;;  %v1092_v63 = vpop.f32.mrf.mxu0  ;;  %v2280_v29 = vld [vmem:[%s9666_s24 + $0x134] sm:$0xff]  ;;  %v2934_v42 = vpack.c.bf16 %v2899_v17, %v2898_v16 }
 0x104   : > { %v818_v2 = vpop.f32.mrf.mxu1  ;;  %v10183_v26 = vadd.f32 %v1092_v63, %v803_v28  ;;  %v2576_v28 = vld [vmem:[%s9666_s24 + $0x45] sm:$0xff]  ;;  %v2299_v32 = vpack.c.bf16 %v2281_v1, %v2280_v29  ;;  %v2903_v29 = vld [vmem:[%s9666_s24 + $0x4e] sm:$0xff] }
 0x105   : > { %v819_v23 = vadd.f32 %v818_v2, %v10094_v31  ;;  %v8633_v4 = vpop.f32.mrf.mxu0  ;;  %8808 = vmatmul.mubr.msk.bf16.gmra.mxu0 %vm13289_vm1, %v1972_v8  ;;  %v2575_v31 = vld [vmem:[%s9666_s24 + $0x3d] sm:$0xff]  ;;  %v2610_v55 = vpack.c.bf16 %v2577_v25, %v2576_v28 }
 0x106   : > { %v8599_v5 = vpop.f32.mrf.mxu1  ;;  %v10187_v36 = vadd.f32 %v8633_v4, %v824_v14  ;;  %8774 = vmatmul.mubr.msk.bf16.gmra.mxu1 %vm13289_vm1, %v1973_v18  ;;  %8811 = vmatprep.mubr.msk.bf16.mxu0 %vm13289_vm1, %v1973_v18  ;;  %v2901_v2 = vld [vmem:[%s9666_s24 + $0x3e] sm:$0xff] }
 0x107   : > { %v840_v12 = vadd.f32 %v8599_v5, %v10098_v35  ;;  %v1105_v58 = vpop.f32.mrf.mxu0  ;;  %8817 = vmatprep.mubr.msk.bf16.mxu1 %vm13289_vm1, %v2608_v0  ;;  %v2609_v35 = vpack.c.bf16 %v2575_v31, %v2574_v10  ;;  %v2900_v0 = vld [vmem:[%s9666_s24 + $0x36] sm:$0xff]  ;;  %v2902_v5 = vld [vmem:[%s9666_s24 + $0x46] sm:$0xff] }
 0x108   : > { %v831_v8 = vpop.f32.mrf.mxu1  ;;  %v10199_v27 = vadd.f32 %v1105_v58, %v816_v50  ;;  %v2581_v58 = vld [vmem:[%s9666_s24 + $0x6d] sm:$0xff]  ;;  %v2935_v17 = vpack.c.bf16 %v2901_v2, %v2900_v0  ;;  %v2936_v25 = vpack.c.bf16 %v2903_v29, %v2902_v5 }
 0x109   : > { %v832_v9 = vadd.f32 %v831_v8, %v10105_v38  ;;  %v8634_v14 = vpop.f32.mrf.mxu0 }
 0x10a   : > { %v8600_v39 = vpop.f32.mrf.mxu1  ;;  %v10204_v40 = vadd.f32 %v8634_v14, %v827_v61 }
 0x10b   : > { %v843_v60 = vadd.f32 %v8600_v39, %v10114_v44  ;;  %v1108_v47 = vpop.f32.mrf.mxu0  ;;  %v2578_v44 = vld [vmem:[%s9666_s24 + $0x55] sm:$0xff] }
 0x10c   : > { %v834_v50 = vpop.f32.mrf.mxu1  ;;  %v10207_v56 = vadd.f32 %v1108_v47, %v819_v23 }
 0x10d   : > { %v835_v38 = vadd.f32 %v834_v50, %v10118_v49  ;;  %v8637_v18 = vpop.f32.mrf.mxu0  ;;  %8812 = vmatmul.mubr.msk.bf16.gmra.mxu0 %vm13289_vm1, %v2299_v32  ;;  %v2579_v49 = vld [vmem:[%s9666_s24 + $0x5d] sm:$0xff] }
 0x10e   : > { %v8603_v61 = vpop.f32.mrf.mxu1  ;;  %v10211_v63 = vadd.f32 %v8637_v18, %v840_v12  ;;  %8818 = vmatmul.mubr.msk.bf16.vlgmr.msra.gmra.mxu1 %vm13289_vm1, %v2609_v35  ;;  %8855 = vmatprep.mubr.msk.bf16.mxu0 %vm13289_vm1, %v2934_v42  ;;  %v2580_v12 = vld [vmem:[%s9666_s24 + $0x65] sm:$0xff] }
 0x10f   : > { %v856_v23 = vadd.f32 %v8603_v61, %v10122_v52  ;;  %v1121_v4 = vpop.f32.mrf.mxu0  ;;  %8821 = vmatprep.mubr.msk.bf16.mxu1 %vm13289_vm1, %v2610_v55  ;;  %v2611_v52 = vpack.c.bf16 %v2579_v49, %v2578_v44  ;;  %v2612_v39 = vpack.c.bf16 %v2581_v58, %v2580_v12  ;;  %v2904_v55 = vld [vmem:[%s9666_s24 + $0x56] sm:$0xff]  ;;  %v2905_v50 = vld [vmem:[%s9666_s24 + $0x5e] sm:$0xff]  ;;  %v2906_v61 = vld [vmem:[%s9666_s24 + $0x66] sm:$0xff] }
 0x110   : > { %v847_v1 = vpop.f32.mrf.mxu1  ;;  %v10223_v10 = vadd.f32 %v1121_v4, %v832_v9  ;;  %v2907_v44 = vld [vmem:[%s9666_s24 + $0x6e] sm:$0xff]  ;;  %v2937_v29 = vpack.c.bf16 %v2905_v50, %v2904_v55  ;;  %v2588_v50 = vld [vmem:[%s9666_s24 + $0xa5] sm:$0xff] }
 0x111   : > { %v848_v31 = vadd.f32 %v847_v1, %v10129_v54  ;;  %v8638_v16 = vpop.f32.mrf.mxu0  ;;  %v2585_v4 = vld [vmem:[%s9666_s24 + $0x8d] sm:$0xff]  ;;  %v2938_v58 = vpack.c.bf16 %v2907_v44, %v2906_v61 }
 0x112   : > { %v8604_v8 = vpop.f32.mrf.mxu1  ;;  %v10228_v28 = vadd.f32 %v8638_v16, %v843_v60 }
 0x113   : > { %v859_v14 = vadd.f32 %v8604_v8, %v10138_v11  ;;  %v1124_v32 = vpop.f32.mrf.mxu0  ;;  %v2582_v11 = vld [vmem:[%s9666_s24 + $0x75] sm:$0xff] }
 0x114   : > { %v850_v9 = vpop.f32.mrf.mxu1  ;;  %v10231_v35 = vadd.f32 %v1124_v32, %v835_v38 }
 0x115   : > { %v851_v54 = vadd.f32 %v850_v9, %v10142_v24  ;;  %v8641_v42 = vpop.f32.mrf.mxu0  ;;  %8856 = vmatmul.mubr.msk.bf16.vlgmr.msra.gmra.mxu0 %vm13289_vm1, %v2935_v17  ;;  %v2583_v24 = vld [vmem:[%s9666_s24 + $0x7d] sm:$0xff] }
 0x116   : > { %v8607_v60 = vpop.f32.mrf.mxu1  ;;  %v10235_v47 = vadd.f32 %v8641_v42, %v856_v23  ;;  %8822 = vmatmul.mubr.msk.bf16.gmra.mxu1 %vm13289_vm1, %v2611_v52  ;;  %8859 = vmatprep.mubr.msk.bf16.mxu0 %vm13289_vm1, %v2936_v25  ;;  %v2584_v23 = vld [vmem:[%s9666_s24 + $0x85] sm:$0xff] }
 0x117   : > { %v872_v38 = vadd.f32 %v8607_v60, %v10146_v59  ;;  %v1137_v18 = vpop.f32.mrf.mxu0  ;;  %8825 = vmatprep.mubr.msk.bf16.mxu1 %vm13289_vm1, %v2612_v39  ;;  %v2613_v59 = vpack.c.bf16 %v2583_v24, %v2582_v11  ;;  %v2908_v39 = vld [vmem:[%s9666_s24 + $0x76] sm:$0xff]  ;;  %v2909_v9 = vld [vmem:[%s9666_s24 + $0x7e] sm:$0xff]  ;;  %v2911_v60 = vld [vmem:[%s9666_s24 + $0x8e] sm:$0xff] }
 0x118   : > { %v863_v0 = vpop.f32.mrf.mxu1  ;;  %v10247_v2 = vadd.f32 %v1137_v18, %v848_v31  ;;  %v2614_v31 = vpack.c.bf16 %v2585_v4, %v2584_v23  ;;  %v2939_v24 = vpack.c.bf16 %v2909_v9, %v2908_v39 }
 0x119   : > { %v864_v49 = vadd.f32 %v863_v0, %v10152_v3  ;;  %v8642_v5 = vpop.f32.mrf.mxu0 }
 0x11a   : > { %v8608_v1 = vpop.f32.mrf.mxu1  ;;  %v10252_v12 = vadd.f32 %v8642_v5, %v859_v14 }
 0x11b   : > { %v875_v16 = vadd.f32 %v8608_v1, %v10160_v13  ;;  %v1140_v17 = vpop.f32.mrf.mxu0  ;;  %v2586_v13 = vld [vmem:[%s9666_s24 + $0x95] sm:$0xff] }
 0x11c   : > { %v866_v8 = vpop.f32.mrf.mxu1  ;;  %v10255_v52 = vadd.f32 %v1140_v17, %v851_v54  ;;  %v2587_v54 = vld [vmem:[%s9666_s24 + $0x9d] sm:$0xff] }
 0x11d   : > { %v867_v3 = vadd.f32 %v866_v8, %v10163_v46  ;;  %v8645_v25 = vpop.f32.mrf.mxu0  ;;  %8860 = vmatmul.mubr.msk.bf16.gmra.mxu0 %vm13289_vm1, %v2937_v29  ;;  %v2910_v46 = vld [vmem:[%s9666_s24 + $0x86] sm:$0xff]  ;;  %v2615_v0 = vpack.c.bf16 %v2587_v54, %v2586_v13  ;;  %v2912_v8 = vld [vmem:[%s9666_s24 + $0x96] sm:$0xff]  ;;  %v2915_v13 = vld [vmem:[%s9666_s24 + $0xae] sm:$0xff] }
 0x11e   : > { %v8611_v14 = vpop.f32.mrf.mxu1  ;;  %v10259_v32 = vadd.f32 %v8645_v25, %v872_v38  ;;  %8826 = vmatmul.mubr.msk.bf16.gmra.mxu1 %vm13289_vm1, %v2613_v59  ;;  %8863 = vmatprep.mubr.msk.bf16.mxu0 %vm13289_vm1, %v2938_v58  ;;  %v2589_v38 = vld [vmem:[%s9666_s24 + $0xad] sm:$0xff]  ;;  %v2940_v23 = vpack.c.bf16 %v2911_v60, %v2910_v46  ;;  %v2590_v58 = vld [vmem:[%s9666_s24 + $0xb5] sm:$0xff]  ;;  %v2913_v25 = vld [vmem:[%s9666_s24 + $0x9e] sm:$0xff] }
 0x11f   : > { %v1153_v42 = vpop.f32.mrf.mxu0  ;;  %8829 = vmatprep.mubr.msk.bf16.mxu1 %vm13289_vm1, %v2614_v31  ;;  %v2616_v5 = vpack.c.bf16 %v2589_v38, %v2588_v50  ;;  %v888_v29 = vadd.f32 %v8611_v14, %v10053_v7  ;;  %v2591_v7 = vld [vmem:[%s9666_s24 + $0xbd] sm:$0xff]  ;;  %v2914_v14 = vld [vmem:[%s9666_s24 + $0xa6] sm:$0xff] }
 0x120   : > { %v879_v11 = vpop.f32.mrf.mxu1  ;;  %v10270_v55 = vadd.f32 %v1153_v42, %v864_v49  ;;  %v2592_v54 = vld [vmem:[%s9666_s24 + $0xc5] sm:$0xff]  ;;  %v2593_v46 = vld [vmem:[%s9666_s24 + $0xcd] sm:$0xff]  ;;  %v9494_v50 = vld [vmem:[%s13271_s4 + $0x38] sm:$0xff]  }
 0x121   : > { %v8646_v18 = vpop.f32.mrf.mxu0  ;;  %8943 = vmatprep.subr.bf16.mxu0 %v9494_v50 }
 0x122   : > { %v8612_v61 = vpop.f32.mrf.mxu1  ;;  %v10274_v44 = vadd.f32 %v8646_v18, %v875_v16  ;;  %v880_v16 = vadd.f32 %v879_v11, %v10062_v48  ;;  %v9493_v48 = vld [vmem:[%s13271_s4 + $0x78] sm:$0xff]   ;;  %v2941_v11 = vpack.c.bf16 %v2913_v25, %v2912_v8  ;;  %8944 = vmatpush3.bf16.msra.mxu0 %v9494_v50  ;;  %v2918_v25 = vld [vmem:[%s9666_s24 + $0xc6] sm:$0xff] }
 0x123   : > { %v1156_v4 = vpop.f32.mrf.mxu0  ;;  %v891_v39 = vadd.f32 %v8612_v61, %v10068_v15  ;;  %8891 = vmatprep.subr.bf16.mxu1 %v9493_v48  ;;  %v2618_v61 = vpack.c.bf16 %v2593_v46, %v2592_v54  ;;  %v2595_v8 = vld [vmem:[%s9666_s24 + $0xdd] sm:$0xff]  ;;  %v9495_v46 = vld [vmem:[%s13271_s4 + $0x70] sm:$0xff]  }
 0x124   : > { %v882_v49 = vpop.f32.mrf.mxu1  ;;  %v10277_v1 = vadd.f32 %v1156_v4, %v867_v3  ;;  %8892 = vmatpush3.bf16.msra.mxu1 %v9493_v48  ;;  %v2596_v48 = vld [vmem:[%s9666_s24 + $0xe5] sm:$0xff] }
 0x125   : > { %v8649_v59 = vpop.f32.mrf.mxu0  ;;  %8864 = vmatmul.mubr.msk.bf16.gmra.mxu0 %vm13289_vm1, %v2939_v24  ;;  %v883_v38 = vadd.f32 %v882_v49, %v10072_v6  ;;  %8893 = vmatprep.subr.bf16.mxu1 %v9495_v46 }
 0x126   : > { %v8615_v17 = vpop.f32.mrf.mxu1  ;;  %v10282_v31 = vadd.f32 %v8649_v59, %v888_v29  ;;  %8830 = vmatmul.mubr.msk.bf16.gmra.mxu1 %vm13289_vm1, %v2615_v0  ;;  %8867 = vmatprep.mubr.msk.bf16.mxu0 %vm13289_vm1, %v2940_v23  ;;  %v2617_v0 = vpack.c.bf16 %v2591_v7, %v2590_v58  ;;  %v2942_v23 = vpack.c.bf16 %v2915_v13, %v2914_v14 }
 0x127   : > { %v1169_v3 = vpop.f32.mrf.mxu0  ;;  %8833 = vmatprep.mubr.msk.bf16.mxu1 %vm13289_vm1, %v2616_v5  ;;  %v904_v4 = vadd.f32 %v8615_v17, %v10077_v21  ;;  %v2594_v21 = vld [vmem:[%s9666_s24 + $0xd5] sm:$0xff]  ;;  %v2917_v17 = vld [vmem:[%s9666_s24 + $0xbe] sm:$0xff] }
 0x128   : > { %v895_v9 = vpop.f32.mrf.mxu1  ;;  %v10296_v42 = vadd.f32 %v1169_v3, %v880_v16  ;;  %v2916_v16 = vld [vmem:[%s9666_s24 + $0xb6] sm:$0xff]  ;;  %v2919_v3 = vld [vmem:[%s9666_s24 + $0xce] sm:$0xff]  ;;  %8894 = vmatpush3.bf16.msra.mxu1 %v9495_v46 }
 0x129   : > { %v8650_v60 = vpop.f32.mrf.mxu0  ;;  %v896_v49 = vadd.f32 %v895_v9, %v10086_v19  ;;  %v2943_v54 = vpack.c.bf16 %v2917_v17, %v2916_v16  ;;  %v2599_v17 = vld [vmem:[%s9666_s24 + $0xfd] sm:$0xff] }
 0x12a   : > { %v8616_v18 = vpop.f32.mrf.mxu1  ;;  %v10304_v24 = vadd.f32 %v8650_v60, %v891_v39  ;;  %v2597_v39 = vld [vmem:[%s9666_s24 + $0xed] sm:$0xff] }
 0x12b   : > { %v1172_v15 = vpop.f32.mrf.mxu0  ;;  %v907_v19 = vadd.f32 %v8616_v18, %v10092_v22  ;;  %v2620_v22 = vpack.c.bf16 %v2597_v39, %v2596_v48  ;;  %v9496_v18 = vld [vmem:[%s13271_s4 + $0x30] sm:$0xff]  }
 0x12c   : > { %v898_v5 = vpop.f32.mrf.mxu1  ;;  %v10307_v29 = vadd.f32 %v1172_v15, %v883_v38  ;;  %v2619_v38 = vpack.c.bf16 %v2595_v8, %v2594_v21  ;;  %8945 = vmatprep.subr.bf16.mxu0 %v9496_v18  ;;  %v2921_v21 = vld [vmem:[%s9666_s24 + $0xde] sm:$0xff]  ;;  %v2923_v8 = vld [vmem:[%s9666_s24 + $0xee] sm:$0xff] }
 0x12d   : > { %v8653_v6 = vpop.f32.mrf.mxu0  ;;  %8868 = vmatmul.mubr.msk.bf16.gmra.mxu0 %vm13289_vm1, %v2941_v11  ;;  %v899_v60 = vadd.f32 %v898_v5, %v10096_v33 }
 0x12e   : > { %v8619_v59 = vpop.f32.mrf.mxu1  ;;  %v10311_v58 = vadd.f32 %v8653_v6, %v904_v4  ;;  %8834 = vmatmul.mubr.msk.bf16.gmra.mxu1 %vm13289_vm1, %v2617_v0  ;;  %8871 = vmatprep.mubr.msk.bf16.mxu0 %vm13289_vm1, %v2942_v23  ;;  %v2944_v0 = vpack.c.bf16 %v2919_v3, %v2918_v25 }
 0x12f   : > { %v1185_v7 = vpop.f32.mrf.mxu0  ;;  %8837 = vmatprep.mubr.msk.bf16.mxu1 %vm13289_vm1, %v2618_v61  ;;  %v920_v15 = vadd.f32 %v8619_v59, %v10101_v37  ;;  %v2598_v37 = vld [vmem:[%s9666_s24 + $0xf5] sm:$0xff]  ;;  %8946 = vmatpush3.bf16.msra.mxu0 %v9496_v18 }
 0x130   : > { %v911_v14 = vpop.f32.mrf.mxu1  ;;  %v10323_v13 = vadd.f32 %v1185_v7, %v896_v49  ;;  %v2920_v59 = vld [vmem:[%s9666_s24 + $0xd6] sm:$0xff]  ;;  %v2922_v7 = vld [vmem:[%s9666_s24 + $0xe6] sm:$0xff] }
 0x131   : > { %v8654_v9 = vpop.f32.mrf.mxu0  ;;  %v912_v5 = vadd.f32 %v911_v14, %v10110_v41  ;;  %v2601_v14 = vld [vmem:[%s9666_s24 + $0x10d] sm:$0xff]  ;;  %v2945_v39 = vpack.c.bf16 %v2921_v21, %v2920_v59 }
 0x132   : > { %v8620_v11 = vpop.f32.mrf.mxu1  ;;  %v10331_v50 = vadd.f32 %v8654_v9, %v907_v19  ;;  %v2600_v19 = vld [vmem:[%s9666_s24 + $0x105] sm:$0xff] }
 0x133   : > { %v1188_v23 = vpop.f32.mrf.mxu0  ;;  %v923_v41 = vadd.f32 %v8620_v11, %v10116_v45  ;;  %v9497_v9 = vld [vmem:[%s13271_s4 + $0x68] sm:$0xff]   ;;  %v2622_v45 = vpack.c.bf16 %v2601_v14, %v2600_v19 }
 0x134   : > { %v914_v61 = vpop.f32.mrf.mxu1  ;;  %v10337_v33 = vadd.f32 %v1188_v23, %v899_v60  ;;  %8895 = vmatprep.subr.bf16.mxu1 %v9497_v9  ;;  %v9498_v11 = vld [vmem:[%s13271_s4 + $0x28] sm:$0xff]  }
 0x135   : > { %v8657_v4 = vpop.f32.mrf.mxu0  ;;  %8872 = vmatmul.mubr.msk.bf16.gmra.mxu0 %vm13289_vm1, %v2943_v54  ;;  %v915_v54 = vadd.f32 %v914_v61, %v10120_v51  ;;  %8896 = vmatpush3.bf16.msra.mxu1 %v9497_v9  ;;  %v2605_v19 = vld [vmem:[%s9666_s24 + $0x12d] sm:$0xff] }
 0x136   : > { %v8623_v6 = vpop.f32.mrf.mxu1  ;;  %v10341_v49 = vadd.f32 %v8657_v4, %v920_v15  ;;  %8838 = vmatmul.mubr.msk.bf16.gmra.mxu1 %vm13289_vm1, %v2619_v38  ;;  %8875 = vmatprep.mubr.msk.bf16.mxu0 %vm13289_vm1, %v2944_v0  ;;  %v2621_v38 = vpack.c.bf16 %v2599_v17, %v2598_v37  ;;  %v2946_v0 = vpack.c.bf16 %v2923_v8, %v2922_v7  ;;  %v2925_v37 = vld [vmem:[%s9666_s24 + $0xfe] sm:$0xff]  ;;  %v2926_v17 = vld [vmem:[%s9666_s24 + $0x106] sm:$0xff] }
 0x137   : > { %v1201_v16 = vpop.f32.mrf.mxu0  ;;  %8841 = vmatprep.mubr.msk.bf16.mxu1 %vm13289_vm1, %v2620_v22  ;;  %v936_v22 = vadd.f32 %v8623_v6, %v10125_v53  ;;  %8947 = vmatprep.subr.bf16.mxu0 %v9498_v11  ;;  %v2602_v53 = vld [vmem:[%s9666_s24 + $0x115] sm:$0xff] }
 0x138   : > { %v927_v25 = vpop.f32.mrf.mxu1  ;;  %v10353_v3 = vadd.f32 %v1201_v16, %v912_v5  ;;  %v2924_v6 = vld [vmem:[%s9666_s24 + $0xf6] sm:$0xff]  ;;  %8948 = vmatpush3.bf16.msra.mxu0 %v9498_v11 }
 0x139   : > { %v8658_v48 = vpop.f32.mrf.mxu0  ;;  %v928_v61 = vadd.f32 %v927_v25, %v10134_v57  ;;  %v2603_v16 = vld [vmem:[%s9666_s24 + $0x11d] sm:$0xff]  ;;  %v2927_v57 = vld [vmem:[%s9666_s24 + $0x10e] sm:$0xff]  ;;  %v2604_v25 = vld [vmem:[%s9666_s24 + $0x125] sm:$0xff] }
 0x13a   : > { %v8624_v46 = vpop.f32.mrf.mxu1  ;;  %v10361_v60 = vadd.f32 %v8658_v48, %v923_v41 }
 0x13b   : > { %v1204_v23 = vpop.f32.mrf.mxu0  ;;  %v939_v7 = vadd.f32 %v8624_v46, %v10140_v62  ;;  %v2624_v46 = vpack.c.bf16 %v2605_v19, %v2604_v25 }
 0x13c   : > { %v10367_v18 = vpop.f32.mrf.mxu1  ;;  %v10369_v51 = vadd.f32 %v1204_v23, %v915_v54  ;;  %v2623_v54 = vpack.c.bf16 %v2603_v16, %v2602_v53  ;;  %v9499_v23 = vld [vmem:[%s13271_s4 + $0x60] sm:$0xff]   ;;  %v2931_v16 = vld [vmem:[%s9666_s24 + $0x12e] sm:$0xff] }
 0x13d   : > { %v8661_v15 = vpop.f32.mrf.mxu0  ;;  %8876 = vmatmul.mubr.msk.bf16.gmra.mxu0 %vm13289_vm1, %v2945_v39  ;;  %v2947_v39 = vpack.c.bf16 %v2925_v37, %v2924_v6  ;;  %8897 = vmatprep.subr.bf16.mxu1 %v9499_v23  ;;  %v2607_v37 = vld [vmem:[%s9666_s24 + $0x13d] sm:$0xff] }
 0x13e   : > { %13374 = vst [vmem:[#allocation3_spill] sm:$0xff] %v10369_v51  ;;  %v10373_v4 = vadd.f32 %v8661_v15, %v936_v22  ;;  %v8667_v5 = vpop.f32.mrf.mxu1  ;;  %8842 = vmatmul.mubr.msk.bf16.gmra.mxu1 %vm13289_vm1, %v2621_v38  ;;  %8879 = vmatprep.mubr.msk.bf16.mxu0 %vm13289_vm1, %v2946_v0  ;;  %v2948_v38 = vpack.c.bf16 %v2927_v57, %v2926_v17  ;;  %v2606_v15 = vld [vmem:[%s9666_s24 + $0x135] sm:$0xff] }
 0x13f   : > { %v1560_v59 = vadd.f32 %v8667_v5, %v10167_v30  ;;  %v1217_v21 = vpop.f32.mrf.mxu0  ;;  %8845 = vmatprep.mubr.msk.bf16.mxu1 %vm13289_vm1, %v2622_v45  ;;  %v2929_v5 = vld [vmem:[%s9666_s24 + $0x11e] sm:$0xff]  ;;  %8898 = vmatpush3.bf16.msra.mxu1 %v9499_v23 }
 0x140   : > { %v10386_v8 = vadd.f32 %v1217_v21, %v928_v61  ;;  %v1415_v41 = vpop.f32.mrf.mxu1  ;;  %v2928_v61 = vld [vmem:[%s9666_s24 + $0x116] sm:$0xff]  ;;  %v2930_v21 = vld [vmem:[%s9666_s24 + $0x126] sm:$0xff]  ;;  %v2933_v23 = vld [vmem:[%s9666_s24 + $0x13e] sm:$0xff] }
 0x141   : > { %v1558_v14 = vadd.f32 %v1415_v41, %v10175_v43  ;;  %v8662_v48 = vpop.f32.mrf.mxu0  ;;  %v2949_v41 = vpack.c.bf16 %v2929_v5, %v2928_v61 }
 0x142   : > { %v10391_v9 = vadd.f32 %v8662_v48, %v939_v7  ;;  %v8668_v30 = vpop.f32.mrf.mxu1  ;;  %v2950_v48 = vpack.c.bf16 %v2931_v16, %v2930_v21 }
 0x143   : > { %v1561_v0 = vadd.f32 %v8668_v30, %v10180_v20  ;;  %v10394_v62 = vpop.f32.mrf.mxu0  ;;  %v9500_v20 = vld [vmem:[%s13271_s4 + $0x20] sm:$0xff]  }
 0x144   : > { %v10399_v43 = vpop.f32.mrf.mxu1  ;;  %8949 = vmatprep.subr.bf16.mxu0 %v9500_v20 }
 0x145   : > { %v8705_v45 = vpop.f32.mrf.mxu0  ;;  %8880 = vmatmul.mubr.msk.bf16.gmra.mxu0 %vm13289_vm1, %v2947_v39 }
 0x146   : > { %v8671_v11 = vpop.f32.mrf.mxu1  ;;  %v10405_v22 = vadd.f32 %v8705_v45, %v1560_v59  ;;  %8846 = vmatmul.mubr.msk.bf16.gmra.mxu1 %vm13289_vm1, %v2623_v54  ;;  %8883 = vmatprep.mubr.msk.bf16.mxu0 %vm13289_vm1, %v2948_v38  ;;  %v9502_v38 = vld [vmem:[%s13271_s4 + $0x18] sm:$0xff]  }
 0x147   : > { %v1564_v53 = vadd.f32 %v8671_v11, %v10187_v36  ;;  %v1741_v6 = vpop.f32.mrf.mxu0  ;;  %8849 = vmatprep.mubr.msk.bf16.mxu1 %vm13289_vm1, %v2624_v46  ;;  %8950 = vmatpush3.bf16.msra.mxu0 %v9500_v20  ;;  %v2625_v36 = vpack.c.bf16 %v2607_v37, %v2606_v15 }
 0x148   : > { %v1431_v17 = vpop.f32.mrf.mxu1  ;;  %v10417_v57 = vadd.f32 %v1741_v6, %v1558_v14  ;;  %v9501_v14 = vld [vmem:[%s13271_s4 + $0x58] sm:$0xff]   ;;  %8951 = vmatprep.subr.bf16.mxu0 %v9502_v38 }
 0x149   : > { %v1562_v59 = vadd.f32 %v1431_v17, %v10199_v27  ;;  %v8706_v7 = vpop.f32.mrf.mxu0  ;;  %8899 = vmatprep.subr.bf16.mxu1 %v9501_v14 }
 0x14a   : > { %v8672_v25 = vpop.f32.mrf.mxu1  ;;  %v10420_v19 = vadd.f32 %v8706_v7, %v1561_v0  ;;  %8900 = vmatpush3.bf16.msra.mxu1 %v9501_v14  ;;  %v3354_v7 = vlaneseq }
 0x14b   : > { %v1565_v39 = vadd.f32 %v8672_v25, %v10204_v40  ;;  %v10423_v30 = vpop.f32.mrf.mxu0  ;;  %v2932_v40 = vld [vmem:[%s9666_s24 + $0x136] sm:$0xff]  ;;  %8952 = vmatpush3.bf16.msra.mxu0 %v9502_v38 }
 0x14c   : > { %v10428_v54 = vpop.f32.mrf.mxu1 }
 0x14d   : > { %v8709_v27 = vpop.f32.mrf.mxu0  ;;  %8884 = vmatmul.mubr.msk.bf16.gmra.mxu0 %vm13289_vm1, %v2949_v41 }
 0x14e   : > { %v8675_v0 = vpop.f32.mrf.mxu1  ;;  %v10434_v46 = vadd.f32 %v8709_v27, %v1564_v53  ;;  %8850 = vmatmul.mubr.msk.bf16.gmra.mxu1 %vm13289_vm1, %v2625_v36  ;;  %8887 = vmatprep.mubr.msk.bf16.mxu0 %vm13289_vm1, %v2950_v48  ;;  %v2951_v53 = vpack.c.bf16 %v2933_v23, %v2932_v40  ;;  %v10461_v27 = vshrl.u32 %v3354_v7, 7 }
 0x14f   : > { %v1568_v45 = vadd.f32 %v8675_v0, %v10211_v63  ;;  %v1757_v20 = vpop.f32.mrf.mxu0 }
 0x150   : > { %v1447_v11 = vpop.f32.mrf.mxu1  ;;  %v10441_v15 = vadd.f32 %v1757_v20, %v1562_v59  ;;  %v9503_v59 = vld [vmem:[%s13271_s4 + $0x50] sm:$0xff]   ;;  %v10471_v20 = vadd.s32 16, %v10461_v27 }
 0x151   : > { %v1566_v61 = vadd.f32 %v1447_v11, %v10223_v10  ;;  %v8710_v5 = vpop.f32.mrf.mxu0  ;;  %8901 = vmatprep.subr.bf16.mxu1 %v9503_v59 }
 0x152   : > { %v8676_v6 = vpop.f32.mrf.mxu1  ;;  %v10444_v37 = vadd.f32 %v8710_v5, %v1565_v39  ;;  %8902 = vmatpush3.bf16.msra.mxu1 %v9503_v59  ;;  %v10483_v59 = vmul.u32.u64.low 3817748708, %v10471_v20  ;;  %v10484_v7 = vmul.u32.u64.high 3817748708, %v10471_v20, %v10483_v59 }
 0x153   : > { %v1569_v21 = vadd.f32 %v8676_v6, %v10228_v28  ;;  %v10447_v16 = vpop.f32.mrf.mxu0 }
 0x154   : > { %v10449_v17 = vpop.f32.mrf.mxu1 }
 0x155   : > { %v8713_v63 = vpop.f32.mrf.mxu0  ;;  %8888 = vmatmul.mubr.msk.bf16.gmra.mxu0 %vm13289_vm1, %v2951_v53  ;;  %v9504_v53 = vld [vmem:[%s13271_s4 + $0x10] sm:$0xff]  }
 0x156   : > { %v8679_v10 = vpop.f32.mrf.mxu1  ;;  %v10455_v41 = vadd.f32 %v8713_v63, %v1568_v45  ;;  %8953 = vmatprep.subr.bf16.mxu0 %v9504_v53 }
 0x157   : > { %v1572_v25 = vadd.f32 %v8679_v10, %v10235_v47  ;;  %v1773_v36 = vpop.f32.mrf.mxu0  ;;  %8954 = vmatpush3.bf16.msra.mxu0 %v9504_v53 }
 0x158   : > { %v1463_v28 = vpop.f32.mrf.mxu1  ;;  %v10458_v48 = vadd.f32 %v1773_v36, %v1566_v61 }
 0x159   : > { %v1570_v39 = vadd.f32 %v1463_v28, %v10247_v2  ;;  %v8714_v14 = vpop.f32.mrf.mxu0 }
 0x15a   : > { %v8680_v38 = vpop.f32.mrf.mxu1  ;;  %v10463_v0 = vadd.f32 %v8714_v14, %v1569_v21 }
 0x15b   : > { %v1573_v40 = vadd.f32 %v8680_v38, %v10252_v12  ;;  %v10466_v23 = vpop.f32.mrf.mxu0 }
 0x15c   : > { %13375 = vst [vmem:[#allocation4_spill] sm:$0xff] %v10463_v0  ;;  %v10468_v45 = vpop.f32.mrf.mxu1 }
 0x15d   : > { %v8717_v47 = vpop.f32.mrf.mxu0 }
 0x15e   : > { %v8683_v11 = vpop.f32.mrf.mxu1  ;;  %v10473_v61 = vadd.f32 %v8717_v47, %v1572_v25 }
 0x15f   : > { %v1576_v2 = vadd.f32 %v8683_v11, %v10259_v32  ;;  %v1789_v5 = vpop.f32.mrf.mxu0 }
 0x160   : > { %13376 = vst [vmem:[#allocation5_spill] sm:$0xff] %v10473_v61  ;;  %v1479_v6 = vpop.f32.mrf.mxu1  ;;  %v10479_v12 = vadd.f32 %v1789_v5, %v1570_v39 }
 0x161   : > { %v1574_v21 = vadd.f32 %v1479_v6, %v10270_v55  ;;  %v8718_v63 = vpop.f32.mrf.mxu0  ;;  %v9505_v55 = vld [vmem:[%s13271_s4 + $0x48] sm:$0xff]  }
 0x162   : > { %13377 = vst [vmem:[#allocation6_spill] sm:$0xff] %v10479_v12  ;;  %v8684_v10 = vpop.f32.mrf.mxu1  ;;  %v10486_v25 = vadd.f32 %v8718_v63, %v1573_v40  ;;  %v9506_v40 = vld [vmem:[%s13271_s4 + $0x8] sm:$0xff]   ;;  %8903 = vmatprep.subr.bf16.mxu1 %v9505_v55  ;;  %v10509_v63 = vadd.s32 24, %v10461_v27 }
 0x163   : > { %v1577_v32 = vadd.f32 %v8684_v10, %v10274_v44  ;;  %v10489_v36 = vpop.f32.mrf.mxu0  ;;  %v10503_v44 = vmul.u32.u64.low 3817748708, %v10461_v27  ;;  %v10504_v5 = vmul.u32.u64.high 3817748708, %v10461_v27, %v10503_v44  ;;  %8904 = vmatpush3.bf16.msra.mxu1 %v9505_v55  ;;  %8955 = vmatprep.subr.bf16.mxu0 %v9506_v40  ;;  %v3419_v10 = vshrl.u32 %v10484_v7, 4  ;;  %v9508_v55 = vld [vmem:[%s13271_s4] sm:$0xff]  }
 0x164   : > { %13378 = vst [vmem:[#allocation7_spill] sm:$0xff] %v10486_v25  ;;  %v10491_v28 = vpop.f32.mrf.mxu1  ;;  %8956 = vmatpush3.bf16.msra.mxu0 %v9506_v40  ;;  %v10528_v7 = vadd.s32 48, %v10461_v27  ;;  %v10533_v40 = vmul.u32.u64.low 3817748708, %v10509_v63  ;;  %v10534_v44 = vmul.u32.u64.high 3817748708, %v10509_v63, %v10533_v40 }
 0x165   : > { %v8721_v39 = vpop.f32.mrf.mxu0  ;;  %8957 = vmatprep.subr.bf16.mxu0 %v9508_v55  ;;  %v3397_v40 = vshrl.u32 %v10504_v5, 4 }
 0x166   : > { %v8687_v14 = vpop.f32.mrf.mxu1  ;;  %v10496_v38 = vadd.f32 %v8721_v39, %v1576_v2  ;;  %v10548_v61 = vmul.u32.u64.low 3817748708, %v10528_v7  ;;  %v10549_v0 = vmul.u32.u64.high 3817748708, %v10528_v7, %v10548_v61 }
 0x167   : > { %v1580_v47 = vadd.f32 %v8687_v14, %v10282_v31  ;;  %v1805_v11 = vpop.f32.mrf.mxu0  ;;  %v10516_v14 = vadd.s32 8, %v10461_v27 }
 0x168   : > { %13379 = vst [vmem:[#allocation8_spill] sm:$0xff] %v10496_v38  ;;  %v1495_v53 = vpop.f32.mrf.mxu1  ;;  %v10506_v6 = vadd.f32 %v1805_v11, %v1574_v21  ;;  %v9507_v21 = vld [vmem:[%s13271_s4 + $0x40] sm:$0xff]   ;;  %8958 = vmatpush3.bf16.msra.mxu0 %v9508_v55 }
 0x169   : > { %v1578_v2 = vadd.f32 %v1495_v53, %v10296_v42  ;;  %v8722_v59 = vpop.f32.mrf.mxu0  ;;  %v10537_v53 = vadd.s32 32, %v10461_v27  ;;  %8905 = vmatprep.subr.bf16.mxu1 %v9507_v21 }
 0x16a   : > { %13380 = vst [vmem:[#allocation9_spill] sm:$0xff] %v10506_v6  ;;  %v8688_v31 = vpop.f32.mrf.mxu1  ;;  %v10513_v39 = vadd.f32 %v8722_v59, %v1577_v32  ;;  %8906 = vmatpush3.bf16.msra.mxu1 %v9507_v21  ;;  %v10542_v6 = vmul.u32.u64.low 3817748708, %v10516_v14  ;;  %v10543_v38 = vmul.u32.u64.high 3817748708, %v10516_v14, %v10542_v6 }
 0x16b   : > { %v1581_v42 = vadd.f32 %v8688_v31, %v10304_v24  ;;  %v10525_v11 = vpop.f32.mrf.mxu0 }
 0x16c   : > { %13381 = vst [vmem:[#allocation10_spill] sm:$0xff] %v10513_v39  ;;  %v10530_v32 = vpop.f32.mrf.mxu1  ;;  %v3420_v39 = vmul.u32 18, %v3419_v10 }
 0x16d   : > { %v8725_v59 = vpop.f32.mrf.mxu0 }
 0x16e   : > { %v8691_v24 = vpop.f32.mrf.mxu1  ;;  %v10539_v31 = vadd.f32 %v8725_v59, %v1580_v47  ;;  %v10554_v21 = vmul.u32.u64.low 3817748708, %v10537_v53  ;;  %v10555_v47 = vmul.u32.u64.high 3817748708, %v10537_v53, %v10554_v21  ;;  %v10559_v6 = vsub.s32 %v10471_v20, %v3420_v39 }
 0x16f   : > { %v1584_v25 = vadd.f32 %v8691_v24, %v10311_v58  ;;  %v1821_v12 = vpop.f32.mrf.mxu0  ;;  %v931_v58 = vadd.f32 %v10367_v18, %v10144_v34  ;;  %v3430_v20 = vshrl.u32 %v10534_v44, 4  ;;  %v1563_v34 = vadd.f32 %v10428_v54, %v10207_v56 }
 0x170   : > { %v1511_v51 = vpop.f32.mrf.mxu1  ;;  %v10551_v10 = vadd.f32 %v1821_v12, %v1578_v2  ;;  %13383 = vst [vmem:[#allocation12_spill] sm:$0xff] %v10559_v6  ;;  %v3398_v2 = vmul.u32 18, %v3397_v40  ;;  %v1567_v18 = vadd.f32 %v10449_v17, %v10231_v35  ;;  %vm3789_vm2 = vcmp.ne.s32.totalorder %v10559_v6, 0 }
 0x171   : > { %v1582_v55 = vadd.f32 %v1511_v51, %v10323_v13  ;;  %v8726_v59 = vpop.f32.mrf.mxu0  ;;  %v1559_v13 = vadd.f32 %v10399_v43, %v10183_v26  ;;  %v10582_v39 = vadd.s32 56, %v10461_v27  ;;  %vm3825_vm3 = vcmp.lt.s32.totalorder %v10559_v6, 0 }
 0x172   : > { %13382 = vst [vmem:[#allocation11_spill] sm:$0xff] %v10551_v10  ;;  %v8692_v5 = vpop.f32.mrf.mxu1  ;;  %v10563_v24 = vadd.f32 %v8726_v59, %v1581_v42  ;;  %v10569_v10 = vadd.f32 %v10394_v62, %v931_v58  ;;  %v10588_v26 = vadd.s32 40, %v10461_v27  ;;  %v10592_v54 = vadd.s32 18, %v10559_v6  ;;  %vm10639_vm6 = vmand %vm3825_vm3, %vm3789_vm2 }
 0x173   : > { %v1585_v61 = vadd.f32 %v8692_v5, %v10331_v50  ;;  %v10566_v12 = vpop.f32.mrf.mxu0  ;;  %v10595_v35 = vsub.s32 %v10461_v27, %v3398_v2  ;;  %v3408_v17 = vshrl.u32 %v10543_v38, 4  ;;  %v9580_v44 = vmov 0.0  }
 0x174   : > { %v10573_v51 = vpop.f32.mrf.mxu1  ;;  %13385 = vst [vmem:[#allocation14_spill] sm:$0xff] %v10592_v54  ;;  %3346 = vst [vmem:[#allocation2] sm:$0xff] %v9580_v44  ;;  %v3431_v21 = vmul.u32 18, %v3430_v20  ;;  %v3463_v59 = vshrl.u32 %v10549_v0, 4  ;;  %v3441_v58 = vshrl.u32 %v10555_v47, 4  ;;  %v10620_v47 = vadd.s32 80, %v10461_v27 }
 0x175   : > { %v8729_v50 = vpop.f32.mrf.mxu0  ;;  %13386 = vst [vmem:[#allocation15_spill] sm:$0xff] %v10595_v35  ;;  %3347 = vst [vmem:[#allocation2 + $0x8] sm:$0xff] %v9580_v44  ;;  %v10616_v20 = vmul.u32.u64.low 3817748708, %v10588_v26  ;;  %v10617_v0 = vmul.u32.u64.high 3817748708, %v10588_v26, %v10616_v20  ;;  %vm3787_vm4 = vcmp.ne.s32.totalorder %v10595_v35, 0  ;;  %vm3823_vm5 = vcmp.lt.s32.totalorder %v10595_v35, 0 }
 0x176   : > { %v8695_v62 = vpop.f32.mrf.mxu1  ;;  %v10584_v42 = vadd.f32 %v8729_v50, %v1584_v25  ;;  %3348 = vst [vmem:[#allocation2 + $0x10] sm:$0x7] %v9580_v44  ;;  %3349 = vst [vmem:[#allocation2 + $0x133] sm:$0xff] %v9580_v44  ;;  %v10607_v2 = vmul.u32.u64.low 3817748708, %v10582_v39  ;;  %v10608_v50 = vmul.u32.u64.high 3817748708, %v10582_v39, %v10607_v2  ;;  %v13410_v6 = vmov 0 }
 0x177   : > { %v1588_v43 = vadd.f32 %v8695_v62, %v10341_v49  ;;  %v1837_v56 = vpop.f32.mrf.mxu0  ;;  %3350 = vst [vmem:[#allocation2 + $0x13b] sm:$0xff] %v9580_v44  ;;  %3351 = vst [vmem:[#allocation2 + $0x143] sm:$0xff] %v9580_v44  ;;  %v9509_v49 = vld [vmem:[%s13271_s4 + $0xb8] sm:$0xff]   ;;  %v13415_v54 = vmov 0 }
 0x178   : > { %13384 = vst [vmem:[#allocation13_spill] sm:$0xff] %v10584_v42  ;;  %v1527_v25 = vpop.f32.mrf.mxu1  ;;  %v10601_v40 = vadd.f32 %v1837_v56, %v1582_v55  ;;  %8995 = vmatprep.subr.bf16.mxu1 %v9509_v49  ;;  %v9510_v62 = vld [vmem:[%s13271_s4 + $0xf8] sm:$0xff]   ;;  %v3409_v49 = vmul.u32 18, %v3408_v17  ;;  %v3464_v17 = vmul.u32 18, %v3463_v59  ;;  %vm10662_vm7 = vmand %vm3823_vm5, %vm3787_vm4  ;;  %v13394_v59 = vmov 0 }
 0x179   : > { %v1586_v38 = vadd.f32 %v1527_v25, %v10353_v3  ;;  %v8730_v5 = vpop.f32.mrf.mxu0  ;;  %v9581_v25 = vmov 0.0|0.0   ;;  %9047 = vmatprep.subr.bf16.mxu0 %v9510_v62  ;;  %v3442_v62 = vmul.u32 18, %v3441_v58  ;;  %v13395_v59 = vsel %vm10662_vm7, 4294967295, %v13394_v59 }
 0x17a   : > { %13387 = vst [vmem:[#allocation16_spill] sm:$0xff] %v10601_v40  ;;  %v8696_v44 = vpop.f32.mrf.mxu1  ;;  %v10613_v55 = vadd.f32 %v8730_v5, %v1585_v61  ;;  %8959 = vmatprep.mubr.bf16.mxu0 %v9581_v25  ;;  %v10628_v61 = vadd.f32 %v10423_v30, %v1559_v13  ;;  %v10631_v5 = vadd.f32 %v10447_v16, %v1563_v34  ;;  %v10654_v34 = vadd.s32 18, %v10595_v35 }
 0x17b   : > { %v1589_v3 = vadd.f32 %v8696_v44, %v10361_v60  ;;  %v10623_v56 = vpop.f32.mrf.mxu0  ;;  %v10644_v44 = vadd.s32 64, %v10461_v27  ;;  %v10648_v30 = vadd.f32 %v10468_v45, %v10255_v52  ;;  %v10651_v16 = vadd.f32 %v10466_v23, %v1567_v18  ;;  %13396 = vst [vmem:[#allocation21_spill] sm:$0xff] %v13395_v59 }
 0x17c   : > { %13388 = vst [vmem:[#allocation17_spill] sm:$0xff] %v10613_v55  ;;  %v10633_v2 = vpop.f32.mrf.mxu1  ;;  %13392 = vst [vmem:[#allocation19_spill] sm:$0xff] %v10654_v34  ;;  %v10667_v52 = vsub.s32 %v10509_v63, %v3431_v21  ;;  %v10670_v23 = vmul.u32.u64.low 3817748708, %v10620_v47  ;;  %v10671_v45 = vmul.u32.u64.high 3817748708, %v10620_v47, %v10670_v23  ;;  %v4217_v18 = vld [vmem:[#allocation2 + $0x1] sm:$0xff]  ;;  %v10684_v40 = vsub.s32 %v10528_v7, %v3464_v17 }
 0x17d   : > { %13391 = vst [vmem:[#allocation18_spill] sm:$0xff] %v10651_v16  ;;  %v8733_v13 = vpop.f32.mrf.mxu0  ;;  %v4218_v58 = vld [vmem:[#allocation2 + $0x9] sm:$0xff]  ;;  %v10687_v23 = vmul.u32.u64.low 3817748708, %v10644_v44  ;;  %v10688_v42 = vmul.u32.u64.high 3817748708, %v10644_v44, %v10687_v23  ;;  %v13404_v35 = vmov 0 }
 0x17e   : > { %v8699_v20 = vpop.f32.mrf.mxu1  ;;  %v10656_v25 = vadd.f32 %v8733_v13, %v1588_v43  ;;  %13397 = vst [vmem:[#allocation22_spill] sm:$0xff] %v10667_v52  ;;  %v4253_v55 = vpack.c.bf16 %v4218_v58, %v4217_v18  ;;  %13399 = vst [vmem:[#allocation24_spill] sm:$0xff] %v10684_v40  ;;  %vm3790_vm8 = vcmp.ne.s32.totalorder %v10667_v52, 0  ;;  %vm3826_vm9 = vcmp.lt.s32.totalorder %v10667_v52, 0 }
 0x17f   : > { %v1592_v43 = vadd.f32 %v8699_v20, %v10373_v4  ;;  %v1853_v13 = vpop.f32.mrf.mxu0  ;;  %vm3793_vm12 = vcmp.ne.s32.totalorder %v10684_v40, 0  ;;  %vm3829_vm13 = vcmp.lt.s32.totalorder %v10684_v40, 0  ;;  %vm10738_vm2 = vmand %vm3826_vm9, %vm3790_vm8 }
 0x180   : > { %13393 = vst [vmem:[#allocation20_spill] sm:$0xff] %v10656_v25  ;;  %v10679_v25 = vsub.s32 %v10516_v14, %v3409_v49  ;;  %v1543_v63 = vpop.f32.mrf.mxu1  ;;  %v10681_v21 = vadd.f32 %v1853_v13, %v1586_v38  ;;  %v10696_v49 = vsub.s32 %v10537_v53, %v3442_v62  ;;  %v3474_v38 = vshrl.u32 %v10608_v50, 4  ;;  %8907 = vmatprep.mubr.bf16.mxu1 %v4253_v55  ;;  %vm10773_vm4 = vmand %vm3829_vm13, %vm3793_vm12 }
 0x181   : > { %v1590_v4 = vadd.f32 %v1543_v63, %v10386_v8  ;;  %v8734_v20 = vpop.f32.mrf.mxu0  ;;  %v3452_v8 = vshrl.u32 %v10617_v0, 4  ;;  %v10708_v13 = vadd.s32 18, %v10667_v52  ;;  %v10712_v53 = vadd.s32 88, %v10461_v27 }
 0x182   : > { %13398 = vst [vmem:[#allocation23_spill] sm:$0xff] %v10679_v25  ;;  %13400 = vst [vmem:[#allocation25_spill] sm:$0xff] %v10696_v49  ;;  %v8700_v7 = vpop.f32.mrf.mxu1  ;;  %v10699_v17 = vadd.f32 %v8734_v20, %v1589_v3  ;;  %vm3788_vm10 = vcmp.ne.s32.totalorder %v10679_v25, 0  ;;  %vm3824_vm11 = vcmp.lt.s32.totalorder %v10679_v25, 0  ;;  %v10718_v55 = vadd.s32 18, %v10679_v25 }
 0x183   : > { %v1593_v18 = vadd.f32 %v8700_v7, %v10391_v9  ;;  %v10705_v58 = vpop.f32.mrf.mxu0  ;;  %13401 = vst [vmem:[#allocation26_spill] sm:$0xff] %v10708_v13  ;;  %v10722_v9 = vadd.s32 72, %v10461_v27  ;;  %v10726_v3 = vadd.s32 18, %v10684_v40  ;;  %vm3791_vm14 = vcmp.ne.s32.totalorder %v10696_v49, 0  ;;  %vm10755_vm3 = vmand %vm3824_vm11, %vm3788_vm10 }
 0x184   : > { %v10714_v50 = vpop.f32.mrf.mxu1  ;;  %13402 = vst [vmem:[#allocation27_spill] sm:$0xff] %v10718_v55  ;;  %v3475_v62 = vmul.u32 18, %v3474_v38  ;;  %vm3827_vm15 = vcmp.lt.s32.totalorder %v10696_v49, 0  ;;  %v3453_v20 = vmul.u32 18, %v3452_v8  ;;  %v3507_v7 = vshrl.u32 %v10671_v45, 4 }
 0x185   : > { %v8737_v0 = vpop.f32.mrf.mxu0  ;;  %13403 = vst [vmem:[#allocation28_spill] sm:$0xff] %v10726_v3  ;;  %v13405_v35 = vsel %vm10738_vm2, 4294967295, %v13404_v35  ;;  %v10761_v34 = vmul.u32.u64.low 3817748708, %v10722_v9  ;;  %v10762_v59 = vmul.u32.u64.high 3817748708, %v10722_v9, %v10761_v34  ;;  %v13411_v6 = vsel %vm10773_vm4, 4294967295, %v13410_v6  ;;  %vm10795_vm5 = vmand %vm3827_vm15, %vm3791_vm14 }
 0x186   : > { %v10729_v63 = vadd.f32 %v8737_v0, %v1592_v43  ;;  %v8743_v23 = vpop.f32.mrf.mxu1  ;;  %13406 = vst [vmem:[#allocation29_spill] sm:$0xff] %v13405_v35  ;;  %v10743_v43 = vmul.u32.u64.low 3817748708, %v10712_v53  ;;  %v10744_v38 = vmul.u32.u64.high 3817748708, %v10712_v53, %v10743_v43  ;;  %v10747_v0 = vadd.s32 112, %v10461_v27  ;;  %13412 = vst [vmem:[#allocation31_spill] sm:$0xff] %v13411_v6 }
 0x187   : > { %v2212_v14 = vadd.f32 %v8743_v23, %v10405_v22  ;;  %v1869_v16 = vpop.f32.mrf.mxu0  ;;  %v13407_v22 = vmov 0  ;;  %v3485_v23 = vshrl.u32 %v10688_v42, 4  ;;  %v10766_v43 = vadd.f32 %v10489_v36, %v10648_v30 }
 0x188   : > { %v10749_v8 = vadd.f32 %v1869_v16, %v1590_v4  ;;  %v2067_v45 = vpop.f32.mrf.mxu1  ;;  %v13408_v22 = vsel %vm10755_vm3, 4294967295, %v13407_v22  ;;  %v10778_v42 = vadd.s32 18, %v10696_v49  ;;  %v10781_v34 = vsub.s32 %v10582_v39, %v3475_v62 }
 0x189   : > { %13409 = vst [vmem:[#allocation30_spill] sm:$0xff] %v13408_v22  ;;  %v2210_v16 = vadd.f32 %v2067_v45, %v10417_v57  ;;  %v8738_v4 = vpop.f32.mrf.mxu0  ;;  %v1575_v36 = vadd.f32 %v10491_v28, %v10277_v1  ;;  %v13416_v54 = vsel %vm10795_vm5, 4294967295, %v13415_v54  ;;  %v3508_v39 = vmul.u32 18, %v3507_v7 }
 0x18a   : > { %13413 = vst [vmem:[#allocation32_spill] sm:$0xff] %v10778_v42  ;;  %13414 = vst [vmem:[#allocation33_spill] sm:$0xff] %v10781_v34  ;;  %v10785_v30 = vadd.f32 %v8738_v4, %v1593_v18  ;;  %v8744_v57 = vpop.f32.mrf.mxu1  ;;  %v10803_v28 = vsub.s32 %v10588_v26, %v3453_v20  ;;  %v10806_v18 = vmul.u32.u64.low 3817748708, %v10747_v0  ;;  %v10807_v4 = vmul.u32.u64.high 3817748708, %v10747_v0, %v10806_v18 }
 0x18b   : > { %13417 = vst [vmem:[#allocation34_spill] sm:$0xff] %v13416_v54  ;;  %v2213_v62 = vadd.f32 %v8744_v57, %v10420_v19  ;;  %v10800_v1 = vpop.f32.mrf.mxu0  ;;  %v10810_v45 = vadd.f32 %v10525_v11, %v1575_v36  ;;  %v3486_v26 = vmul.u32 18, %v3485_v23  ;;  %v1579_v20 = vadd.f32 %v10530_v32, %v10307_v29 }
 0x18c   : > { %13418 = vst [vmem:[#allocation35_spill] sm:$0xff] %v10803_v28  ;;  %v10812_v52 = vpop.f32.mrf.mxu1  ;;  %vm3794_vm8 = vcmp.ne.s32.totalorder %v10781_v34, 0  ;;  %v10830_v36 = vadd.s32 96, %v10461_v27  ;;  %vm3830_vm9 = vcmp.lt.s32.totalorder %v10781_v34, 0  ;;  %v10836_v23 = vadd.s32 18, %v10781_v34 }
 0x18d   : > { %v8781_v57 = vpop.f32.mrf.mxu0  ;;  %v10839_v29 = vsub.s32 %v10620_v47, %v3508_v39  ;;  %vm3792_vm10 = vcmp.ne.s32.totalorder %v10803_v28, 0  ;;  %vm3828_vm11 = vcmp.lt.s32.totalorder %v10803_v28, 0  ;;  %v3518_v11 = vshrl.u32 %v10744_v38, 4  ;;  %vm10876_vm14 = vmand %vm3830_vm9, %vm3794_vm8 }
 0x18e   : > { %v8747_v18 = vpop.f32.mrf.mxu1  ;;  %v10832_v7 = vadd.f32 %v8781_v57, %v2212_v14  ;;  %13420 = vst [vmem:[#allocation37_spill] sm:$0xff] %v10836_v23  ;;  %v10848_v57 = vsub.s32 %v10644_v44, %v3486_v26  ;;  %v3496_v42 = vshrl.u32 %v10762_v59, 4  ;;  %v10852_v47 = vadd.s32 120, %v10461_v27  ;;  %vm10890_vm15 = vmand %vm3828_vm11, %vm3792_vm10 }
 0x18f   : > { %13421 = vst [vmem:[#allocation38_spill] sm:$0xff] %v10839_v29  ;;  %v2216_v32 = vadd.f32 %v8747_v18, %v10434_v46  ;;  %v2393_v19 = vpop.f32.mrf.mxu0  ;;  %v10856_v18 = vmul.u32.u64.low 3817748708, %v10830_v36  ;;  %v10857_v54 = vmul.u32.u64.high 3817748708, %v10830_v36, %v10856_v18  ;;  %v10860_v38 = vadd.s32 104, %v10461_v27 }
 0x190   : > { %13419 = vst [vmem:[#allocation36_spill] sm:$0xff] %v10832_v7  ;;  %v2083_v49 = vpop.f32.mrf.mxu1  ;;  %v10845_v14 = vadd.f32 %v2393_v19, %v2210_v16  ;;  %13423 = vst [vmem:[#allocation40_spill] sm:$0xff] %v10848_v57  ;;  %v10865_v44 = vadd.s32 18, %v10803_v28  ;;  %vm3797_vm12 = vcmp.ne.s32.totalorder %v10839_v29, 0  ;;  %vm3833_vm13 = vcmp.lt.s32.totalorder %v10839_v29, 0 }
 0x191   : > { %v2214_v46 = vadd.f32 %v2083_v49, %v10441_v15  ;;  %v8782_v39 = vpop.f32.mrf.mxu0  ;;  %v13426_v49 = vmov 0  ;;  %v3519_v26 = vmul.u32 18, %v3518_v11  ;;  %vm3795_vm8 = vcmp.ne.s32.totalorder %v10848_v57, 0  ;;  %vm10899_vm9 = vmand %vm3833_vm13, %vm3797_vm12 }
 0x192   : > { %13422 = vst [vmem:[#allocation39_spill] sm:$0xff] %v10845_v14  ;;  %v8748_v16 = vpop.f32.mrf.mxu1  ;;  %v10862_v19 = vadd.f32 %v8782_v39, %v2213_v62  ;;  %13425 = vst [vmem:[#allocation42_spill] sm:$0xff] %v10865_v44  ;;  %v13427_v49 = vsel %vm10876_vm14, 4294967295, %v13426_v49  ;;  %v10881_v62 = vadd.s32 18, %v10839_v29  ;;  %v3551_v39 = vshrl.u32 %v10807_v4, 4 }
 0x193   : > { %v2217_v15 = vadd.f32 %v8748_v16, %v10444_v37  ;;  %v10870_v59 = vpop.f32.mrf.mxu0  ;;  %13428 = vst [vmem:[#allocation43_spill] sm:$0xff] %v13427_v49  ;;  %v13430_v37 = vmov 0  ;;  %v3497_v16 = vmul.u32 18, %v3496_v42  ;;  %v13433_v4 = vmov 0 }
 0x194   : > { %13424 = vst [vmem:[#allocation41_spill] sm:$0xff] %v10862_v19  ;;  %13429 = vst [vmem:[#allocation44_spill] sm:$0xff] %v10881_v62  ;;  %v10884_v18 = vpop.f32.mrf.mxu1  ;;  %v13431_v37 = vsel %vm10890_vm15, 4294967295, %v13430_v37  ;;  %v10896_v40 = vmul.u32.u64.low 3817748708, %v10852_v47  ;;  %v10897_v3 = vmul.u32.u64.high 3817748708, %v10852_v47, %v10896_v40  ;;  %v13434_v4 = vsel %vm10899_vm9, 4294967295, %v13433_v4 }
 0x195   : > { %13432 = vst [vmem:[#allocation45_spill] sm:$0xff] %v13431_v37  ;;  %v8785_v11 = vpop.f32.mrf.mxu0  ;;  %13435 = vst [vmem:[#allocation46_spill] sm:$0xff] %v13434_v4  ;;  %vm3831_vm1 = vcmp.lt.s32.totalorder %v10848_v57, 0  ;;  %v10905_v6 = vmul.u32.u64.low 3817748708, %v10860_v38  ;;  %v10906_v25 = vmul.u32.u64.high 3817748708, %v10860_v38, %v10905_v6  ;;  %v10909_v55 = vadd.s32 144, %v10461_v27 }
 0x196   : > { %v1583_v42 = vadd.f32 %v10573_v51, %v10337_v33  ;;  %v10914_v22 = vadd.f32 %v10566_v12, %v1579_v20  ;;  %v8751_v40 = vpop.f32.mrf.mxu1  ;;  %v10916_v19 = vadd.f32 %v8785_v11, %v2216_v32  ;;  %v10924_v14 = vadd.s32 18, %v10848_v57  ;;  %vm10943_vm10 = vmand %vm3831_vm1, %vm3795_vm8  ;;  %v13448_v57 = vld [vmem:[#allocation5_spill] sm:$0xff]  ;;  %v13461_v37 = vld [vmem:[#allocation7_spill] sm:$0xff] }
 0x197   : > { %v2220_v35 = vadd.f32 %v8751_v40, %v10455_v41  ;;  %v2409_v6 = vpop.f32.mrf.mxu0  ;;  %v10927_v7 = vsub.s32 %v10712_v53, %v3519_v26  ;;  %v3552_v33 = vmul.u32 18, %v3551_v39  ;;  %v13438_v53 = vmov 0 }
 0x198   : > { %13436 = vst [vmem:[#allocation47_spill] sm:$0xff] %v10924_v14  ;;  %v2099_v12 = vpop.f32.mrf.mxu1  ;;  %v10929_v51 = vadd.f32 %v2409_v6, %v2214_v46  ;;  %v13439_v53 = vsel %vm10943_vm10, 4294967295, %v13438_v53  ;;  %v10948_v32 = vsub.s32 %v10722_v9, %v3497_v16  ;;  %v3529_v39 = vshrl.u32 %v10857_v54, 4  ;;  %v13442_v6 = vld [vmem:[#allocation3_spill] sm:$0xff] }
 0x199   : > { %13437 = vst [vmem:[#allocation48_spill] sm:$0xff] %v10927_v7  ;;  %13440 = vst [vmem:[#allocation49_spill] sm:$0xff] %v13439_v53  ;;  %v2218_v46 = vadd.f32 %v2099_v12, %v10458_v48  ;;  %v8786_v26 = vpop.f32.mrf.mxu0  ;;  %v10953_v11 = vmul.u32.u64.low 3817748708, %v10909_v55  ;;  %v10954_v40 = vmul.u32.u64.high 3817748708, %v10909_v55, %v10953_v11  ;;  %v1587_v41 = vadd.f32 %v10633_v2, %v13442_v6  ;;  %v13444_v48 = vld [vmem:[#allocation4_spill] sm:$0xff] }
 0x19a   : > { %13441 = vst [vmem:[#allocation50_spill] sm:$0xff] %v10948_v32  ;;  %v10959_v20 = vadd.f32 %v10623_v56, %v1583_v42  ;;  %v8752_v13 = vpop.f32.mrf.mxu1  ;;  %v10961_v29 = vadd.f32 %v8786_v26, %v2217_v15  ;;  %v10964_v9 = vadd.s32 128, %v10461_v27  ;;  %vm3798_vm1 = vcmp.ne.s32.totalorder %v10927_v7, 0 }
 0x19b   : > { %v2221_v16 = vadd.f32 %v8752_v13, %v13444_v48  ;;  %v10967_v12 = vpop.f32.mrf.mxu0  ;;  %v10975_v56 = vsub.s32 %v10747_v0, %v3552_v33  ;;  %vm3834_vm11 = vcmp.lt.s32.totalorder %v10927_v7, 0  ;;  %v10981_v15 = vadd.s32 18, %v10927_v7 }
 0x19c   : > { %13443 = vst [vmem:[#allocation3_spill] sm:$0xff] %v10961_v29  ;;  %v10977_v2 = vpop.f32.mrf.mxu1  ;;  %v3562_v13 = vshrl.u32 %v10897_v3, 4  ;;  %v10985_v42 = vadd.s32 152, %v10461_v27  ;;  %vm3796_vm12 = vcmp.ne.s32.totalorder %v10948_v32, 0  ;;  %v3530_v11 = vmul.u32 18, %v3529_v39  ;;  %vm11011_vm13 = vmand %vm3834_vm11, %vm3798_vm1 }
 0x19d   : > { %13445 = vst [vmem:[#allocation4_spill] sm:$0xff] %v10975_v56  ;;  %13446 = vst [vmem:[#allocation51_spill] sm:$0xff] %v10981_v15  ;;  %v8789_v26 = vpop.f32.mrf.mxu0  ;;  %v3540_v0 = vshrl.u32 %v10906_v25, 4  ;;  %v10993_v48 = vmul.u32.u64.low 3817748708, %v10964_v9  ;;  %v10994_v54 = vmul.u32.u64.high 3817748708, %v10964_v9, %v10993_v48  ;;  %v10997_v3 = vadd.s32 136, %v10461_v27 }
 0x19e   : > { %v8755_v33 = vpop.f32.mrf.mxu1  ;;  %v10990_v6 = vadd.f32 %v8789_v26, %v2220_v35  ;;  %v11001_v62 = vadd.s32 18, %v10948_v32  ;;  %v13451_v39 = vmov 0  ;;  %v13454_v48 = vld [vmem:[#allocation6_spill] sm:$0xff]  ;;  %vm13455_vm0 = vcmp.lt.s32.totalorder %v10948_v32, 0 }
 0x19f   : > { %v2224_v14 = vadd.f32 %v8755_v33, %v13448_v57  ;;  %v2425_v53 = vpop.f32.mrf.mxu0  ;;  %v13452_v39 = vsel %vm11011_vm13, 4294967295, %v13451_v39  ;;  %v3563_v57 = vmul.u32 18, %v3562_v13  ;;  %vm11024_vm8 = vmand %vm13455_vm0, %vm3796_vm12  ;;  %v11030_v13 = vadd.s32 176, %v10461_v27 }
 0x1a0   : > { %13447 = vst [vmem:[#allocation52_spill] sm:$0xff] %v10990_v6  ;;  %13449 = vst [vmem:[#allocation5_spill] sm:$0xff] %v11001_v62  ;;  %v2115_v25 = vpop.f32.mrf.mxu1  ;;  %v11005_v35 = vadd.f32 %v2425_v53, %v2218_v46  ;;  %v11016_v26 = vmul.u32.u64.low 3817748708, %v10985_v42  ;;  %v11017_v33 = vmul.u32.u64.high 3817748708, %v10985_v42, %v11016_v26  ;;  %v13456_v53 = vmov 0 }
 0x1a1   : > { %13453 = vst [vmem:[#allocation54_spill] sm:$0xff] %v13452_v39  ;;  %v2222_v4 = vadd.f32 %v2115_v25, %v13454_v48  ;;  %v8790_v6 = vpop.f32.mrf.mxu0  ;;  %v13457_v53 = vsel %vm11024_vm8, 4294967295, %v13456_v53  ;;  %v3541_v46 = vmul.u32 18, %v3540_v0  ;;  %v11035_v25 = vsub.s32 %v10830_v36, %v3530_v11 }
 0x1a2   : > { %13450 = vst [vmem:[#allocation53_spill] sm:$0xff] %v11005_v35  ;;  %13458 = vst [vmem:[#allocation6_spill] sm:$0xff] %v13457_v53  ;;  %v3595_v35 = vshrl.u32 %v10954_v40, 4  ;;  %v8756_v28 = vpop.f32.mrf.mxu1  ;;  %v11032_v44 = vadd.f32 %v8790_v6, %v2221_v16  ;;  %v11038_v26 = vmul.u32.u64.low 3817748708, %v10997_v3  ;;  %v11039_v48 = vmul.u32.u64.high 3817748708, %v10997_v3, %v11038_v26 }
 0x1a3   : > { %13460 = vst [vmem:[#allocation56_spill] sm:$0xff] %v11035_v25  ;;  %v2225_v34 = vadd.f32 %v8756_v28, %v13461_v37  ;;  %v11042_v23 = vpop.f32.mrf.mxu0  ;;  %v11049_v0 = vadd.s32 18, %v10975_v56  ;;  %v11052_v16 = vadd.s32 160, %v10461_v27  ;;  %v1591_v36 = vadd.f32 %v10714_v50, %v10569_v10 }
 0x1a4   : > { %13459 = vst [vmem:[#allocation55_spill] sm:$0xff] %v11032_v44  ;;  %v11057_v11 = vadd.f32 %v10705_v58, %v1587_v41  ;;  %v11059_v28 = vpop.f32.mrf.mxu1  ;;  %vm13463_vm0 = vcmp.ne.s32.totalorder %v10975_v56, 0  ;;  %vm13464_vm1 = vcmp.lt.s32.totalorder %v10975_v56, 0  ;;  %v13465_v6 = vmov 0  ;;  %v13481_v56 = vld [vmem:[#allocation10_spill] sm:$0xff] }
 0x1a5   : > { %13462 = vst [vmem:[#allocation7_spill] sm:$0xff] %v11049_v0  ;;  %vm11069_vm11 = vmand %vm13464_vm1, %vm13463_vm0  ;;  %v11074_v10 = vsub.s32 %v10852_v47, %v3563_v57  ;;  %v8793_v58 = vpop.f32.mrf.mxu0  ;;  %v11077_v50 = vsub.s32 %v10860_v38, %v3541_v46  ;;  %v3596_v41 = vmul.u32 18, %v3595_v35  ;;  %vm3799_vm12 = vcmp.ne.s32.totalorder %v11035_v25, 0  ;;  %v13471_v47 = vld [vmem:[#allocation8_spill] sm:$0xff] }
 0x1a6   : > { %v13466_v6 = vsel %vm11069_vm11, 4294967295, %v13465_v6  ;;  %v11080_v26 = vmul.u32.u64.low 3817748708, %v11030_v13  ;;  %v11081_v40 = vmul.u32.u64.high 3817748708, %v11030_v13, %v11080_v26  ;;  %v8759_v37 = vpop.f32.mrf.mxu1  ;;  %v11083_v32 = vadd.f32 %v8793_v58, %v2224_v14 }
 0x1a7   : > { %13467 = vst [vmem:[#allocation57_spill] sm:$0xff] %v13466_v6  ;;  %13468 = vst [vmem:[#allocation58_spill] sm:$0xff] %v11074_v10  ;;  %vm3835_vm0 = vcmp.lt.s32.totalorder %v11035_v25, 0  ;;  %v3573_v62 = vshrl.u32 %v10994_v54, 4  ;;  %v2228_v57 = vadd.f32 %v8759_v37, %v13471_v47  ;;  %v2441_v53 = vpop.f32.mrf.mxu0  ;;  %v11100_v26 = vadd.s32 18, %v11035_v25  ;;  %v13474_v37 = vld [vmem:[#allocation9_spill] sm:$0xff] }
 0x1a8   : > { %13469 = vst [vmem:[#allocation59_spill] sm:$0xff] %v11077_v50  ;;  %13470 = vst [vmem:[#allocation60_spill] sm:$0xff] %v11083_v32  ;;  %v11094_v35 = vmul.u32.u64.low 3817748708, %v11052_v16  ;;  %v11095_v46 = vmul.u32.u64.high 3817748708, %v11052_v16, %v11094_v35  ;;  %v2131_v14 = vpop.f32.mrf.mxu1  ;;  %v11097_v58 = vadd.f32 %v2441_v53, %v2222_v4  ;;  %v3606_v54 = vshrl.u32 %v11017_v33, 4 }
 0x1a9   : > { %13473 = vst [vmem:[#allocation61_spill] sm:$0xff] %v11100_v26  ;;  %v2226_v47 = vadd.f32 %v2131_v14, %v13474_v37  ;;  %v8794_v32 = vpop.f32.mrf.mxu0  ;;  %vm11107_vm11 = vmand %vm3835_vm0, %vm3799_vm12  ;;  %v13475_v38 = vmov 0  ;;  %vm3838_vm8 = vcmp.lt.s32.totalorder %v11074_v10, 0  ;;  %vm3800_vm13 = vcmp.ne.s32.totalorder %v11077_v50, 0 }
 0x1aa   : > { %13472 = vst [vmem:[#allocation8_spill] sm:$0xff] %v11097_v58  ;;  %v13476_v38 = vsel %vm11107_vm11, 4294967295, %v13475_v38  ;;  %v11114_v4 = vsub.s32 %v10909_v55, %v3596_v41  ;;  %v8760_v53 = vpop.f32.mrf.mxu1  ;;  %v11116_v35 = vadd.f32 %v8794_v32, %v2225_v34  ;;  %vm3836_vm1 = vcmp.lt.s32.totalorder %v11077_v50, 0 }
 0x1ab   : > { %13477 = vst [vmem:[#allocation9_spill] sm:$0xff] %v13476_v38  ;;  %v3574_v33 = vmul.u32 18, %v3573_v62  ;;  %v3584_v14 = vshrl.u32 %v11039_v48, 4  ;;  %v11121_v37 = vadd.f32 %v10800_v1, %v1591_v36  ;;  %v2211_v58 = vadd.f32 %v10812_v52, %v10628_v61  ;;  %v11126_v6 = vpop.f32.mrf.mxu0  ;;  %vm11155_vm11 = vmand %vm3836_vm1, %vm3800_vm13 }
 0x1ac   : > { %13478 = vst [vmem:[#allocation62_spill] sm:$0xff] %v11114_v4  ;;  %13479 = vst [vmem:[#allocation63_spill] sm:$0xff] %v11116_v35  ;;  %v2229_v0 = vadd.f32 %v8760_v53, %v13481_v56  ;;  %v11129_v55 = vadd.s32 184, %v10461_v27  ;;  %v11131_v34 = vpop.f32.mrf.mxu1  ;;  %vm13482_vm12 = vcmp.ne.s32.totalorder %v11074_v10, 0  ;;  %v13483_v61 = vmov 0 }
 0x1ad   : > { %13480 = vst [vmem:[#allocation64_spill] sm:$0xff] %v11121_v37  ;;  %vm11141_vm0 = vmand %vm3838_vm8, %vm13482_vm12  ;;  %v11146_v52 = vadd.s32 18, %v11074_v10  ;;  %v11149_v1 = vadd.s32 18, %v11077_v50  ;;  %v3607_v32 = vmul.u32 18, %v3606_v54  ;;  %v8797_v56 = vpop.f32.mrf.mxu0  ;;  %v13488_v48 = vmov 0 }
 0x1ae   : > { %v13484_v61 = vsel %vm11141_vm0, 4294967295, %v13483_v61  ;;  %v13489_v48 = vsel %vm11155_vm11, 4294967295, %v13488_v48  ;;  %vm3805_vm8 = vcmp.ne.s32.totalorder %v11114_v4, 0  ;;  %vm3841_vm12 = vcmp.lt.s32.totalorder %v11114_v4, 0  ;;  %v8763_v53 = vpop.f32.mrf.mxu1 }
 0x1af   : > { %13485 = vst [vmem:[#allocation10_spill] sm:$0xff] %v13484_v61  ;;  %13486 = vst [vmem:[#allocation65_spill] sm:$0xff] %v11146_v52  ;;  %v3639_v36 = vshrl.u32 %v11081_v40, 4  ;;  %v11163_v41 = vadd.s32 168, %v10461_v27  ;;  %v11165_v54 = vadd.f32 %v8797_v56, %v2228_v57  ;;  %v11168_v62 = vadd.s32 18, %v11114_v4  ;;  %v2457_v38 = vpop.f32.mrf.mxu0 }
 0x1b0   : > { %13487 = vst [vmem:[#allocation66_spill] sm:$0xff] %v11149_v1  ;;  %13490 = vst [vmem:[#allocation67_spill] sm:$0xff] %v13489_v48  ;;  %v11171_v35 = vsub.s32 %v10964_v9, %v3574_v33  ;;  %v3585_v25 = vmul.u32 18, %v3584_v14  ;;  %v2232_v26 = vadd.f32 %v8763_v53, %v10539_v31  ;;  %v3617_v7 = vshrl.u32 %v11095_v46, 4  ;;  %v2147_v39 = vpop.f32.mrf.mxu1  ;;  %v13498_v46 = vld [vmem:[#allocation11_spill] sm:$0xff] }
 0x1b1   : > { %13491 = vst [vmem:[#allocation68_spill] sm:$0xff] %v11165_v54  ;;  %13492 = vst [vmem:[#allocation69_spill] sm:$0xff] %v11168_v62  ;;  %v11176_v40 = vmul.u32.u64.low 3817748708, %v11129_v55  ;;  %v11177_v15 = vmul.u32.u64.high 3817748708, %v11129_v55, %v11176_v40  ;;  %v11179_v44 = vadd.f32 %v2457_v38, %v2226_v47  ;;  %v13495_v9 = vmov 0  ;;  %v8798_v33 = vpop.f32.mrf.mxu0  ;;  %v13507_v54 = vld [vmem:[#allocation17_spill] sm:$0xff] }
 0x1b2   : > { %13493 = vst [vmem:[#allocation70_spill] sm:$0xff] %v11171_v35  ;;  %vm11193_vm13 = vmand %vm3841_vm12, %vm3805_vm8  ;;  %v11198_v38 = vsub.s32 %v10985_v42, %v3607_v32  ;;  %v2230_v47 = vadd.f32 %v2147_v39, %v13498_v46  ;;  %v3640_v14 = vmul.u32 18, %v3639_v36  ;;  %v11207_v40 = vadd.f32 %v10884_v18, %v10631_v5  ;;  %v8764_v57 = vpop.f32.mrf.mxu1 }
 0x1b3   : > { %13494 = vst [vmem:[#allocation71_spill] sm:$0xff] %v11179_v44  ;;  %v13496_v9 = vsel %vm11193_vm13, 4294967295, %v13495_v9  ;;  %v11202_v56 = vmul.u32.u64.low 3817748708, %v11163_v41  ;;  %v11203_v53 = vmul.u32.u64.high 3817748708, %v11163_v41, %v11202_v56  ;;  %v11210_v31 = vadd.f32 %v10870_v59, %v2211_v58  ;;  %v11218_v32 = vpop.f32.mrf.mxu0 }
 0x1b4   : > { %13497 = vst [vmem:[#allocation72_spill] sm:$0xff] %v13496_v9  ;;  %v11212_v44 = vadd.f32 %v8798_v33, %v2229_v0  ;;  %v11215_v42 = vsub.s32 %v10997_v3, %v3585_v25  ;;  %v2233_v39 = vadd.f32 %v8764_v57, %v10563_v24  ;;  %v3618_v5 = vmul.u32 18, %v3617_v7  ;;  %v11225_v59 = vpop.f32.mrf.mxu1  ;;  %v13502_v33 = vld [vmem:[#allocation13_spill] sm:$0xff] }
 0x1b5   : > { %v11229_v18 = vadd.s32 18, %v11171_v35  ;;  %v11232_v3 = vadd.s32 208, %v10461_v27  ;;  %v11235_v24 = vadd.s32 192, %v10461_v27  ;;  %v8801_v25 = vpop.f32.mrf.mxu0  ;;  %v11240_v7 = vsub.s32 %v11030_v13, %v3640_v14 }
 0x1b6   : > { %13499 = vst [vmem:[#allocation11_spill] sm:$0xff] %v11212_v44  ;;  %v11243_v0 = vadd.s32 216, %v10461_v27  ;;  %v8767_v58 = vpop.f32.mrf.mxu1  ;;  %v11245_v57 = vadd.f32 %v8801_v25, %v2232_v26  ;;  %v11248_v46 = vadd.s32 18, %v11198_v38  ;;  %v11254_v44 = vadd.s32 18, %v11215_v42 }
 0x1b7   : > { %13500 = vst [vmem:[#allocation73_spill] sm:$0xff] %v11229_v18  ;;  %v2236_v56 = vadd.f32 %v8767_v58, %v13502_v33  ;;  %v2473_v36 = vpop.f32.mrf.mxu0  ;;  %v11257_v13 = vsub.s32 %v11052_v16, %v3618_v5  ;;  %v3650_v14 = vshrl.u32 %v11177_v15, 4  ;;  %v11267_v62 = vadd.s32 200, %v10461_v27  ;;  %v13505_v58 = vld [vmem:[#allocation16_spill] sm:$0xff]  ;;  %v13529_v18 = vld [vmem:[#allocation18_spill] sm:$0xff] }
 0x1b8   : > { %13501 = vst [vmem:[#allocation74_spill] sm:$0xff] %v11245_v57  ;;  %v2163_v26 = vpop.f32.mrf.mxu1  ;;  %v11260_v25 = vadd.f32 %v2473_v36, %v2230_v47  ;;  %v11263_v57 = vmul.u32.u64.low 3817748708, %v11232_v3  ;;  %v11264_v4 = vmul.u32.u64.high 3817748708, %v11232_v3, %v11263_v57  ;;  %v3628_v16 = vshrl.u32 %v11203_v53, 4 }
 0x1b9   : > { %13503 = vst [vmem:[#allocation13_spill] sm:$0xff] %v11257_v13  ;;  %v2234_v33 = vadd.f32 %v2163_v26, %v13505_v58  ;;  %v8802_v9 = vpop.f32.mrf.mxu0  ;;  %v11273_v5 = vadd.s32 240, %v10461_v27  ;;  %v11282_v57 = vadd.s32 224, %v10461_v27  ;;  %vm13508_vm1 = vcmp.ne.s32.totalorder %v11171_v35, 0 }
 0x1ba   : > { %13504 = vst [vmem:[#allocation75_spill] sm:$0xff] %v11260_v25  ;;  %v8768_v15 = vpop.f32.mrf.mxu1  ;;  %v11275_v47 = vadd.f32 %v8802_v9, %v2233_v39  ;;  %v11278_v36 = vmul.u32.u64.low 3817748708, %v11235_v24  ;;  %v11279_v25 = vmul.u32.u64.high 3817748708, %v11235_v24, %v11278_v36  ;;  %vm13509_vm8 = vcmp.lt.s32.totalorder %v11171_v35, 0 }
 0x1bb   : > { %v2237_v26 = vadd.f32 %v8768_v15, %v13507_v54  ;;  %v11285_v58 = vpop.f32.mrf.mxu0  ;;  %vm11291_vm13 = vmand %vm13509_vm8, %vm13508_vm1  ;;  %v13510_v53 = vmov 0  ;;  %v11297_v9 = vmul.u32.u64.low 3817748708, %v11243_v0  ;;  %v11298_v39 = vmul.u32.u64.high 3817748708, %v11243_v0, %v11297_v9 }
 0x1bc   : > { %13506 = vst [vmem:[#allocation16_spill] sm:$0xff] %v11275_v47  ;;  %v13511_v53 = vsel %vm11291_vm13, 4294967295, %v13510_v53  ;;  %v11300_v36 = vpop.f32.mrf.mxu1  ;;  %v3651_v54 = vmul.u32 18, %v3650_v14  ;;  %v11304_v15 = vmul.u32.u64.low 3817748708, %v11267_v62  ;;  %v11305_v47 = vmul.u32.u64.high 3817748708, %v11267_v62, %v11304_v15 }
 0x1bd   : > { %13512 = vst [vmem:[#allocation17_spill] sm:$0xff] %v13511_v53  ;;  %v8805_v50 = vpop.f32.mrf.mxu0  ;;  %vm13513_vm1 = vcmp.ne.s32.totalorder %v11198_v38, 0  ;;  %vm13514_vm8 = vcmp.lt.s32.totalorder %v11198_v38, 0  ;;  %v13515_v1 = vmov 0  ;;  %v3629_v9 = vmul.u32 18, %v3628_v16 }
 0x1be   : > { %vm11311_vm0 = vmand %vm13514_vm8, %vm13513_vm1  ;;  %v11317_v48 = vmul.u32.u64.low 3817748708, %v11273_v5  ;;  %v11318_v10 = vmul.u32.u64.high 3817748708, %v11273_v5, %v11317_v48  ;;  %v8771_v14 = vpop.f32.mrf.mxu1  ;;  %v11320_v52 = vadd.f32 %v8805_v50, %v2236_v56  ;;  %vm13518_vm1 = vcmp.ne.s32.totalorder %v11215_v42, 0 }
 0x1bf   : > { %v13516_v1 = vsel %vm11311_vm0, 4294967295, %v13515_v1  ;;  %vm13519_vm8 = vcmp.lt.s32.totalorder %v11215_v42, 0  ;;  %v13520_v61 = vmov 0  ;;  %v11340_v50 = vadd.f32 %v10967_v12, %v11207_v40  ;;  %v13523_v48 = vld [vmem:[#allocation20_spill] sm:$0xff] }
 0x1c0   : > { %13517 = vst [vmem:[#allocation76_spill] sm:$0xff] %v11320_v52  ;;  %vm11330_vm11 = vmand %vm13519_vm8, %vm13518_vm1  ;;  %v11335_v16 = vmul.u32.u64.low 3817748708, %v11282_v57  ;;  %v11336_v37 = vmul.u32.u64.high 3817748708, %v11282_v57, %v11335_v16  ;;  %v2240_v56 = vadd.f32 %v8771_v14, %v13523_v48  ;;  %v2489_v52 = vpop.f32.mrf.mxu0  ;;  %vm13524_vm12 = vcmp.ne.s32.totalorder %v11240_v7, 0  ;;  %v2179_v40 = vpop.f32.mrf.mxu1 }
 0x1c1   : > { %v13521_v61 = vsel %vm11330_vm11, 4294967295, %v13520_v61  ;;  %13522 = vst [vmem:[#allocation77_spill] sm:$0xff] %v11340_v50  ;;  %vm13525_vm13 = vcmp.lt.s32.totalorder %v11240_v7, 0  ;;  %v13526_v15 = vmov 0  ;;  %v11352_v35 = vadd.s32 18, %v11240_v7 }
 0x1c2   : > { %vm11347_vm10 = vmand %vm13525_vm13, %vm13524_vm12  ;;  %v11355_v16 = vadd.s32 18, %v11257_v13  ;;  %v2219_v12 = vadd.f32 %v10977_v2, %v13529_v18  ;;  %v11359_v14 = vadd.f32 %v2489_v52, %v2234_v33  ;;  %vm13531_vm1 = vcmp.ne.s32.totalorder %v11257_v13, 0  ;;  %v8806_v29 = vpop.f32.mrf.mxu0 }
 0x1c3   : > { %v13527_v15 = vsel %vm11347_vm10, 4294967295, %v13526_v15  ;;  %vm13532_vm8 = vcmp.lt.s32.totalorder %v11257_v13, 0  ;;  %v13533_v48 = vmov 0  ;;  %v11370_v53 = vsub.s32 %v11129_v55, %v3651_v54 }
 0x1c4   : > { %13528 = vst [vmem:[#allocation20_spill] sm:$0xff] %v11355_v16  ;;  %13530 = vst [vmem:[#allocation18_spill] sm:$0xff] %v11359_v14  ;;  %v3683_v50 = vshrl.u32 %v11264_v4, 4  ;;  %v2238_v49 = vadd.f32 %v2179_v40, %v10681_v21  ;;  %v11383_v18 = vsub.s32 %v11163_v41, %v3629_v9  ;;  %v2223_v55 = vadd.f32 %v11059_v28, %v10766_v43  ;;  %v8772_v21 = vpop.f32.mrf.mxu1  ;;  %v11394_v2 = vpop.f32.mrf.mxu0 }
 0x1c5   : > { %vm11365_vm13 = vmand %vm13532_vm8, %vm13531_vm1  ;;  %v11388_v4 = vadd.f32 %v11042_v23, %v2219_v12  ;;  %v11390_v33 = vadd.f32 %v8806_v29, %v2237_v26  ;;  %v3661_v54 = vshrl.u32 %v11279_v25, 4  ;;  %v2241_v40 = vadd.f32 %v8772_v21, %v10699_v17 }
 0x1c6   : > { %v13534_v48 = vsel %vm11365_vm13, 4294967295, %v13533_v48  ;;  %13535 = vst [vmem:[#allocation78_spill] sm:$0xff] %v11383_v18  ;;  %v3694_v23 = vshrl.u32 %v11298_v39, 4  ;;  %v11405_v29 = vpop.f32.mrf.mxu1  ;;  %vm3810_vm12 = vcmp.ne.s32.totalorder %v11370_v53, 0  ;;  %vm3846_vm1 = vcmp.lt.s32.totalorder %v11370_v53, 0  ;;  %v8809_v25 = vpop.f32.mrf.mxu0 }
 0x1c7   : > { %13536 = vst [vmem:[#allocation79_spill] sm:$0xff] %v11390_v33  ;;  %v3684_v17 = vmul.u32 18, %v3683_v50  ;;  %v3672_v28 = vshrl.u32 %v11305_v47, 4  ;;  %vm3808_vm8 = vcmp.ne.s32.totalorder %v11383_v18, 0  ;;  %v3727_v26 = vshrl.u32 %v11318_v10, 4  ;;  %vm11430_vm10 = vmand %vm3846_vm1, %vm3810_vm12 }
 0x1c8   : > { %v11414_v9 = vadd.s32 248, %v10461_v27  ;;  %v8775_v39 = vpop.f32.mrf.mxu1  ;;  %v11416_v12 = vadd.f32 %v8809_v25, %v2240_v56  ;;  %v11419_v21 = vadd.s32 18, %v11370_v53  ;;  %v3662_v43 = vmul.u32 18, %v3661_v54  ;;  %v2505_v52 = vpop.f32.mrf.mxu0 }
 0x1c9   : > { %v3705_v50 = vshrl.u32 %v11336_v37, 4  ;;  %v11423_v47 = vadd.f32 %v11126_v6, %v2223_v55  ;;  %v2244_v41 = vadd.f32 %v8775_v39, %v10729_v63  ;;  %v13538_v10 = vmov 0 }
 0x1ca   : > { %13537 = vst [vmem:[#allocation80_spill] sm:$0xff] %v11416_v12  ;;  %v13539_v10 = vsel %vm11430_vm10, 4294967295, %v13538_v10  ;;  %v11435_v56 = vadd.s32 18, %v11383_v18  ;;  %v3695_v54 = vmul.u32 18, %v3694_v23  ;;  %v2195_v25 = vpop.f32.mrf.mxu1  ;;  %v11437_v37 = vadd.f32 %v2505_v52, %v2238_v49  ;;  %v8810_v12 = vpop.f32.mrf.mxu0 }
 0x1cb   : > { %vm13541_vm13 = vcmp.lt.s32.totalorder %v11383_v18, 0  ;;  %v13542_v63 = vmov 0  ;;  %v11448_v6 = vsub.s32 %v11232_v3, %v3684_v17  ;;  %v3673_v55 = vmul.u32 18, %v3672_v28  ;;  %v13652_v18 = vld [vmem:[#allocation38_spill] sm:$0xff] }
 0x1cc   : > { %13540 = vst [vmem:[#allocation81_spill] sm:$0xff] %v11437_v37  ;;  %vm11443_vm11 = vmand %vm13541_vm13, %vm3808_vm8  ;;  %v11451_v39 = vadd.s32 232, %v10461_v27  ;;  %v2242_v23 = vadd.f32 %v2195_v25, %v10749_v8  ;;  %v3728_v49 = vmul.u32 18, %v3727_v26  ;;  %v2227_v33 = vadd.f32 %v11131_v34, %v10810_v45  ;;  %v8776_v14 = vpop.f32.mrf.mxu1  ;;  %v11466_v16 = vpop.f32.mrf.mxu0 }
 0x1cd   : > { %v13543_v63 = vsel %vm11443_vm11, 4294967295, %v13542_v63  ;;  %13544 = vst [vmem:[#allocation82_spill] sm:$0xff] %v11448_v6  ;;  %v11455_v52 = vmul.u32.u64.low 3817748708, %v11414_v9  ;;  %v11456_v37 = vmul.u32.u64.high 3817748708, %v11414_v9, %v11455_v52  ;;  %v11460_v13 = vadd.f32 %v8810_v12, %v2241_v40 }
 0x1ce   : > { %v11463_v3 = vsub.s32 %v11235_v24, %v3662_v43  ;;  %v3706_v17 = vmul.u32 18, %v3705_v50  ;;  %v2245_v28 = vadd.f32 %v8776_v14, %v10785_v30  ;;  %v11477_v34 = vsub.s32 %v11243_v0, %v3695_v54  ;;  %v11482_v40 = vpop.f32.mrf.mxu1  ;;  %v8813_v43 = vpop.f32.mrf.mxu0 }
 0x1cf   : > { %13545 = vst [vmem:[#allocation83_spill] sm:$0xff] %v11460_v13  ;;  %v11480_v24 = vadd.f32 %v11218_v32, %v2227_v33  ;;  %v11487_v30 = vsub.s32 %v11267_v62, %v3673_v55  ;;  %v2231_v14 = vadd.f32 %v11225_v59, %v10914_v22  ;;  %v11492_v26 = vsub.s32 %v11273_v5, %v3728_v49  ;;  %v13591_v13 = vld [vmem:[#allocation19_spill] sm:$0xff] }
 0x1d0   : > { %13546 = vst [vmem:[#allocation84_spill] sm:$0xff] %v11463_v3  ;;  %13547 = vst [vmem:[#allocation85_spill] sm:$0xff] %v11477_v34  ;;  %v11495_v0 = vmul.u32.u64.low 3817748708, %v11451_v39  ;;  %v11496_v32 = vmul.u32.u64.high 3817748708, %v11451_v39, %v11495_v0  ;;  %v11498_v33 = vadd.f32 %v8813_v43, %v2244_v41  ;;  %v8819_v12 = vpop.f32.mrf.mxu1  ;;  %vm3847_vm8 = vcmp.lt.s32.totalorder %v11463_v3, 0  ;;  %v2521_v50 = vpop.f32.mrf.mxu0 }
 0x1d1   : > { %13548 = vst [vmem:[#allocation86_spill] sm:$0xff] %v11487_v30  ;;  %13549 = vst [vmem:[#allocation87_spill] sm:$0xff] %v11492_v26  ;;  %v11503_v62 = vsub.s32 %v11282_v57, %v3706_v17  ;;  %v11506_v22 = vadd.s32 18, %v11448_v6  ;;  %v11511_v59 = vadd.s32 272, %v10461_v27  ;;  %v11513_v5 = vadd.f32 %v2521_v50, %v2242_v23 }
 0x1d2   : > { %13550 = vst [vmem:[#allocation88_spill] sm:$0xff] %v11498_v33  ;;  %v2719_v41 = vpop.f32.mrf.mxu1  ;;  %vm13554_vm1 = vcmp.ne.s32.totalorder %v11448_v6, 0  ;;  %vm13555_vm11 = vcmp.lt.s32.totalorder %v11448_v6, 0  ;;  %v13556_v57 = vmov 0  ;;  %v11524_v54 = vadd.s32 18, %v11463_v3  ;;  %v8814_v25 = vpop.f32.mrf.mxu0 }
 0x1d3   : > { %13551 = vst [vmem:[#allocation89_spill] sm:$0xff] %v11503_v62  ;;  %13552 = vst [vmem:[#allocation90_spill] sm:$0xff] %v11506_v22  ;;  %vm13560_vm0 = vcmp.ne.s32.totalorder %v11463_v3, 0  ;;  %v13561_v55 = vmov 0  ;;  %v11535_v23 = vadd.s32 18, %v11477_v34  ;;  %v3738_v49 = vshrl.u32 %v11456_v37, 4 }
 0x1d4   : > { %13553 = vst [vmem:[#allocation91_spill] sm:$0xff] %v11513_v5  ;;  %vm11519_vm10 = vmand %vm13555_vm11, %vm13554_vm1  ;;  %v11540_v52 = vadd.f32 %v8814_v25, %v2245_v28  ;;  %v8820_v17 = vpop.f32.mrf.mxu1  ;;  %vm13566_vm13 = vcmp.ne.s32.totalorder %v11477_v34, 0  ;;  %vm13567_vm12 = vcmp.lt.s32.totalorder %v11477_v34, 0  ;;  %v11551_v0 = vadd.s32 18, %v11487_v30  ;;  %v11555_v50 = vpop.f32.mrf.mxu0  ;;  %v13572_v37 = vld [vmem:[#allocation14_spill] sm:$0xff]  ;;  %v13573_v28 = vld [vmem:[#allocation12_spill] sm:$0xff] }
 0x1d5   : > { %v13557_v57 = vsel %vm11519_vm10, 4294967295, %v13556_v57  ;;  %13559 = vst [vmem:[#allocation93_spill] sm:$0xff] %v11524_v54  ;;  %vm11530_vm9 = vmand %vm3847_vm8, %vm13560_vm0  ;;  %vm3815_vm8 = vcmp.ne.s32.totalorder %v11503_v62, 0  ;;  %v13574_v25 = vsel %vm10639_vm6, %v13572_v37, %v13573_v28  ;;  %v11579_v60 = vadd.s32 18, %v11492_v26  ;;  %v13583_v5 = vld [vmem:[#allocation36_spill] sm:$0xff]  ;;  %v13592_v3 = vld [vmem:[#allocation15_spill] sm:$0xff] }
 0x1d6   : > { %13558 = vst [vmem:[#allocation92_spill] sm:$0xff] %v13557_v57  ;;  %v13562_v55 = vsel %vm11530_vm9, 4294967295, %v13561_v55  ;;  %13564 = vst [vmem:[#allocation95_spill] sm:$0xff] %v11535_v23  ;;  %vm11562_vm11 = vcmp.lt.s32.totalorder %v13574_v25, 16  ;;  %v11582_v37 = vmul.u32.u64.low 3817748708, %v11511_v59  ;;  %v11583_v28 = vmul.u32.u64.high 3817748708, %v11511_v59, %v11582_v37  ;;  %v2722_v33 = vpop.f32.mrf.mxu1 }
 0x1d7   : > { %13563 = vst [vmem:[#allocation94_spill] sm:$0xff] %v13562_v55  ;;  %13565 = vst [vmem:[#allocation96_spill] sm:$0xff] %v11540_v52  ;;  %v13579_v52 = vmov 0  ;;  %v11586_v25 = vadd.f32 %v11285_v58, %v2231_v14  ;;  %v2864_v8 = vadd.f32 %v8819_v12, %v13583_v5  ;;  %vm13584_vm6 = vcmp.ne.s32.totalorder %v11492_v26, 0  ;;  %v8857_v14 = vpop.f32.mrf.mxu0  ;;  %v11609_v12 = vld [vmem:[%s13269_s2] ss:$0 sm:$0xff] }
 0x1d8   : > { %vm11546_vm0 = vmand %vm13567_vm12, %vm13566_vm13  ;;  %13570 = vst [vmem:[#allocation97_spill] sm:$0xff] %v11551_v0  ;;  %vm13577_vm13 = vcmp.ne.s32.totalorder %v11487_v30, 0  ;;  %vm13578_vm12 = vcmp.lt.s32.totalorder %v11487_v30, 0  ;;  %v11602_v37 = vadd.s32 18, %v11503_v62  ;;  %v2235_v58 = vadd.f32 %v11300_v36, %v10959_v20  ;;  %v13600_v22 = vld [vmem:[#allocation39_spill] sm:$0xff]  ;;  %v13604_v57 = vld [vmem:[#allocation22_spill] sm:$0xff] }
 0x1d9   : > { %13571 = vst [vmem:[#allocation98_spill] sm:$0xff] %v11555_v50  ;;  %vm11574_vm1 = vmand %vm13578_vm12, %vm13577_vm13  ;;  %vm13585_vm13 = vcmp.lt.s32.totalorder %v11492_v26, 0  ;;  %v13586_v50 = vmov 0  ;;  %v13593_v54 = vsel %vm10662_vm7, %v13591_v13, %v13592_v3  ;;  %v13597_v20 = vmov 0  ;;  %v8823_v3 = vpop.f32.mrf.mxu1 }
 0x1da   : > { %v13580_v52 = vsel %vm11574_vm1, 4294967295, %v13579_v52  ;;  %13582 = vst [vmem:[#allocation12_spill] sm:$0xff] %v11579_v60  ;;  %vm11597_vm12 = vmand %vm13585_vm13, %vm13584_vm6  ;;  %vm11616_vm6 = vcmp.lt.s32.totalorder %v13593_v54, 16  ;;  %vm13596_vm13 = vcmp.lt.s32.totalorder %v11503_v62, 0  ;;  %v3739_v36 = vmul.u32 18, %v3738_v49 }
 0x1db   : > { %13581 = vst [vmem:[#allocation14_spill] sm:$0xff] %v13580_v52  ;;  %v13587_v50 = vsel %vm11597_vm12, 4294967295, %v13586_v50  ;;  %13589 = vst [vmem:[#allocation99_spill] sm:$0xff] %v11602_v37  ;;  %v3716_v6 = vshrl.u32 %v11496_v32, 4  ;;  %v11630_v5 = vadd.s32 256, %v10461_v27  ;;  %v2862_v13 = vadd.f32 %v2719_v41, %v13600_v22  ;;  %v3045_v22 = vpop.f32.mrf.mxu0  ;;  %v2735_v41 = vpop.f32.mrf.mxu1  ;;  %v13610_v52 = vld [vmem:[#allocation27_spill] sm:$0xff] }
 0x1dc   : > { %13588 = vst [vmem:[#allocation36_spill] sm:$0xff] %v13587_v50  ;;  %vm11624_vm9 = vmand %vm13596_vm13, %vm3815_vm8  ;;  %v3190_v54 = vadd.f32 %v8857_v14, %v2864_v8  ;;  %v11643_v32 = vadd.f32 %v11405_v29, %v11057_v11  ;;  %v11646_v49 = vadd.f32 %v11394_v2, %v2235_v58  ;;  %v11651_v8 = vld [vmem:[%s13270_s3] ss:$0 sm:$0xff]  ;;  %v13603_v14 = vld [vmem:[#allocation26_spill] sm:$0xff]  ;;  %v11667_v2 = vadd.s32 280, %v10461_v27 }
 0x1dd   : > { %v13598_v20 = vsel %vm11624_vm9, 4294967295, %v13597_v20  ;;  %v13605_v34 = vsel %vm10738_vm2, %v13603_v14, %v13604_v57  ;;  %v13608_v29 = vld [vmem:[#allocation41_spill] sm:$0xff]  ;;  %v3188_v0 = vadd.f32 %v3045_v22, %v2862_v13  ;;  %v8858_v57 = vpop.f32.mrf.mxu0  ;;  %v13611_v50 = vld [vmem:[#allocation23_spill] sm:$0xff]  ;;  %v8824_v62 = vpop.f32.mrf.mxu1 }
 0x1de   : > { %13599 = vst [vmem:[#allocation21_spill] sm:$0xff] %v13598_v20  ;;  %13601 = vst [vmem:[#allocation19_spill] sm:$0xff] %v11646_v49  ;;  %vm11658_vm7 = vcmp.lt.s32.totalorder %v13605_v34, 16  ;;  %v2865_v58 = vadd.f32 %v8820_v17, %v13608_v29  ;;  %v3233_v30 = vmul.f32 %v11609_v12, %v3190_v54  ;;  %v13612_v11 = vsel %vm10755_vm3, %v13610_v52, %v13611_v50 }
 0x1df   : > { %vm11680_vm2 = vcmp.lt.s32.totalorder %v13612_v11, 16  ;;  %v11685_v17 = vsub.s32 %v11414_v9, %v3739_v36  ;;  %v3717_v54 = vmul.u32 18, %v3716_v6  ;;  %v2863_v29 = vadd.f32 %v2722_v33, %v11210_v31  ;;  %v3048_v50 = vpop.f32.mrf.mxu0  ;;  %v2738_v33 = vpop.f32.mrf.mxu1 }
 0x1e0   : > { %v11688_v13 = vmul.u32.u64.low 3817748708, %v11630_v5  ;;  %v11689_v22 = vmul.u32.u64.high 3817748708, %v11630_v5, %v11688_v13  ;;  %v3276_v34 = vadd.f32 %v11651_v8, %v3233_v30  ;;  %v3231_v14 = vmul.f32 %v11609_v12, %v3188_v0 }
 0x1e1   : > { %13615 = vst [vmem:[#allocation15_spill] sm:$0xff] %v11685_v17  ;;  %v3191_v52 = vadd.f32 %v8858_v57, %v2865_v58  ;;  %v3771_v11 = vshrl.u32 %v11583_v28, 4  ;;  %v11696_v37 = vmul.u32.u64.low 3817748708, %v11667_v2  ;;  %v11697_v9 = vmul.u32.u64.high 3817748708, %v11667_v2, %v11696_v37  ;;  %v13618_v58 = vld [vmem:[#allocation28_spill] sm:$0xff]  ;;  %v8827_v60 = vpop.f32.mrf.mxu1 }
 0x1e2   : > { %v11701_v6 = vadd.s32 264, %v10461_v27  ;;  %v3312_v36 = vmax.f32 %v3276_v34, 0.0  ;;  %v3274_v31 = vadd.f32 %v11651_v8, %v3231_v14  ;;  %v3189_v0 = vadd.f32 %v3048_v50, %v2863_v29  ;;  %v13619_v57 = vld [vmem:[#allocation24_spill] sm:$0xff]  ;;  %v8861_v34 = vpop.f32.mrf.mxu0 }
 0x1e3   : > { %v3234_v30 = vmul.f32 %v11609_v12, %v3191_v52  ;;  %v13620_v28 = vsel %vm10773_vm4, %v13618_v58, %v13619_v57  ;;  %v2868_v37 = vadd.f32 %v8823_v3, %v10916_v19  ;;  %v2866_v27 = vadd.f32 %v2735_v41, %v10929_v51  ;;  %v13624_v14 = vld [vmem:[#allocation32_spill] sm:$0xff]  ;;  %v13625_v52 = vld [vmem:[#allocation25_spill] sm:$0xff]  ;;  %v13629_v41 = vld [vmem:[#allocation3_spill] sm:$0xff] }
 0x1e4   : > { %13616 = vst [vmem:[#allocation39_spill] sm:$0xff] %v11701_v6  ;;  %vm11710_vm3 = vcmp.lt.s32.totalorder %v13620_v28, 16  ;;  %v13626_v49 = vsel %vm10795_vm5, %v13624_v14, %v13625_v52  ;;  %vm3818_vm4 = vcmp.ne.s32.totalorder %v11685_v17, 0  ;;  %vm3854_vm13 = vcmp.lt.s32.totalorder %v11685_v17, 0  ;;  %v3061_v58 = vpop.f32.mrf.mxu0  ;;  %v13631_v28 = vld [vmem:[#allocation37_spill] sm:$0xff] }
 0x1e5   : > { %vm11721_vm8 = vcmp.lt.s32.totalorder %v13626_v49, 16  ;;  %v4077_v50 = vsel %vm11562_vm11, %v3312_v36, 0.0  ;;  %v3310_v19 = vmax.f32 %v3274_v31, 0.0  ;;  %v3277_v51 = vadd.f32 %v11651_v8, %v3234_v30  ;;  %v13632_v14 = vld [vmem:[#allocation33_spill] sm:$0xff] }
 0x1e6   : > { %v3232_v3 = vmul.f32 %v11609_v12, %v3189_v0  ;;  %4113 = vst [vmem:[#allocation2 + $0x23] sm:$0xff] %v4077_v50  ;;  %v2869_v13 = vadd.f32 %v8824_v62, %v13629_v41  ;;  %v3194_v49 = vadd.f32 %v8861_v34, %v2868_v37  ;;  %v13633_v52 = vsel %vm10876_vm14, %v13631_v28, %v13632_v14  ;;  %v2751_v0 = vpop.f32.mrf.mxu1  ;;  %vm11754_vm14 = vmand %vm3854_vm13, %vm3818_vm4  ;;  %v13640_v50 = vld [vmem:[#allocation77_spill] sm:$0xff]  ;;  %v8862_v55 = vpop.f32.mrf.mxu0 }
 0x1e7   : > { %vm11737_vm5 = vcmp.lt.s32.totalorder %v13633_v52, 16  ;;  %v11742_v45 = vadd.s32 18, %v11685_v17  ;;  %v11745_v36 = vsub.s32 %v11451_v39, %v3717_v54  ;;  %v4075_v62 = vsel %vm11616_vm6, %v3310_v19, 0.0 }
 0x1e8   : > { %v3313_v31 = vmax.f32 %v3277_v51, 0.0  ;;  %v3275_v30 = vadd.f32 %v11651_v8, %v3232_v3  ;;  %v3192_v37 = vadd.f32 %v3061_v58, %v2866_v27  ;;  %v13637_v34 = vmov 0  ;;  %4111 = vst [vmem:[#allocation2 + $0x13] sm:$0xff] %v4075_v62  ;;  %v13642_v51 = vld [vmem:[#allocation42_spill] sm:$0xff]  ;;  %v13643_v3 = vld [vmem:[#allocation35_spill] sm:$0xff] }
 0x1e9   : > { %13636 = vst [vmem:[#allocation29_spill] sm:$0xff] %v11742_v45  ;;  %v13638_v34 = vsel %vm11754_vm14, 4294967295, %v13637_v34  ;;  %v2867_v39 = vadd.f32 %v2738_v33, %v13640_v50  ;;  %v3237_v54 = vmul.f32 %v11609_v12, %v3194_v49  ;;  %v13644_v41 = vsel %vm10890_vm15, %v13642_v51, %v13643_v3  ;;  %v8828_v49 = vpop.f32.mrf.mxu1  ;;  %v13648_v50 = vld [vmem:[#allocation52_spill] sm:$0xff]  ;;  %v13649_v3 = vld [vmem:[#allocation46_spill] sm:$0xff] }
 0x1ea   : > { %13639 = vst [vmem:[#allocation26_spill] sm:$0xff] %v13638_v34  ;;  %vm11765_vm11 = vcmp.lt.s32.totalorder %v13644_v41, 16  ;;  %v3772_v58 = vmul.u32 18, %v3771_v11  ;;  %v3749_v57 = vshrl.u32 %v11689_v22, 4  ;;  %v4078_v28 = vsel %vm11658_vm7, %v3313_v31, 0.0  ;;  %v3064_v11 = vpop.f32.mrf.mxu0  ;;  %v13651_v22 = vld [vmem:[#allocation44_spill] sm:$0xff] }
 0x1eb   : > { %v3311_v14 = vmax.f32 %v3275_v30, 0.0  ;;  %v3235_v33 = vmul.f32 %v11609_v12, %v3192_v37  ;;  %v3195_v52 = vadd.f32 %v8862_v55, %v2869_v13  ;;  %v11775_v62 = vadd.f32 %v11466_v16, %v11643_v32  ;;  %4114 = vst [vmem:[#allocation2 + $0x2b] sm:$0xff] %v4078_v28  ;;  %v2754_v37 = vpop.f32.mrf.mxu1  ;;  %v13656_v55 = vld [vmem:[#allocation64_spill] sm:$0xff] }
 0x1ec   : > { %v2872_v19 = vadd.f32 %v8827_v60, %v13648_v50  ;;  %v3280_v51 = vadd.f32 %v11651_v8, %v3237_v54  ;;  %vm13650_vm15 = vnez %v13649_v3  ;;  %v3193_v54 = vadd.f32 %v3064_v11, %v2867_v39  ;;  %v8865_v50 = vpop.f32.mrf.mxu0  ;;  %v13657_v39 = vld [vmem:[#allocation49_spill] sm:$0xff]  ;;  %v13659_v11 = vld [vmem:[#allocation47_spill] sm:$0xff]  ;;  %v13692_v45 = vld [vmem:[#allocation56_spill] sm:$0xff] }
 0x1ed   : > { %13647 = vst [vmem:[#allocation22_spill] sm:$0xff] %v11775_v62  ;;  %v13653_v31 = vsel %vm13650_vm15, %v13651_v22, %v13652_v18  ;;  %v4076_v32 = vsel %vm11680_vm2, %v3311_v14, 0.0  ;;  %v3278_v60 = vadd.f32 %v11651_v8, %v3235_v33  ;;  %v3238_v13 = vmul.f32 %v11609_v12, %v3195_v52  ;;  %v8831_v52 = vpop.f32.mrf.mxu1  ;;  %v13716_v62 = vld [vmem:[#allocation69_spill] sm:$0xff] }
 0x1ee   : > { %vm11784_vm6 = vcmp.lt.s32.totalorder %v13653_v31, 16  ;;  %v11798_v41 = vadd.f32 %v11482_v40, %v13656_v55  ;;  %4112 = vst [vmem:[#allocation2 + $0x1b] sm:$0xff] %v4076_v32  ;;  %v3316_v28 = vmax.f32 %v3280_v51, 0.0  ;;  %v3236_v33 = vmul.f32 %v11609_v12, %v3193_v54  ;;  %v13660_v40 = vld [vmem:[#allocation40_spill] sm:$0xff]  ;;  %v13664_v55 = vld [vmem:[#allocation53_spill] sm:$0xff]  ;;  %v3077_v16 = vpop.f32.mrf.mxu0  ;;  %v13666_v54 = vld [vmem:[#allocation54_spill] sm:$0xff] }
 0x1ef   : > { %v11801_v3 = vmul.u32.u64.low 3817748708, %v11701_v6  ;;  %v11802_v22 = vmul.u32.u64.high 3817748708, %v11701_v6, %v11801_v3  ;;  %v3314_v26 = vmax.f32 %v3278_v60, 0.0  ;;  %v3281_v14 = vadd.f32 %v11651_v8, %v3238_v13  ;;  %v4219_v23 = vld [vmem:[#allocation2 + $0x11] sm:$0xff]  ;;  %v9513_v51 = vld [vmem:[%s13271_s4 + $0xa8] sm:$0xff]  }
 0x1f0   : > { %v3198_v18 = vadd.f32 %v8865_v50, %v2872_v19  ;;  %vm13658_vm7 = vnez %v13657_v39  ;;  %v4081_v32 = vsel %vm11710_vm3, %v3316_v28, 0.0  ;;  %v2870_v60 = vadd.f32 %v2751_v0, %v13664_v55  ;;  %v13665_v3 = vld [vmem:[#allocation55_spill] sm:$0xff]  ;;  %v13669_v50 = vld [vmem:[#allocation48_spill] sm:$0xff]  ;;  %v8866_v55 = vpop.f32.mrf.mxu0 }
 0x1f1   : > { %v13661_v31 = vsel %vm13658_vm7, %v13659_v11, %v13660_v40  ;;  %v2873_v13 = vadd.f32 %v8828_v49, %v13665_v3  ;;  %vm13667_vm4 = vnez %v13666_v54  ;;  %v13668_v19 = vld [vmem:[#allocation51_spill] sm:$0xff]  ;;  %vm3816_vm15 = vcmp.ne.s32.totalorder %v11745_v36, 0  ;;  %4117 = vst [vmem:[#allocation2 + $0x43] sm:$0xff] %v4081_v32  ;;  %v2767_v11 = vpop.f32.mrf.mxu1  ;;  %v13673_v3 = vld [vmem:[#allocation6_spill] sm:$0xff]  ;;  %v13675_v54 = vld [vmem:[#allocation5_spill] sm:$0xff] }
 0x1f2   : > { %vm11812_vm2 = vcmp.lt.s32.totalorder %v13661_v31, 16  ;;  %v13670_v39 = vsel %vm13667_vm4, %v13668_v19, %v13669_v50  ;;  %v4079_v20 = vsel %vm11721_vm8, %v3314_v26, 0.0  ;;  %v3317_v28 = vmax.f32 %v3281_v14, 0.0  ;;  %v13676_v19 = vld [vmem:[#allocation50_spill] sm:$0xff]  ;;  %v9565_v6 = vld [vmem:[%s13271_s4 + $0xb8] sm:$0xff]   ;;  %v13724_v32 = vld [vmem:[#allocation73_spill] sm:$0xff] }
 0x1f3   : > { %vm11825_vm13 = vcmp.lt.s32.totalorder %v13670_v39, 16  ;;  %v3279_v0 = vadd.f32 %v11651_v8, %v3236_v33  ;;  %v3241_v49 = vmul.f32 %v11609_v12, %v3198_v18  ;;  %4115 = vst [vmem:[#allocation2 + $0x33] sm:$0xff] %v4079_v20  ;;  %v2871_v40 = vadd.f32 %v2754_v37, %v11388_v4  ;;  %v8832_v37 = vpop.f32.mrf.mxu1  ;;  %v13680_v33 = vld [vmem:[#allocation60_spill] sm:$0xff]  ;;  %v3080_v39 = vpop.f32.mrf.mxu0  ;;  %v13681_v20 = vld [vmem:[#allocation57_spill] sm:$0xff] }
 0x1f4   : > { %v3196_v31 = vadd.f32 %v3077_v16, %v2870_v60  ;;  %vm13674_vm3 = vnez %v13673_v3  ;;  %vm3852_vm8 = vcmp.lt.s32.totalorder %v11745_v36, 0  ;;  %v11846_v29 = vadd.s32 18, %v11745_v36  ;;  %v13683_v3 = vld [vmem:[#allocation7_spill] sm:$0xff] }
 0x1f5   : > { %v13677_v50 = vsel %vm13674_vm3, %v13675_v54, %v13676_v19  ;;  %v4082_v26 = vsel %vm11737_vm5, %v3317_v28, 0.0  ;;  %v3315_v4 = vmax.f32 %v3279_v0, 0.0  ;;  %v3284_v16 = vadd.f32 %v11651_v8, %v3241_v49  ;;  %v13684_v54 = vld [vmem:[#allocation4_spill] sm:$0xff]  ;;  %v4149_v28 = vld [vmem:[#allocation2 + $0x10] sm:$0xff] }
 0x1f6   : > { %vm11840_vm7 = vcmp.lt.s32.totalorder %v13677_v50, 16  ;;  %v3199_v14 = vadd.f32 %v8866_v55, %v2873_v13  ;;  %4118 = vst [vmem:[#allocation2 + $0x4b] sm:$0xff] %v4082_v26  ;;  %v2876_v18 = vadd.f32 %v8831_v52, %v13680_v33  ;;  %v3239_v60 = vmul.f32 %v11609_v12, %v3196_v31  ;;  %v2770_v55 = vpop.f32.mrf.mxu1  ;;  %v4220_v33 = vld [vmem:[#allocation2 + $0x19] sm:$0xff] }
 0x1f7   : > { %vm13682_vm4 = vnez %v13681_v20  ;;  %v11863_v0 = vsub.s32 %v11511_v59, %v3772_v58  ;;  %v11865_v13 = vmul.u32 18, %v3749_v57  ;;  %v4080_v52 = vsel %vm11765_vm11, %v3315_v4, 0.0  ;;  %v4150_v20 = vld [vmem:[#allocation2 + $0x18] sm:$0xff]  ;;  %v8869_v59 = vpop.f32.mrf.mxu0  ;;  %v13689_v58 = vld [vmem:[#allocation9_spill] sm:$0xff] }
 0x1f8   : > { %v13685_v19 = vsel %vm13682_vm4, %v13683_v3, %v13684_v54  ;;  %v3320_v49 = vmax.f32 %v3284_v16, 0.0  ;;  %v3242_v31 = vmul.f32 %v11609_v12, %v3199_v14  ;;  %v3197_v26 = vadd.f32 %v3080_v39, %v2871_v40  ;;  %v4221_v3 = vld [vmem:[#allocation2 + $0x21] sm:$0xff]  ;;  %4116 = vst [vmem:[#allocation2 + $0x3b] sm:$0xff] %v4080_v52  ;;  %v9511_v39 = vld [vmem:[%s13271_s4 + $0xb0] sm:$0xff]   ;;  %vm11895_vm4 = vmand %vm3852_vm8, %vm3816_vm15 }
 0x1f9   : > { %vm11858_vm3 = vcmp.lt.s32.totalorder %v13685_v19, 16  ;;  %v13688_v54 = vld [vmem:[#allocation8_spill] sm:$0xff]  ;;  %v3282_v17 = vadd.f32 %v11651_v8, %v3239_v60  ;;  %vm13690_vm5 = vnez %v13689_v58  ;;  %v13691_v57 = vld [vmem:[#allocation61_spill] sm:$0xff]  ;;  %v4254_v16 = vpack.c.bf16 %v4220_v33, %v4219_v23  ;;  %v3093_v30 = vpop.f32.mrf.mxu0 }
 0x1fa   : > { %v2874_v19 = vadd.f32 %v2767_v11, %v13688_v54  ;;  %v13693_v27 = vsel %vm13690_vm5, %v13691_v57, %v13692_v45  ;;  %v4184_v40 = vpack.c.bf16 %v4150_v20, %v4149_v28  ;;  %v4151_v14 = vld [vmem:[#allocation2 + $0x20] sm:$0xff]  ;;  %v9512_v11 = vld [vmem:[%s13271_s4 + $0xf0] sm:$0xff]   ;;  %v4085_v60 = vsel %vm11784_vm6, %v3320_v49, 0.0  ;;  %v8835_v54 = vpop.f32.mrf.mxu1  ;;  %v4152_v28 = vld [vmem:[#allocation2 + $0x28] sm:$0xff] }
 0x1fb   : > { %vm11877_vm11 = vcmp.lt.s32.totalorder %v13693_v27, 16  ;;  %v3285_v45 = vadd.f32 %v11651_v8, %v3242_v31  ;;  %v3240_v52 = vmul.f32 %v11609_v12, %v3197_v26  ;;  %v3202_v58 = vadd.f32 %v8869_v59, %v2876_v18  ;;  %v4222_v23 = vld [vmem:[#allocation2 + $0x29] sm:$0xff]  ;;  %4121 = vst [vmem:[#allocation2 + $0x63] sm:$0xff] %v4085_v60  ;;  %8908 = vmatmul.mubr.bf16.vlgmr.msra.gmra.mxu1 %v4254_v16  ;;  %v9566_v60 = vld [vmem:[%s13271_s4 + $0xf8] sm:$0xff]  }
 0x1fc   : > { %v3318_v20 = vmax.f32 %v3282_v17, 0.0  ;;  %8960 = vmatmul.mubr.bf16.vlgmr.msra.gmra.mxu0 %v4184_v40  ;;  %v4255_v49 = vpack.c.bf16 %v4222_v23, %v4221_v3  ;;  %v4185_v31 = vpack.c.bf16 %v4152_v28, %v4151_v14  ;;  %v2783_v27 = vpop.f32.mrf.mxu1  ;;  %v3200_v34 = vadd.f32 %v3093_v30, %v2874_v19  ;;  %8996 = vmatpush3.bf16.msra.mxu1 %v9565_v6  ;;  %v13698_v17 = vld [vmem:[#allocation10_spill] sm:$0xff]  ;;  %v13700_v16 = vld [vmem:[#allocation65_spill] sm:$0xff]  ;;  %v13706_v23 = vld [vmem:[#allocation67_spill] sm:$0xff] }
 0x1fd   : > { %v3321_v18 = vmax.f32 %v3285_v45, 0.0  ;;  %v3283_v59 = vadd.f32 %v11651_v8, %v3240_v52  ;;  %v3245_v57 = vmul.f32 %v11609_v12, %v3202_v58  ;;  %vm13699_vm6 = vnez %v13698_v17  ;;  %v13701_v40 = vld [vmem:[#allocation58_spill] sm:$0xff]  ;;  %9048 = vmatpush3.bf16.msra.mxu0 %v9566_v60  ;;  %v13705_v45 = vld [vmem:[#allocation63_spill] sm:$0xff]  ;;  %v8870_v58 = vpop.f32.mrf.mxu0  ;;  %8997 = vmatprep.subr.bf16.mxu1 %v9511_v39  ;;  %v13722_v26 = vld [vmem:[#allocation17_spill] sm:$0xff] }
 0x1fe   : > { %v13702_v3 = vsel %vm13699_vm6, %v13700_v16, %v13701_v40  ;;  %v4083_v19 = vsel %vm11812_vm2, %v3318_v20, 0.0  ;;  %v2877_v52 = vadd.f32 %v8832_v37, %v13705_v45  ;;  %v2875_v6 = vadd.f32 %v2770_v55, %v11423_v47  ;;  %8911 = vmatprep.mubr.bf16.mxu1 %v4255_v49  ;;  %8963 = vmatprep.mubr.bf16.mxu0 %v4185_v31  ;;  %v13708_v28 = vld [vmem:[#allocation66_spill] sm:$0xff]  ;;  %v13709_v30 = vld [vmem:[#allocation59_spill] sm:$0xff]  ;;  %v8836_v31 = vpop.f32.mrf.mxu1  ;;  %v9514_v40 = vld [vmem:[%s13271_s4 + $0xe8] sm:$0xff]  }
 0x1ff   : > { %vm11910_vm15 = vcmp.lt.s32.totalorder %v13702_v3, 16  ;;  %vm13707_vm8 = vnez %v13706_v23  ;;  %4119 = vst [vmem:[#allocation2 + $0x53] sm:$0xff] %v4083_v19  ;;  %v4086_v37 = vsel %vm11825_vm13, %v3321_v18, 0.0  ;;  %v3319_v55 = vmax.f32 %v3283_v59, 0.0  ;;  %9049 = vmatprep.subr.bf16.mxu0 %v9512_v11  ;;  %v13713_v3 = vld [vmem:[#allocation68_spill] sm:$0xff]  ;;  %v3096_v19 = vpop.f32.mrf.mxu0  ;;  %v13717_v18 = vld [vmem:[#allocation62_spill] sm:$0xff] }
 0x200   : > { %v13710_v17 = vsel %vm13707_vm8, %v13708_v28, %v13709_v30  ;;  %v3288_v20 = vadd.f32 %v11651_v8, %v3245_v57  ;;  %v3243_v49 = vmul.f32 %v11609_v12, %v3200_v34  ;;  %4122 = vst [vmem:[#allocation2 + $0x6b] sm:$0xff] %v4086_v37  ;;  %v2880_v60 = vadd.f32 %v8835_v54, %v13713_v3  ;;  %v13714_v23 = vld [vmem:[#allocation72_spill] sm:$0xff]  ;;  %v4223_v34 = vld [vmem:[#allocation2 + $0x31] sm:$0xff]  ;;  %v2786_v30 = vpop.f32.mrf.mxu1 }
 0x201   : > { %vm11926_vm5 = vcmp.lt.s32.totalorder %v13710_v17, 16  ;;  %v3203_v45 = vadd.f32 %v8870_v58, %v2877_v52  ;;  %vm13715_vm2 = vnez %v13714_v23  ;;  %v4153_v28 = vld [vmem:[#allocation2 + $0x30] sm:$0xff]  ;;  %vm3821_vm6 = vcmp.ne.s32.totalorder %v11863_v0, 0  ;;  %v4224_v37 = vld [vmem:[#allocation2 + $0x39] sm:$0xff]  ;;  %v4225_v23 = vld [vmem:[#allocation2 + $0x41] sm:$0xff]  ;;  %8998 = vmatpush3.bf16.msra.mxu1 %v9511_v39  ;;  %9050 = vmatpush3.bf16.msra.mxu0 %v9512_v11  ;;  %v8873_v47 = vpop.f32.mrf.mxu0 }
 0x202   : > { %v13718_v59 = vsel %vm13715_vm2, %v13716_v62, %v13717_v18  ;;  %vm3857_vm8 = vcmp.lt.s32.totalorder %v11863_v0, 0  ;;  %v4084_v54 = vsel %vm11840_vm7, %v3319_v55, 0.0  ;;  %v3324_v52 = vmax.f32 %v3288_v20, 0.0  ;;  %v4154_v3 = vld [vmem:[#allocation2 + $0x38] sm:$0xff]  ;;  %v13725_v55 = vld [vmem:[#allocation70_spill] sm:$0xff]  ;;  %8999 = vmatprep.subr.bf16.mxu1 %v9513_v51  ;;  %v11973_v39 = vld [vmem:[%s13271_s4 + $0xa0] sm:$0xff]   ;;  %9051 = vmatprep.subr.bf16.mxu0 %v9514_v40 }
 0x203   : > { %vm11950_vm13 = vcmp.lt.s32.totalorder %v13718_v59, 16  ;;  %v3286_v58 = vadd.f32 %v11651_v8, %v3243_v49  ;;  %v3201_v17 = vadd.f32 %v3096_v19, %v2875_v6  ;;  %4120 = vst [vmem:[#allocation2 + $0x5b] sm:$0xff] %v4084_v54  ;;  %v13721_v62 = vld [vmem:[#allocation71_spill] sm:$0xff]  ;;  %v3246_v59 = vmul.f32 %v11609_v12, %v3203_v45  ;;  %v8839_v45 = vpop.f32.mrf.mxu1  ;;  %v13748_v16 = vld [vmem:[#allocation20_spill] sm:$0xff]  ;;  %v13759_v49 = vld [vmem:[#allocation78_spill] sm:$0xff] }
 0x204   : > { %v2878_v18 = vadd.f32 %v2783_v27, %v13721_v62  ;;  %vm13723_vm2 = vnez %v13722_v26  ;;  %v4256_v6 = vpack.c.bf16 %v4224_v37, %v4223_v34  ;;  %v4186_v19 = vpack.c.bf16 %v4154_v3, %v4153_v28  ;;  %v4226_v62 = vld [vmem:[#allocation2 + $0x49] sm:$0xff]  ;;  %v9516_v34 = vld [vmem:[%s13271_s4 + $0xe0] sm:$0xff]   ;;  %v13729_v28 = vld [vmem:[#allocation11_spill] sm:$0xff] }
 0x205   : > { %v13726_v20 = vsel %vm13723_vm2, %v13724_v32, %v13725_v55  ;;  %v4089_v11 = vsel %vm11858_vm3, %v3324_v52, 0.0  ;;  %v3322_v27 = vmax.f32 %v3286_v58, 0.0  ;;  %v3244_v26 = vmul.f32 %v11609_v12, %v3201_v17  ;;  %v4155_v32 = vld [vmem:[#allocation2 + $0x40] sm:$0xff]  ;;  %v3109_v55 = vpop.f32.mrf.mxu0  ;;  %9000 = vmatpush3.bf16.msra.mxu1 %v9513_v51  ;;  %9052 = vmatpush3.bf16.msra.mxu0 %v9514_v40  ;;  %v12011_v51 = vld [vmem:[%s13271_s4 + $0x98] sm:$0xff]  }
 0x206   : > { %vm11966_vm7 = vcmp.lt.s32.totalorder %v13726_v20, 16  ;;  %v3206_v54 = vadd.f32 %v8873_v47, %v2880_v60  ;;  %4125 = vst [vmem:[#allocation2 + $0x83] sm:$0xff] %v4089_v11  ;;  %v2881_v37 = vadd.f32 %v8836_v31, %v13729_v28  ;;  %v3289_v3 = vadd.f32 %v11651_v8, %v3246_v59  ;;  %8912 = vmatmul.mubr.bf16.gmra.mxu1 %v4256_v6  ;;  %v13741_v28 = vld [vmem:[#allocation74_spill] sm:$0xff] }
 0x207   : > { %8964 = vmatmul.mubr.bf16.gmra.mxu0 %v4186_v19  ;;  %v4257_v50 = vpack.c.bf16 %v4226_v62, %v4225_v23  ;;  %vm13730_vm3 = vnez %v13516_v1  ;;  %v11993_v52 = vadd.s32 18, %v11863_v0  ;;  %v4087_v31 = vsel %vm11877_vm11, %v3322_v27, 0.0  ;;  %v2799_v23 = vpop.f32.mrf.mxu1  ;;  %v4156_v1 = vld [vmem:[#allocation2 + $0x48] sm:$0xff]  ;;  %v8874_v20 = vpop.f32.mrf.mxu0  ;;  %9001 = vmatprep.subr.bf16.mxu1 %v11973_v39 }
 0x208   : > { %v13731_v47 = vsel %vm13730_vm3, %v11248_v46, %v11198_v38  ;;  %v3287_v58 = vadd.f32 %v11651_v8, %v3244_v26  ;;  %v3249_v17 = vmul.f32 %v11609_v12, %v3206_v54  ;;  %v3204_v59 = vadd.f32 %v3109_v55, %v2878_v18  ;;  %vm12003_vm3 = vmand %vm3857_vm8, %vm3821_vm6  ;;  %4123 = vst [vmem:[#allocation2 + $0x73] sm:$0xff] %v4087_v31  ;;  %v4157_v55 = vld [vmem:[#allocation2 + $0x50] sm:$0xff]  ;;  %v13746_v31 = vld [vmem:[#allocation75_spill] sm:$0xff] }
 0x209   : > { %vm11988_vm2 = vcmp.lt.s32.totalorder %v13731_v47, 16  ;;  %v3325_v46 = vmax.f32 %v3289_v3, 0.0  ;;  %8915 = vmatprep.mubr.bf16.mxu1 %v4257_v50  ;;  %v4187_v4 = vpack.c.bf16 %v4156_v1, %v4155_v32  ;;  %v12015_v40 = vsub.s32 %v11630_v5, %v11865_v13  ;;  %v8840_v26 = vpop.f32.mrf.mxu1  ;;  %9053 = vmatprep.subr.bf16.mxu0 %v9516_v34  ;;  %v9518_v5 = vld [vmem:[%s13271_s4 + $0xd8] sm:$0xff]   ;;  %v13749_v1 = vld [vmem:[#allocation13_spill] sm:$0xff]  ;;  %v9523_v32 = vld [vmem:[%s13271_s4 + $0x80] sm:$0xff]  }
 0x20a   : > { %v13736_v18 = vshrl.u32 %v11697_v9, 4  ;;  %v3323_v19 = vmax.f32 %v3287_v58, 0.0  ;;  %v3292_v11 = vadd.f32 %v11651_v8, %v3249_v17  ;;  %v3247_v27 = vmul.f32 %v11609_v12, %v3204_v59  ;;  %v4227_v3 = vld [vmem:[#allocation2 + $0x51] sm:$0xff]  ;;  %v4229_v47 = vld [vmem:[#allocation2 + $0x61] sm:$0xff]  ;;  %9002 = vmatpush3.bf16.msra.mxu1 %v11973_v39  ;;  %9054 = vmatpush3.bf16.msra.mxu0 %v9516_v34 }
 0x20b   : > { %v3207_v54 = vadd.f32 %v8874_v20, %v2881_v37  ;;  %vm13737_vm11 = vnez %v13521_v61  ;;  %v4090_v9 = vsel %vm11910_vm15, %v3325_v46, 0.0  ;;  %v2879_v13 = vadd.f32 %v2786_v30, %v11480_v24  ;;  %8967 = vmatprep.mubr.bf16.mxu0 %v4187_v4  ;;  %v3112_v61 = vpop.f32.mrf.mxu0  ;;  %v4158_v50 = vld [vmem:[#allocation2 + $0x58] sm:$0xff]  ;;  %9003 = vmatprep.subr.bf16.mxu1 %v12011_v51  ;;  %v9519_v39 = vld [vmem:[%s13271_s4 + $0x90] sm:$0xff]  }
 0x20c   : > { %v12019_v6 = vmul.u32 18, %v13736_v18  ;;  %v13738_v62 = vsel %vm13737_vm11, %v11254_v44, %v11215_v42  ;;  %v2884_v37 = vadd.f32 %v8839_v45, %v13741_v28  ;;  %vm13742_vm8 = vnez %v13527_v15  ;;  %4126 = vst [vmem:[#allocation2 + $0x8b] sm:$0xff] %v4090_v9  ;;  %v4228_v45 = vld [vmem:[#allocation2 + $0x59] sm:$0xff]  ;;  %9055 = vmatprep.subr.bf16.mxu0 %v9518_v5 }
 0x20d   : > { %vm12028_vm6 = vcmp.lt.s32.totalorder %v13738_v62, 16  ;;  %v13743_v44 = vsel %vm13742_vm8, %v11352_v35, %v11240_v7  ;;  %v3965_v24 = vsel %vm12003_vm3, %v11993_v52, %v11863_v0  ;;  %v4088_v14 = vsel %vm11926_vm5, %v3323_v19, 0.0  ;;  %v2802_v7 = vpop.f32.mrf.mxu1  ;;  %v8877_v59 = vpop.f32.mrf.mxu0  ;;  %v9520_v62 = vld [vmem:[%s13271_s4 + $0xd0] sm:$0xff]   ;;  %v13753_v9 = vld [vmem:[#allocation16_spill] sm:$0xff] }
 0x20e   : > { %vm12044_vm11 = vcmp.lt.s32.totalorder %v13743_v44, 16  ;;  %v3328_v30 = vmax.f32 %v3292_v11, 0.0  ;;  %v3290_v15 = vadd.f32 %v11651_v8, %v3247_v27  ;;  %v3250_v35 = vmul.f32 %v11609_v12, %v3207_v54  ;;  %4124 = vst [vmem:[#allocation2 + $0x7b] sm:$0xff] %v4088_v14  ;;  %v4230_v27 = vld [vmem:[#allocation2 + $0x69] sm:$0xff]  ;;  %v4159_v54 = vld [vmem:[#allocation2 + $0x60] sm:$0xff]  ;;  %9004 = vmatpush3.bf16.msra.mxu1 %v12011_v51  ;;  %9056 = vmatpush3.bf16.msra.mxu0 %v9518_v5 }
 0x20f   : > { %v2882_v58 = vadd.f32 %v2799_v23, %v13746_v31  ;;  %v3205_v17 = vadd.f32 %v3112_v61, %v2879_v13  ;;  %vm13747_vm15 = vnez %v13534_v48  ;;  %v4258_v20 = vpack.c.bf16 %v4228_v45, %v4227_v3  ;;  %v8843_v19 = vpop.f32.mrf.mxu1  ;;  %v3125_v61 = vpop.f32.mrf.mxu0  ;;  %9005 = vmatprep.subr.bf16.mxu1 %v9519_v39  ;;  %v9522_v51 = vld [vmem:[%s13271_s4 + $0xc8] sm:$0xff]   ;;  %9057 = vmatprep.subr.bf16.mxu0 %v9520_v62  ;;  %v13797_v44 = vld [vmem:[#allocation12_spill] sm:$0xff] }
 0x210   : > { %v13750_v46 = vsel %vm13747_vm15, %v13748_v16, %v13749_v1  ;;  %v4188_v18 = vpack.c.bf16 %v4158_v50, %v4157_v55  ;;  %v4093_v34 = vsel %vm11950_vm13, %v3328_v30, 0.0  ;;  %v3326_v23 = vmax.f32 %v3290_v15, 0.0  ;;  %v4231_v1 = vld [vmem:[#allocation2 + $0x71] sm:$0xff]  ;;  %v9568_v0 = vld [vmem:[%s13270_s3] ss:$0 sm:$0xff] }
 0x211   : > { %vm12063_vm5 = vcmp.lt.s32.totalorder %v13750_v46, 16  ;;  %v3293_v48 = vadd.f32 %v11651_v8, %v3250_v35  ;;  %v3210_v11 = vadd.f32 %v8877_v59, %v2884_v37  ;;  %4129 = vst [vmem:[#allocation2 + $0xa3] sm:$0xff] %v4093_v34  ;;  %v2885_v13 = vadd.f32 %v8840_v26, %v13753_v9  ;;  %8916 = vmatmul.mubr.bf16.gmra.mxu1 %v4258_v20  ;;  %v2815_v30 = vpop.f32.mrf.mxu1  ;;  %v4160_v35 = vld [vmem:[#allocation2 + $0x68] sm:$0xff]  ;;  %v8878_v45 = vpop.f32.mrf.mxu0  ;;  %v4161_v46 = vld [vmem:[#allocation2 + $0x70] sm:$0xff] }
 0x212   : > { %v3248_v28 = vmul.f32 %v11609_v12, %v3205_v17  ;;  %8968 = vmatmul.mubr.bf16.gmra.mxu0 %v4188_v18  ;;  %v4259_v57 = vpack.c.bf16 %v4230_v27, %v4229_v47  ;;  %vm13754_vm13 = vnez %v13539_v10  ;;  %v3760_v3 = vshrl.u32 %v11802_v22, 4  ;;  %v13763_v17 = vld [vmem:[#allocation76_spill] sm:$0xff]  ;;  %v13766_v27 = vld [vmem:[#allocation82_spill] sm:$0xff]  ;;  %9006 = vmatpush3.bf16.msra.mxu1 %v9519_v39  ;;  %v13803_v47 = vld [vmem:[#allocation39_spill] sm:$0xff] }
 0x213   : > { %v13755_v37 = vsel %vm13754_vm13, %v11419_v21, %v11370_v53  ;;  %v4091_v26 = vsel %vm11966_vm7, %v3326_v23, 0.0  ;;  %v3329_v55 = vmax.f32 %v3293_v48, 0.0  ;;  %v3253_v14 = vmul.f32 %v11609_v12, %v3210_v11  ;;  %v3128_v16 = vpop.f32.mrf.mxu0  ;;  %9058 = vmatpush3.bf16.msra.mxu0 %v9520_v62  ;;  %v4164_v11 = vld [vmem:[#allocation2 + $0x88] sm:$0xff] }
 0x214   : > { %vm12084_vm8 = vcmp.lt.s32.totalorder %v13755_v37, 16  ;;  %v3208_v15 = vadd.f32 %v3125_v61, %v2882_v58  ;;  %4127 = vst [vmem:[#allocation2 + $0x93] sm:$0xff] %v4091_v26  ;;  %v2883_v53 = vadd.f32 %v2802_v7, %v11586_v25  ;;  %v3291_v21 = vadd.f32 %v11651_v8, %v3248_v28  ;;  %8919 = vmatprep.mubr.bf16.mxu1 %v4259_v57  ;;  %v9521_v25 = vld [vmem:[%s13271_s4 + $0x88] sm:$0xff]   ;;  %v8844_v7 = vpop.f32.mrf.mxu1  ;;  %v13770_v61 = vld [vmem:[#allocation18_spill] sm:$0xff] }
 0x215   : > { %v4189_v10 = vpack.c.bf16 %v4160_v35, %v4159_v54  ;;  %vm13758_vm15 = vnez %v13543_v63  ;;  %vm3819_vm13 = vcmp.ne.s32.totalorder %v12015_v40, 0  ;;  %v4094_v63 = vsel %vm11988_vm2, %v3329_v55, 0.0  ;;  %v4162_v28 = vld [vmem:[#allocation2 + $0x78] sm:$0xff]  ;;  %v8881_v37 = vpop.f32.mrf.mxu0  ;;  %v13771_v26 = vld [vmem:[#allocation94_spill] sm:$0xff]  ;;  %v13773_v55 = vld [vmem:[#allocation93_spill] sm:$0xff]  ;;  %9007 = vmatprep.subr.bf16.mxu1 %v9521_v25  ;;  %9059 = vmatprep.subr.bf16.mxu0 %v9522_v51 }
 0x216   : > { %v13760_v50 = vsel %vm13758_vm15, %v11435_v56, %v13759_v49  ;;  %v3296_v56 = vadd.f32 %v11651_v8, %v3253_v14  ;;  %v3251_v5 = vmul.f32 %v11609_v12, %v3208_v15  ;;  %v3211_v31 = vadd.f32 %v8878_v45, %v2885_v13  ;;  %4130 = vst [vmem:[#allocation2 + $0xab] sm:$0xff] %v4094_v63  ;;  %v2818_v23 = vpop.f32.mrf.mxu1  ;;  %v4232_v13 = vld [vmem:[#allocation2 + $0x79] sm:$0xff]  ;;  %v4234_v49 = vld [vmem:[#allocation2 + $0x89] sm:$0xff] }
 0x217   : > { %vm12100_vm7 = vcmp.lt.s32.totalorder %v13760_v50, 16  ;;  %v3327_v58 = vmax.f32 %v3291_v21, 0.0  ;;  %v2888_v59 = vadd.f32 %v8843_v19, %v13763_v17  ;;  %8971 = vmatprep.mubr.bf16.mxu0 %v4189_v10  ;;  %v12119_v60 = vsub.s32 %v11667_v2, %v12019_v6  ;;  %v13765_v19 = vld [vmem:[#allocation90_spill] sm:$0xff]  ;;  %v4233_v2 = vld [vmem:[#allocation2 + $0x81] sm:$0xff]  ;;  %v13779_v17 = vld [vmem:[#allocation95_spill] sm:$0xff]  ;;  %9008 = vmatpush3.bf16.msra.mxu1 %v9521_v25 }
 0x218   : > { %v3332_v20 = vmax.f32 %v3296_v56, 0.0  ;;  %v3294_v18 = vadd.f32 %v11651_v8, %v3251_v5  ;;  %v3254_v34 = vmul.f32 %v11609_v12, %v3211_v31  ;;  %v3209_v48 = vadd.f32 %v3128_v16, %v2883_v53  ;;  %v13774_v14 = vld [vmem:[#allocation84_spill] sm:$0xff]  ;;  %v8847_v45 = vpop.f32.mrf.mxu1  ;;  %v13778_v56 = vld [vmem:[#allocation79_spill] sm:$0xff]  ;;  %v13780_v16 = vld [vmem:[#allocation85_spill] sm:$0xff]  ;;  %9060 = vmatpush3.bf16.msra.mxu0 %v9522_v51  ;;  %9009 = vmatprep.subr.bf16.mxu1 %v9523_v32 }
 0x219   : > { %v13767_v54 = vsel %vm11519_vm10, %v13765_v19, %v13766_v27  ;;  %v4092_v6 = vsel %vm12028_vm6, %v3327_v58, 0.0  ;;  %v2886_v57 = vadd.f32 %v2815_v30, %v13770_v61  ;;  %vm13772_vm15 = vnez %v13771_v26  ;;  %v4163_v50 = vld [vmem:[#allocation2 + $0x80] sm:$0xff]  ;;  %v3141_v58 = vpop.f32.mrf.mxu0  ;;  %v13787_v19 = vld [vmem:[#allocation19_spill] sm:$0xff]  ;;  %v13812_v9 = vld [vmem:[#allocation29_spill] sm:$0xff] }
 0x21a   : > { %vm12128_vm2 = vcmp.lt.s32.totalorder %v13767_v54, 16  ;;  %v13775_v15 = vsel %vm13772_vm15, %v13773_v55, %v13774_v14  ;;  %v4260_v53 = vpack.c.bf16 %v4232_v13, %v4231_v1  ;;  %v4190_v21 = vpack.c.bf16 %v4162_v28, %v4161_v46  ;;  %4128 = vst [vmem:[#allocation2 + $0x9b] sm:$0xff] %v4092_v6  ;;  %v9524_v63 = vld [vmem:[%s13271_s4 + $0xc0] sm:$0xff]   ;;  %v13790_v6 = vld [vmem:[#allocation86_spill] sm:$0xff]  ;;  %v12194_v51 = vld [vmem:[%s13271_s4 + $0x138] sm:$0xff]  }
 0x21b   : > { %vm12140_vm10 = vcmp.lt.s32.totalorder %v13775_v15, 16  ;;  %v4097_v39 = vsel %vm12044_vm11, %v3332_v20, 0.0  ;;  %v3330_v62 = vmax.f32 %v3294_v18, 0.0  ;;  %v3297_v30 = vadd.f32 %v11651_v8, %v3254_v34  ;;  %v2831_v34 = vpop.f32.mrf.mxu1  ;;  %v8882_v13 = vpop.f32.mrf.mxu0  ;;  %9061 = vmatprep.subr.bf16.mxu0 %v9524_v63  ;;  %9010 = vmatpush3.bf16.msra.mxu1 %v9523_v32  ;;  %v4235_v28 = vld [vmem:[#allocation2 + $0x91] sm:$0xff]  ;;  %v13821_v46 = vld [vmem:[#allocation88_spill] sm:$0xff] }
 0x21c   : > { %v3252_v10 = vmul.f32 %v11609_v12, %v3209_v48  ;;  %4133 = vst [vmem:[#allocation2 + $0xc3] sm:$0xff] %v4097_v39  ;;  %v2889_v5 = vadd.f32 %v8844_v7, %v13778_v56  ;;  %v3214_v31 = vadd.f32 %v8881_v37, %v2888_v59  ;;  %8920 = vmatmul.mubr.bf16.gmra.mxu1 %v4260_v53  ;;  %v12165_v20 = vadd.s32 18, %v12015_v40  ;;  %v13795_v53 = vld [vmem:[#allocation80_spill] sm:$0xff] }
 0x21d   : > { %8972 = vmatmul.mubr.bf16.gmra.mxu0 %v4190_v21  ;;  %v4261_v42 = vpack.c.bf16 %v4234_v49, %v4233_v2  ;;  %v13781_v1 = vsel %vm11546_vm0, %v13779_v17, %v13780_v16  ;;  %v4095_v7 = vsel %vm12063_vm5, %v3330_v62, 0.0  ;;  %v3333_v59 = vmax.f32 %v3297_v30, 0.0  ;;  %v13789_v2 = vld [vmem:[#allocation97_spill] sm:$0xff]  ;;  %v8848_v14 = vpop.f32.mrf.mxu1  ;;  %v3144_v62 = vpop.f32.mrf.mxu0  ;;  %9099 = vmatprep.subr.bf16.mxu1 %v12194_v51 }
 0x21e   : > { %vm12160_vm6 = vcmp.lt.s32.totalorder %v13781_v1, 16  ;;  %v3295_v18 = vadd.f32 %v11651_v8, %v3252_v10  ;;  %v3212_v48 = vadd.f32 %v3141_v58, %v2886_v57  ;;  %vm13784_vm0 = vcmp.lt.s32.totalorder %v12015_v40, 0  ;;  %4131 = vst [vmem:[#allocation2 + $0xb3] sm:$0xff] %v4095_v7  ;;  %v13798_v10 = vld [vmem:[#allocation87_spill] sm:$0xff]  ;;  %9062 = vmatpush3.bf16.msra.mxu0 %v9524_v63  ;;  %v13802_v17 = vld [vmem:[#allocation81_spill] sm:$0xff] }
 0x21f   : > { %vm12174_vm11 = vmand %vm13784_vm0, %vm3819_vm13  ;;  %v2887_v4 = vadd.f32 %v2818_v23, %v13787_v19  ;;  %v3257_v27 = vmul.f32 %v11609_v12, %v3214_v31  ;;  %8923 = vmatprep.mubr.bf16.mxu1 %v4261_v42  ;;  %v4191_v54 = vpack.c.bf16 %v4164_v11, %v4163_v50  ;;  %v13791_v61 = vsel %vm11574_vm1, %v13789_v2, %v13790_v6  ;;  %v12199_v23 = vld [vmem:[%s13271_s4 + $0x178] sm:$0xff]   ;;  %v2834_v31 = vpop.f32.mrf.mxu1  ;;  %v8885_v1 = vpop.f32.mrf.mxu0  ;;  %v4165_v2 = vld [vmem:[#allocation2 + $0x90] sm:$0xff] }
 0x220   : > { %vm12185_vm5 = vcmp.lt.s32.totalorder %v13791_v61, 16  ;;  %v3761_v25 = vmul.u32 18, %v3760_v3  ;;  %v4098_v37 = vsel %vm12084_vm8, %v3333_v59, 0.0  ;;  %v3331_v26 = vmax.f32 %v3295_v18, 0.0  ;;  %v13794_v3 = vld [vmem:[#allocation98_spill] sm:$0xff]  ;;  %9151 = vmatprep.subr.bf16.mxu0 %v12199_v23 }
 0x221   : > { %v3255_v55 = vmul.f32 %v11609_v12, %v3212_v48  ;;  %v3215_v22 = vadd.f32 %v8882_v13, %v2889_v5  ;;  %v12206_v15 = vadd.f32 %v13794_v3, %v11798_v41  ;;  %4134 = vst [vmem:[#allocation2 + $0xcb] sm:$0xff] %v4098_v37  ;;  %v2892_v21 = vadd.f32 %v8847_v45, %v13795_v53  ;;  %v4236_v7 = vld [vmem:[#allocation2 + $0x99] sm:$0xff]  ;;  %v4237_v6 = vld [vmem:[#allocation2 + $0xa1] sm:$0xff] }
 0x222   : > { %v3300_v39 = vadd.f32 %v11651_v8, %v3257_v27  ;;  %8975 = vmatprep.mubr.bf16.mxu0 %v4191_v54  ;;  %v13799_v49 = vsel %vm11597_vm12, %v13797_v44, %v13798_v10  ;;  %v3963_v41 = vsel %vm12174_vm11, %v12165_v20, %v12015_v40  ;;  %v4096_v45 = vsel %vm12100_vm7, %v3331_v26, 0.0  ;;  %v4166_v59 = vld [vmem:[#allocation2 + $0x98] sm:$0xff]  ;;  %v13806_v27 = vld [vmem:[#allocation89_spill] sm:$0xff]  ;;  %v3157_v26 = vpop.f32.mrf.mxu0  ;;  %v4167_v3 = vld [vmem:[#allocation2 + $0xa0] sm:$0xff] }
 0x223   : > { %vm12215_vm1 = vcmp.lt.s32.totalorder %v13799_v49, 16  ;;  %v3298_v56 = vadd.f32 %v11651_v8, %v3255_v55  ;;  %v3258_v5 = vmul.f32 %v11609_v12, %v3215_v22  ;;  %v3213_v58 = vadd.f32 %v3144_v62, %v2887_v4  ;;  %4132 = vst [vmem:[#allocation2 + $0xbb] sm:$0xff] %v4096_v45  ;;  %v13805_v4 = vld [vmem:[#allocation99_spill] sm:$0xff]  ;;  %v4238_v44 = vld [vmem:[#allocation2 + $0xa9] sm:$0xff] }
 0x224   : > { %v3336_v42 = vmax.f32 %v3300_v39, 0.0  ;;  %v2890_v16 = vadd.f32 %v2831_v34, %v13802_v17  ;;  %vm3822_vm12 = vcmp.ne.s32.totalorder %v12119_v60, 0  ;;  %vm3858_vm8 = vcmp.lt.s32.totalorder %v12119_v60, 0  ;;  %v8851_v34 = vpop.f32.mrf.mxu1  ;;  %v13813_v49 = vld [vmem:[#allocation15_spill] sm:$0xff]  ;;  %v8886_v17 = vpop.f32.mrf.mxu0 }
 0x225   : > { %v12231_v18 = vsub.s32 %v13803_v47, %v3761_v25  ;;  %v3334_v32 = vmax.f32 %v3298_v56, 0.0  ;;  %v3301_v63 = vadd.f32 %v11651_v8, %v3258_v5  ;;  %v3256_v48 = vmul.f32 %v11609_v12, %v3213_v58  ;;  %v13810_v25 = vld [vmem:[#allocation83_spill] sm:$0xff]  ;;  %v13817_v56 = vld [vmem:[#allocation22_spill] sm:$0xff]  ;;  %vm12300_vm15 = vmand %vm3858_vm8, %vm3822_vm12 }
 0x226   : > { %v3218_v11 = vadd.f32 %v8885_v1, %v2892_v21  ;;  %v13807_v54 = vsel %vm11624_vm9, %v13805_v4, %v13806_v27  ;;  %v4101_v61 = vsel %vm12128_vm2, %v3336_v42, 0.0  ;;  %v2893_v37 = vadd.f32 %v8848_v14, %v13810_v25  ;;  %v2847_v30 = vpop.f32.mrf.mxu1  ;;  %v4168_v42 = vld [vmem:[#allocation2 + $0xa8] sm:$0xff]  ;;  %v4169_v57 = vld [vmem:[#allocation2 + $0xb0] sm:$0xff] }
 0x227   : > { %vm12242_vm7 = vcmp.lt.s32.totalorder %v13807_v54, 16  ;;  %v4262_v55 = vpack.c.bf16 %v4236_v7, %v4235_v28  ;;  %v4192_v22 = vpack.c.bf16 %v4166_v59, %v4165_v2  ;;  %4137 = vst [vmem:[#allocation2 + $0xe3] sm:$0xff] %v4101_v61  ;;  %v4099_v53 = vsel %vm12140_vm10, %v3334_v32, 0.0 }
 0x228   : > { %v3337_v21 = vmax.f32 %v3301_v63, 0.0  ;;  %v3299_v39 = vadd.f32 %v11651_v8, %v3256_v48  ;;  %v3261_v62 = vmul.f32 %v11609_v12, %v3218_v11  ;;  %v13814_v14 = vsel %vm11754_vm14, %v13812_v9, %v13813_v49  ;;  %4135 = vst [vmem:[#allocation2 + $0xd3] sm:$0xff] %v4099_v53  ;;  %v8852_v4 = vpop.f32.mrf.mxu1 }
 0x229   : > { %vm12258_vm9 = vcmp.lt.s32.totalorder %v13814_v14, 16  ;;  %v2891_v35 = vadd.f32 %v2834_v31, %v13817_v56  ;;  %v3216_v5 = vadd.f32 %v3157_v26, %v2890_v16  ;;  %8924 = vmatmul.mubr.bf16.gmra.mxu1 %v4262_v55  ;;  %8976 = vmatmul.mubr.bf16.gmra.mxu0 %v4192_v22  ;;  %v4263_v58 = vpack.c.bf16 %v4238_v44, %v4237_v6  ;;  %v13822_v6 = vld [vmem:[#allocation91_spill] sm:$0xff]  ;;  %v13823_v14 = vld [vmem:[#allocation96_spill] sm:$0xff] }
 0x22a   : > { %v13818_v1 = vsel %vm11895_vm4, %v11846_v29, %v11745_v36  ;;  %v12273_v59 = vadd.s32 18, %v12119_v60  ;;  %v4102_v31 = vsel %vm12160_vm6, %v3337_v21, 0.0  ;;  %v3335_v16 = vmax.f32 %v3299_v39, 0.0  ;;  %v3160_v36 = vpop.f32.mrf.mxu0  ;;  %v4239_v29 = vld [vmem:[#allocation2 + $0xb1] sm:$0xff]  ;;  %v4240_v54 = vld [vmem:[#allocation2 + $0xb9] sm:$0xff]  ;;  %v4241_v2 = vld [vmem:[#allocation2 + $0xc1] sm:$0xff] }
 0x22b   : > { %vm12268_vm13 = vcmp.lt.s32.totalorder %v13818_v1, 16  ;;  %v3304_v47 = vadd.f32 %v11651_v8, %v3261_v62  ;;  %v4193_v32 = vpack.c.bf16 %v4168_v42, %v4167_v3  ;;  %4138 = vst [vmem:[#allocation2 + $0xeb] sm:$0xff] %v4102_v31  ;;  %v3259_v33 = vmul.f32 %v11609_v12, %v3216_v5  ;;  %8927 = vmatprep.mubr.bf16.mxu1 %v4263_v58  ;;  %v4170_v28 = vld [vmem:[#allocation2 + $0xb8] sm:$0xff]  ;;  %v4171_v22 = vld [vmem:[#allocation2 + $0xc0] sm:$0xff]  ;;  %v4242_v39 = vld [vmem:[#allocation2 + $0xc9] sm:$0xff] }
 0x22c   : > { %v3219_v63 = vadd.f32 %v8886_v17, %v2893_v37  ;;  %vm3820_vm14 = vcmp.ne.s32.totalorder %v12231_v18, 0  ;;  %vm3856_vm4 = vcmp.lt.s32.totalorder %v12231_v18, 0  ;;  %v4100_v48 = vsel %vm12185_vm5, %v3335_v16, 0.0  ;;  %v8889_v26 = vpop.f32.mrf.mxu0  ;;  %v4172_v62 = vld [vmem:[#allocation2 + $0xc8] sm:$0xff] }
 0x22d   : > { %v2896_v11 = vadd.f32 %v8851_v34, %v13821_v46  ;;  %v3340_v19 = vmax.f32 %v3304_v47, 0.0  ;;  %8979 = vmatprep.mubr.bf16.mxu0 %v4193_v32  ;;  %v3217_v27 = vadd.f32 %v3160_v36, %v2891_v35  ;;  %4136 = vst [vmem:[#allocation2 + $0xdb] sm:$0xff] %v4100_v48  ;;  %v2894_v61 = vadd.f32 %v2847_v30, %v13822_v6  ;;  %v2850_v35 = vpop.f32.mrf.mxu1  ;;  %vm12331_vm3 = vmand %vm3856_vm4, %vm3820_vm14 }
 0x22e   : > { %v3302_v25 = vadd.f32 %v11651_v8, %v3259_v33  ;;  %v3262_v37 = vmul.f32 %v11609_v12, %v3219_v63  ;;  %v4264_v55 = vpack.c.bf16 %v4240_v54, %v4239_v29  ;;  %v4194_v21 = vpack.c.bf16 %v4170_v28, %v4169_v57  ;;  %v3173_v10 = vpop.f32.mrf.mxu0 }
 0x22f   : > { %v4105_v34 = vsel %vm12215_vm1, %v3340_v19, 0.0  ;;  %v3260_v3 = vmul.f32 %v11609_v12, %v3217_v27  ;;  %v3222_v53 = vadd.f32 %v8889_v26, %v2896_v11  ;;  %v4265_v9 = vpack.c.bf16 %v4242_v39, %v4241_v2  ;;  %v9567_v12 = vld [vmem:[%s13269_s2] ss:$0 sm:$0xff]  ;;  %v4243_v33 = vld [vmem:[#allocation2 + $0xd1] sm:$0xff] }
 0x230   : > { %4141 = vst [vmem:[#allocation2 + $0x103] sm:$0xff] %v4105_v34  ;;  %v3338_v44 = vmax.f32 %v3302_v25, 0.0  ;;  %v3305_v30 = vadd.f32 %v11651_v8, %v3262_v37  ;;  %v4195_v49 = vpack.c.bf16 %v4172_v62, %v4171_v22  ;;  %v2897_v56 = vadd.f32 %v8852_v4, %v13823_v14  ;;  %v8890_v13 = vpop.f32.mrf.mxu0  ;;  %v4173_v63 = vld [vmem:[#allocation2 + $0xd0] sm:$0xff] }
 0x231   : > { %v3303_v5 = vadd.f32 %v11651_v8, %v3260_v3  ;;  %v3265_v50 = vmul.f32 %v9567_v12, %v3222_v53  ;;  %v3220_v58 = vadd.f32 %v3173_v10, %v2894_v61  ;;  %vm12311_vm2 = vcmp.lt.s32.totalorder %v3965_v24, 16  ;;  %8928 = vmatmul.mubr.bf16.gmra.mxu1 %v4264_v55  ;;  %8980 = vmatmul.mubr.bf16.gmra.mxu0 %v4194_v21 }
 0x232   : > { %v4103_v17 = vsel %vm12242_vm7, %v3338_v44, 0.0  ;;  %v3341_v1 = vmax.f32 %v3305_v30, 0.0  ;;  %vm12320_vm10 = vcmp.lt.s32.totalorder %v3963_v41, 16  ;;  %8931 = vmatprep.mubr.bf16.mxu1 %v4265_v9  ;;  %8983 = vmatprep.mubr.bf16.mxu0 %v4195_v49  ;;  %v3223_v43 = vadd.f32 %v8890_v13, %v2897_v56  ;;  %v3176_v47 = vpop.f32.mrf.mxu0  ;;  %v4246_v36 = vld [vmem:[#allocation2 + $0xe9] sm:$0xff] }
 0x233   : > { %4139 = vst [vmem:[#allocation2 + $0xf3] sm:$0xff] %v4103_v17  ;;  %v3339_v38 = vmax.f32 %v3303_v5, 0.0  ;;  %v3308_v52 = vadd.f32 %v9568_v0, %v3265_v50  ;;  %v3263_v24 = vmul.f32 %v9567_v12, %v3220_v58  ;;  %v2895_v41 = vadd.f32 %v2850_v35, %v12206_v15  ;;  %v4176_v28 = vld [vmem:[#allocation2 + $0xe8] sm:$0xff]  ;;  %v5071_v58 = vld [vmem:[#allocation2 + $0x1a] sm:$0xff] }
 0x234   : > { %v4106_v20 = vsel %vm12258_vm9, %v3341_v1, 0.0  ;;  %v3966_v16 = vsel %vm12300_vm15, %v12273_v59, %v12119_v60  ;;  %v3928_v32 = vadd.s32 18, %v12231_v18  ;;  %v3266_v46 = vmul.f32 %v9567_v12, %v3223_v43  ;;  %v4244_v11 = vld [vmem:[#allocation2 + $0xd9] sm:$0xff]  ;;  %v4245_v19 = vld [vmem:[#allocation2 + $0xe1] sm:$0xff] }
 0x235   : > { %4142 = vst [vmem:[#allocation2 + $0x10b] sm:$0xff] %v4106_v20  ;;  %v4104_v29 = vsel %vm12268_vm13, %v3339_v38, 0.0  ;;  %v3344_v48 = vmax.f32 %v3308_v52, 0.0  ;;  %v3306_v45 = vadd.f32 %v9568_v0, %v3263_v24  ;;  %v4174_v15 = vld [vmem:[#allocation2 + $0xd8] sm:$0xff]  ;;  %v3221_v4 = vadd.f32 %v3176_v47, %v2895_v41  ;;  %v4175_v54 = vld [vmem:[#allocation2 + $0xe0] sm:$0xff]  ;;  %v5073_v24 = vld [vmem:[#allocation2 + $0x2a] sm:$0xff] }
 0x236   : > { %4140 = vst [vmem:[#allocation2 + $0xfb] sm:$0xff] %v4104_v29  ;;  %v4266_v27 = vpack.c.bf16 %v4244_v11, %v4243_v33  ;;  %v4196_v60 = vpack.c.bf16 %v4174_v15, %v4173_v63  ;;  %v4267_v59 = vpack.c.bf16 %v4246_v36, %v4245_v19  ;;  %v3309_v61 = vadd.f32 %v9568_v0, %v3266_v46  ;;  %v4738_v5 = vld [vmem:[#allocation2 + $0x2] sm:$0xff]  ;;  %v5070_v38 = vld [vmem:[#allocation2 + $0x12] sm:$0xff]  ;;  %v5075_v43 = vld [vmem:[#allocation2 + $0x3a] sm:$0xff] }
 0x237   : > { %v4109_v2 = vsel %vm12311_vm2, %v3344_v48, 0.0  ;;  %v3342_v6 = vmax.f32 %v3306_v45, 0.0  ;;  %v4197_v7 = vpack.c.bf16 %v4176_v28, %v4175_v54  ;;  %vm4002_vm6 = vcmp.lt.s32.totalorder %v3966_v16, 16  ;;  %v5072_v52 = vld [vmem:[#allocation2 + $0x22] sm:$0xff]  ;;  %v5074_v20 = vld [vmem:[#allocation2 + $0x32] sm:$0xff]  ;;  %v5079_v36 = vld [vmem:[#allocation2 + $0x5a] sm:$0xff] }
 0x238   : > { %4145 = vst [vmem:[#allocation2 + $0x123] sm:$0xff] %v4109_v2  ;;  %v3264_v25 = vmul.f32 %v9567_v12, %v3221_v4  ;;  %v3964_v37 = vsel %vm12331_vm3, %v3928_v32, %v12231_v18  ;;  %v3345_v55 = vmax.f32 %v3309_v61, 0.0  ;;  %v4739_v12 = vld [vmem:[#allocation2 + $0xa] sm:$0xff]  ;;  %v5107_v40 = vpack.c.bf16 %v5073_v24, %v5072_v52  ;;  %v5076_v33 = vld [vmem:[#allocation2 + $0x42] sm:$0xff]  ;;  %v9533_v15 = vld [vmem:[%s13271_s4 + $0x118] sm:$0xff]  }
 0x239   : > { %v4107_v26 = vsel %vm12320_vm10, %v3342_v6, 0.0  ;;  %8932 = vmatmul.mubr.bf16.gmra.mxu1 %v4266_v27  ;;  %8984 = vmatmul.mubr.bf16.gmra.mxu0 %v4196_v60  ;;  %vm12354_vm0 = vcmp.lt.s32.totalorder %v3964_v37, 16  ;;  %v4774_v13 = vpack.c.bf16 %v4739_v12, %v4738_v5  ;;  %v9527_v41 = vld [vmem:[%s13271_s4 + $0x130] sm:$0xff]   ;;  %v5108_v47 = vpack.c.bf16 %v5075_v43, %v5074_v20  ;;  %v9529_v32 = vld [vmem:[%s13271_s4 + $0x128] sm:$0xff]   ;;  %v9532_v46 = vld [vmem:[%s13271_s4 + $0x160] sm:$0xff]  }
 0x23a   : > { %4143 = vst [vmem:[#allocation2 + $0x113] sm:$0xff] %v4107_v26  ;;  %v12352_v57 = vadd.f32 %v9568_v0, %v3264_v25  ;;  %v4110_v22 = vsel %vm4002_vm6, %v3345_v55, 0.0  ;;  %8935 = vmatprep.mubr.bf16.mxu1 %v4267_v59  ;;  %8987 = vmatprep.mubr.bf16.mxu0 %v4197_v7  ;;  %v4247_v18 = vld [vmem:[#allocation2 + $0xf1] sm:$0xff]  ;;  %v5106_v0 = vpack.c.bf16 %v5071_v58, %v5070_v38  ;;  %v9530_v63 = vld [vmem:[%s13271_s4 + $0x168] sm:$0xff]   ;;  %v5083_v4 = vld [vmem:[#allocation2 + $0x7a] sm:$0xff]  ;;  %vm13834_vm11 = vcmask 1041408  }
 0x23b   : > { %4146 = vst [vmem:[#allocation2 + $0x12b] sm:$0xff] %v4110_v22  ;;  %v4177_v53 = vld [vmem:[#allocation2 + $0xf0] sm:$0xff]  ;;  %v5080_v11 = vld [vmem:[#allocation2 + $0x62] sm:$0xff]  ;;  %v9534_v19 = vld [vmem:[%s13271_s4 + $0x158] sm:$0xff]   ;;  %vm9582_vm5 = vmmov 1   ;;  %vm13836_vm8 = vcmask 31744  }
 0x23c   : > { %v3343_v3 = vmax.f32 %v12352_v57, 0.0  ;;  %v4250_v9 = vld [vmem:[#allocation2 + $0x109] sm:$0xff]  ;;  %v5082_v59 = vld [vmem:[#allocation2 + $0x72] sm:$0xff]  ;;  %v5087_v25 = vld [vmem:[#allocation2 + $0x9a] sm:$0xff] }
 0x23d   : > { %v4248_v21 = vld [vmem:[#allocation2 + $0xf9] sm:$0xff]  ;;  %v4249_v62 = vld [vmem:[#allocation2 + $0x101] sm:$0xff]  ;;  %v9528_v16 = vld [vmem:[%s13271_s4 + $0x170] sm:$0xff]   ;;  %v5112_v54 = vpack.c.bf16 %v5083_v4, %v5082_v59 }
 0x23e   : > { %v4178_v39 = vld [vmem:[#allocation2 + $0xf8] sm:$0xff]  ;;  %v4108_v44 = vsel %vm12354_vm0, %v3343_v3, 0.0  ;;  %v4268_v30 = vpack.c.bf16 %v4248_v21, %v4247_v18  ;;  %v4179_v49 = vld [vmem:[#allocation2 + $0x100] sm:$0xff]  ;;  %v4180_v14 = vld [vmem:[#allocation2 + $0x108] sm:$0xff]  ;;  %v4269_v56 = vpack.c.bf16 %v4250_v9, %v4249_v62 }
 0x23f   : > { %v4198_v10 = vpack.c.bf16 %v4178_v39, %v4177_v53  ;;  %4144 = vst [vmem:[#allocation2 + $0x11b] sm:$0xff] %v4108_v44  ;;  %v4199_v35 = vpack.c.bf16 %v4180_v14, %v4179_v49  ;;  %v5077_v29 = vld [vmem:[#allocation2 + $0x4a] sm:$0xff]  ;;  %v5084_v6 = vld [vmem:[#allocation2 + $0x82] sm:$0xff]  ;;  %v5086_v55 = vld [vmem:[#allocation2 + $0x92] sm:$0xff] }
 0x240   : > { %v5109_v48 = vpack.c.bf16 %v5077_v29, %v5076_v33  ;;  %v5081_v27 = vld [vmem:[#allocation2 + $0x6a] sm:$0xff]  ;;  %v5114_v22 = vpack.c.bf16 %v5087_v25, %v5086_v55  ;;  %v9539_v18 = vld [vmem:[%s13271_s4 + $0x100] sm:$0xff]   ;;  %v12410_v39 = vld [vmem:[%s13271_s4 + $0x1b8] sm:$0xff]  }
 0x241   : > { %8936 = vmatmul.mubr.bf16.gmra.mxu1 %v4268_v30  ;;  %8988 = vmatmul.mubr.bf16.gmra.mxu0 %v4198_v10  ;;  %v4251_v50 = vld [vmem:[#allocation2 + $0x111] sm:$0xff]  ;;  %v5111_v60 = vpack.c.bf16 %v5081_v27, %v5080_v11  ;;  %v9537_v61 = vld [vmem:[%s13271_s4 + $0x108] sm:$0xff]   ;;  %v9540_v53 = vld [vmem:[%s13271_s4 + $0x140] sm:$0xff]  }
 0x242   : > { %8939 = vmatprep.mubr.bf16.mxu1 %v4269_v56  ;;  %8991 = vmatprep.mubr.bf16.mxu0 %v4199_v35  ;;  %v4181_v17 = vld [vmem:[#allocation2 + $0x110] sm:$0xff]  ;;  %v9538_v7 = vld [vmem:[%s13271_s4 + $0x148] sm:$0xff]   ;;  %v12415_v62 = vld [vmem:[%s13271_s4 + $0x1f8] sm:$0xff]  }
 0x243   : > { %v9535_v28 = vld [vmem:[%s13271_s4 + $0x110] sm:$0xff]   ;;  %v5088_v21 = vld [vmem:[#allocation2 + $0xa2] sm:$0xff]  ;;  %v5091_v44 = vld [vmem:[#allocation2 + $0xba] sm:$0xff] }
 0x244   : > { %v9536_v2 = vld [vmem:[%s13271_s4 + $0x150] sm:$0xff]   ;;  %v5092_v14 = vld [vmem:[#allocation2 + $0xc2] sm:$0xff]  ;;  %v5095_v56 = vld [vmem:[#allocation2 + $0xda] sm:$0xff] }
 0x245   : > { %v5085_v37 = vld [vmem:[#allocation2 + $0x8a] sm:$0xff]  ;;  %v5090_v9 = vld [vmem:[#allocation2 + $0xb2] sm:$0xff]  ;;  %v5096_v58 = vld [vmem:[#allocation2 + $0xe2] sm:$0xff] }
 0x246   : > { %v4252_v42 = vld [vmem:[#allocation2 + $0x119] sm:$0xff]  ;;  %v5113_v26 = vpack.c.bf16 %v5085_v37, %v5084_v6  ;;  %v5089_v30 = vld [vmem:[#allocation2 + $0xaa] sm:$0xff]  ;;  %v5116_v49 = vpack.c.bf16 %v5091_v44, %v5090_v9  ;;  %vm9569_vm1 = vmpackc.low %vm12354_vm0, %vm9582_vm5 }
 0x247   : > { %v4182_v1 = vld [vmem:[#allocation2 + $0x118] sm:$0xff]  ;;  %v4270_v8 = vpack.c.bf16 %v4252_v42, %v4251_v50  ;;  %v5115_v10 = vpack.c.bf16 %v5089_v30, %v5088_v21  ;;  %v5093_v35 = vld [vmem:[#allocation2 + $0xca] sm:$0xff]  ;;  %v9548_v44 = vld [vmem:[%s13271_s4 + $0x1e0] sm:$0xff]  }
 0x248   : > { %v4200_v31 = vpack.c.bf16 %v4182_v1, %v4181_v17  ;;  %v5117_v5 = vpack.c.bf16 %v5093_v35, %v5092_v14  ;;  %v5094_v12 = vld [vmem:[#allocation2 + $0xd2] sm:$0xff]  ;;  %v5099_v42 = vld [vmem:[#allocation2 + $0xfa] sm:$0xff]  ;;  %v5097_v17 = vld [vmem:[#allocation2 + $0xea] sm:$0xff] }
 0x249   : > { %8940 = vmatmul.mubr.bf16.gmra.mxu1 %v4270_v8  ;;  %v5118_v50 = vpack.c.bf16 %v5095_v56, %v5094_v12  ;;  %v5119_v1 = vpack.c.bf16 %v5097_v17, %v5096_v58  ;;  %v5098_v8 = vld [vmem:[#allocation2 + $0xf2] sm:$0xff]  ;;  %v5103_v38 = vld [vmem:[#allocation2 + $0x11a] sm:$0xff]  ;;  %v5740_v55 = vld [vmem:[#allocation2 + $0x44] sm:$0xff] }
 0x24a   : > { %8992 = vmatmul.mubr.bf16.gmra.mxu0 %v4200_v31  ;;  %9011 = vmatprep.mubr.bf16.mxu1 %v4774_v13  ;;  %v5120_v31 = vpack.c.bf16 %v5099_v42, %v5098_v8  ;;  %v5100_v13 = vld [vmem:[#allocation2 + $0x102] sm:$0xff]  ;;  %v5102_v24 = vld [vmem:[#allocation2 + $0x112] sm:$0xff]  ;;  %vm13835_vm12 = vmmov %vm13834_vm11 }
 0x24b   : > { %9063 = vmatprep.mubr.bf16.mxu0 %v5106_v0  ;;  %v5122_v43 = vpack.c.bf16 %v5103_v38, %v5102_v24  ;;  %v5403_v20 = vld [vmem:[#allocation2 + $0x1b] sm:$0xff]  ;;  %v5402_v33 = vld [vmem:[#allocation2 + $0x13] sm:$0xff]  ;;  %v5405_v29 = vld [vmem:[#allocation2 + $0x2b] sm:$0xff] }
 0x24c   : > { %v5739_v11 = vld [vmem:[#allocation2 + $0x3c] sm:$0xff]  ;;  %v5406_v4 = vld [vmem:[#allocation2 + $0x33] sm:$0xff]  ;;  %v5413_v30 = vld [vmem:[#allocation2 + $0x6b] sm:$0xff] }
 0x24d   : > { %v9544_v59 = vld [vmem:[%s13271_s4 + $0x1f0] sm:$0xff]   ;;  %v5743_v37 = vld [vmem:[#allocation2 + $0x5c] sm:$0xff]  ;;  %v5744_v12 = vld [vmem:[#allocation2 + $0x64] sm:$0xff] }
 0x24e   : > { %v5741_v6 = vld [vmem:[#allocation2 + $0x4c] sm:$0xff]  ;;  %v5742_v25 = vld [vmem:[#allocation2 + $0x54] sm:$0xff]  ;;  %v5747_v35 = vld [vmem:[#allocation2 + $0x7c] sm:$0xff] }
 0x24f   : > { %v9549_v9 = vld [vmem:[%s13271_s4 + $0x198] sm:$0xff]   ;;  %v9551_v8 = vld [vmem:[%s13271_s4 + $0x190] sm:$0xff]   ;;  %vm13837_vm7 = vmmov %vm13836_vm8 }
 0x250   : > { %v5415_v14 = vld [vmem:[#allocation2 + $0x7b] sm:$0xff]  ;;  %v5414_v42 = vld [vmem:[#allocation2 + $0x73] sm:$0xff]  ;;  %vm13838_vm9 = vmmov %vm13837_vm7 }
 0x251   : > { %9012 = vmatmul.mubr.bf16.vlgmr.msra.gmra.mxu1 %v5106_v0  ;;  %v5101_v0 = vld [vmem:[#allocation2 + $0x10a] sm:$0xff]  ;;  %v5746_v56 = vld [vmem:[#allocation2 + $0x74] sm:$0xff]  ;;  %v5444_v17 = vpack.c.bf16 %v5415_v14, %v5414_v42  ;;  %vm13839_vm13 = vmmov %vm13837_vm7 }
 0x252   : > { %9064 = vmatmul.mubr.bf16.vlgmr.msra.gmra.mxu0 %v5107_v40  ;;  %9100 = vmatpush3.bf16.msra.mxu1 %v12194_v51  ;;  %v5078_v51 = vld [vmem:[#allocation2 + $0x52] sm:$0xff]  ;;  %v5121_v52 = vpack.c.bf16 %v5101_v0, %v5100_v13  ;;  %v9553_v0 = vld [vmem:[%s13271_s4 + $0x188] sm:$0xff]   ;;  %v5419_v24 = vld [vmem:[#allocation2 + $0x9b] sm:$0xff] }
 0x253   : > { %9015 = vmatprep.mubr.bf16.mxu1 %v5107_v40  ;;  %9067 = vmatprep.mubr.bf16.mxu0 %v5108_v47  ;;  %v5110_v45 = vpack.c.bf16 %v5079_v36, %v5078_v51  ;;  %v5104_v40 = vld [vmem:[#allocation2 + $0x122] sm:$0xff]  ;;  %v5417_v13 = vld [vmem:[#allocation2 + $0x8b] sm:$0xff]  ;;  %v5762_v14 = vld [vmem:[#allocation2 + $0xf4] sm:$0xff] }
 0x254   : > { %9152 = vmatpush3.bf16.msra.mxu0 %v12199_v23  ;;  %9101 = vmatprep.subr.bf16.mxu1 %v9527_v41  ;;  %v9531_v23 = vld [vmem:[%s13271_s4 + $0x120] sm:$0xff]   ;;  %v5749_v38 = vld [vmem:[#allocation2 + $0x8c] sm:$0xff]  ;;  %vm13840_vm14 = vmmov %vm13837_vm7 }
 0x255   : > { %9153 = vmatprep.subr.bf16.mxu0 %v9528_v16  ;;  %v5404_v51 = vld [vmem:[#allocation2 + $0x23] sm:$0xff]  ;;  %vm13841_vm4 = vmmov %vm13837_vm7 }
 0x256   : > { %9102 = vmatpush3.bf16.msra.mxu1 %v9527_v41  ;;  %v5734_v41 = vld [vmem:[#allocation2 + $0x14] sm:$0xff]  ;;  %vm13842_vm15 = vmmov %vm13841_vm4 }
 0x257   : > { %9103 = vmatprep.subr.bf16.mxu1 %v9529_v32  ;;  %vm13843_vm2 = vmmov %vm13841_vm4 }
 0x258   : > { %9154 = vmatpush3.bf16.msra.mxu0 %v9528_v16  ;;  %v5735_v16 = vld [vmem:[#allocation2 + $0x1c] sm:$0xff]  ;;  %vm13844_vm10 = vmmov %vm13843_vm2 }
 0x259   : > { %9155 = vmatprep.subr.bf16.mxu0 %v9530_v63  ;;  %9016 = vmatmul.mubr.bf16.gmra.mxu1 %v5108_v47  ;;  %v5105_v47 = vld [vmem:[#allocation2 + $0x12a] sm:$0xff]  ;;  %v5770_v36 = vpack.c.bf16 %v5735_v16, %v5734_v41  ;;  %vm13845_vm3 = vmmov %vm13843_vm2 }
 0x25a   : > { %9068 = vmatmul.mubr.bf16.gmra.mxu0 %v5109_v48  ;;  %9019 = vmatprep.mubr.bf16.mxu1 %v5109_v48  ;;  %v5737_v48 = vld [vmem:[#allocation2 + $0x2c] sm:$0xff]  ;;  %v5748_v41 = vld [vmem:[#allocation2 + $0x84] sm:$0xff]  ;;  %vm13846_vm6 = vmmov %vm13843_vm2 }
 0x25b   : > { %9071 = vmatprep.mubr.bf16.mxu0 %v5110_v45  ;;  %9104 = vmatpush3.bf16.msra.mxu1 %v9529_v32  ;;  %v5123_v32 = vpack.c.bf16 %v5105_v47, %v5104_v40  ;;  %v5751_v40 = vld [vmem:[#allocation2 + $0x9c] sm:$0xff]  ;;  %v12475_v47 = vpack.c.bf16 %v5749_v38, %v5748_v41  ;;  %v5433_v41 = vld [vmem:[#allocation2 + $0x10b] sm:$0xff]  ;;  %vm13847_vm0 = vmmov %vm13843_vm2 }
 0x25c   : > { %9156 = vmatpush3.bf16.msra.mxu0 %v9530_v63  ;;  %9105 = vmatprep.subr.bf16.mxu1 %v9531_v23  ;;  %v5438_v63 = vpack.c.bf16 %v5403_v20, %v5402_v33  ;;  %v5416_v20 = vld [vmem:[#allocation2 + $0x83] sm:$0xff]  ;;  %vm13849_vm5 = vmmov %vm13847_vm0 }
 0x25d   : > { %9157 = vmatprep.subr.bf16.mxu0 %v9532_v46  ;;  %v5445_v16 = vpack.c.bf16 %v5417_v13, %v5416_v20 }
 0x25f   : > { %9106 = vmatpush3.bf16.msra.mxu1 %v9531_v23  ;;  %v5736_v23 = vld [vmem:[#allocation2 + $0x24] sm:$0xff] }
 0x260   : > { %9158 = vmatpush3.bf16.msra.mxu0 %v9532_v46  ;;  %9107 = vmatprep.subr.bf16.mxu1 %v9533_v15  ;;  %v5738_v46 = vld [vmem:[#allocation2 + $0x34] sm:$0xff] }
 0x261   : > { %9159 = vmatprep.subr.bf16.mxu0 %v9534_v19  ;;  %9020 = vmatmul.mubr.bf16.gmra.mxu1 %v5110_v45  ;;  %v5407_v45 = vld [vmem:[#allocation2 + $0x3b] sm:$0xff] }
 0x262   : > { %9072 = vmatmul.mubr.bf16.gmra.mxu0 %v5111_v60  ;;  %9023 = vmatprep.mubr.bf16.mxu1 %v5111_v60  ;;  %v5440_v27 = vpack.c.bf16 %v5407_v45, %v5406_v4  ;;  %v9543_v60 = vld [vmem:[%s13271_s4 + $0x1b0] sm:$0xff]   ;;  %v5423_v45 = vld [vmem:[#allocation2 + $0xbb] sm:$0xff]  ;;  %v5420_v4 = vld [vmem:[#allocation2 + $0xa3] sm:$0xff] }
 0x263   : > { %9075 = vmatprep.mubr.bf16.mxu0 %v5112_v54  ;;  %9108 = vmatpush3.bf16.msra.mxu1 %v9533_v15  ;;  %v5439_v15 = vpack.c.bf16 %v5405_v29, %v5404_v51  ;;  %v9556_v29 = vld [vmem:[%s13271_s4 + $0x1c0] sm:$0xff]   ;;  %v5753_v51 = vld [vmem:[#allocation2 + $0xac] sm:$0xff] }
 0x264   : > { %9160 = vmatpush3.bf16.msra.mxu0 %v9534_v19  ;;  %9109 = vmatprep.subr.bf16.mxu1 %v9535_v28  ;;  %v12419_v19 = vpack.c.bf16 %v5737_v48, %v5736_v23  ;;  %v5421_v48 = vld [vmem:[#allocation2 + $0xab] sm:$0xff]  ;;  %v12490_v23 = vld [vmem:[%s13271_s4 + $0x238] sm:$0xff]  }
 0x265   : > { %9161 = vmatprep.subr.bf16.mxu0 %v9536_v2 }
 0x267   : > { %9110 = vmatpush3.bf16.msra.mxu1 %v9535_v28  ;;  %v9545_v28 = vld [vmem:[%s13271_s4 + $0x1a8] sm:$0xff]  }
 0x268   : > { %9162 = vmatpush3.bf16.msra.mxu0 %v9536_v2  ;;  %9111 = vmatprep.subr.bf16.mxu1 %v9537_v61  ;;  %v5409_v2 = vld [vmem:[#allocation2 + $0x4b] sm:$0xff] }
 0x269   : > { %9163 = vmatprep.subr.bf16.mxu0 %v9538_v7  ;;  %9024 = vmatmul.mubr.bf16.gmra.mxu1 %v5112_v54  ;;  %v12428_v54 = vpack.c.bf16 %v5739_v11, %v5738_v46  ;;  %v5754_v46 = vld [vmem:[#allocation2 + $0xb4] sm:$0xff]  ;;  %v5755_v11 = vld [vmem:[#allocation2 + $0xbc] sm:$0xff] }
 0x26a   : > { %9076 = vmatmul.mubr.bf16.gmra.mxu0 %v5113_v26  ;;  %9027 = vmatprep.mubr.bf16.mxu1 %v5113_v26  ;;  %v5408_v26 = vld [vmem:[#allocation2 + $0x43] sm:$0xff] }
 0x26b   : > { %9079 = vmatprep.mubr.bf16.mxu0 %v5114_v22  ;;  %9112 = vmatpush3.bf16.msra.mxu1 %v9537_v61  ;;  %v9546_v61 = vld [vmem:[%s13271_s4 + $0x1e8] sm:$0xff]  }
 0x26c   : > { %9164 = vmatpush3.bf16.msra.mxu0 %v9538_v7  ;;  %9113 = vmatprep.subr.bf16.mxu1 %v9539_v18  ;;  %v5411_v7 = vld [vmem:[#allocation2 + $0x5b] sm:$0xff] }
 0x26d   : > { %9165 = vmatprep.subr.bf16.mxu0 %v9540_v53 }
 0x26f   : > { %9114 = vmatpush3.bf16.msra.mxu1 %v9539_v18  ;;  %v12439_v18 = vpack.c.bf16 %v5741_v6, %v5740_v55  ;;  %v12499_v6 = vpack.c.bf16 %v5755_v11, %v5754_v46  ;;  %v5424_v55 = vld [vmem:[#allocation2 + $0xc3] sm:$0xff] }
 0x270   : > { %9166 = vmatpush3.bf16.msra.mxu0 %v9540_v53  ;;  %9203 = vmatprep.subr.bf16.mxu1 %v12410_v39  ;;  %v5410_v53 = vld [vmem:[#allocation2 + $0x53] sm:$0xff]  ;;  %v5764_v46 = vld [vmem:[#allocation2 + $0x104] sm:$0xff] }
 0x271   : > { %9255 = vmatprep.subr.bf16.mxu0 %v12415_v62  ;;  %9028 = vmatmul.mubr.bf16.gmra.mxu1 %v5114_v22  ;;  %v5441_v22 = vpack.c.bf16 %v5409_v2, %v5408_v26  ;;  %v5442_v21 = vpack.c.bf16 %v5411_v7, %v5410_v53  ;;  %v5757_v7 = vld [vmem:[#allocation2 + $0xcc] sm:$0xff]  ;;  %v5759_v26 = vld [vmem:[#allocation2 + $0xdc] sm:$0xff] }
 0x272   : > { %9080 = vmatmul.mubr.bf16.gmra.mxu0 %v5115_v10  ;;  %9031 = vmatprep.mubr.bf16.mxu1 %v5115_v10  ;;  %v5745_v10 = vld [vmem:[#allocation2 + $0x6c] sm:$0xff] }
 0x273   : > { %9083 = vmatprep.mubr.bf16.mxu0 %v5116_v49  ;;  %v12457_v58 = vpack.c.bf16 %v5745_v10, %v5744_v12  ;;  %v5429_v10 = vld [vmem:[#allocation2 + $0xeb] sm:$0xff] }
 0x279   : > { %9032 = vmatmul.mubr.bf16.gmra.mxu1 %v5116_v49  ;;  %v9550_v49 = vld [vmem:[%s13271_s4 + $0x1d8] sm:$0xff]  }
 0x27a   : > { %9084 = vmatmul.mubr.bf16.gmra.mxu0 %v5117_v5  ;;  %9035 = vmatprep.mubr.bf16.mxu1 %v5117_v5  ;;  %v5412_v5 = vld [vmem:[#allocation2 + $0x63] sm:$0xff] }
 0x27b   : > { %9087 = vmatprep.mubr.bf16.mxu0 %v5118_v50 }
 0x281   : > { %9036 = vmatmul.mubr.bf16.gmra.mxu1 %v5118_v50  ;;  %v5443_v50 = vpack.c.bf16 %v5413_v30, %v5412_v5  ;;  %v5760_v5 = vld [vmem:[#allocation2 + $0xe4] sm:$0xff] }
 0x282   : > { %9088 = vmatmul.mubr.bf16.gmra.mxu0 %v5119_v1  ;;  %9039 = vmatprep.mubr.bf16.mxu1 %v5119_v1  ;;  %v12459_v1 = vpack.c.bf16 %v5747_v35, %v5746_v56  ;;  %v5763_v56 = vld [vmem:[#allocation2 + $0xfc] sm:$0xff] }
 0x283   : > { %9091 = vmatprep.mubr.bf16.mxu0 %v5120_v31  ;;  %v5428_v35 = vld [vmem:[#allocation2 + $0xe3] sm:$0xff]  ;;  %v12516_v38 = vpack.c.bf16 %v5763_v56, %v5762_v14 }
 0x284   : > { %v5451_v42 = vpack.c.bf16 %v5429_v10, %v5428_v35  ;;  %v5436_v14 = vld [vmem:[#allocation2 + $0x123] sm:$0xff] }
 0x289   : > { %9040 = vmatmul.mubr.bf16.gmra.mxu1 %v5120_v31  ;;  %v9552_v31 = vld [vmem:[%s13271_s4 + $0x1d0] sm:$0xff]  }
 0x28a   : > { %9092 = vmatmul.mubr.bf16.gmra.mxu0 %v5121_v52  ;;  %9043 = vmatprep.mubr.bf16.mxu1 %v5121_v52  ;;  %v9554_v52 = vld [vmem:[%s13271_s4 + $0x1c8] sm:$0xff]  }
 0x28b   : > { %9095 = vmatprep.mubr.bf16.mxu0 %v5122_v43 }
 0x291   : > { %9044 = vmatmul.mubr.bf16.gmra.mxu1 %v5122_v43  ;;  %v5750_v43 = vld [vmem:[#allocation2 + $0x94] sm:$0xff] }
 0x292   : > { %9096 = vmatmul.mubr.bf16.gmra.mxu0 %v5123_v32  ;;  %9115 = vmatprep.mubr.bf16.mxu1 %v5438_v63  ;;  %v5418_v32 = vld [vmem:[#allocation2 + $0x93] sm:$0xff]  ;;  %v12477_v63 = vpack.c.bf16 %v5751_v40, %v5750_v43 }
 0x293   : > { %9167 = vmatprep.mubr.bf16.mxu0 %v5770_v36  ;;  %v5446_v33 = vpack.c.bf16 %v5419_v24, %v5418_v32  ;;  %v9555_v36 = vld [vmem:[%s13271_s4 + $0x180] sm:$0xff]  }
 0x299   : > { %9116 = vmatmul.mubr.bf16.vlgmr.msra.gmra.mxu1 %v5439_v15  ;;  %v12495_v15 = vld [vmem:[%s13274_s7] sm:$0x3] }
 0x29a   : > { %9168 = vmatmul.mubr.bf16.vlgmr.msra.gmra.mxu0 %v12419_v19  ;;  %9204 = vmatpush3.bf16.msra.mxu1 %v12410_v39  ;;  %v12441_v39 = vpack.c.bf16 %v5743_v37, %v5742_v25  ;;  %v5427_v25 = vld [vmem:[#allocation2 + $0xdb] sm:$0xff] }
 0x29b   : > { %9119 = vmatprep.mubr.bf16.mxu1 %v5440_v27  ;;  %9171 = vmatprep.mubr.bf16.mxu0 %v12428_v54  ;;  %v5752_v27 = vld [vmem:[#allocation2 + $0xa4] sm:$0xff]  ;;  %v5758_v37 = vld [vmem:[#allocation2 + $0xd4] sm:$0xff] }
 0x29c   : > { %9256 = vmatpush3.bf16.msra.mxu0 %v12415_v62  ;;  %9205 = vmatprep.subr.bf16.mxu1 %v9543_v60  ;;  %v9547_v62 = vld [vmem:[%s13271_s4 + $0x1a0] sm:$0xff]   ;;  %v12508_v30 = vpack.c.bf16 %v5759_v26, %v5758_v37 }
 0x29d   : > { %9257 = vmatprep.subr.bf16.mxu0 %v9544_v59 }
 0x29e   : > { %9206 = vmatpush3.bf16.msra.mxu1 %v9543_v60  ;;  %v5447_v60 = vpack.c.bf16 %v5421_v48, %v5420_v4  ;;  %v5767_v48 = vld [vmem:[#allocation2 + $0x11c] sm:$0xff] }
 0x29f   : > { %9207 = vmatprep.subr.bf16.mxu1 %v9545_v28 }
 0x2a0   : > { %9258 = vmatpush3.bf16.msra.mxu0 %v9544_v59  ;;  %v12497_v59 = vpack.c.bf16 %v5753_v51, %v5752_v27 }
 0x2a1   : > { %9259 = vmatprep.subr.bf16.mxu0 %v9546_v61  ;;  %9120 = vmatmul.mubr.bf16.gmra.mxu1 %v5441_v22  ;;  %v5756_v22 = vld [vmem:[#allocation2 + $0xc4] sm:$0xff] }
 0x2a2   : > { %9172 = vmatmul.mubr.bf16.gmra.mxu0 %v12439_v18  ;;  %9123 = vmatprep.mubr.bf16.mxu1 %v5442_v21  ;;  %v12506_v21 = vpack.c.bf16 %v5757_v7, %v5756_v22 }
 0x2a3   : > { %9175 = vmatprep.mubr.bf16.mxu0 %v12441_v39  ;;  %9208 = vmatpush3.bf16.msra.mxu1 %v9545_v28  ;;  %v5422_v28 = vld [vmem:[#allocation2 + $0xb3] sm:$0xff] }
 0x2a4   : > { %9260 = vmatpush3.bf16.msra.mxu0 %v9546_v61  ;;  %9209 = vmatprep.subr.bf16.mxu1 %v9547_v62  ;;  %v5448_v2 = vpack.c.bf16 %v5423_v45, %v5422_v28  ;;  %v5425_v61 = vld [vmem:[#allocation2 + $0xcb] sm:$0xff]  ;;  %v5432_v45 = vld [vmem:[#allocation2 + $0x103] sm:$0xff] }
 0x2a5   : > { %9261 = vmatprep.subr.bf16.mxu0 %v9548_v44  ;;  %v5449_v53 = vpack.c.bf16 %v5425_v61, %v5424_v55  ;;  %v5453_v27 = vpack.c.bf16 %v5433_v41, %v5432_v45  ;;  %v6401_v41 = vld [vmem:[#allocation2 + $0x3d] sm:$0xff] }
 0x2a7   : > { %9210 = vmatpush3.bf16.msra.mxu1 %v9547_v62  ;;  %v5426_v62 = vld [vmem:[#allocation2 + $0xd3] sm:$0xff] }
 0x2a8   : > { %9262 = vmatpush3.bf16.msra.mxu0 %v9548_v44  ;;  %9211 = vmatprep.subr.bf16.mxu1 %v9549_v9  ;;  %v5450_v44 = vpack.c.bf16 %v5427_v25, %v5426_v62  ;;  %v5768_v62 = vld [vmem:[#allocation2 + $0x124] sm:$0xff] }
 0x2a9   : > { %9263 = vmatprep.subr.bf16.mxu0 %v9550_v49  ;;  %9124 = vmatmul.mubr.bf16.gmra.mxu1 %v5443_v50 }
 0x2aa   : > { %9176 = vmatmul.mubr.bf16.gmra.mxu0 %v12457_v58  ;;  %9127 = vmatprep.mubr.bf16.mxu1 %v5444_v17 }
 0x2ab   : > { %9179 = vmatprep.mubr.bf16.mxu0 %v12459_v1  ;;  %9212 = vmatpush3.bf16.msra.mxu1 %v9549_v9  ;;  %v5761_v9 = vld [vmem:[#allocation2 + $0xec] sm:$0xff] }
 0x2ac   : > { %9264 = vmatpush3.bf16.msra.mxu0 %v9550_v49  ;;  %9213 = vmatprep.subr.bf16.mxu1 %v9551_v8  ;;  %v5431_v49 = vld [vmem:[#allocation2 + $0xfb] sm:$0xff]  ;;  %v12512_v17 = vpack.c.bf16 %v5761_v9, %v5760_v5  ;;  %v6398_v5 = vld [vmem:[#allocation2 + $0x25] sm:$0xff] }
 0x2ad   : > { %9265 = vmatprep.subr.bf16.mxu0 %v9552_v31 }
 0x2af   : > { %9214 = vmatpush3.bf16.msra.mxu1 %v9551_v8  ;;  %v5430_v8 = vld [vmem:[#allocation2 + $0xf3] sm:$0xff] }
 0x2b0   : > { %9266 = vmatpush3.bf16.msra.mxu0 %v9552_v31  ;;  %9215 = vmatprep.subr.bf16.mxu1 %v9553_v0  ;;  %v5452_v13 = vpack.c.bf16 %v5431_v49, %v5430_v8  ;;  %v6399_v49 = vld [vmem:[#allocation2 + $0x2d] sm:$0xff] }
 0x2b1   : > { %9267 = vmatprep.subr.bf16.mxu0 %v9554_v52  ;;  %9128 = vmatmul.mubr.bf16.gmra.mxu1 %v5445_v16  ;;  %v5765_v16 = vld [vmem:[#allocation2 + $0x10c] sm:$0xff] }
 0x2b2   : > { %9180 = vmatmul.mubr.bf16.gmra.mxu0 %v12475_v47  ;;  %9131 = vmatprep.mubr.bf16.mxu1 %v5446_v33 }
 0x2b3   : > { %9183 = vmatprep.mubr.bf16.mxu0 %v12477_v63  ;;  %9216 = vmatpush3.bf16.msra.mxu1 %v9553_v0 }
 0x2b4   : > { %9268 = vmatpush3.bf16.msra.mxu0 %v9554_v52  ;;  %9217 = vmatprep.subr.bf16.mxu1 %v9555_v36 }
 0x2b5   : > { %9269 = vmatprep.subr.bf16.mxu0 %v9556_v29 }
 0x2b7   : > { %9218 = vmatpush3.bf16.msra.mxu1 %v9555_v36  ;;  %v5434_v36 = vld [vmem:[#allocation2 + $0x113] sm:$0xff] }
 0x2b8   : > { %9270 = vmatpush3.bf16.msra.mxu0 %v9556_v29  ;;  %9307 = vmatprep.subr.bf16.mxu1 %v12490_v23  ;;  %v5766_v29 = vld [vmem:[#allocation2 + $0x114] sm:$0xff]  ;;  %v9570_v25 = vpack.c.bf16 %v3343_v3, %v5434_v36 }
 0x2b9   : > { %9409 = vmatprep.subr.msk.bf16.mxu0 %vm13834_vm11, %v12495_v15  ;;  %9132 = vmatmul.mubr.bf16.gmra.mxu1 %v5447_v60  ;;  %v12526_v60 = vpack.c.bf16 %v5765_v16, %v5764_v46  ;;  %v6403_v36 = vld [vmem:[#allocation2 + $0x4d] sm:$0xff]  ;;  %vm13848_vm11 = vmmov %vm13847_vm0 }
 0x2ba   : > { %9184 = vmatmul.mubr.bf16.gmra.mxu0 %v12497_v59  ;;  %9135 = vmatprep.mubr.bf16.mxu1 %v5448_v2  ;;  %v12530_v2 = vpack.c.bf16 %v5767_v48, %v5766_v29 }
 0x2bb   : > { %9187 = vmatprep.mubr.bf16.mxu0 %v12499_v6  ;;  %v8909_v12 = vpop.f32.mrf.mxu1 }
 0x2bc   : > { %v8961_v50 = vpop.f32.mrf.mxu0 }
 0x2bd   : > { %v12514_v31 = vadd.f32 %v8961_v50, %v8909_v12  ;;  %v4370_v0 = vpop.f32.mrf.mxu1  ;;  %v6434_v50 = vpack.c.bf16 %v6399_v49, %v6398_v5  ;;  %v6406_v49 = vld [vmem:[#allocation2 + $0x65] sm:$0xff] }
 0x2be   : > { %v4595_v52 = vpop.f32.mrf.mxu0 }
 0x2bf   : > { %v12520_v24 = vadd.f32 %v4595_v52, %v4370_v0  ;;  %v8910_v43 = vpop.f32.mrf.mxu1 }
 0x2c0   : > { %v8962_v40 = vpop.f32.mrf.mxu0 }
 0x2c1   : > { %9136 = vmatmul.mubr.bf16.gmra.mxu1 %v5449_v53  ;;  %v12522_v20 = vadd.f32 %v8962_v40, %v8910_v43  ;;  %v4373_v32 = vpop.f32.mrf.mxu1  ;;  %v5437_v53 = vld [vmem:[#allocation2 + $0x12b] sm:$0xff]  ;;  %v6400_v40 = vld [vmem:[#allocation2 + $0x35] sm:$0xff] }
 0x2c2   : > { %9188 = vmatmul.mubr.bf16.gmra.mxu0 %v12506_v21  ;;  %9139 = vmatprep.mubr.bf16.mxu1 %v5450_v44  ;;  %v4598_v33 = vpop.f32.mrf.mxu0  ;;  %v5769_v44 = vld [vmem:[#allocation2 + $0x12c] sm:$0xff]  ;;  %v5455_v56 = vpack.c.bf16 %v5437_v53, %v5436_v14  ;;  %v6435_v45 = vpack.c.bf16 %v6401_v41, %v6400_v40  ;;  %v9561_v40 = vld [vmem:[%s13271_s4 + $0x218] sm:$0xff]  }
 0x2c3   : > { %9191 = vmatprep.mubr.bf16.mxu0 %v12508_v30  ;;  %v12524_v51 = vadd.f32 %v4598_v33, %v4373_v32  ;;  %v12544_v35 = vpack.c.bf16 %v5769_v44, %v5768_v62  ;;  %v6405_v62 = vld [vmem:[#allocation2 + $0x5d] sm:$0xff] }
 0x2c6   : > { %v8913_v11 = vpop.f32.mrf.mxu1 }
 0x2c7   : > { %v8965_v4 = vpop.f32.mrf.mxu0 }
 0x2c8   : > { %v12528_v28 = vadd.f32 %v8965_v4, %v8913_v11  ;;  %v4386_v61 = vpop.f32.mrf.mxu1  ;;  %v7294_v11 = vsel %vm13835_vm12, %v12495_v15, 0  ;;  %v9558_v4 = vld [vmem:[%s13271_s4 + $0x230] sm:$0xff]   ;;  %vm13851_vm12 = vmmov %vm13847_vm0 }
 0x2c9   : > { %9140 = vmatmul.mubr.bf16.gmra.mxu1 %v5451_v42  ;;  %v4611_v7 = vpop.f32.mrf.mxu0 }
 0x2ca   : > { %9192 = vmatmul.mubr.bf16.gmra.mxu0 %v12512_v17  ;;  %9143 = vmatprep.mubr.bf16.mxu1 %v5452_v13  ;;  %v12538_v37 = vadd.f32 %v4611_v7, %v4386_v61  ;;  %v8914_v26 = vpop.f32.mrf.mxu1 }
 0x2cb   : > { %9195 = vmatprep.mubr.bf16.mxu0 %v12516_v38  ;;  %v8966_v55 = vpop.f32.mrf.mxu0 }
 0x2cc   : > { %v12540_v22 = vadd.f32 %v8966_v55, %v8914_v26  ;;  %v4389_v10 = vpop.f32.mrf.mxu1  ;;  %v9559_v55 = vld [vmem:[%s13271_s4 + $0x228] sm:$0xff]  }
 0x2cd   : > { %v4614_v9 = vpop.f32.mrf.mxu0 }
 0x2ce   : > { %v12542_v34 = vadd.f32 %v4614_v9, %v4389_v10 }
 0x2d1   : > { %9144 = vmatmul.mubr.bf16.gmra.mxu1 %v5453_v27  ;;  %v8917_v57 = vpop.f32.mrf.mxu1 }
 0x2d2   : > { %9196 = vmatmul.mubr.bf16.gmra.mxu0 %v12526_v60  ;;  %9571 = vmatprep.mubr.msk.bf16.mxu1 %vm9569_vm1, %v9570_v25  ;;  %v8969_v3 = vpop.f32.mrf.mxu0  ;;  %vm13850_vm1 = vmmov %vm13847_vm0 }
 0x2d3   : > { %9199 = vmatprep.mubr.bf16.mxu0 %v12530_v2  ;;  %v12546_v12 = vadd.f32 %v8969_v3, %v8917_v57  ;;  %v4402_v42 = vpop.f32.mrf.mxu1  ;;  %v9560_v57 = vld [vmem:[%s13271_s4 + $0x220] sm:$0xff]  }
 0x2d4   : > { %v4627_v8 = vpop.f32.mrf.mxu0 }
 0x2d5   : > { %v12550_v13 = vadd.f32 %v4627_v8, %v4402_v42  ;;  %v8918_v0 = vpop.f32.mrf.mxu1 }
 0x2d6   : > { %v8970_v52 = vpop.f32.mrf.mxu0 }
 0x2d7   : > { %v12552_v43 = vadd.f32 %v8970_v52, %v8918_v0  ;;  %v4405_v16 = vpop.f32.mrf.mxu1  ;;  %v6408_v0 = vld [vmem:[#allocation2 + $0x75] sm:$0xff]  ;;  %v6409_v52 = vld [vmem:[#allocation2 + $0x7d] sm:$0xff] }
 0x2d8   : > { %v4630_v32 = vpop.f32.mrf.mxu0 }
 0x2d9   : > { %9148 = vmatmul.mubr.bf16.gmra.mxu1 %v5455_v56  ;;  %v12554_v33 = vadd.f32 %v4630_v32, %v4405_v16  ;;  %v6411_v16 = vld [vmem:[#allocation2 + $0x8d] sm:$0xff] }
 0x2da   : > { %9200 = vmatmul.mubr.bf16.gmra.mxu0 %v12544_v35  ;;  %9219 = vmatprep.mubr.bf16.mxu1 %v12419_v19  ;;  %v6402_v19 = vld [vmem:[#allocation2 + $0x45] sm:$0xff] }
 0x2db   : > { %9271 = vmatprep.mubr.bf16.mxu0 %v6434_v50  ;;  %v6436_v27 = vpack.c.bf16 %v6403_v36, %v6402_v19 }
 0x2dc   : > { %v8921_v29 = vpop.f32.mrf.mxu1 }
 0x2dd   : > { %v8973_v48 = vpop.f32.mrf.mxu0 }
 0x2de   : > { %v12556_v46 = vadd.f32 %v8973_v48, %v8921_v29  ;;  %v4418_v61 = vpop.f32.mrf.mxu1  ;;  %v6439_v29 = vpack.c.bf16 %v6409_v52, %v6408_v0  ;;  %v6410_v48 = vld [vmem:[#allocation2 + $0x85] sm:$0xff] }
 0x2df   : > { %v4643_v7 = vpop.f32.mrf.mxu0  ;;  %v6440_v19 = vpack.c.bf16 %v6411_v16, %v6410_v48  ;;  %v6417_v16 = vld [vmem:[#allocation2 + $0xbd] sm:$0xff] }
 0x2e0   : > { %v12566_v25 = vadd.f32 %v4643_v7, %v4418_v61  ;;  %v8922_v26 = vpop.f32.mrf.mxu1 }
 0x2e1   : > { %9220 = vmatmul.mubr.bf16.vlgmr.msra.gmra.mxu1 %v12428_v54  ;;  %v8974_v15 = vpop.f32.mrf.mxu0  ;;  %v6404_v54 = vld [vmem:[#allocation2 + $0x55] sm:$0xff] }
 0x2e2   : > { %9272 = vmatmul.mubr.bf16.vlgmr.msra.gmra.mxu0 %v6435_v45  ;;  %9308 = vmatpush3.bf16.msra.mxu1 %v12490_v23  ;;  %v12571_v53 = vadd.f32 %v8974_v15, %v8922_v26  ;;  %v4421_v44 = vpop.f32.mrf.mxu1  ;;  %v6407_v23 = vld [vmem:[#allocation2 + $0x6d] sm:$0xff] }
 0x2e3   : > { %9223 = vmatprep.mubr.bf16.mxu1 %v12439_v18  ;;  %9275 = vmatprep.mubr.bf16.mxu0 %v6436_v27  ;;  %v4646_v10 = vpop.f32.mrf.mxu0  ;;  %v6437_v18 = vpack.c.bf16 %v6405_v62, %v6404_v54  ;;  %v6438_v14 = vpack.c.bf16 %v6407_v23, %v6406_v49  ;;  %v6413_v54 = vld [vmem:[#allocation2 + $0x9d] sm:$0xff]  ;;  %v9563_v62 = vld [vmem:[%s13271_s4 + $0x208] sm:$0xff]  }
 0x2e4   : > { %9360 = vmatpush3.bf16.msra.mxu0 %v7294_v11  ;;  %9309 = vmatprep.subr.bf16.mxu1 %v9558_v4  ;;  %v12573_v9 = vadd.f32 %v4646_v10, %v4421_v44  ;;  %v9562_v11 = vld [vmem:[%s13271_s4 + $0x210] sm:$0xff]  }
 0x2e5   : > { %v6415_v10 = vld [vmem:[#allocation2 + $0xad] sm:$0xff] }
 0x2e6   : > { %9310 = vmatpush3.bf16.msra.mxu1 %v9558_v4 }
 0x2e7   : > { %9311 = vmatprep.subr.bf16.mxu1 %v9559_v55 }
 0x2e9   : > { %v8925_v3 = vpop.f32.mrf.mxu1  ;;  %v8977_v56 = vpop.f32.mrf.mxu0  ;;  %9224 = vmatmul.mubr.bf16.gmra.mxu1 %v12441_v39 }
 0x2ea   : > { %9276 = vmatmul.mubr.bf16.gmra.mxu0 %v6437_v18  ;;  %v12579_v5 = vadd.f32 %v8977_v56, %v8925_v3  ;;  %9227 = vmatprep.mubr.bf16.mxu1 %v12457_v58  ;;  %v9564_v56 = vld [vmem:[%s13271_s4 + $0x200] sm:$0xff]  }
 0x2eb   : > { %9279 = vmatprep.mubr.bf16.mxu0 %v6438_v14  ;;  %v4434_v50 = vpop.f32.mrf.mxu1  ;;  %v4659_v42 = vpop.f32.mrf.mxu0  ;;  %9312 = vmatpush3.bf16.msra.mxu1 %v9559_v55  ;;  %v6412_v55 = vld [vmem:[#allocation2 + $0x95] sm:$0xff]  ;;  %v6414_v14 = vld [vmem:[#allocation2 + $0xa5] sm:$0xff] }
 0x2ec   : > { %v12582_v8 = vadd.f32 %v4659_v42, %v4434_v50  ;;  %9313 = vmatprep.subr.bf16.mxu1 %v9560_v57  ;;  %v6441_v49 = vpack.c.bf16 %v6413_v54, %v6412_v55  ;;  %v6442_v3 = vpack.c.bf16 %v6415_v10, %v6414_v14  ;;  %v6421_v10 = vld [vmem:[#allocation2 + $0xdd] sm:$0xff] }
 0x2ed   : > { %v8926_v41 = vpop.f32.mrf.mxu1  ;;  %v8978_v39 = vpop.f32.mrf.mxu0 }
 0x2ee   : > { %v12587_v32 = vadd.f32 %v8978_v39, %v8926_v41  ;;  %v6416_v39 = vld [vmem:[#allocation2 + $0xb5] sm:$0xff] }
 0x2ef   : > { %v4437_v36 = vpop.f32.mrf.mxu1  ;;  %v4662_v58 = vpop.f32.mrf.mxu0  ;;  %9314 = vmatpush3.bf16.msra.mxu1 %v9560_v57 }
 0x2f0   : > { %v12589_v45 = vadd.f32 %v4662_v58, %v4437_v36  ;;  %9315 = vmatprep.subr.bf16.mxu1 %v9561_v40 }
 0x2f1   : > { %v8929_v4 = vpop.f32.mrf.mxu1  ;;  %v8981_v27 = vpop.f32.mrf.mxu0  ;;  %9228 = vmatmul.mubr.bf16.gmra.mxu1 %v12459_v1 }
 0x2f2   : > { %9280 = vmatmul.mubr.bf16.gmra.mxu0 %v6439_v29  ;;  %v12595_v61 = vadd.f32 %v8981_v27, %v8929_v4  ;;  %9231 = vmatprep.mubr.bf16.mxu1 %v12475_v47  ;;  %v6419_v29 = vld [vmem:[#allocation2 + $0xcd] sm:$0xff]  ;;  %v6418_v4 = vld [vmem:[#allocation2 + $0xc5] sm:$0xff] }
 0x2f3   : > { %9283 = vmatprep.mubr.bf16.mxu0 %v6440_v19  ;;  %v4450_v7 = vpop.f32.mrf.mxu1  ;;  %v4675_v26 = vpop.f32.mrf.mxu0  ;;  %9316 = vmatpush3.bf16.msra.mxu1 %v9561_v40  ;;  %v6444_v27 = vpack.c.bf16 %v6419_v29, %v6418_v4  ;;  %v6424_v29 = vld [vmem:[#allocation2 + $0xf5] sm:$0xff]  ;;  %v6427_v4 = vld [vmem:[#allocation2 + $0x10d] sm:$0xff] }
 0x2f4   : > { %v12598_v15 = vadd.f32 %v4675_v26, %v4450_v7  ;;  %9317 = vmatprep.subr.bf16.mxu1 %v9562_v11 }
 0x2f5   : > { %v8930_v44 = vpop.f32.mrf.mxu1  ;;  %v8982_v1 = vpop.f32.mrf.mxu0 }
 0x2f6   : > { %v12603_v23 = vadd.f32 %v8982_v1, %v8930_v44  ;;  %v6420_v1 = vld [vmem:[#allocation2 + $0xd5] sm:$0xff] }
 0x2f7   : > { %v4453_v18 = vpop.f32.mrf.mxu1  ;;  %v4678_v47 = vpop.f32.mrf.mxu0  ;;  %9318 = vmatpush3.bf16.msra.mxu1 %v9562_v11  ;;  %v6443_v11 = vpack.c.bf16 %v6417_v16, %v6416_v39 }
 0x2f8   : > { %v12605_v57 = vadd.f32 %v4678_v47, %v4453_v18  ;;  %9319 = vmatprep.subr.bf16.mxu1 %v9563_v62 }
 0x2f9   : > { %v8933_v50 = vpop.f32.mrf.mxu1  ;;  %v8985_v42 = vpop.f32.mrf.mxu0  ;;  %9232 = vmatmul.mubr.bf16.gmra.mxu1 %v12477_v63 }
 0x2fa   : > { %9284 = vmatmul.mubr.bf16.gmra.mxu0 %v6441_v49  ;;  %v12611_v0 = vadd.f32 %v8985_v42, %v8933_v50  ;;  %9235 = vmatprep.mubr.bf16.mxu1 %v12497_v59  ;;  %v6423_v49 = vld [vmem:[#allocation2 + $0xed] sm:$0xff]  ;;  %v6422_v50 = vld [vmem:[#allocation2 + $0xe5] sm:$0xff] }
 0x2fb   : > { %9287 = vmatprep.mubr.bf16.mxu0 %v6442_v3  ;;  %v4466_v52 = vpop.f32.mrf.mxu1  ;;  %v4691_v40 = vpop.f32.mrf.mxu0  ;;  %9320 = vmatpush3.bf16.msra.mxu1 %v9563_v62 }
 0x2fc   : > { %v12614_v41 = vadd.f32 %v4691_v40, %v4466_v52  ;;  %9321 = vmatprep.subr.bf16.mxu1 %v9564_v56  ;;  %v6446_v52 = vpack.c.bf16 %v6423_v49, %v6422_v50  ;;  %v6429_v50 = vld [vmem:[#allocation2 + $0x11d] sm:$0xff] }
 0x2fd   : > { %v8934_v36 = vpop.f32.mrf.mxu1  ;;  %v8986_v58 = vpop.f32.mrf.mxu0 }
 0x2fe   : > { %v12616_v48 = vadd.f32 %v8986_v58, %v8934_v36 }
 0x2ff   : > { %v4469_v63 = vpop.f32.mrf.mxu1  ;;  %v4694_v19 = vpop.f32.mrf.mxu0  ;;  %9322 = vmatpush3.bf16.msra.mxu1 %v9564_v56 }
 0x300   : > { %v12618_v59 = vadd.f32 %v4694_v19, %v4469_v63  ;;  %v6425_v63 = vld [vmem:[#allocation2 + $0xfd] sm:$0xff] }
 0x301   : > { %v8937_v7 = vpop.f32.mrf.mxu1  ;;  %v8989_v26 = vpop.f32.mrf.mxu0  ;;  %9236 = vmatmul.mubr.bf16.gmra.mxu1 %v12499_v6  ;;  %v6445_v6 = vpack.c.bf16 %v6421_v10, %v6420_v1 }
 0x302   : > { %9288 = vmatmul.mubr.bf16.gmra.mxu0 %v6443_v11  ;;  %v12621_v55 = vadd.f32 %v8989_v26, %v8937_v7  ;;  %9239 = vmatprep.mubr.bf16.mxu1 %v12506_v21 }
 0x303   : > { %9291 = vmatprep.mubr.bf16.mxu0 %v6444_v27  ;;  %v4482_v54 = vpop.f32.mrf.mxu1  ;;  %v4707_v62 = vpop.f32.mrf.mxu0 }
 0x304   : > { %v12624_v44 = vadd.f32 %v4707_v62, %v4482_v54  ;;  %v6426_v54 = vld [vmem:[#allocation2 + $0x105] sm:$0xff] }
 0x305   : > { %v8938_v18 = vpop.f32.mrf.mxu1  ;;  %v8990_v47 = vpop.f32.mrf.mxu0  ;;  %v6448_v1 = vpack.c.bf16 %v6427_v4, %v6426_v54  ;;  %v6432_v54 = vld [vmem:[#allocation2 + $0x135] sm:$0xff] }
 0x306   : > { %v12626_v14 = vadd.f32 %v8990_v47, %v8938_v18 }
 0x307   : > { %v4485_v3 = vpop.f32.mrf.mxu1  ;;  %v4710_v56 = vpop.f32.mrf.mxu0 }
 0x308   : > { %v12628_v42 = vadd.f32 %v4710_v56, %v4485_v3 }
 0x309   : > { %v8941_v21 = vpop.f32.mrf.mxu1  ;;  %9240 = vmatmul.mubr.bf16.gmra.mxu1 %v12508_v30  ;;  %v6447_v30 = vpack.c.bf16 %v6425_v63, %v6424_v29 }
 0x30a   : > { %v8993_v40 = vpop.f32.mrf.mxu0  ;;  %9292 = vmatmul.mubr.bf16.gmra.mxu0 %v6445_v6  ;;  %9243 = vmatprep.mubr.bf16.mxu1 %v12512_v17  ;;  %v6428_v6 = vld [vmem:[#allocation2 + $0x115] sm:$0xff] }
 0x30b   : > { %v12631_v39 = vadd.f32 %v8993_v40, %v8941_v21  ;;  %9295 = vmatprep.mubr.bf16.mxu0 %v6446_v52  ;;  %v4498_v16 = vpop.f32.mrf.mxu1  ;;  %v6430_v40 = vld [vmem:[#allocation2 + $0x125] sm:$0xff] }
 0x30c   : > { %v4723_v36 = vpop.f32.mrf.mxu0 }
 0x30d   : > { %v12634_v58 = vadd.f32 %v4723_v36, %v4498_v16  ;;  %v8942_v19 = vpop.f32.mrf.mxu1  ;;  %v6431_v16 = vld [vmem:[#allocation2 + $0x12d] sm:$0xff] }
 0x30e   : > { %v8994_v11 = vpop.f32.mrf.mxu0 }
 0x30f   : > { %v12636_v27 = vadd.f32 %v8994_v11, %v8942_v19  ;;  %v4501_v7 = vpop.f32.mrf.mxu1  ;;  %v6450_v11 = vpack.c.bf16 %v6431_v16, %v6430_v40 }
 0x310   : > { %v4726_v26 = vpop.f32.mrf.mxu0 }
 0x311   : > { %v12638_v62 = vadd.f32 %v4726_v26, %v4501_v7  ;;  %v9013_v17 = vpop.f32.mrf.mxu1  ;;  %9244 = vmatmul.mubr.bf16.gmra.mxu1 %v12516_v38  ;;  %v6100_v7 = vld [vmem:[#allocation2 + $0x134] sm:$0xff] }
 0x312   : > { %v9065_v10 = vpop.f32.mrf.mxu0  ;;  %9296 = vmatmul.mubr.bf16.gmra.mxu0 %v6447_v30  ;;  %v5036_v18 = vadd.f32 %v9013_v17, %v12514_v31  ;;  %9247 = vmatprep.mubr.bf16.mxu1 %v12526_v60  ;;  %v6449_v60 = vpack.c.bf16 %v6429_v50, %v6428_v6  ;;  %v6101_v30 = vld [vmem:[#allocation2 + $0x13c] sm:$0xff] }
 0x313   : > { %9299 = vmatprep.mubr.bf16.mxu0 %v6448_v1  ;;  %v4891_v47 = vpop.f32.mrf.mxu1  ;;  %v6433_v1 = vld [vmem:[#allocation2 + $0x13d] sm:$0xff]  ;;  %v6119_v6 = vpack.c.bf16 %v6101_v30, %v6100_v7  ;;  %v7188_v30 = vld [vmem:[%s9666_s24 + $0x33] sm:$0xff] }
 0x314   : > { %v5223_v49 = vpop.f32.mrf.mxu0  ;;  %v12643_v3 = vadd.f32 %v9065_v10, %v5036_v18  ;;  %v5034_v56 = vadd.f32 %v4891_v47, %v12520_v24  ;;  %v7184_v10 = vld [vmem:[%s9666_s24 + $0x13] sm:$0xff]  ;;  %v7185_v18 = vld [vmem:[%s9666_s24 + $0x1b] sm:$0xff]  ;;  %v6451_v50 = vpack.c.bf16 %v6433_v1, %v6432_v54 }
 0x315   : > { %v9014_v52 = vpop.f32.mrf.mxu1  ;;  %v7189_v54 = vld [vmem:[%s9666_s24 + $0x3b] sm:$0xff] }
 0x316   : > { %v9066_v21 = vpop.f32.mrf.mxu0  ;;  %v12646_v36 = vadd.f32 %v5223_v49, %v5034_v56  ;;  %v5037_v38 = vadd.f32 %v9014_v52, %v12522_v20  ;;  %v6731_v52 = vld [vmem:[#allocation2 + $0x2e] sm:$0xff] }
 0x317   : > { %v4894_v31 = vpop.f32.mrf.mxu1 }
 0x318   : > { %v5226_v29 = vpop.f32.mrf.mxu0  ;;  %v12649_v63 = vadd.f32 %v9066_v21, %v5037_v38  ;;  %v5035_v19 = vadd.f32 %v4894_v31, %v12524_v51  ;;  %v7220_v21 = vpack.c.bf16 %v7185_v18, %v7184_v10  ;;  %v6730_v38 = vld [vmem:[#allocation2 + $0x26] sm:$0xff] }
 0x319   : > { %v9017_v24 = vpop.f32.mrf.mxu1  ;;  %9248 = vmatmul.mubr.bf16.gmra.mxu1 %v12530_v2 }
 0x31a   : > { %v9069_v4 = vpop.f32.mrf.mxu0  ;;  %9300 = vmatmul.mubr.bf16.gmra.mxu0 %v6449_v60  ;;  %v12653_v26 = vadd.f32 %v5226_v29, %v5035_v19  ;;  %v5040_v20 = vadd.f32 %v9017_v24, %v12528_v28  ;;  %9251 = vmatprep.mubr.bf16.mxu1 %v12544_v35  ;;  %v6766_v29 = vpack.c.bf16 %v6731_v52, %v6730_v38  ;;  %v7186_v24 = vld [vmem:[%s9666_s24 + $0x23] sm:$0xff] }
 0x31b   : > { %9303 = vmatprep.mubr.bf16.mxu0 %v6450_v11  ;;  %v4907_v51 = vpop.f32.mrf.mxu1 }
 0x31c   : > { %v5239_v17 = vpop.f32.mrf.mxu0  ;;  %v12659_v47 = vadd.f32 %v9069_v4, %v5040_v20  ;;  %v5038_v2 = vadd.f32 %v4907_v51, %v12538_v37  ;;  %v7187_v4 = vld [vmem:[%s9666_s24 + $0x2b] sm:$0xff]  ;;  %v6732_v51 = vld [vmem:[#allocation2 + $0x36] sm:$0xff] }
 0x31d   : > { %v9018_v49 = vpop.f32.mrf.mxu1 }
 0x31e   : > { %v9070_v56 = vpop.f32.mrf.mxu0  ;;  %v12662_v28 = vadd.f32 %v5239_v17, %v5038_v2  ;;  %v5041_v35 = vadd.f32 %v9018_v49, %v12540_v22  ;;  %v6733_v17 = vld [vmem:[#allocation2 + $0x3e] sm:$0xff]  ;;  %v7221_v2 = vpack.c.bf16 %v7187_v4, %v7186_v24  ;;  %v6735_v49 = vld [vmem:[#allocation2 + $0x4e] sm:$0xff] }
 0x31f   : > { %v4910_v40 = vpop.f32.mrf.mxu1  ;;  %v7192_v4 = vld [vmem:[%s9666_s24 + $0x53] sm:$0xff] }
 0x320   : > { %v5242_v16 = vpop.f32.mrf.mxu0  ;;  %v12665_v31 = vadd.f32 %v9070_v56, %v5041_v35  ;;  %v5039_v37 = vadd.f32 %v4910_v40, %v12542_v34  ;;  %v6767_v35 = vpack.c.bf16 %v6733_v17, %v6732_v51 }
 0x321   : > { %v9021_v60 = vpop.f32.mrf.mxu1  ;;  %9252 = vmatmul.mubr.bf16.gmra.mxu1 %v6119_v6  ;;  %v7222_v6 = vpack.c.bf16 %v7189_v54, %v7188_v30  ;;  %v6736_v30 = vld [vmem:[#allocation2 + $0x56] sm:$0xff]  ;;  %v6737_v54 = vld [vmem:[#allocation2 + $0x5e] sm:$0xff] }
 0x322   : > { %v9073_v19 = vpop.f32.mrf.mxu0  ;;  %9304 = vmatmul.mubr.bf16.gmra.mxu0 %v6451_v50  ;;  %v12668_v11 = vadd.f32 %v5242_v16, %v5039_v37  ;;  %v5044_v22 = vadd.f32 %v9021_v60, %v12546_v12  ;;  %9323 = vmatprep.mubr.bf16.mxu1 %v6766_v29  ;;  %v7190_v60 = vld [vmem:[%s9666_s24 + $0x43] sm:$0xff] }
 0x323   : > { %9361 = vmatprep.mubr.msk.bf16.mxu0 %vm13836_vm8, %v7220_v21  ;;  %v4923_v7 = vpop.f32.mrf.mxu1  ;;  %v6734_v21 = vld [vmem:[#allocation2 + $0x46] sm:$0xff]  ;;  %vm13852_vm8 = vmmov %vm13847_vm0 }
 0x324   : > { %v5255_v20 = vpop.f32.mrf.mxu0  ;;  %v12676_v1 = vadd.f32 %v9073_v19, %v5044_v22  ;;  %v5042_v34 = vadd.f32 %v4923_v7, %v12550_v13  ;;  %v6768_v16 = vpack.c.bf16 %v6735_v49, %v6734_v21  ;;  %v7191_v19 = vld [vmem:[%s9666_s24 + $0x4b] sm:$0xff]  ;;  %v7193_v7 = vld [vmem:[%s9666_s24 + $0x5b] sm:$0xff] }
 0x325   : > { %v9022_v10 = vpop.f32.mrf.mxu1  ;;  %v7223_v17 = vpack.c.bf16 %v7191_v19, %v7190_v60  ;;  %v7196_v19 = vld [vmem:[%s9666_s24 + $0x73] sm:$0xff] }
 0x326   : > { %v9074_v18 = vpop.f32.mrf.mxu0  ;;  %v12679_v12 = vadd.f32 %v5255_v20, %v5042_v34  ;;  %v5045_v56 = vadd.f32 %v9022_v10, %v12552_v43  ;;  %v6739_v10 = vld [vmem:[#allocation2 + $0x6e] sm:$0xff] }
 0x327   : > { %v4926_v50 = vpop.f32.mrf.mxu1 }
 0x328   : > { %v5258_v52 = vpop.f32.mrf.mxu0  ;;  %v12682_v40 = vadd.f32 %v9074_v18, %v5045_v56  ;;  %v5043_v13 = vadd.f32 %v4926_v50, %v12554_v33  ;;  %v6738_v50 = vld [vmem:[#allocation2 + $0x66] sm:$0xff] }
 0x329   : > { %v9025_v38 = vpop.f32.mrf.mxu1  ;;  %9324 = vmatmul.mubr.bf16.vlgmr.msra.gmra.mxu1 %v6767_v35  ;;  %v6770_v35 = vpack.c.bf16 %v6739_v10, %v6738_v50 }
 0x32a   : > { %v9077_v37 = vpop.f32.mrf.mxu0  ;;  %9362 = vmatmul.mubr.msk.bf16.vlgmr.msra.gmra.mxu0 %vm13837_vm7, %v7221_v2  ;;  %v12686_v43 = vadd.f32 %v5258_v52, %v5043_v13  ;;  %v5048_v29 = vadd.f32 %v9025_v38, %v12556_v46  ;;  %9327 = vmatprep.mubr.bf16.mxu1 %v6768_v16  ;;  %v7224_v2 = vpack.c.bf16 %v7193_v7, %v7192_v4  ;;  %v7194_v38 = vld [vmem:[%s9666_s24 + $0x63] sm:$0xff]  ;;  %v6740_v4 = vld [vmem:[#allocation2 + $0x76] sm:$0xff]  ;;  %vm13853_vm7 = vmmov %vm13847_vm0 }
 0x32b   : > { %9365 = vmatprep.mubr.msk.bf16.mxu0 %vm13838_vm9, %v7222_v6  ;;  %v4939_v22 = vpop.f32.mrf.mxu1  ;;  %v6769_v6 = vpack.c.bf16 %v6737_v54, %v6736_v30  ;;  %v6741_v7 = vld [vmem:[#allocation2 + $0x7e] sm:$0xff] }
 0x32c   : > { %v5271_v24 = vpop.f32.mrf.mxu0  ;;  %v12694_v33 = vadd.f32 %v9077_v37, %v5048_v29  ;;  %v5046_v20 = vadd.f32 %v4939_v22, %v12566_v25  ;;  %v7195_v37 = vld [vmem:[%s9666_s24 + $0x6b] sm:$0xff]  ;;  %v7197_v22 = vld [vmem:[%s9666_s24 + $0x7b] sm:$0xff] }
 0x32d   : > { %v9026_v34 = vpop.f32.mrf.mxu1  ;;  %v7225_v54 = vpack.c.bf16 %v7195_v37, %v7194_v38  ;;  %v7200_v37 = vld [vmem:[%s9666_s24 + $0x93] sm:$0xff] }
 0x32e   : > { %v9078_v51 = vpop.f32.mrf.mxu0  ;;  %v12697_v46 = vadd.f32 %v5271_v24, %v5046_v20  ;;  %v5049_v18 = vadd.f32 %v9026_v34, %v12571_v53  ;;  %v6743_v34 = vld [vmem:[#allocation2 + $0x8e] sm:$0xff] }
 0x32f   : > { %v4942_v49 = vpop.f32.mrf.mxu1 }
 0x330   : > { %v5274_v56 = vpop.f32.mrf.mxu0  ;;  %v12700_v52 = vadd.f32 %v9078_v51, %v5049_v18  ;;  %v5047_v25 = vadd.f32 %v4942_v49, %v12573_v9  ;;  %v6742_v49 = vld [vmem:[#allocation2 + $0x86] sm:$0xff] }
 0x331   : > { %v9029_v21 = vpop.f32.mrf.mxu1  ;;  %9328 = vmatmul.mubr.bf16.gmra.mxu1 %v6769_v6  ;;  %v6772_v6 = vpack.c.bf16 %v6743_v34, %v6742_v49 }
 0x332   : > { %v9081_v13 = vpop.f32.mrf.mxu0  ;;  %9366 = vmatmul.mubr.msk.bf16.gmra.mxu0 %vm13839_vm13, %v7223_v17  ;;  %v12704_v53 = vadd.f32 %v5274_v56, %v5047_v25  ;;  %v5052_v16 = vadd.f32 %v9029_v21, %v12579_v5  ;;  %9331 = vmatprep.mubr.bf16.mxu1 %v6770_v35  ;;  %v7226_v17 = vpack.c.bf16 %v7197_v22, %v7196_v19  ;;  %v7198_v21 = vld [vmem:[%s9666_s24 + $0x83] sm:$0xff]  ;;  %v6744_v19 = vld [vmem:[#allocation2 + $0x96] sm:$0xff] }
 0x333   : > { %9369 = vmatprep.mubr.msk.bf16.mxu0 %vm13840_vm14, %v7224_v2  ;;  %v4955_v29 = vpop.f32.mrf.mxu1  ;;  %v6771_v2 = vpack.c.bf16 %v6741_v7, %v6740_v4  ;;  %v6745_v22 = vld [vmem:[#allocation2 + $0x9e] sm:$0xff] }
 0x334   : > { %v5287_v60 = vpop.f32.mrf.mxu0  ;;  %v12712_v9 = vadd.f32 %v9081_v13, %v5052_v16  ;;  %v5050_v24 = vadd.f32 %v4955_v29, %v12582_v8  ;;  %v7199_v13 = vld [vmem:[%s9666_s24 + $0x8b] sm:$0xff]  ;;  %v7201_v29 = vld [vmem:[%s9666_s24 + $0x9b] sm:$0xff] }
 0x335   : > { %v9030_v20 = vpop.f32.mrf.mxu1  ;;  %v7227_v7 = vpack.c.bf16 %v7199_v13, %v7198_v21  ;;  %v7204_v13 = vld [vmem:[%s9666_s24 + $0xb3] sm:$0xff] }
 0x336   : > { %v9082_v30 = vpop.f32.mrf.mxu0  ;;  %v12715_v5 = vadd.f32 %v5287_v60, %v5050_v24  ;;  %v5053_v51 = vadd.f32 %v9030_v20, %v12587_v32  ;;  %v6747_v20 = vld [vmem:[#allocation2 + $0xae] sm:$0xff] }
 0x337   : > { %v4958_v10 = vpop.f32.mrf.mxu1 }
 0x338   : > { %v5290_v18 = vpop.f32.mrf.mxu0  ;;  %v12718_v56 = vadd.f32 %v9082_v30, %v5053_v51  ;;  %v5051_v8 = vadd.f32 %v4958_v10, %v12589_v45  ;;  %v6746_v10 = vld [vmem:[#allocation2 + $0xa6] sm:$0xff] }
 0x339   : > { %v9033_v50 = vpop.f32.mrf.mxu1  ;;  %9332 = vmatmul.mubr.bf16.gmra.mxu1 %v6771_v2  ;;  %v6774_v2 = vpack.c.bf16 %v6747_v20, %v6746_v10 }
 0x33a   : > { %v9085_v25 = vpop.f32.mrf.mxu0  ;;  %9370 = vmatmul.mubr.msk.bf16.gmra.mxu0 %vm13841_vm4, %v7225_v54  ;;  %v12722_v32 = vadd.f32 %v5290_v18, %v5051_v8  ;;  %v5056_v35 = vadd.f32 %v9033_v50, %v12595_v61  ;;  %9335 = vmatprep.mubr.bf16.mxu1 %v6772_v6  ;;  %v7228_v54 = vpack.c.bf16 %v7201_v29, %v7200_v37  ;;  %v7202_v50 = vld [vmem:[%s9666_s24 + $0xa3] sm:$0xff]  ;;  %v6748_v37 = vld [vmem:[#allocation2 + $0xb6] sm:$0xff] }
 0x33b   : > { %9373 = vmatprep.mubr.msk.bf16.mxu0 %vm13842_vm15, %v7226_v17  ;;  %v4971_v16 = vpop.f32.mrf.mxu1  ;;  %v6773_v17 = vpack.c.bf16 %v6745_v22, %v6744_v19  ;;  %v6749_v29 = vld [vmem:[#allocation2 + $0xbe] sm:$0xff] }
 0x33c   : > { %v5303_v38 = vpop.f32.mrf.mxu0  ;;  %v12730_v45 = vadd.f32 %v9085_v25, %v5056_v35  ;;  %v5054_v60 = vadd.f32 %v4971_v16, %v12598_v15  ;;  %v7203_v25 = vld [vmem:[%s9666_s24 + $0xab] sm:$0xff]  ;;  %v7205_v16 = vld [vmem:[%s9666_s24 + $0xbb] sm:$0xff] }
 0x33d   : > { %v9034_v24 = vpop.f32.mrf.mxu1  ;;  %v7229_v22 = vpack.c.bf16 %v7203_v25, %v7202_v50  ;;  %v7208_v25 = vld [vmem:[%s9666_s24 + $0xd3] sm:$0xff] }
 0x33e   : > { %v9086_v4 = vpop.f32.mrf.mxu0  ;;  %v12733_v61 = vadd.f32 %v5303_v38, %v5054_v60  ;;  %v5057_v30 = vadd.f32 %v9034_v24, %v12603_v23  ;;  %v6751_v24 = vld [vmem:[#allocation2 + $0xce] sm:$0xff] }
 0x33f   : > { %v4974_v34 = vpop.f32.mrf.mxu1 }
 0x340   : > { %v5306_v51 = vpop.f32.mrf.mxu0  ;;  %v12736_v18 = vadd.f32 %v9086_v4, %v5057_v30  ;;  %v5055_v15 = vadd.f32 %v4974_v34, %v12605_v57  ;;  %v6750_v34 = vld [vmem:[#allocation2 + $0xc6] sm:$0xff] }
 0x341   : > { %v9037_v49 = vpop.f32.mrf.mxu1  ;;  %9336 = vmatmul.mubr.bf16.gmra.mxu1 %v6773_v17  ;;  %v6776_v17 = vpack.c.bf16 %v6751_v24, %v6750_v34 }
 0x342   : > { %v9089_v8 = vpop.f32.mrf.mxu0  ;;  %9374 = vmatmul.mubr.msk.bf16.gmra.mxu0 %vm13843_vm2, %v7227_v7  ;;  %v12740_v23 = vadd.f32 %v5306_v51, %v5055_v15  ;;  %v5060_v6 = vadd.f32 %v9037_v49, %v12611_v0  ;;  %9339 = vmatprep.mubr.bf16.mxu1 %v6774_v2  ;;  %v7230_v7 = vpack.c.bf16 %v7205_v16, %v7204_v13  ;;  %v7206_v49 = vld [vmem:[%s9666_s24 + $0xc3] sm:$0xff]  ;;  %v6752_v13 = vld [vmem:[#allocation2 + $0xd6] sm:$0xff] }
 0x343   : > { %9377 = vmatprep.mubr.msk.bf16.mxu0 %vm13844_vm10, %v7228_v54  ;;  %v4987_v35 = vpop.f32.mrf.mxu1  ;;  %v6775_v54 = vpack.c.bf16 %v6749_v29, %v6748_v37  ;;  %v6753_v16 = vld [vmem:[#allocation2 + $0xde] sm:$0xff] }
 0x344   : > { %v5319_v21 = vpop.f32.mrf.mxu0  ;;  %v12748_v57 = vadd.f32 %v9089_v8, %v5060_v6  ;;  %v5058_v38 = vadd.f32 %v4987_v35, %v12614_v41  ;;  %v7207_v8 = vld [vmem:[%s9666_s24 + $0xcb] sm:$0xff]  ;;  %v7209_v35 = vld [vmem:[%s9666_s24 + $0xdb] sm:$0xff] }
 0x345   : > { %v9038_v60 = vpop.f32.mrf.mxu1  ;;  %v7231_v29 = vpack.c.bf16 %v7207_v8, %v7206_v49  ;;  %v7212_v8 = vld [vmem:[%s9666_s24 + $0xf3] sm:$0xff] }
 0x346   : > { %v9090_v19 = vpop.f32.mrf.mxu0  ;;  %v12751_v0 = vadd.f32 %v5319_v21, %v5058_v38  ;;  %v5061_v4 = vadd.f32 %v9038_v60, %v12616_v48  ;;  %v6755_v60 = vld [vmem:[#allocation2 + $0xee] sm:$0xff] }
 0x347   : > { %v4990_v20 = vpop.f32.mrf.mxu1 }
 0x348   : > { %v5322_v30 = vpop.f32.mrf.mxu0  ;;  %v12754_v51 = vadd.f32 %v9090_v19, %v5061_v4  ;;  %v5059_v41 = vadd.f32 %v4990_v20, %v12618_v59  ;;  %v6754_v20 = vld [vmem:[#allocation2 + $0xe6] sm:$0xff] }
 0x349   : > { %v9041_v10 = vpop.f32.mrf.mxu1  ;;  %9340 = vmatmul.mubr.bf16.gmra.mxu1 %v6775_v54  ;;  %v6778_v54 = vpack.c.bf16 %v6755_v60, %v6754_v20 }
 0x34a   : > { %v9093_v15 = vpop.f32.mrf.mxu0  ;;  %9378 = vmatmul.mubr.msk.bf16.gmra.mxu0 %vm13845_vm3, %v7229_v22  ;;  %v12758_v48 = vadd.f32 %v5322_v30, %v5059_v41  ;;  %v5064_v2 = vadd.f32 %v9041_v10, %v12621_v55  ;;  %9343 = vmatprep.mubr.bf16.mxu1 %v6776_v17  ;;  %v7232_v22 = vpack.c.bf16 %v7209_v35, %v7208_v25  ;;  %v7210_v10 = vld [vmem:[%s9666_s24 + $0xe3] sm:$0xff]  ;;  %v6756_v25 = vld [vmem:[#allocation2 + $0xf6] sm:$0xff] }
 0x34b   : > { %9381 = vmatprep.mubr.msk.bf16.mxu0 %vm13846_vm6, %v7230_v7  ;;  %v5003_v6 = vpop.f32.mrf.mxu1  ;;  %v6777_v7 = vpack.c.bf16 %v6753_v16, %v6752_v13  ;;  %v6757_v35 = vld [vmem:[#allocation2 + $0xfe] sm:$0xff] }
 0x34c   : > { %v5335_v50 = vpop.f32.mrf.mxu0  ;;  %v12766_v59 = vadd.f32 %v9093_v15, %v5064_v2  ;;  %v5062_v21 = vadd.f32 %v5003_v6, %v12624_v44  ;;  %v7211_v15 = vld [vmem:[%s9666_s24 + $0xeb] sm:$0xff]  ;;  %v7213_v6 = vld [vmem:[%s9666_s24 + $0xfb] sm:$0xff] }
 0x34d   : > { %v9042_v38 = vpop.f32.mrf.mxu1  ;;  %v7233_v16 = vpack.c.bf16 %v7211_v15, %v7210_v10  ;;  %v7216_v15 = vld [vmem:[%s9666_s24 + $0x113] sm:$0xff] }
 0x34e   : > { %v9094_v37 = vpop.f32.mrf.mxu0  ;;  %v12769_v55 = vadd.f32 %v5335_v50, %v5062_v21  ;;  %v5065_v19 = vadd.f32 %v9042_v38, %v12626_v14  ;;  %v6759_v38 = vld [vmem:[#allocation2 + $0x10e] sm:$0xff] }
 0x34f   : > { %v5006_v24 = vpop.f32.mrf.mxu1 }
 0x350   : > { %v5338_v4 = vpop.f32.mrf.mxu0  ;;  %v12772_v30 = vadd.f32 %v9094_v37, %v5065_v19  ;;  %v5063_v44 = vadd.f32 %v5006_v24, %v12628_v42  ;;  %v6758_v24 = vld [vmem:[#allocation2 + $0x106] sm:$0xff] }
 0x351   : > { %v9045_v34 = vpop.f32.mrf.mxu1  ;;  %9344 = vmatmul.mubr.bf16.gmra.mxu1 %v6777_v7  ;;  %v6780_v7 = vpack.c.bf16 %v6759_v38, %v6758_v24 }
 0x352   : > { %v9097_v41 = vpop.f32.mrf.mxu0  ;;  %9382 = vmatmul.mubr.msk.bf16.gmra.mxu0 %vm13847_vm0, %v7231_v29  ;;  %v12776_v14 = vadd.f32 %v5338_v4, %v5063_v44  ;;  %v5068_v17 = vadd.f32 %v9045_v34, %v12631_v39  ;;  %9347 = vmatprep.mubr.bf16.mxu1 %v6778_v54  ;;  %v7234_v29 = vpack.c.bf16 %v7213_v6, %v7212_v8  ;;  %v7214_v34 = vld [vmem:[%s9666_s24 + $0x103] sm:$0xff]  ;;  %v6760_v8 = vld [vmem:[#allocation2 + $0x116] sm:$0xff] }
 0x353   : > { %9385 = vmatprep.mubr.msk.bf16.mxu0 %vm13848_vm11, %v7232_v22  ;;  %v5019_v2 = vpop.f32.mrf.mxu1  ;;  %v6779_v22 = vpack.c.bf16 %v6757_v35, %v6756_v25  ;;  %v6761_v6 = vld [vmem:[#allocation2 + $0x11e] sm:$0xff] }
 0x354   : > { %v5351_v49 = vpop.f32.mrf.mxu0  ;;  %v12784_v42 = vadd.f32 %v9097_v41, %v5068_v17  ;;  %v5066_v50 = vadd.f32 %v5019_v2, %v12634_v58  ;;  %v7215_v41 = vld [vmem:[%s9666_s24 + $0x10b] sm:$0xff]  ;;  %v7217_v2 = vld [vmem:[%s9666_s24 + $0x11b] sm:$0xff] }
 0x355   : > { %v9046_v21 = vpop.f32.mrf.mxu1  ;;  %v7235_v35 = vpack.c.bf16 %v7215_v41, %v7214_v34  ;;  %v7236_v38 = vpack.c.bf16 %v7217_v2, %v7216_v15  ;;  %v7219_v34 = vld [vmem:[%s9666_s24 + $0x12b] sm:$0xff] }
 0x356   : > { %v9098_v13 = vpop.f32.mrf.mxu0  ;;  %v12787_v39 = vadd.f32 %v5351_v49, %v5066_v50  ;;  %v5069_v37 = vadd.f32 %v9046_v21, %v12636_v27  ;;  %v6762_v21 = vld [vmem:[#allocation2 + $0x126] sm:$0xff] }
 0x357   : > { %v5022_v60 = vpop.f32.mrf.mxu1 }
 0x358   : > { %v5354_v19 = vpop.f32.mrf.mxu0  ;;  %v12790_v4 = vadd.f32 %v9098_v13, %v5069_v37  ;;  %v5067_v58 = vadd.f32 %v5022_v60, %v12638_v62  ;;  %v6781_v60 = vpack.c.bf16 %v6761_v6, %v6760_v8 }
 0x359   : > { %v9117_v20 = vpop.f32.mrf.mxu1  ;;  %9348 = vmatmul.mubr.bf16.gmra.mxu1 %v6779_v22 }
 0x35a   : > { %v9169_v44 = vpop.f32.mrf.mxu0  ;;  %9386 = vmatmul.mubr.msk.bf16.gmra.mxu0 %vm13849_vm5, %v7233_v16  ;;  %v12794_v27 = vadd.f32 %v5354_v19, %v5067_v58  ;;  %v5700_v54 = vadd.f32 %v9117_v20, %v12643_v3  ;;  %9351 = vmatprep.mubr.bf16.mxu1 %v6780_v7  ;;  %v6763_v3 = vld [vmem:[#allocation2 + $0x12e] sm:$0xff]  ;;  %v6764_v7 = vld [vmem:[#allocation2 + $0x136] sm:$0xff] }
 0x35b   : > { %9389 = vmatprep.mubr.msk.bf16.mxu0 %vm13850_vm1, %v7234_v29  ;;  %v5555_v17 = vpop.f32.mrf.mxu1  ;;  %v6782_v22 = vpack.c.bf16 %v6763_v3, %v6762_v21 }
 0x35c   : > { %v5887_v10 = vpop.f32.mrf.mxu0  ;;  %v12802_v62 = vadd.f32 %v9169_v44, %v5700_v54  ;;  %v5698_v49 = vadd.f32 %v5555_v17, %v12646_v36  ;;  %v6765_v44 = vld [vmem:[#allocation2 + $0x13e] sm:$0xff] }
 0x35d   : > { %v9118_v50 = vpop.f32.mrf.mxu1  ;;  %v7218_v54 = vld [vmem:[%s9666_s24 + $0x123] sm:$0xff] }
 0x35e   : > { %v9170_v25 = vpop.f32.mrf.mxu0  ;;  %v12805_v13 = vadd.f32 %v5887_v10, %v5698_v49  ;;  %v5701_v16 = vadd.f32 %v9118_v50, %v12649_v63  ;;  %v6783_v49 = vpack.c.bf16 %v6765_v44, %v6764_v7  ;;  %v7237_v8 = vpack.c.bf16 %v7219_v34, %v7218_v54 }
 0x35f   : > { %v5558_v37 = vpop.f32.mrf.mxu1 }
 0x360   : > { %v5890_v29 = vpop.f32.mrf.mxu0  ;;  %v12808_v19 = vadd.f32 %v9170_v25, %v5701_v16  ;;  %v5699_v36 = vadd.f32 %v5558_v37, %v12653_v26 }
 0x361   : > { %v9121_v24 = vpop.f32.mrf.mxu1  ;;  %9352 = vmatmul.mubr.bf16.gmra.mxu1 %v6781_v60 }
 0x362   : > { %v9173_v58 = vpop.f32.mrf.mxu0  ;;  %9390 = vmatmul.mubr.msk.bf16.gmra.mxu0 %vm13851_vm12, %v7235_v35  ;;  %v12812_v20 = vadd.f32 %v5890_v29, %v5699_v36  ;;  %v5704_v63 = vadd.f32 %v9121_v24, %v12659_v47  ;;  %9355 = vmatprep.mubr.bf16.mxu1 %v6782_v22 }
 0x363   : > { %9393 = vmatprep.mubr.msk.bf16.mxu0 %vm13852_vm8, %v7236_v38  ;;  %v5571_v41 = vpop.f32.mrf.mxu1 }
 0x364   : > { %v5903_v17 = vpop.f32.mrf.mxu0  ;;  %v12818_v26 = vadd.f32 %v9173_v58, %v5704_v63  ;;  %v5702_v10 = vadd.f32 %v5571_v41, %v12662_v28 }
 0x365   : > { %v9122_v15 = vpop.f32.mrf.mxu1 }
 0x366   : > { %v9174_v2 = vpop.f32.mrf.mxu0  ;;  %v12821_v6 = vadd.f32 %v5903_v17, %v5702_v10  ;;  %v5705_v47 = vadd.f32 %v9122_v15, %v12665_v31 }
 0x367   : > { %v5574_v50 = vpop.f32.mrf.mxu1 }
 0x368   : > { %v5906_v25 = vpop.f32.mrf.mxu0  ;;  %v12824_v35 = vadd.f32 %v9174_v2, %v5705_v47  ;;  %v5703_v21 = vadd.f32 %v5574_v50, %v12668_v11 }
 0x369   : > { %v9125_v3 = vpop.f32.mrf.mxu1  ;;  %9356 = vmatmul.mubr.bf16.gmra.mxu1 %v6783_v49 }
 0x36a   : > { %v9177_v16 = vpop.f32.mrf.mxu0  ;;  %9394 = vmatmul.mubr.msk.bf16.gmra.mxu0 %vm13853_vm7, %v7237_v8  ;;  %v12828_v28 = vadd.f32 %v5906_v25, %v5703_v21  ;;  %v5708_v38 = vadd.f32 %v9125_v3, %v12676_v1 }
 0x36b   : > { %v5587_v37 = vpop.f32.mrf.mxu1 }
 0x36c   : > { %v5919_v29 = vpop.f32.mrf.mxu0  ;;  %v12831_v60 = vadd.f32 %v9177_v16, %v5708_v38  ;;  %v5706_v31 = vadd.f32 %v5587_v37, %v12679_v12 }
 0x36d   : > { %v9126_v36 = vpop.f32.mrf.mxu1 }
 0x36e   : > { %v9178_v22 = vpop.f32.mrf.mxu0  ;;  %v12834_v24 = vadd.f32 %v5919_v29, %v5706_v31  ;;  %v5709_v11 = vadd.f32 %v9126_v36, %v12682_v40 }
 0x36f   : > { %v5590_v58 = vpop.f32.mrf.mxu1 }
 0x370   : > { %v5922_v7 = vpop.f32.mrf.mxu0  ;;  %v12837_v63 = vadd.f32 %v9178_v22, %v5709_v11  ;;  %v5707_v44 = vadd.f32 %v5590_v58, %v12686_v43 }
 0x371   : > { %v9129_v54 = vpop.f32.mrf.mxu1 }
 0x372   : > { %v9181_v1 = vpop.f32.mrf.mxu0  ;;  %v12840_v34 = vadd.f32 %v5922_v7, %v5707_v44  ;;  %v5712_v41 = vadd.f32 %v9129_v54, %v12694_v33 }
 0x373   : > { %v5603_v17 = vpop.f32.mrf.mxu1 }
 0x374   : > { %v5935_v12 = vpop.f32.mrf.mxu0  ;;  %v12843_v10 = vadd.f32 %v9181_v1, %v5712_v41  ;;  %v5710_v15 = vadd.f32 %v5603_v17, %v12697_v46 }
 0x375   : > { %v9130_v2 = vpop.f32.mrf.mxu1 }
 0x376   : > { %v9182_v40 = vpop.f32.mrf.mxu0  ;;  %v12846_v49 = vadd.f32 %v5935_v12, %v5710_v15  ;;  %v5713_v8 = vadd.f32 %v9130_v2, %v12700_v52 }
 0x377   : > { %v5606_v47 = vpop.f32.mrf.mxu1 }
 0x378   : > { %v5938_v43 = vpop.f32.mrf.mxu0  ;;  %v12849_v50 = vadd.f32 %v9182_v40, %v5713_v8  ;;  %v5711_v25 = vadd.f32 %v5606_v47, %v12704_v53 }
 0x379   : > { %v9133_v21 = vpop.f32.mrf.mxu1 }
 0x37a   : > { %v9185_v33 = vpop.f32.mrf.mxu0  ;;  %v12852_v3 = vadd.f32 %v5938_v43, %v5711_v25  ;;  %v5716_v16 = vadd.f32 %v9133_v21, %v12712_v9 }
 0x37b   : > { %v5619_v38 = vpop.f32.mrf.mxu1 }
 0x37c   : > { %v5951_v46 = vpop.f32.mrf.mxu0  ;;  %v12855_v37 = vadd.f32 %v9185_v33, %v5716_v16  ;;  %v5714_v29 = vadd.f32 %v5619_v38, %v12715_v5 }
 0x37d   : > { %v9134_v31 = vpop.f32.mrf.mxu1 }
 0x37e   : > { %v9186_v52 = vpop.f32.mrf.mxu0  ;;  %v12858_v36 = vadd.f32 %v5951_v46, %v5714_v29  ;;  %v5717_v22 = vadd.f32 %v9134_v31, %v12718_v56 }
 0x37f   : > { %v5622_v11 = vpop.f32.mrf.mxu1 }
 0x380   : > { %v5954_v53 = vpop.f32.mrf.mxu0  ;;  %v12861_v58 = vadd.f32 %v9186_v52, %v5717_v22  ;;  %v5715_v7 = vadd.f32 %v5622_v11, %v12722_v32 }
 0x381   : > { %v9137_v44 = vpop.f32.mrf.mxu1 }
 0x382   : > { %v9189_v9 = vpop.f32.mrf.mxu0  ;;  %v12864_v54 = vadd.f32 %v5954_v53, %v5715_v7  ;;  %v5720_v1 = vadd.f32 %v9137_v44, %v12730_v45 }
 0x383   : > { %v5635_v41 = vpop.f32.mrf.mxu1 }
 0x384   : > { %v5967_v5 = vpop.f32.mrf.mxu0  ;;  %v12867_v17 = vadd.f32 %v9189_v9, %v5720_v1  ;;  %v5718_v12 = vadd.f32 %v5635_v41, %v12733_v61 }
 0x385   : > { %v9138_v15 = vpop.f32.mrf.mxu1 }
 0x386   : > { %v9190_v56 = vpop.f32.mrf.mxu0  ;;  %v12870_v2 = vadd.f32 %v5967_v5, %v5718_v12  ;;  %v5721_v40 = vadd.f32 %v9138_v15, %v12736_v18 }
 0x387   : > { %v5638_v8 = vpop.f32.mrf.mxu1 }
 0x388   : > { %v5970_v32 = vpop.f32.mrf.mxu0  ;;  %v12873_v47 = vadd.f32 %v9190_v56, %v5721_v40  ;;  %v5719_v43 = vadd.f32 %v5638_v8, %v12740_v23 }
 0x389   : > { %v9141_v25 = vpop.f32.mrf.mxu1 }
 0x38a   : > { %v9193_v45 = vpop.f32.mrf.mxu0  ;;  %v12876_v21 = vadd.f32 %v5970_v32, %v5719_v43  ;;  %v5724_v33 = vadd.f32 %v9141_v25, %v12748_v57 }
 0x38b   : > { %v5651_v16 = vpop.f32.mrf.mxu1 }
 0x38c   : > { %v5983_v61 = vpop.f32.mrf.mxu0  ;;  %v12879_v38 = vadd.f32 %v9193_v45, %v5724_v33  ;;  %v5722_v46 = vadd.f32 %v5651_v16, %v12751_v0 }
 0x38d   : > { %v9142_v29 = vpop.f32.mrf.mxu1 }
 0x38e   : > { %v9194_v18 = vpop.f32.mrf.mxu0  ;;  %v12882_v31 = vadd.f32 %v5983_v61, %v5722_v46  ;;  %v5725_v52 = vadd.f32 %v9142_v29, %v12754_v51 }
 0x38f   : > { %v5654_v22 = vpop.f32.mrf.mxu1 }
 0x390   : > { %v5986_v23 = vpop.f32.mrf.mxu0  ;;  %v12885_v11 = vadd.f32 %v9194_v18, %v5725_v52  ;;  %v5723_v53 = vadd.f32 %v5654_v22, %v12758_v48 }
 0x391   : > { %v9145_v7 = vpop.f32.mrf.mxu1 }
 0x392   : > { %v9197_v57 = vpop.f32.mrf.mxu0  ;;  %v12888_v44 = vadd.f32 %v5986_v23, %v5723_v53  ;;  %v5728_v9 = vadd.f32 %v9145_v7, %v12766_v59 }
 0x393   : > { %v5667_v1 = vpop.f32.mrf.mxu1 }
 0x394   : > { %v5999_v0 = vpop.f32.mrf.mxu0  ;;  %v12891_v41 = vadd.f32 %v9197_v57, %v5728_v9  ;;  %v5726_v5 = vadd.f32 %v5667_v1, %v12769_v55 }
 0x395   : > { %v9146_v12 = vpop.f32.mrf.mxu1 }
 0x396   : > { %v9198_v51 = vpop.f32.mrf.mxu0  ;;  %v12894_v15 = vadd.f32 %v5999_v0, %v5726_v5  ;;  %v5729_v56 = vadd.f32 %v9146_v12, %v12772_v30 }
 0x397   : > { %v5670_v40 = vpop.f32.mrf.mxu1 }
 0x398   : > { %v6002_v48 = vpop.f32.mrf.mxu0  ;;  %v12897_v8 = vadd.f32 %v9198_v51, %v5729_v56  ;;  %v5727_v32 = vadd.f32 %v5670_v40, %v12776_v14 }
 0x399   : > { %v9149_v43 = vpop.f32.mrf.mxu1 }
 0x39a   : > { %v9201_v59 = vpop.f32.mrf.mxu0  ;;  %v12900_v25 = vadd.f32 %v6002_v48, %v5727_v32  ;;  %v5732_v45 = vadd.f32 %v9149_v43, %v12784_v42 }
 0x39b   : > { %v5683_v33 = vpop.f32.mrf.mxu1 }
 0x39c   : > { %v6015_v55 = vpop.f32.mrf.mxu0  ;;  %v12903_v16 = vadd.f32 %v9201_v59, %v5732_v45  ;;  %v5730_v61 = vadd.f32 %v5683_v33, %v12787_v39 }
 0x39d   : > { %v9150_v46 = vpop.f32.mrf.mxu1 }
 0x39e   : > { %v9202_v30 = vpop.f32.mrf.mxu0  ;;  %v12906_v29 = vadd.f32 %v6015_v55, %v5730_v61  ;;  %v5733_v18 = vadd.f32 %v9150_v46, %v12790_v4 }
 0x39f   : > { %v5686_v52 = vpop.f32.mrf.mxu1 }
 0x3a0   : > { %v6018_v14 = vpop.f32.mrf.mxu0  ;;  %v12909_v22 = vadd.f32 %v9202_v30, %v5733_v18  ;;  %v5731_v23 = vadd.f32 %v5686_v52, %v12794_v27 }
 0x3a1   : > { %v9221_v53 = vpop.f32.mrf.mxu1 }
 0x3a2   : > { %v9273_v42 = vpop.f32.mrf.mxu0  ;;  %v12912_v7 = vadd.f32 %v6018_v14, %v5731_v23  ;;  %v6364_v57 = vadd.f32 %v9221_v53, %v12802_v62 }
 0x3a3   : > { %v6219_v9 = vpop.f32.mrf.mxu1 }
 0x3a4   : > { %v6551_v39 = vpop.f32.mrf.mxu0  ;;  %v12915_v1 = vadd.f32 %v9273_v42, %v6364_v57  ;;  %v6362_v0 = vadd.f32 %v6219_v9, %v12805_v13 }
 0x3a5   : > { %v9222_v5 = vpop.f32.mrf.mxu1 }
 0x3a6   : > { %v9274_v4 = vpop.f32.mrf.mxu0  ;;  %v12918_v12 = vadd.f32 %v6551_v39, %v6362_v0  ;;  %v6365_v51 = vadd.f32 %v9222_v5, %v12808_v19 }
 0x3a7   : > { %v6222_v56 = vpop.f32.mrf.mxu1 }
 0x3a8   : > { %v6554_v27 = vpop.f32.mrf.mxu0  ;;  %v12921_v40 = vadd.f32 %v9274_v4, %v6365_v51  ;;  %v6363_v48 = vadd.f32 %v6222_v56, %v12812_v20 }
 0x3a9   : > { %v9225_v32 = vpop.f32.mrf.mxu1 }
 0x3aa   : > { %v9277_v62 = vpop.f32.mrf.mxu0  ;;  %v12924_v43 = vadd.f32 %v6554_v27, %v6363_v48  ;;  %v6368_v59 = vadd.f32 %v9225_v32, %v12818_v26 }
 0x3ab   : > { %v6235_v45 = vpop.f32.mrf.mxu1 }
 0x3ac   : > { %v6567_v13 = vpop.f32.mrf.mxu0  ;;  %v12927_v33 = vadd.f32 %v9277_v62, %v6368_v59  ;;  %v6366_v55 = vadd.f32 %v6235_v45, %v12821_v6 }
 0x3ad   : > { %v9226_v61 = vpop.f32.mrf.mxu1 }
 0x3ae   : > { %v9278_v19 = vpop.f32.mrf.mxu0  ;;  %v12930_v46 = vadd.f32 %v6567_v13, %v6366_v55  ;;  %v6369_v30 = vadd.f32 %v9226_v61, %v12824_v35 }
 0x3af   : > { %v6238_v18 = vpop.f32.mrf.mxu1 }
 0x3b0   : > { %v6570_v20 = vpop.f32.mrf.mxu0  ;;  %v12933_v52 = vadd.f32 %v9278_v19, %v6369_v30  ;;  %v6367_v14 = vadd.f32 %v6238_v18, %v12828_v28 }
 0x3b1   : > { %v9229_v23 = vpop.f32.mrf.mxu1 }
 0x3b2   : > { %v9281_v26 = vpop.f32.mrf.mxu0  ;;  %v12936_v53 = vadd.f32 %v6570_v20, %v6367_v14  ;;  %v6372_v42 = vadd.f32 %v9229_v23, %v12831_v60 }
 0x3b3   : > { %v6251_v57 = vpop.f32.mrf.mxu1 }
 0x3b4   : > { %v6583_v6 = vpop.f32.mrf.mxu0  ;;  %v12939_v9 = vadd.f32 %v9281_v26, %v6372_v42  ;;  %v6370_v39 = vadd.f32 %v6251_v57, %v12834_v24 }
 0x3b5   : > { %v9230_v0 = vpop.f32.mrf.mxu1 }
 0x3b6   : > { %v9282_v35 = vpop.f32.mrf.mxu0  ;;  %v12942_v5 = vadd.f32 %v6583_v6, %v6370_v39  ;;  %v6373_v4 = vadd.f32 %v9230_v0, %v12837_v63 }
 0x3b7   : > { %v6254_v51 = vpop.f32.mrf.mxu1 }
 0x3b8   : > { %v6586_v28 = vpop.f32.mrf.mxu0  ;;  %v12945_v56 = vadd.f32 %v9282_v35, %v6373_v4  ;;  %v6371_v27 = vadd.f32 %v6254_v51, %v12840_v34 }
 0x3b9   : > { %v9233_v48 = vpop.f32.mrf.mxu1 }
 0x3ba   : > { %v9285_v60 = vpop.f32.mrf.mxu0  ;;  %v12948_v32 = vadd.f32 %v6586_v28, %v6371_v27  ;;  %v6376_v62 = vadd.f32 %v9233_v48, %v12843_v10 }
 0x3bb   : > { %v6267_v59 = vpop.f32.mrf.mxu1 }
 0x3bc   : > { %v6599_v24 = vpop.f32.mrf.mxu0  ;;  %v12951_v45 = vadd.f32 %v9285_v60, %v6376_v62  ;;  %v6374_v13 = vadd.f32 %v6267_v59, %v12846_v49 }
 0x3bd   : > { %v9234_v55 = vpop.f32.mrf.mxu1 }
 0x3be   : > { %v9286_v63 = vpop.f32.mrf.mxu0  ;;  %v12954_v61 = vadd.f32 %v6599_v24, %v6374_v13  ;;  %v6377_v19 = vadd.f32 %v9234_v55, %v12849_v50 }
 0x3bf   : > { %v6270_v30 = vpop.f32.mrf.mxu1 }
 0x3c0   : > { %v6602_v34 = vpop.f32.mrf.mxu0  ;;  %v12957_v18 = vadd.f32 %v9286_v63, %v6377_v19  ;;  %v6375_v20 = vadd.f32 %v6270_v30, %v12852_v3 }
 0x3c1   : > { %v9237_v14 = vpop.f32.mrf.mxu1 }
 0x3c2   : > { %v9289_v10 = vpop.f32.mrf.mxu0  ;;  %v12960_v23 = vadd.f32 %v6602_v34, %v6375_v20  ;;  %v6380_v26 = vadd.f32 %v9237_v14, %v12855_v37 }
 0x3c3   : > { %v6283_v42 = vpop.f32.mrf.mxu1 }
 0x3c4   : > { %v6615_v49 = vpop.f32.mrf.mxu0  ;;  %v12963_v57 = vadd.f32 %v9289_v10, %v6380_v26  ;;  %v6378_v6 = vadd.f32 %v6283_v42, %v12858_v36 }
 0x3c5   : > { %v9238_v39 = vpop.f32.mrf.mxu1 }
 0x3c6   : > { %v9290_v50 = vpop.f32.mrf.mxu0  ;;  %v12966_v0 = vadd.f32 %v6615_v49, %v6378_v6  ;;  %v6381_v35 = vadd.f32 %v9238_v39, %v12861_v58 }
 0x3c7   : > { %v6286_v4 = vpop.f32.mrf.mxu1 }
 0x3c8   : > { %v6618_v3 = vpop.f32.mrf.mxu0  ;;  %v12969_v51 = vadd.f32 %v9290_v50, %v6381_v35  ;;  %v6379_v28 = vadd.f32 %v6286_v4, %v12864_v54 }
 0x3c9   : > { %v9241_v27 = vpop.f32.mrf.mxu1 }
 0x3ca   : > { %v9293_v37 = vpop.f32.mrf.mxu0  ;;  %v12972_v48 = vadd.f32 %v6618_v3, %v6379_v28  ;;  %v6384_v60 = vadd.f32 %v9241_v27, %v12867_v17 }
 0x3cb   : > { %v6299_v62 = vpop.f32.mrf.mxu1 }
 0x3cc   : > { %v6631_v36 = vpop.f32.mrf.mxu0  ;;  %v12975_v59 = vadd.f32 %v9293_v37, %v6384_v60  ;;  %v6382_v24 = vadd.f32 %v6299_v62, %v12870_v2 }
 0x3cd   : > { %v9242_v13 = vpop.f32.mrf.mxu1 }
 0x3ce   : > { %v9294_v58 = vpop.f32.mrf.mxu0  ;;  %v12978_v55 = vadd.f32 %v6631_v36, %v6382_v24  ;;  %v6385_v63 = vadd.f32 %v9242_v13, %v12873_v47 }
 0x3cf   : > { %v6302_v19 = vpop.f32.mrf.mxu1 }
 0x3d0   : > { %v6634_v54 = vpop.f32.mrf.mxu0  ;;  %v12981_v30 = vadd.f32 %v9294_v58, %v6385_v63  ;;  %v6383_v34 = vadd.f32 %v6302_v19, %v12876_v21 }
 0x3d1   : > { %v9245_v20 = vpop.f32.mrf.mxu1 }
 0x3d2   : > { %v9297_v17 = vpop.f32.mrf.mxu0  ;;  %v12984_v14 = vadd.f32 %v6634_v54, %v6383_v34  ;;  %v6388_v10 = vadd.f32 %v9245_v20, %v12879_v38 }
 0x3d3   : > { %v6315_v26 = vpop.f32.mrf.mxu1 }
 0x3d4   : > { %v6647_v2 = vpop.f32.mrf.mxu0  ;;  %v12987_v42 = vadd.f32 %v9297_v17, %v6388_v10  ;;  %v6386_v49 = vadd.f32 %v6315_v26, %v12882_v31 }
 0x3d5   : > { %v9246_v6 = vpop.f32.mrf.mxu1 }
 0x3d6   : > { %v9298_v47 = vpop.f32.mrf.mxu0  ;;  %v12990_v39 = vadd.f32 %v6647_v2, %v6386_v49  ;;  %v6389_v50 = vadd.f32 %v9246_v6, %v12885_v11 }
 0x3d7   : > { %v6318_v35 = vpop.f32.mrf.mxu1 }
 0x3d8   : > { %v6650_v21 = vpop.f32.mrf.mxu0  ;;  %v12993_v4 = vadd.f32 %v9298_v47, %v6389_v50  ;;  %v6387_v3 = vadd.f32 %v6318_v35, %v12888_v44  ;;  %v13020_v35 = vld [vmem:[%s13275_s8] ss:$0 sm:$0xff] }
 0x3d9   : > { %v9249_v28 = vpop.f32.mrf.mxu1 }
 0x3da   : > { %v9301_v38 = vpop.f32.mrf.mxu0  ;;  %v12996_v27 = vadd.f32 %v6650_v21, %v6387_v3  ;;  %v6392_v37 = vadd.f32 %v9249_v28, %v12891_v41 }
 0x3db   : > { %v6331_v60 = vpop.f32.mrf.mxu1 }
 0x3dc   : > { %v6663_v31 = vpop.f32.mrf.mxu0  ;;  %v12999_v62 = vadd.f32 %v9301_v38, %v6392_v37  ;;  %v6390_v36 = vadd.f32 %v6331_v60, %v12894_v15 }
 0x3dd   : > { %v9250_v24 = vpop.f32.mrf.mxu1 }
 0x3de   : > { %v9302_v11 = vpop.f32.mrf.mxu0  ;;  %v13002_v13 = vadd.f32 %v6663_v31, %v6390_v36  ;;  %v6393_v58 = vadd.f32 %v9250_v24, %v12897_v8 }
 0x3df   : > { %v6334_v63 = vpop.f32.mrf.mxu1 }
 0x3e0   : > { %v6666_v44 = vpop.f32.mrf.mxu0  ;;  %v13005_v19 = vadd.f32 %v9302_v11, %v6393_v58  ;;  %v6391_v54 = vadd.f32 %v6334_v63, %v12900_v25 }
 0x3e1   : > { %v9253_v34 = vpop.f32.mrf.mxu1 }
 0x3e2   : > { %v9305_v41 = vpop.f32.mrf.mxu0  ;;  %v13008_v20 = vadd.f32 %v6666_v44, %v6391_v54  ;;  %v6396_v17 = vadd.f32 %v9253_v34, %v12903_v16 }
 0x3e3   : > { %v6347_v10 = vpop.f32.mrf.mxu1 }
 0x3e4   : > { %v6679_v15 = vpop.f32.mrf.mxu0  ;;  %v13011_v26 = vadd.f32 %v9305_v41, %v6396_v17  ;;  %v6394_v2 = vadd.f32 %v6347_v10, %v12906_v29  ;;  %v13028_v29 = vld [vmem:[%s13272_s5] ss:$0 sm:$0xff] }
 0x3e5   : > { %v9254_v49 = vpop.f32.mrf.mxu1 }
 0x3e6   : > { %v9306_v8 = vpop.f32.mrf.mxu0  ;;  %v13014_v6 = vadd.f32 %v6679_v15, %v6394_v2  ;;  %v6397_v47 = vadd.f32 %v9254_v49, %v12909_v22  ;;  %v13033_v22 = vld [vmem:[%s13276_s9] ss:$0 sm:$0xff] }
 0x3e7   : > { %v6350_v50 = vpop.f32.mrf.mxu1 }
 0x3e8   : > { %v6682_v25 = vpop.f32.mrf.mxu0  ;;  %v13022_v16 = vadd.f32 %v9306_v8, %v6397_v47  ;;  %v6395_v21 = vadd.f32 %v6350_v50, %v12912_v7  ;;  %v13042_v7 = vld [vmem:[%s13273_s6] ss:$0 sm:$0xff] }
 0x3e9   : > { %v9325_v3 = vpop.f32.mrf.mxu1 }
 0x3ea   : > { %v9363_v28 = vpop.f32.mrf.mxu0  ;;  %v13035_v38 = vadd.f32 %v6682_v25, %v6395_v21  ;;  %v7028_v37 = vadd.f32 %v9325_v3, %v12915_v1 }
 0x3eb   : > { %v7482_v60 = vmul.f32 %v9363_v28, %v13020_v35  ;;  %v6883_v31 = vpop.f32.mrf.mxu1 }
 0x3ec   : > { %v7330_v36 = vpop.f32.mrf.mxu0  ;;  %v7071_v24 = vmul.f32 %v13028_v29, %v7028_v37  ;;  %v7026_v58 = vadd.f32 %v6883_v31, %v12918_v12 }
 0x3ed   : > { %v7525_v11 = vadd.f32 %v13033_v22, %v7482_v60  ;;  %v7480_v63 = vmul.f32 %v13020_v35, %v7330_v36  ;;  %v9326_v44 = vpop.f32.mrf.mxu1 }
 0x3ee   : > { %v9364_v1 = vpop.f32.mrf.mxu0  ;;  %v7114_v54 = vadd.f32 %v13042_v7, %v7071_v24  ;;  %v7069_v41 = vmul.f32 %v13028_v29, %v7026_v58  ;;  %v7029_v10 = vadd.f32 %v9326_v44, %v12921_v40 }
 0x3ef   : > { %v7561_v34 = vmax.f32 %v7525_v11, 0.0  ;;  %v7523_v17 = vadd.f32 %v13033_v22, %v7480_v63  ;;  %v7483_v15 = vmul.f32 %v9364_v1, %v13020_v35  ;;  %v6886_v2 = vpop.f32.mrf.mxu1 }
 0x3f0   : > { %v7333_v49 = vpop.f32.mrf.mxu0  ;;  %v7150_v8 = vmax.f32 %v7114_v54, 0.0  ;;  %v7112_v12 = vadd.f32 %v13042_v7, %v7069_v41  ;;  %v7027_v47 = vadd.f32 %v6886_v2, %v12924_v43  ;;  %v7072_v25 = vmul.f32 %v13028_v29, %v7029_v10 }
 0x3f1   : > { %v7559_v50 = vmax.f32 %v7523_v17, 0.0  ;;  %v7526_v40 = vadd.f32 %v13033_v22, %v7483_v15  ;;  %v7481_v21 = vmul.f32 %v13020_v35, %v7333_v49  ;;  %v9329_v3 = vpop.f32.mrf.mxu1 }
 0x3f2   : > { %v9367_v28 = vpop.f32.mrf.mxu0  ;;  %v7597_v37 = vadd.f32 %v7561_v34, %v7150_v8  ;;  %v7148_v60 = vmax.f32 %v7112_v12, 0.0  ;;  %v7070_v31 = vmul.f32 %v13028_v29, %v7027_v47  ;;  %v7032_v43 = vadd.f32 %v9329_v3, %v12927_v33 }
 0x3f3   : > { %v7115_v36 = vadd.f32 %v13042_v7, %v7072_v25  ;;  %v7562_v24 = vmax.f32 %v7526_v40, 0.0  ;;  %v7524_v11 = vadd.f32 %v13033_v22, %v7481_v21  ;;  %v7486_v58 = vmul.f32 %v9367_v28, %v13020_v35  ;;  %v6899_v63 = vpop.f32.mrf.mxu1 }
 0x3f4   : > { %v7346_v44 = vpop.f32.mrf.mxu0  ;;  %7633 = vst [vmem:[%s13059_s16 + $0x10] sm:$0xff] %v7597_v37  ;;  %v7595_v1 = vadd.f32 %v7559_v50, %v7148_v60  ;;  %v7113_v54 = vadd.f32 %v13042_v7, %v7070_v31  ;;  %v7075_v34 = vmul.f32 %v13028_v29, %v7032_v43  ;;  %v7030_v41 = vadd.f32 %v6899_v63, %v12930_v46 }
 0x3f5   : > { %v7151_v17 = vmax.f32 %v7115_v36, 0.0  ;;  %v7560_v33 = vmax.f32 %v7524_v11, 0.0  ;;  %v7529_v10 = vadd.f32 %v13033_v22, %v7486_v58  ;;  %v7484_v15 = vmul.f32 %v13020_v35, %v7346_v44  ;;  %v9330_v2 = vpop.f32.mrf.mxu1 }
 0x3f6   : > { %v9368_v49 = vpop.f32.mrf.mxu0  ;;  %7631 = vst [vmem:[%s13059_s16] sm:$0xff] %v7595_v1  ;;  %v7149_v8 = vmax.f32 %v7113_v54, 0.0  ;;  %v7118_v12 = vadd.f32 %v13042_v7, %v7075_v34  ;;  %v7073_v47 = vmul.f32 %v13028_v29, %v7030_v41  ;;  %v7033_v50 = vadd.f32 %v9330_v2, %v12933_v52 }
 0x3f7   : > { %v7598_v25 = vadd.f32 %v7562_v24, %v7151_v17  ;;  %v7565_v40 = vmax.f32 %v7529_v10, 0.0  ;;  %v7527_v46 = vadd.f32 %v13033_v22, %v7484_v15  ;;  %v7487_v21 = vmul.f32 %v9368_v49, %v13020_v35  ;;  %v6902_v3 = vpop.f32.mrf.mxu1 }
 0x3f8   : > { %v7349_v28 = vpop.f32.mrf.mxu0  ;;  %v7596_v37 = vadd.f32 %v7560_v33, %v7149_v8  ;;  %v7154_v60 = vmax.f32 %v7118_v12, 0.0  ;;  %v7116_v31 = vadd.f32 %v13042_v7, %v7073_v47  ;;  %v7076_v43 = vmul.f32 %v13028_v29, %v7033_v50 }
 0x3f9   : > { %7634 = vst [vmem:[%s13059_s16 + $0x18] sm:$0xff] %v7598_v25  ;;  %v7563_v36 = vmax.f32 %v7527_v46, 0.0  ;;  %v7530_v11 = vadd.f32 %v13033_v22, %v7487_v21  ;;  %v7031_v52 = vadd.f32 %v6902_v3, %v12936_v53  ;;  %v7485_v24 = vmul.f32 %v13020_v35, %v7349_v28  ;;  %v9333_v58 = vpop.f32.mrf.mxu1 }
 0x3fa   : > { %v9371_v63 = vpop.f32.mrf.mxu0  ;;  %7632 = vst [vmem:[%s13059_s16 + $0x8] sm:$0xff] %v7596_v37  ;;  %v7601_v44 = vadd.f32 %v7565_v40, %v7154_v60  ;;  %v7152_v1 = vmax.f32 %v7116_v31, 0.0  ;;  %v7119_v54 = vadd.f32 %v13042_v7, %v7076_v43  ;;  %v7036_v34 = vadd.f32 %v9333_v58, %v12939_v9 }
 0x3fb   : > { %v7566_v41 = vmax.f32 %v7530_v11, 0.0  ;;  %v7074_v17 = vmul.f32 %v13028_v29, %v7031_v52  ;;  %v7528_v33 = vadd.f32 %v13033_v22, %v7485_v24  ;;  %v7490_v10 = vmul.f32 %v9371_v63, %v13020_v35  ;;  %v6915_v53 = vpop.f32.mrf.mxu1 }
 0x3fc   : > { %v7362_v15 = vpop.f32.mrf.mxu0  ;;  %7637 = vst [vmem:[%s13059_s16 + $0x30] sm:$0xff] %v7601_v44  ;;  %v7599_v2 = vadd.f32 %v7563_v36, %v7152_v1  ;;  %v7155_v49 = vmax.f32 %v7119_v54, 0.0  ;;  %v7079_v8 = vmul.f32 %v13028_v29, %v7036_v34  ;;  %v7034_v12 = vadd.f32 %v6915_v53, %v12942_v5 }
 0x3fd   : > { %v7117_v47 = vadd.f32 %v13042_v7, %v7074_v17  ;;  %v7564_v9 = vmax.f32 %v7528_v33, 0.0  ;;  %v7533_v50 = vadd.f32 %v13033_v22, %v7490_v10  ;;  %v7488_v25 = vmul.f32 %v13020_v35, %v7362_v15  ;;  %v9334_v40 = vpop.f32.mrf.mxu1 }
 0x3fe   : > { %v9372_v46 = vpop.f32.mrf.mxu0  ;;  %7635 = vst [vmem:[%s13059_s16 + $0x20] sm:$0xff] %v7599_v2  ;;  %v7602_v21 = vadd.f32 %v7566_v41, %v7155_v49  ;;  %v7122_v3 = vadd.f32 %v13042_v7, %v7079_v8  ;;  %v7077_v28 = vmul.f32 %v13028_v29, %v7034_v12  ;;  %v7037_v37 = vadd.f32 %v9334_v40, %v12945_v56 }
 0x3ff   : > { %v7153_v60 = vmax.f32 %v7117_v47, 0.0  ;;  %v7569_v5 = vmax.f32 %v7533_v50, 0.0  ;;  %v7531_v31 = vadd.f32 %v13033_v22, %v7488_v25  ;;  %v7491_v43 = vmul.f32 %v9372_v46, %v13020_v35  ;;  %v6918_v36 = vpop.f32.mrf.mxu1 }
 0x400   : > { %v7365_v11 = vpop.f32.mrf.mxu0  ;;  %7638 = vst [vmem:[%s13059_s16 + $0x38] sm:$0xff] %v7602_v21  ;;  %v7158_v52 = vmax.f32 %v7122_v3, 0.0  ;;  %v7120_v24 = vadd.f32 %v13042_v7, %v7077_v28  ;;  %v7080_v58 = vmul.f32 %v13028_v29, %v7037_v37  ;;  %v7035_v63 = vadd.f32 %v6918_v36, %v12948_v32 }
 0x401   : > { %v7600_v44 = vadd.f32 %v7564_v9, %v7153_v60  ;;  %v7567_v1 = vmax.f32 %v7531_v31, 0.0  ;;  %v7534_v56 = vadd.f32 %v13033_v22, %v7491_v43  ;;  %v7489_v54 = vmul.f32 %v13020_v35, %v7365_v11  ;;  %v9337_v34 = vpop.f32.mrf.mxu1 }
 0x402   : > { %v9375_v41 = vpop.f32.mrf.mxu0  ;;  %v7605_v17 = vadd.f32 %v7569_v5, %v7158_v52  ;;  %v7156_v33 = vmax.f32 %v7120_v24, 0.0  ;;  %v7123_v10 = vadd.f32 %v13042_v7, %v7080_v58  ;;  %v7078_v53 = vmul.f32 %v13028_v29, %v7035_v63 }
 0x403   : > { %7636 = vst [vmem:[%s13059_s16 + $0x28] sm:$0xff] %v7600_v44  ;;  %v7570_v15 = vmax.f32 %v7534_v56, 0.0  ;;  %v7532_v2 = vadd.f32 %v13033_v22, %v7489_v54  ;;  %v7040_v32 = vadd.f32 %v9337_v34, %v12951_v45  ;;  %v7494_v49 = vmul.f32 %v9375_v41, %v13020_v35  ;;  %v6931_v8 = vpop.f32.mrf.mxu1 }
 0x404   : > { %v7378_v12 = vpop.f32.mrf.mxu0  ;;  %7641 = vst [vmem:[%s13059_s16 + $0x50] sm:$0xff] %v7605_v17  ;;  %v7603_v47 = vadd.f32 %v7567_v1, %v7156_v33  ;;  %v7159_v9 = vmax.f32 %v7123_v10, 0.0  ;;  %v7121_v50 = vadd.f32 %v13042_v7, %v7078_v53  ;;  %v7038_v25 = vadd.f32 %v6931_v8, %v12954_v61 }
 0x405   : > { %v7568_v40 = vmax.f32 %v7532_v2, 0.0  ;;  %v7083_v46 = vmul.f32 %v13028_v29, %v7040_v32  ;;  %v7537_v21 = vadd.f32 %v13033_v22, %v7494_v49  ;;  %v7492_v3 = vmul.f32 %v13020_v35, %v7378_v12  ;;  %v9338_v45 = vpop.f32.mrf.mxu1 }
 0x406   : > { %v9376_v28 = vpop.f32.mrf.mxu0  ;;  %7639 = vst [vmem:[%s13059_s16 + $0x40] sm:$0xff] %v7603_v47  ;;  %v7606_v37 = vadd.f32 %v7570_v15, %v7159_v9  ;;  %v7157_v60 = vmax.f32 %v7121_v50, 0.0  ;;  %v7081_v5 = vmul.f32 %v13028_v29, %v7038_v25  ;;  %v7041_v31 = vadd.f32 %v9338_v45, %v12957_v18 }
 0x407   : > { %v7126_v43 = vadd.f32 %v13042_v7, %v7083_v46  ;;  %v7573_v61 = vmax.f32 %v7537_v21, 0.0  ;;  %v7535_v36 = vadd.f32 %v13033_v22, %v7492_v3  ;;  %v7495_v11 = vmul.f32 %v9376_v28, %v13020_v35  ;;  %v6934_v52 = vpop.f32.mrf.mxu1 }
 0x408   : > { %v7381_v24 = vpop.f32.mrf.mxu0  ;;  %7642 = vst [vmem:[%s13059_s16 + $0x58] sm:$0xff] %v7606_v37  ;;  %v7604_v58 = vadd.f32 %v7568_v40, %v7157_v60  ;;  %v7124_v63 = vadd.f32 %v13042_v7, %v7081_v5  ;;  %v7084_v44 = vmul.f32 %v13028_v29, %v7041_v31  ;;  %v7039_v1 = vadd.f32 %v6934_v52, %v12960_v23 }
 0x409   : > { %v7162_v56 = vmax.f32 %v7126_v43, 0.0  ;;  %v7571_v18 = vmax.f32 %v7535_v36, 0.0  ;;  %v7538_v54 = vadd.f32 %v13033_v22, %v7495_v11  ;;  %v7493_v34 = vmul.f32 %v13020_v35, %v7381_v24  ;;  %v9341_v41 = vpop.f32.mrf.mxu1 }
 0x40a   : > { %v9379_v17 = vpop.f32.mrf.mxu0  ;;  %7640 = vst [vmem:[%s13059_s16 + $0x48] sm:$0xff] %v7604_v58  ;;  %v7160_v33 = vmax.f32 %v7124_v63, 0.0  ;;  %v7127_v10 = vadd.f32 %v13042_v7, %v7084_v44  ;;  %v7082_v53 = vmul.f32 %v13028_v29, %v7039_v1  ;;  %v7044_v15 = vadd.f32 %v9341_v41, %v12963_v57 }
 0x40b   : > { %v7609_v2 = vadd.f32 %v7573_v61, %v7162_v56  ;;  %v7574_v32 = vmax.f32 %v7538_v54, 0.0  ;;  %v7536_v23 = vadd.f32 %v13033_v22, %v7493_v34  ;;  %v7498_v49 = vmul.f32 %v9379_v17, %v13020_v35  ;;  %v6947_v8 = vpop.f32.mrf.mxu1 }
 0x40c   : > { %v7394_v12 = vpop.f32.mrf.mxu0  ;;  %v7607_v47 = vadd.f32 %v7571_v18, %v7160_v33  ;;  %v7163_v9 = vmax.f32 %v7127_v10, 0.0  ;;  %v7125_v50 = vadd.f32 %v13042_v7, %v7082_v53  ;;  %v7087_v25 = vmul.f32 %v13028_v29, %v7044_v15 }
 0x40d   : > { %7645 = vst [vmem:[%s13059_s16 + $0x70] sm:$0xff] %v7609_v2  ;;  %v7572_v40 = vmax.f32 %v7536_v23, 0.0  ;;  %v7541_v46 = vadd.f32 %v13033_v22, %v7498_v49  ;;  %v7042_v57 = vadd.f32 %v6947_v8, %v12966_v0  ;;  %v7496_v21 = vmul.f32 %v13020_v35, %v7394_v12  ;;  %v9342_v3 = vpop.f32.mrf.mxu1 }
 0x40e   : > { %v9380_v45 = vpop.f32.mrf.mxu0  ;;  %7643 = vst [vmem:[%s13059_s16 + $0x60] sm:$0xff] %v7607_v47  ;;  %v7610_v28 = vadd.f32 %v7574_v32, %v7163_v9  ;;  %v7161_v37 = vmax.f32 %v7125_v50, 0.0  ;;  %v7130_v60 = vadd.f32 %v13042_v7, %v7087_v25  ;;  %v7045_v5 = vadd.f32 %v9342_v3, %v12969_v51 }
 0x40f   : > { %v7577_v31 = vmax.f32 %v7541_v46, 0.0  ;;  %v7085_v43 = vmul.f32 %v13028_v29, %v7042_v57  ;;  %v7539_v61 = vadd.f32 %v13033_v22, %v7496_v21  ;;  %v7499_v36 = vmul.f32 %v9380_v45, %v13020_v35  ;;  %v6950_v0 = vpop.f32.mrf.mxu1 }
 0x410   : > { %v7397_v11 = vpop.f32.mrf.mxu0  ;;  %7646 = vst [vmem:[%s13059_s16 + $0x78] sm:$0xff] %v7610_v28  ;;  %v7608_v52 = vadd.f32 %v7572_v40, %v7161_v37  ;;  %v7166_v24 = vmax.f32 %v7130_v60, 0.0  ;;  %v7088_v58 = vmul.f32 %v13028_v29, %v7045_v5  ;;  %v7043_v63 = vadd.f32 %v6950_v0, %v12972_v48 }
 0x411   : > { %v7128_v44 = vadd.f32 %v13042_v7, %v7085_v43  ;;  %v7575_v51 = vmax.f32 %v7539_v61, 0.0  ;;  %v7542_v1 = vadd.f32 %v13033_v22, %v7499_v36  ;;  %v7497_v56 = vmul.f32 %v13020_v35, %v7397_v11  ;;  %v9345_v18 = vpop.f32.mrf.mxu1 }
 0x412   : > { %v9383_v54 = vpop.f32.mrf.mxu0  ;;  %7644 = vst [vmem:[%s13059_s16 + $0x68] sm:$0xff] %v7608_v52  ;;  %v7613_v34 = vadd.f32 %v7577_v31, %v7166_v24  ;;  %v7131_v41 = vadd.f32 %v13042_v7, %v7088_v58  ;;  %v7086_v17 = vmul.f32 %v13028_v29, %v7043_v63  ;;  %v7048_v33 = vadd.f32 %v9345_v18, %v12975_v59 }
 0x413   : > { %v7164_v10 = vmax.f32 %v7128_v44, 0.0  ;;  %v7578_v48 = vmax.f32 %v7542_v1, 0.0  ;;  %v7540_v53 = vadd.f32 %v13033_v22, %v7497_v56  ;;  %v7502_v15 = vmul.f32 %v9383_v54, %v13020_v35  ;;  %v6963_v2 = vpop.f32.mrf.mxu1 }
 0x414   : > { %v7410_v32 = vpop.f32.mrf.mxu0  ;;  %7649 = vst [vmem:[%s13059_s16 + $0x90] sm:$0xff] %v7613_v34  ;;  %v7167_v23 = vmax.f32 %v7131_v41, 0.0  ;;  %v7129_v49 = vadd.f32 %v13042_v7, %v7086_v17  ;;  %v7091_v8 = vmul.f32 %v13028_v29, %v7048_v33  ;;  %v7046_v12 = vadd.f32 %v6963_v2, %v12978_v55 }
 0x415   : > { %v7611_v47 = vadd.f32 %v7575_v51, %v7164_v10  ;;  %v7576_v9 = vmax.f32 %v7540_v53, 0.0  ;;  %v7545_v59 = vadd.f32 %v13033_v22, %v7502_v15  ;;  %v7500_v50 = vmul.f32 %v13020_v35, %v7410_v32  ;;  %v9346_v25 = vpop.f32.mrf.mxu1 }
 0x416   : > { %v9384_v40 = vpop.f32.mrf.mxu0  ;;  %v7614_v46 = vadd.f32 %v7578_v48, %v7167_v23  ;;  %v7165_v57 = vmax.f32 %v7129_v49, 0.0  ;;  %v7134_v21 = vadd.f32 %v13042_v7, %v7091_v8  ;;  %v7089_v3 = vmul.f32 %v13028_v29, %v7046_v12 }
 0x417   : > { %7647 = vst [vmem:[%s13059_s16 + $0x80] sm:$0xff] %v7611_v47  ;;  %v7581_v45 = vmax.f32 %v7545_v59, 0.0  ;;  %v7543_v28 = vadd.f32 %v13033_v22, %v7500_v50  ;;  %v7049_v55 = vadd.f32 %v9346_v25, %v12981_v30  ;;  %v7503_v37 = vmul.f32 %v9384_v40, %v13020_v35  ;;  %v6966_v60 = vpop.f32.mrf.mxu1 }
 0x418   : > { %v7413_v5 = vpop.f32.mrf.mxu0  ;;  %7650 = vst [vmem:[%s13059_s16 + $0x98] sm:$0xff] %v7614_v46  ;;  %v7612_v31 = vadd.f32 %v7576_v9, %v7165_v57  ;;  %v7170_v43 = vmax.f32 %v7134_v21, 0.0  ;;  %v7132_v61 = vadd.f32 %v13042_v7, %v7089_v3  ;;  %v7047_v36 = vadd.f32 %v6966_v60, %v12984_v14 }
 0x419   : > { %v7579_v0 = vmax.f32 %v7543_v28, 0.0  ;;  %v7092_v11 = vmul.f32 %v13028_v29, %v7049_v55  ;;  %v7546_v52 = vadd.f32 %v13033_v22, %v7503_v37  ;;  %v7501_v24 = vmul.f32 %v13020_v35, %v7413_v5  ;;  %v9349_v30 = vpop.f32.mrf.mxu1 }
 0x41a   : > { %v9387_v58 = vpop.f32.mrf.mxu0  ;;  %7648 = vst [vmem:[%s13059_s16 + $0x88] sm:$0xff] %v7612_v31  ;;  %v7617_v63 = vadd.f32 %v7581_v45, %v7170_v43  ;;  %v7168_v44 = vmax.f32 %v7132_v61, 0.0  ;;  %v7090_v51 = vmul.f32 %v13028_v29, %v7047_v36  ;;  %v7052_v1 = vadd.f32 %v9349_v30, %v12987_v42 }
 0x41b   : > { %v7135_v56 = vadd.f32 %v13042_v7, %v7092_v11  ;;  %v7582_v14 = vmax.f32 %v7546_v52, 0.0  ;;  %v7544_v18 = vadd.f32 %v13033_v22, %v7501_v24  ;;  %v7506_v54 = vmul.f32 %v9387_v58, %v13020_v35  ;;  %v6979_v34 = vpop.f32.mrf.mxu1 }
 0x41c   : > { %v7426_v41 = vpop.f32.mrf.mxu0  ;;  %7653 = vst [vmem:[%s13059_s16 + $0xb0] sm:$0xff] %v7617_v63  ;;  %v7615_v17 = vadd.f32 %v7579_v0, %v7168_v44  ;;  %v7133_v33 = vadd.f32 %v13042_v7, %v7090_v51  ;;  %v7095_v10 = vmul.f32 %v13028_v29, %v7052_v1  ;;  %v7050_v48 = vadd.f32 %v6979_v34, %v12990_v39 }
 0x41d   : > { %v7171_v53 = vmax.f32 %v7135_v56, 0.0  ;;  %v7580_v42 = vmax.f32 %v7544_v18, 0.0  ;;  %v7549_v15 = vadd.f32 %v13033_v22, %v7506_v54  ;;  %v7504_v2 = vmul.f32 %v13020_v35, %v7426_v41  ;;  %v9350_v32 = vpop.f32.mrf.mxu1 }
 0x41e   : > { %v9388_v23 = vpop.f32.mrf.mxu0  ;;  %7651 = vst [vmem:[%s13059_s16 + $0xa0] sm:$0xff] %v7615_v17  ;;  %v7169_v49 = vmax.f32 %v7133_v33, 0.0  ;;  %v7138_v8 = vadd.f32 %v13042_v7, %v7095_v10  ;;  %v7093_v12 = vmul.f32 %v13028_v29, %v7050_v48  ;;  %v7053_v47 = vadd.f32 %v9350_v32, %v12993_v4 }
 0x41f   : > { %v7618_v9 = vadd.f32 %v7582_v14, %v7171_v53  ;;  %v7585_v59 = vmax.f32 %v7549_v15, 0.0  ;;  %v7547_v39 = vadd.f32 %v13033_v22, %v7504_v2  ;;  %v7507_v50 = vmul.f32 %v9388_v23, %v13020_v35  ;;  %v6982_v25 = vpop.f32.mrf.mxu1 }
 0x420   : > { %v7429_v40 = vpop.f32.mrf.mxu0  ;;  %v7616_v46 = vadd.f32 %v7580_v42, %v7169_v49  ;;  %v7174_v57 = vmax.f32 %v7138_v8, 0.0  ;;  %v7136_v21 = vadd.f32 %v13042_v7, %v7093_v12  ;;  %v7096_v3 = vmul.f32 %v13028_v29, %v7053_v47 }
 0x421   : > { %7654 = vst [vmem:[%s13059_s16 + $0xb8] sm:$0xff] %v7618_v9  ;;  %v7583_v45 = vmax.f32 %v7547_v39, 0.0  ;;  %v7550_v28 = vadd.f32 %v13033_v22, %v7507_v50  ;;  %v7051_v4 = vadd.f32 %v6982_v25, %v12996_v27  ;;  %v7505_v55 = vmul.f32 %v13020_v35, %v7429_v40  ;;  %v9353_v37 = vpop.f32.mrf.mxu1 }
 0x422   : > { %v9391_v60 = vpop.f32.mrf.mxu0  ;;  %7652 = vst [vmem:[%s13059_s16 + $0xa8] sm:$0xff] %v7616_v46  ;;  %v7621_v5 = vadd.f32 %v7585_v59, %v7174_v57  ;;  %v7172_v31 = vmax.f32 %v7136_v21, 0.0  ;;  %v7139_v43 = vadd.f32 %v13042_v7, %v7096_v3  ;;  %v7056_v61 = vadd.f32 %v9353_v37, %v12999_v62 }
 0x423   : > { %v7586_v36 = vmax.f32 %v7550_v28, 0.0  ;;  %v7094_v0 = vmul.f32 %v13028_v29, %v7051_v4  ;;  %v7548_v11 = vadd.f32 %v13033_v22, %v7505_v55  ;;  %v7510_v52 = vmul.f32 %v9391_v60, %v13020_v35  ;;  %v6995_v27 = vpop.f32.mrf.mxu1 }
 0x424   : > { %v7442_v24 = vpop.f32.mrf.mxu0  ;;  %7657 = vst [vmem:[%s13059_s16 + $0xd0] sm:$0xff] %v7621_v5  ;;  %v7619_v30 = vadd.f32 %v7583_v45, %v7172_v31  ;;  %v7175_v58 = vmax.f32 %v7139_v43, 0.0  ;;  %v7099_v63 = vmul.f32 %v13028_v29, %v7056_v61  ;;  %v7054_v44 = vadd.f32 %v6995_v27, %v13002_v13 }
 0x425   : > { %v7137_v51 = vadd.f32 %v13042_v7, %v7094_v0  ;;  %v7584_v62 = vmax.f32 %v7548_v11, 0.0  ;;  %v7553_v1 = vadd.f32 %v13033_v22, %v7510_v52  ;;  %v7508_v56 = vmul.f32 %v13020_v35, %v7442_v24  ;;  %v9354_v14 = vpop.f32.mrf.mxu1 }
 0x426   : > { %v9392_v18 = vpop.f32.mrf.mxu0  ;;  %7655 = vst [vmem:[%s13059_s16 + $0xc0] sm:$0xff] %v7619_v30  ;;  %v7622_v54 = vadd.f32 %v7586_v36, %v7175_v58  ;;  %v7142_v34 = vadd.f32 %v13042_v7, %v7099_v63  ;;  %v7097_v41 = vmul.f32 %v13028_v29, %v7054_v44  ;;  %v7057_v17 = vadd.f32 %v9354_v14, %v13005_v19 }
 0x427   : > { %v7173_v33 = vmax.f32 %v7137_v51, 0.0  ;;  %v7589_v13 = vmax.f32 %v7553_v1, 0.0  ;;  %v7551_v10 = vadd.f32 %v13033_v22, %v7508_v56  ;;  %v7511_v48 = vmul.f32 %v9392_v18, %v13020_v35  ;;  %v6998_v53 = vpop.f32.mrf.mxu1 }
 0x428   : > { %v7445_v42 = vpop.f32.mrf.mxu0  ;;  %7658 = vst [vmem:[%s13059_s16 + $0xd8] sm:$0xff] %v7622_v54  ;;  %v7178_v15 = vmax.f32 %v7142_v34, 0.0  ;;  %v7140_v2 = vadd.f32 %v13042_v7, %v7097_v41  ;;  %v7100_v32 = vmul.f32 %v13028_v29, %v7057_v17  ;;  %v7055_v23 = vadd.f32 %v6998_v53, %v13008_v20 }
 0x429   : > { %v7620_v49 = vadd.f32 %v7584_v62, %v7173_v33  ;;  %v7587_v8 = vmax.f32 %v7551_v10, 0.0  ;;  %v7554_v19 = vadd.f32 %v13033_v22, %v7511_v48  ;;  %v7509_v12 = vmul.f32 %v13020_v35, %v7445_v42  ;;  %v9357_v47 = vpop.f32.mrf.mxu1 }
 0x42a   : > { %v9395_v9 = vpop.f32.mrf.mxu0  ;;  %v7625_v59 = vadd.f32 %v7589_v13, %v7178_v15  ;;  %v7176_v39 = vmax.f32 %v7140_v2, 0.0  ;;  %v7143_v50 = vadd.f32 %v13042_v7, %v7100_v32  ;;  %v7098_v25 = vmul.f32 %v13028_v29, %v7055_v23 }
 0x42b   : > { %7656 = vst [vmem:[%s13059_s16 + $0xc8] sm:$0xff] %v7620_v49  ;;  %v7590_v40 = vmax.f32 %v7554_v19, 0.0  ;;  %v7552_v46 = vadd.f32 %v13033_v22, %v7509_v12  ;;  %v7060_v20 = vadd.f32 %v9357_v47, %v13011_v26  ;;  %v7514_v57 = vmul.f32 %v9395_v9, %v13020_v35  ;;  %v7011_v21 = vpop.f32.mrf.mxu1 }
 0x42c   : > { %v7458_v3 = vpop.f32.mrf.mxu0  ;;  %7661 = vst [vmem:[%s13059_s16 + $0xf0] sm:$0xff] %v7625_v59  ;;  %v7623_v45 = vadd.f32 %v7587_v8, %v7176_v39  ;;  %v7179_v28 = vmax.f32 %v7143_v50, 0.0  ;;  %v7141_v4 = vadd.f32 %v13042_v7, %v7098_v25  ;;  %v7058_v55 = vadd.f32 %v7011_v21, %v13014_v6 }
 0x42d   : > { %v7588_v37 = vmax.f32 %v7552_v46, 0.0  ;;  %v7103_v60 = vmul.f32 %v13028_v29, %v7060_v20  ;;  %v7557_v5 = vadd.f32 %v13033_v22, %v7514_v57  ;;  %v7512_v31 = vmul.f32 %v13020_v35, %v7458_v3  ;;  %v9358_v26 = vpop.f32.mrf.mxu1 }
 0x42e   : > { %v9396_v43 = vpop.f32.mrf.mxu0  ;;  %7659 = vst [vmem:[%s13059_s16 + $0xe0] sm:$0xff] %v7623_v45  ;;  %v7626_v61 = vadd.f32 %v7590_v40, %v7179_v28  ;;  %v7177_v36 = vmax.f32 %v7141_v4, 0.0  ;;  %v7101_v0 = vmul.f32 %v13028_v29, %v7058_v55  ;;  %v7061_v11 = vadd.f32 %v9358_v26, %v13022_v16 }
 0x42f   : > { %v7146_v6 = vadd.f32 %v13042_v7, %v7103_v60  ;;  %v7593_v52 = vmax.f32 %v7557_v5, 0.0  ;;  %v7555_v27 = vadd.f32 %v13033_v22, %v7512_v31  ;;  %v7515_v24 = vmul.f32 %v9396_v43, %v13020_v35  ;;  %v7014_v30 = vpop.f32.mrf.mxu1 }
 0x430   : > { %v7461_v58 = vpop.f32.mrf.mxu0  ;;  %7662 = vst [vmem:[%s13059_s16 + $0xf8] sm:$0xff] %v7626_v61  ;;  %v7624_v63 = vadd.f32 %v7588_v37, %v7177_v36  ;;  %v7144_v44 = vadd.f32 %v13042_v7, %v7101_v0  ;;  %v7104_v51 = vmul.f32 %v13028_v29, %v7061_v11  ;;  %v7059_v62 = vadd.f32 %v7014_v30, %v13035_v38 }
 0x431   : > { %v7182_v16 = vmax.f32 %v7146_v6, 0.0  ;;  %v7558_v1 = vadd.f32 %v13033_v22, %v7515_v24  ;;  %v7513_v56 = vmul.f32 %v13020_v35, %v7461_v58  ;;  %v7591_v18 = vmax.f32 %v7555_v27, 0.0 }
 0x432   : > { %7660 = vst [vmem:[%s13059_s16 + $0xe8] sm:$0xff] %v7624_v63  ;;  %v7180_v14 = vmax.f32 %v7144_v44, 0.0  ;;  %v7147_v54 = vadd.f32 %v13042_v7, %v7104_v51  ;;  %v7102_v34 = vmul.f32 %v13028_v29, %v7059_v62 }
 0x433   : > { %v7629_v41 = vadd.f32 %v7593_v52, %v7182_v16  ;;  %v7556_v17 = vadd.f32 %v13033_v22, %v7513_v56  ;;  %v7594_v13 = vmax.f32 %v7558_v1, 0.0 }
 0x434   : > { %v7627_v33 = vadd.f32 %v7591_v18, %v7180_v14  ;;  %v7183_v38 = vmax.f32 %v7147_v54, 0.0  ;;  %v7145_v10 = vadd.f32 %v13042_v7, %v7102_v34 }
 0x435   : > { %7665 = vst [vmem:[%s13059_s16 + $0x110] sm:$0xff] %v7629_v41  ;;  %v7592_v53 = vmax.f32 %v7556_v17, 0.0 }
 0x436   : > { %7663 = vst [vmem:[%s13059_s16 + $0x100] sm:$0xff] %v7627_v33  ;;  %v7630_v35 = vadd.f32 %v7594_v13, %v7183_v38  ;;  %v7181_v48 = vmax.f32 %v7145_v10, 0.0 }
 0x438   : > { %7666 = vst [vmem:[%s13059_s16 + $0x118] sm:$0xff] %v7630_v35  ;;  %v7628_v42 = vadd.f32 %v7592_v53, %v7181_v48 }
 0x43a   : > { %7664 = vst [vmem:[%s13059_s16 + $0x108] sm:$0xff] %v7628_v42 }
 0x43b PF: > { %s20_s13 = sadd.s32 1, %s9578_s13  }
 0x43c   : > { %p17_p4 = scmp.ge.s32.totalorder %s20_s13, 4  }
 0x43e   :  { %19 = sbr.rel (!%p17_p4) target bundleno = 1 (0x1), region = 106 }

</bundles_post_ra>
